<compile_context>
chip_gen: v6e
topology: v6e:2x2x1
jax: 0.10.0
libtpu: 0.0.40
codegen_flags: <defaults>
</compile_context>

<pallas_src>
import jax
import jax.numpy as jnp
from jax import lax
from jax.experimental import pallas as pl
from jax.experimental.pallas import tpu as pltpu

START_IX = 3   # tag_to_ix['<START>']
STOP_IX = 4    # tag_to_ix['<STOP>']
NEG = -10000.0


# --------------------------------------------------------------------------
# Fused kernel: table gather + fused BiLSTM + hidden2tag + Viterbi decode
# --------------------------------------------------------------------------
def bilstm_crf_kernel(sent_ref,                        # (B_total, L) int32 SMEM (scalar prefetch)
                      tab_f_ref, tab_b_ref,            # (V, 8H) fwd/bwd gate tables (emb @ W_in folded)
                      whh_ref,                         # (2H, 8H) block-diagonal recurrent weights
                      hc0_ref, cc0_ref,                # (B, 2H)  initial [h_f|h_b], [c_f|c_b]
                      wtagA_ref, wtagB_ref, btag_ref,  # (2H,T), (2H,T), (1,T)
                      trans_ref,                       # (T, T)  transitions[next, prev]
                      feats_ref, score_ref, path_ref,  # outputs: (L*B,T) f32, (B,1) f32, (B,L) i32
                      xg_ref, outA_ref, outB_ref, bp_ref):
    B, L = path_ref.shape
    T = feats_ref.shape[1]
    H2 = whh_ref.shape[0]                 # 2H  ([fwd | bwd] hidden width)
    H6 = 3 * H2                           # width of the sigmoid gate block (i, f, o)
    b0 = pl.program_id(0) * B             # global batch offset of this chunk

    # ---- gather: gate-slab row (t,b) = table_f[tok(b,t)] + table_b[tok(b,L-1-t)] ----
    # (combined biases are folded into table_f host-side); rows are lane-dense (1, 8H).
    def gather_t(t, _):
        def gather_b(b, _):
            tok_f = sent_ref[b0 + b, t]
            tok_r = sent_ref[b0 + b, L - 1 - t]
            xg_ref[pl.ds(t * B + b, 1), :] = (tab_f_ref[pl.ds(tok_f, 1), :]
                                              + tab_b_ref[pl.ds(tok_r, 1), :])
            return 0
        lax.fori_loop(0, B, gather_b, 0, unroll=True)
        return 0
    lax.fori_loop(0, L, gather_t, 0, unroll=True)

    # ---- fused bidirectional recurrence, batched over B on sublanes -------------
    # gate layout [i_f,i_b, f_f,f_b, o_f,o_b, g_f,g_b]: one sigmoid + one tanh/step.
    whh = whh_ref[...]

    def step(t, carry):
        h, c = carry                                          # (B, 2H) each
        row0 = pl.multiple_of(t * B, B)
        gates = xg_ref[pl.ds(row0, B), :] + jnp.dot(
            h, whh, preferred_element_type=jnp.float32)       # (B, 8H)
        sig = jax.nn.sigmoid(gates[:, 0:H6])
        i = sig[:, 0:H2]
        f = sig[:, H2:2 * H2]
        o = sig[:, 2 * H2:3 * H2]
        g = jnp.tanh(gates[:, H6:])
        c = f * c + i * g
        h = o * jnp.tanh(c)
        outA_ref[pl.ds(row0, B), :] = h                       # fwd half valid for time t
        rowR = pl.multiple_of((L - 1 - t) * B, B)
        outB_ref[pl.ds(rowR, B), :] = h                       # bwd half valid for time L-1-t
        return (h, c)

    lax.fori_loop(0, L, step, (hc0_ref[...], cc0_ref[...]), unroll=True)

    # ---- hidden2tag: zero-padded weight halves pick the valid direction ---------
    feats_ref[...] = (
        jnp.dot(outA_ref[...], wtagA_ref[...], preferred_element_type=jnp.float32)
        + jnp.dot(outB_ref[...], wtagB_ref[...], preferred_element_type=jnp.float32)
        + btag_ref[...])

    # ---- Viterbi DP, batched: fv is (B,T) with batch on sublanes, prev-tag on lanes ----
    trans = trans_ref[...]
    lane_bt = lax.broadcasted_iota(jnp.int32, (B, T), 1)
    fv = jnp.where(lane_bt == START_IX,
                   jnp.zeros((B, T), jnp.float32),
                   jnp.full((B, T), NEG, jnp.float32))

    def dp_body(t, fv):
        row0 = pl.multiple_of(t * B, B)
        mx_acc = jnp.zeros((B, T), jnp.float32)
        bp_acc = jnp.zeros((B, T), jnp.int32)
        for n in range(T):                                    # static unroll over next-tags
            s_n = fv + trans[n:n + 1, :]                      # (B,T): fv[prev] + trans[n, prev]
            mx_n = jnp.max(s_n, axis=1, keepdims=True)        # (B, 1)
            bp_n = jnp.min(jnp.where(s_n == mx_n, lane_bt, T),
                           axis=1, keepdims=True)             # (B, 1) first-occurrence argmax
            sel = lane_bt == n
            mx_acc = jnp.where(sel, mx_n, mx_acc)
            bp_acc = jnp.where(sel, bp_n, bp_acc)
        bp_ref[pl.ds(row0, B), :] = bp_acc
        return mx_acc + feats_ref[pl.ds(row0, B), :]

    fv = lax.fori_loop(0, L, dp_body, fv, unroll=True)

    terminal = fv + trans[STOP_IX:STOP_IX + 1, :]             # (B, T)
    score = jnp.max(terminal, axis=1, keepdims=True)          # (B, 1)
    best = jnp.min(jnp.where(terminal == score, lane_bt, T),
                   axis=1, keepdims=True)                     # (B, 1) int32
    score_ref[...] = score

    # ---- backtrace, vectorized over B; path built in vregs, single store --------
    lane_bl = lax.broadcasted_iota(jnp.int32, (B, L), 1)
    path0 = jnp.where(lane_bl == (L - 1), best, 0)

    def back_body(k, carry):
        cur, path = carry
        t = L - 1 - k
        row0 = pl.multiple_of(t * B, B)
        bp_t = bp_ref[pl.ds(row0, B), :]                      # (B, T)
        prev = jnp.sum(jnp.where(lane_bt == cur, bp_t, 0),
                       axis=1, keepdims=True)                 # (B, 1) = bp_t[b, cur[b]]
        return (prev, jnp.where(lane_bl == (t - 1), prev, path))

    _, path = lax.fori_loop(0, L - 1, back_body, (best, path0), unroll=True)
    path_ref[...] = path


# --------------------------------------------------------------------------
# Wrapper
# --------------------------------------------------------------------------
def bilstm_crf_forward(sentences, kp):
    """sentences: (B, L) int32. Returns (feats (B,L,T), score (B,1), path (B,L))."""
    B_total, L = sentences.shape
    b_sub = kp['hc0'].shape[0]                # in-kernel sub-batch (sublane resident)
    assert B_total % b_sub == 0
    n_chunks = B_total // b_sub
    V, G = kp['table_f'].shape                # (vocab, 8H)
    H2 = kp['whh_bd'].shape[0]                # 2H
    T = kp['trans'].shape[0]

    def whole(shape):                         # full-array, grid-invariant VMEM block
        return pl.BlockSpec(shape, lambda i, s: tuple(0 for _ in shape))

    feats, score, path = pl.pallas_call(
        bilstm_crf_kernel,
        out_shape=(jax.ShapeDtypeStruct((n_chunks * L * b_sub, T), jnp.float32),
                   jax.ShapeDtypeStruct((B_total, 1), jnp.float32),
                   jax.ShapeDtypeStruct((B_total, L), jnp.int32)),
        grid_spec=pltpu.PrefetchScalarGridSpec(
            num_scalar_prefetch=1,            # token ids -> SMEM (whole array)
            grid=(n_chunks,),
            in_specs=[whole((V, G)), whole((V, G)), whole((H2, G)),
                      whole((b_sub, H2)), whole((b_sub, H2)),
                      whole((H2, T)), whole((H2, T)), whole((1, T)),
                      whole((T, T))],
            out_specs=(pl.BlockSpec((L * b_sub, T), lambda i, s: (i, 0)),
                       pl.BlockSpec((b_sub, 1), lambda i, s: (i, 0)),
                       pl.BlockSpec((b_sub, L), lambda i, s: (i, 0))),
            scratch_shapes=[pltpu.VMEM((L * b_sub, G), jnp.float32),   # fused gate slab
                            pltpu.VMEM((L * b_sub, H2), jnp.float32),  # h in forward time order
                            pltpu.VMEM((L * b_sub, H2), jnp.float32),  # h in backward time order
                            pltpu.VMEM((L * b_sub, T), jnp.int32)]),   # Viterbi backpointers
        compiler_params=pltpu.CompilerParams(
            dimension_semantics=("parallel",)),   # batch chunks split across TCs on v7x
    )(sentences, kp['table_f'], kp['table_b'], kp['whh_bd'],
      kp['hc0'], kp['cc0'], kp['wtagA'], kp['wtagB'], kp['btag'], kp['trans'])

    feats = feats.reshape(n_chunks, L, b_sub, T)
    feats = jnp.transpose(feats, (0, 2, 1, 3)).reshape(B_total, L, T)
    return feats, score, path


# --------------------------------------------------------------------------
# Host-side parameter packing (layout prep only; not on the hot path)
# --------------------------------------------------------------------------
def make_kernel_params(emb, w_ih_f, w_hh_f, b_ih_f, b_hh_f,
                       w_ih_b, w_hh_b, b_ih_b, b_hh_b,
                       W_tag, b_tag, transitions, h0, c0, b_sub):
    H = w_hh_f.shape[1]
    T = W_tag.shape[0]

    def gate_blocks(wT):          # (X, 4H) in torch gate order [i, f, g, o]
        return [wT[:, k * H:(k + 1) * H] for k in range(4)]

    # Fold the input projection into the embedding table (per-direction gate tables),
    # fused gate order: [i_f, i_b, f_f, f_b, o_f, o_b, g_f, g_b].
    pf_i, pf_f, pf_g, pf_o = gate_blocks(emb @ w_ih_f.T)     # each (V, H)
    pb_i, pb_f, pb_g, pb_o = gate_blocks(emb @ w_ih_b.T)
    zV = jnp.zeros_like(pf_i)
    table_f = jnp.concatenate([pf_i, zV, pf_f, zV, pf_o, zV, pf_g, zV], axis=1)
    table_b = jnp.concatenate([zV, pb_i, zV, pb_f, zV, pb_o, zV, pb_g], axis=1)

    bias_f = b_ih_f + b_hh_f
    bias_b = b_ih_b + b_hh_b
    bf = [bias_f[k * H:(k + 1) * H] for k in range(4)]        # [i, f, g, o]
    bb = [bias_b[k * H:(k + 1) * H] for k in range(4)]
    b_g = jnp.concatenate([bf[0], bb[0], bf[1], bb[1], bf[3], bb[3], bf[2], bb[2]])
    table_f = table_f + b_g[None, :]          # bias folded exactly once

    hf_i, hf_f, hf_g, hf_o = gate_blocks(w_hh_f.T)            # each (H, H)
    hb_i, hb_f, hb_g, hb_o = gate_blocks(w_hh_b.T)
    zH = jnp.zeros_like(hf_i)
    row_f = jnp.concatenate([hf_i, zH, hf_f, zH, hf_o, zH, hf_g, zH], axis=1)
    row_b = jnp.concatenate([zH, hb_i, zH, hb_f, zH, hb_o, zH, hb_g], axis=1)
    whh_bd = jnp.concatenate([row_f, row_b], axis=0)          # (2H, 8H) block diagonal

    wtagT = W_tag.T                                           # (2H, T)
    zHT = jnp.zeros((H, T), jnp.float32)
    wtagA = jnp.concatenate([wtagT[:H], zHT], axis=0)         # forward half active
    wtagB = jnp.concatenate([zHT, wtagT[H:]], axis=0)         # backward half active

    hc0 = jnp.tile(jnp.concatenate([h0[0], h0[1]], axis=1), (b_sub, 1))
    cc0 = jnp.tile(jnp.concatenate([c0[0], c0[1]], axis=1), (b_sub, 1))

    return dict(table_f=table_f.astype(jnp.float32),
                table_b=table_b.astype(jnp.float32),
                whh_bd=whh_bd.astype(jnp.float32),
                hc0=hc0.astype(jnp.float32), cc0=cc0.astype(jnp.float32),
                wtagA=wtagA.astype(jnp.float32), wtagB=wtagB.astype(jnp.float32),
                btag=b_tag[None, :].astype(jnp.float32),
                trans=transitions.astype(jnp.float32))


# --------------------------------------------------------------------------
# Pure-JAX / numpy reference for validation
# --------------------------------------------------------------------------
def ref_lstm_feats(embeds, p):
    H = p['h0f'].shape[1]
    L = embeds.shape[0]

    def cell(x, h, c, wihT, whhT, b):
        g = x @ wihT + h @ whhT + b
        i = jax.nn.sigmoid(g[:, :H])
        f = jax.nn.sigmoid(g[:, H:2 * H])
        gg = jnp.tanh(g[:, 2 * H:3 * H])
        o = jax.nn.sigmoid(g[:, 3 * H:])
        c = f * c + i * gg
        h = o * jnp.tanh(c)
        return h, c

    hf, cf = p['h0f'], p['c0f']
    outs_f = []
    for t in range(L):
        hf, cf = cell(embeds[t:t + 1], hf, cf, p['wih_fT'], p['whh_fT'], p['b_f'])
        outs_f.append(hf)
    hb, cb = p['h0b'], p['c0b']
    outs_b = [None] * L
    for t in reversed(range(L)):
        hb, cb = cell(embeds[t:t + 1], hb, cb, p['wih_bT'], p['whh_bT'], p['b_b'])
        outs_b[t] = hb
    lstm_out = jnp.concatenate(
        [jnp.concatenate(outs_f, 0), jnp.concatenate(outs_b, 0)], axis=1)
    return lstm_out @ p['wtagT'] + p['btag']


def ref_viterbi(feats, trans):
    import numpy as np
    feats = np.asarray(feats)
    trans = np.asarray(trans)
    T = trans.shape[0]
    fv = np.full((T,), -10000.0, np.float64)
    fv[START_IX] = 0.0
    bps = []
    for feat in feats:
        M = trans + fv[None, :]
        bps.append(M.argmax(axis=1))
        fv = M.max(axis=1) + feat
    term = fv + trans[STOP_IX]
    best = int(term.argmax())
    score = term[best]
    path = [best]
    for bp in reversed(bps):
        best = int(bp[best])
        path.append(best)
    path.pop()           # pop START
    path.reverse()
    return score, path


# --------------------------------------------------------------------------
if __name__ == "__main__":
    import numpy as np

    jax.config.update("jax_default_matmul_precision", "highest")

    # batch=16 sentences (2 chunks x 8 sub-batch), seq L=8, embedding_dim=16,
    # hidden_dim=32 (16 per direction), tagset_size=5.
    vocab_size, E, hidden_dim, T, L = 16, 16, 32, 5, 8
    H = hidden_dim // 2
    B_SUB, N_CHUNKS = 8, 2
    B = B_SUB * N_CHUNKS

    key = jax.random.PRNGKey(0)
    ks = jax.random.split(key, 16)
    kscale = 1.0 / jnp.sqrt(H)
    lscale = 1.0 / jnp.sqrt(hidden_dim)

    def uni(k, shape, s):
        return jax.random.uniform(k, shape, jnp.float32, -s, s)

    emb = jax.random.normal(ks[0], (vocab_size, E), jnp.float32)

    w_ih_f = uni(ks[1], (4 * H, E), kscale)
    w_hh_f = uni(ks[2], (4 * H, H), kscale)
    b_ih_f = uni(ks[3], (4 * H,), kscale)
    b_hh_f = uni(ks[4], (4 * H,), kscale)
    w_ih_b = uni(ks[5], (4 * H, E), kscale)
    w_hh_b = uni(ks[6], (4 * H, H), kscale)
    b_ih_b = uni(ks[7], (4 * H,), kscale)
    b_hh_b = uni(ks[8], (4 * H,), kscale)

    W_tag = uni(ks[9], (T, hidden_dim), lscale)
    b_tag = uni(ks[10], (T,), lscale)

    transitions = jax.random.normal(ks[11], (T, T), jnp.float32)
    transitions = transitions.at[START_IX, :].set(NEG)
    transitions = transitions.at[:, STOP_IX].set(NEG)

    h0 = jax.random.normal(ks[12], (2, 1, H), jnp.float32)
    c0 = jax.random.normal(ks[13], (2, 1, H), jnp.float32)

    sentences = jax.random.randint(ks[14], (B, L), 0, vocab_size, jnp.int32)

    kp = make_kernel_params(emb, w_ih_f, w_hh_f, b_ih_f, b_hh_f,
                            w_ih_b, w_hh_b, b_ih_b, b_hh_b,
                            W_tag, b_tag, transitions, h0, c0, b_sub=B_SUB)

    feats, score, path = bilstm_crf_forward(sentences, kp)
    jax.block_until_ready((feats, score, path))

    # Validate against the pure-JAX / numpy reference, per sentence.
    ref_p = dict(
        wih_fT=w_ih_f.T, whh_fT=w_hh_f.T, b_f=(b_ih_f + b_hh_f)[None, :],
        wih_bT=w_ih_b.T, whh_bT=w_hh_b.T, b_b=(b_ih_b + b_hh_b)[None, :],
        h0f=h0[0], c0f=c0[0], h0b=h0[1], c0b=c0[1],
        wtagT=W_tag.T, btag=b_tag[None, :])

    feats_np = np.asarray(feats)
    score_np = np.asarray(score)
    path_np = np.asarray(path)
    for b in range(B):
        feats_ref_b = ref_lstm_feats(emb[sentences[b]], ref_p)
        ref_score, ref_path = ref_viterbi(feats_ref_b, transitions)
        assert np.allclose(feats_np[b], np.asarray(feats_ref_b),
                           rtol=1e-3, atol=1e-3), f"emission feats mismatch (b={b})"
        assert np.allclose(float(score_np[b, 0]), float(ref_score),
                           rtol=1e-3, atol=1e-3), f"viterbi score mismatch (b={b})"
        assert list(path_np[b]) == ref_path, f"viterbi path mismatch (b={b})"

    print("KERNEL_OK")
</pallas_src>

<mosaic_0001>
module attributes {stable_mosaic.version = 11 : i64} {
  func.func @bilstm_crf_kernel(%arg0: i32, %arg1: memref<16x8xi32, #tpu.memory_space<smem>>, %arg2: memref<16x128xf32, #tpu.memory_space<vmem>>, %arg3: memref<16x128xf32, #tpu.memory_space<vmem>>, %arg4: memref<32x128xf32, #tpu.memory_space<vmem>>, %arg5: memref<8x32xf32, #tpu.memory_space<vmem>>, %arg6: memref<8x32xf32, #tpu.memory_space<vmem>>, %arg7: memref<32x5xf32, #tpu.memory_space<vmem>>, %arg8: memref<32x5xf32, #tpu.memory_space<vmem>>, %arg9: memref<1x5xf32, #tpu.memory_space<vmem>>, %arg10: memref<5x5xf32, #tpu.memory_space<vmem>>, %arg11: memref<64x5xf32, #tpu.memory_space<vmem>>, %arg12: memref<8x1xf32, #tpu.memory_space<vmem>>, %arg13: memref<8x8xi32, #tpu.memory_space<vmem>>, %arg14: memref<64x128xf32, #tpu.memory_space<vmem>>, %arg15: memref<64x32xf32, #tpu.memory_space<vmem>>, %arg16: memref<64x32xf32, #tpu.memory_space<vmem>>, %arg17: memref<64x5xi32, #tpu.memory_space<vmem>>) attributes {dimension_semantics = [#tpu.dimension_semantics<parallel>], iteration_bounds = array<i64: 2>, scalar_prefetch = 1 : i64, scratch_operands = 4 : i64, tpu.core_type = #tpu.core_type<tc>, window_params = [{pipeline_mode = #tpu.pipeline_mode<synchronous>, transform_indices = @transform_0, window_bounds = array<i64: 16, 128>}, {pipeline_mode = #tpu.pipeline_mode<synchronous>, transform_indices = @transform_1, window_bounds = array<i64: 16, 128>}, {pipeline_mode = #tpu.pipeline_mode<synchronous>, transform_indices = @transform_2, window_bounds = array<i64: 32, 128>}, {pipeline_mode = #tpu.pipeline_mode<synchronous>, transform_indices = @transform_3, window_bounds = array<i64: 8, 32>}, {pipeline_mode = #tpu.pipeline_mode<synchronous>, transform_indices = @transform_4, window_bounds = array<i64: 8, 32>}, {pipeline_mode = #tpu.pipeline_mode<synchronous>, transform_indices = @transform_5, window_bounds = array<i64: 32, 5>}, {pipeline_mode = #tpu.pipeline_mode<synchronous>, transform_indices = @transform_6, window_bounds = array<i64: 32, 5>}, {pipeline_mode = #tpu.pipeline_mode<synchronous>, transform_indices = @transform_7, window_bounds = array<i64: 1, 5>}, {pipeline_mode = #tpu.pipeline_mode<synchronous>, transform_indices = @transform_8, window_bounds = array<i64: 5, 5>}, {transform_indices = @transform_9, window_bounds = array<i64: 64, 5>}, {transform_indices = @transform_10, window_bounds = array<i64: 8, 1>}, {transform_indices = @transform_11, window_bounds = array<i64: 8, 8>}]} {
    %c8_i32 = arith.constant 8 : i32
    %0 = arith.muli %arg0, %c8_i32 : i32
    %c0_i32 = arith.constant 0 : i32
    %c0_i32_0 = arith.constant 0 : i32
    %1 = arith.addi %0, %c0_i32_0 : i32
    %2 = arith.index_cast %1 : i32 to index
    %3 = arith.index_cast %c0_i32 : i32 to index
    %4 = memref.load %arg1[%2, %3] : memref<16x8xi32, #tpu.memory_space<smem>>
    %5 = arith.addi %0, %c0_i32_0 : i32
    %c7_i32 = arith.constant 7 : i32
    %6 = arith.subi %c7_i32, %c0_i32 : i32
    %7 = arith.index_cast %5 : i32 to index
    %8 = arith.index_cast %6 : i32 to index
    %9 = memref.load %arg1[%7, %8] : memref<16x8xi32, #tpu.memory_space<smem>>
    %10 = arith.index_cast %4 : i32 to index
    %c0 = arith.constant 0 : index
    %11 = vector.load %arg2[%10, %c0] : memref<16x128xf32, #tpu.memory_space<vmem>>, vector<1x128xf32>
    %12 = arith.index_cast %9 : i32 to index
    %c0_1 = arith.constant 0 : index
    %13 = vector.load %arg3[%12, %c0_1] : memref<16x128xf32, #tpu.memory_space<vmem>>, vector<1x128xf32>
    %14 = arith.addf %11, %13 : vector<1x128xf32>
    %c8_i32_2 = arith.constant 8 : i32
    %15 = arith.muli %c0_i32, %c8_i32_2 : i32
    %16 = arith.addi %15, %c0_i32_0 : i32
    %17 = arith.index_cast %16 : i32 to index
    %c0_3 = arith.constant 0 : index
    %18 = vector.load %arg14[%17, %c0_3] : memref<64x128xf32, #tpu.memory_space<vmem>>, vector<1x128xf32>
    tpu.vector_store %arg14[%17, %c0_3], %14 {strides = array<i32>} : memref<64x128xf32, #tpu.memory_space<vmem>>, vector<1x128xf32>,
    %c1_i32 = arith.constant 1 : i32
    %19 = arith.addi %0, %c1_i32 : i32
    %20 = arith.index_cast %19 : i32 to index
    %21 = arith.index_cast %c0_i32 : i32 to index
    %22 = memref.load %arg1[%20, %21] : memref<16x8xi32, #tpu.memory_space<smem>>
    %23 = arith.addi %0, %c1_i32 : i32
    %c7_i32_4 = arith.constant 7 : i32
    %24 = arith.subi %c7_i32_4, %c0_i32 : i32
    %25 = arith.index_cast %23 : i32 to index
    %26 = arith.index_cast %24 : i32 to index
    %27 = memref.load %arg1[%25, %26] : memref<16x8xi32, #tpu.memory_space<smem>>
    %28 = arith.index_cast %22 : i32 to index
    %c0_5 = arith.constant 0 : index
    %29 = vector.load %arg2[%28, %c0_5] : memref<16x128xf32, #tpu.memory_space<vmem>>, vector<1x128xf32>
    %30 = arith.index_cast %27 : i32 to index
    %c0_6 = arith.constant 0 : index
    %31 = vector.load %arg3[%30, %c0_6] : memref<16x128xf32, #tpu.memory_space<vmem>>, vector<1x128xf32>
    %32 = arith.addf %29, %31 : vector<1x128xf32>
    %c8_i32_7 = arith.constant 8 : i32
    %33 = arith.muli %c0_i32, %c8_i32_7 : i32
    %34 = arith.addi %33, %c1_i32 : i32
    %35 = arith.index_cast %34 : i32 to index
    %c0_8 = arith.constant 0 : index
    %36 = vector.load %arg14[%35, %c0_8] : memref<64x128xf32, #tpu.memory_space<vmem>>, vector<1x128xf32>
    tpu.vector_store %arg14[%35, %c0_8], %32 {strides = array<i32>} : memref<64x128xf32, #tpu.memory_space<vmem>>, vector<1x128xf32>,
    %c2_i32 = arith.constant 2 : i32
    %37 = arith.addi %0, %c2_i32 : i32
    %38 = arith.index_cast %37 : i32 to index
    %39 = arith.index_cast %c0_i32 : i32 to index
    %40 = memref.load %arg1[%38, %39] : memref<16x8xi32, #tpu.memory_space<smem>>
    %41 = arith.addi %0, %c2_i32 : i32
    %c7_i32_9 = arith.constant 7 : i32
    %42 = arith.subi %c7_i32_9, %c0_i32 : i32
    %43 = arith.index_cast %41 : i32 to index
    %44 = arith.index_cast %42 : i32 to index
    %45 = memref.load %arg1[%43, %44] : memref<16x8xi32, #tpu.memory_space<smem>>
    %46 = arith.index_cast %40 : i32 to index
    %c0_10 = arith.constant 0 : index
    %47 = vector.load %arg2[%46, %c0_10] : memref<16x128xf32, #tpu.memory_space<vmem>>, vector<1x128xf32>
    %48 = arith.index_cast %45 : i32 to index
    %c0_11 = arith.constant 0 : index
    %49 = vector.load %arg3[%48, %c0_11] : memref<16x128xf32, #tpu.memory_space<vmem>>, vector<1x128xf32>
    %50 = arith.addf %47, %49 : vector<1x128xf32>
    %c8_i32_12 = arith.constant 8 : i32
    %51 = arith.muli %c0_i32, %c8_i32_12 : i32
    %52 = arith.addi %51, %c2_i32 : i32
    %53 = arith.index_cast %52 : i32 to index
    %c0_13 = arith.constant 0 : index
    %54 = vector.load %arg14[%53, %c0_13] : memref<64x128xf32, #tpu.memory_space<vmem>>, vector<1x128xf32>
    tpu.vector_store %arg14[%53, %c0_13], %50 {strides = array<i32>} : memref<64x128xf32, #tpu.memory_space<vmem>>, vector<1x128xf32>,
    %c3_i32 = arith.constant 3 : i32
    %55 = arith.addi %0, %c3_i32 : i32
    %56 = arith.index_cast %55 : i32 to index
    %57 = arith.index_cast %c0_i32 : i32 to index
    %58 = memref.load %arg1[%56, %57] : memref<16x8xi32, #tpu.memory_space<smem>>
    %59 = arith.addi %0, %c3_i32 : i32
    %c7_i32_14 = arith.constant 7 : i32
    %60 = arith.subi %c7_i32_14, %c0_i32 : i32
    %61 = arith.index_cast %59 : i32 to index
    %62 = arith.index_cast %60 : i32 to index
    %63 = memref.load %arg1[%61, %62] : memref<16x8xi32, #tpu.memory_space<smem>>
    %64 = arith.index_cast %58 : i32 to index
    %c0_15 = arith.constant 0 : index
    %65 = vector.load %arg2[%64, %c0_15] : memref<16x128xf32, #tpu.memory_space<vmem>>, vector<1x128xf32>
    %66 = arith.index_cast %63 : i32 to index
    %c0_16 = arith.constant 0 : index
    %67 = vector.load %arg3[%66, %c0_16] : memref<16x128xf32, #tpu.memory_space<vmem>>, vector<1x128xf32>
    %68 = arith.addf %65, %67 : vector<1x128xf32>
    %c8_i32_17 = arith.constant 8 : i32
    %69 = arith.muli %c0_i32, %c8_i32_17 : i32
    %70 = arith.addi %69, %c3_i32 : i32
    %71 = arith.index_cast %70 : i32 to index
    %c0_18 = arith.constant 0 : index
    %72 = vector.load %arg14[%71, %c0_18] : memref<64x128xf32, #tpu.memory_space<vmem>>, vector<1x128xf32>
    tpu.vector_store %arg14[%71, %c0_18], %68 {strides = array<i32>} : memref<64x128xf32, #tpu.memory_space<vmem>>, vector<1x128xf32>,
    %c4_i32 = arith.constant 4 : i32
    %73 = arith.addi %0, %c4_i32 : i32
    %74 = arith.index_cast %73 : i32 to index
    %75 = arith.index_cast %c0_i32 : i32 to index
    %76 = memref.load %arg1[%74, %75] : memref<16x8xi32, #tpu.memory_space<smem>>
    %77 = arith.addi %0, %c4_i32 : i32
    %c7_i32_19 = arith.constant 7 : i32
    %78 = arith.subi %c7_i32_19, %c0_i32 : i32
    %79 = arith.index_cast %77 : i32 to index
    %80 = arith.index_cast %78 : i32 to index
    %81 = memref.load %arg1[%79, %80] : memref<16x8xi32, #tpu.memory_space<smem>>
    %82 = arith.index_cast %76 : i32 to index
    %c0_20 = arith.constant 0 : index
    %83 = vector.load %arg2[%82, %c0_20] : memref<16x128xf32, #tpu.memory_space<vmem>>, vector<1x128xf32>
    %84 = arith.index_cast %81 : i32 to index
    %c0_21 = arith.constant 0 : index
    %85 = vector.load %arg3[%84, %c0_21] : memref<16x128xf32, #tpu.memory_space<vmem>>, vector<1x128xf32>
    %86 = arith.addf %83, %85 : vector<1x128xf32>
    %c8_i32_22 = arith.constant 8 : i32
    %87 = arith.muli %c0_i32, %c8_i32_22 : i32
    %88 = arith.addi %87, %c4_i32 : i32
    %89 = arith.index_cast %88 : i32 to index
    %c0_23 = arith.constant 0 : index
    %90 = vector.load %arg14[%89, %c0_23] : memref<64x128xf32, #tpu.memory_space<vmem>>, vector<1x128xf32>
    tpu.vector_store %arg14[%89, %c0_23], %86 {strides = array<i32>} : memref<64x128xf32, #tpu.memory_space<vmem>>, vector<1x128xf32>,
    %c5_i32 = arith.constant 5 : i32
    %91 = arith.addi %0, %c5_i32 : i32
    %92 = arith.index_cast %91 : i32 to index
    %93 = arith.index_cast %c0_i32 : i32 to index
    %94 = memref.load %arg1[%92, %93] : memref<16x8xi32, #tpu.memory_space<smem>>
    %95 = arith.addi %0, %c5_i32 : i32
    %c7_i32_24 = arith.constant 7 : i32
    %96 = arith.subi %c7_i32_24, %c0_i32 : i32
    %97 = arith.index_cast %95 : i32 to index
    %98 = arith.index_cast %96 : i32 to index
    %99 = memref.load %arg1[%97, %98] : memref<16x8xi32, #tpu.memory_space<smem>>
    %100 = arith.index_cast %94 : i32 to index
    %c0_25 = arith.constant 0 : index
    %101 = vector.load %arg2[%100, %c0_25] : memref<16x128xf32, #tpu.memory_space<vmem>>, vector<1x128xf32>
    %102 = arith.index_cast %99 : i32 to index
    %c0_26 = arith.constant 0 : index
    %103 = vector.load %arg3[%102, %c0_26] : memref<16x128xf32, #tpu.memory_space<vmem>>, vector<1x128xf32>
    %104 = arith.addf %101, %103 : vector<1x128xf32>
    %c8_i32_27 = arith.constant 8 : i32
    %105 = arith.muli %c0_i32, %c8_i32_27 : i32
    %106 = arith.addi %105, %c5_i32 : i32
    %107 = arith.index_cast %106 : i32 to index
    %c0_28 = arith.constant 0 : index
    %108 = vector.load %arg14[%107, %c0_28] : memref<64x128xf32, #tpu.memory_space<vmem>>, vector<1x128xf32>
    tpu.vector_store %arg14[%107, %c0_28], %104 {strides = array<i32>} : memref<64x128xf32, #tpu.memory_space<vmem>>, vector<1x128xf32>,
    %c6_i32 = arith.constant 6 : i32
    %109 = arith.addi %0, %c6_i32 : i32
    %110 = arith.index_cast %109 : i32 to index
    %111 = arith.index_cast %c0_i32 : i32 to index
    %112 = memref.load %arg1[%110, %111] : memref<16x8xi32, #tpu.memory_space<smem>>
    %113 = arith.addi %0, %c6_i32 : i32
    %c7_i32_29 = arith.constant 7 : i32
    %114 = arith.subi %c7_i32_29, %c0_i32 : i32
    %115 = arith.index_cast %113 : i32 to index
    %116 = arith.index_cast %114 : i32 to index
    %117 = memref.load %arg1[%115, %116] : memref<16x8xi32, #tpu.memory_space<smem>>
    %118 = arith.index_cast %112 : i32 to index
    %c0_30 = arith.constant 0 : index
    %119 = vector.load %arg2[%118, %c0_30] : memref<16x128xf32, #tpu.memory_space<vmem>>, vector<1x128xf32>
    %120 = arith.index_cast %117 : i32 to index
    %c0_31 = arith.constant 0 : index
    %121 = vector.load %arg3[%120, %c0_31] : memref<16x128xf32, #tpu.memory_space<vmem>>, vector<1x128xf32>
    %122 = arith.addf %119, %121 : vector<1x128xf32>
    %c8_i32_32 = arith.constant 8 : i32
    %123 = arith.muli %c0_i32, %c8_i32_32 : i32
    %124 = arith.addi %123, %c6_i32 : i32
    %125 = arith.index_cast %124 : i32 to index
    %c0_33 = arith.constant 0 : index
    %126 = vector.load %arg14[%125, %c0_33] : memref<64x128xf32, #tpu.memory_space<vmem>>, vector<1x128xf32>
    tpu.vector_store %arg14[%125, %c0_33], %122 {strides = array<i32>} : memref<64x128xf32, #tpu.memory_space<vmem>>, vector<1x128xf32>,
    %c7_i32_34 = arith.constant 7 : i32
    %127 = arith.addi %0, %c7_i32_34 : i32
    %128 = arith.index_cast %127 : i32 to index
    %129 = arith.index_cast %c0_i32 : i32 to index
    %130 = memref.load %arg1[%128, %129] : memref<16x8xi32, #tpu.memory_space<smem>>
    %131 = arith.addi %0, %c7_i32_34 : i32
    %c7_i32_35 = arith.constant 7 : i32
    %132 = arith.subi %c7_i32_35, %c0_i32 : i32
    %133 = arith.index_cast %131 : i32 to index
    %134 = arith.index_cast %132 : i32 to index
    %135 = memref.load %arg1[%133, %134] : memref<16x8xi32, #tpu.memory_space<smem>>
    %136 = arith.index_cast %130 : i32 to index
    %c0_36 = arith.constant 0 : index
    %137 = vector.load %arg2[%136, %c0_36] : memref<16x128xf32, #tpu.memory_space<vmem>>, vector<1x128xf32>
    %138 = arith.index_cast %135 : i32 to index
    %c0_37 = arith.constant 0 : index
    %139 = vector.load %arg3[%138, %c0_37] : memref<16x128xf32, #tpu.memory_space<vmem>>, vector<1x128xf32>
    %140 = arith.addf %137, %139 : vector<1x128xf32>
    %c8_i32_38 = arith.constant 8 : i32
    %141 = arith.muli %c0_i32, %c8_i32_38 : i32
    %142 = arith.addi %141, %c7_i32_34 : i32
    %143 = arith.index_cast %142 : i32 to index
    %c0_39 = arith.constant 0 : index
    %144 = vector.load %arg14[%143, %c0_39] : memref<64x128xf32, #tpu.memory_space<vmem>>, vector<1x128xf32>
    tpu.vector_store %arg14[%143, %c0_39], %140 {strides = array<i32>} : memref<64x128xf32, #tpu.memory_space<vmem>>, vector<1x128xf32>,
    %c8_i32_40 = arith.constant 8 : i32
    %c1_i32_41 = arith.constant 1 : i32
    %c0_i32_42 = arith.constant 0 : i32
    %145 = arith.addi %0, %c0_i32_42 : i32
    %146 = arith.index_cast %145 : i32 to index
    %147 = arith.index_cast %c1_i32_41 : i32 to index
    %148 = memref.load %arg1[%146, %147] : memref<16x8xi32, #tpu.memory_space<smem>>
    %149 = arith.addi %0, %c0_i32_42 : i32
    %c7_i32_43 = arith.constant 7 : i32
    %150 = arith.subi %c7_i32_43, %c1_i32_41 : i32
    %151 = arith.index_cast %149 : i32 to index
    %152 = arith.index_cast %150 : i32 to index
    %153 = memref.load %arg1[%151, %152] : memref<16x8xi32, #tpu.memory_space<smem>>
    %154 = arith.index_cast %148 : i32 to index
    %c0_44 = arith.constant 0 : index
    %155 = vector.load %arg2[%154, %c0_44] : memref<16x128xf32, #tpu.memory_space<vmem>>, vector<1x128xf32>
    %156 = arith.index_cast %153 : i32 to index
    %c0_45 = arith.constant 0 : index
    %157 = vector.load %arg3[%156, %c0_45] : memref<16x128xf32, #tpu.memory_space<vmem>>, vector<1x128xf32>
    %158 = arith.addf %155, %157 : vector<1x128xf32>
    %c8_i32_46 = arith.constant 8 : i32
    %159 = arith.muli %c1_i32_41, %c8_i32_46 : i32
    %160 = arith.addi %159, %c0_i32_42 : i32
    %161 = arith.index_cast %160 : i32 to index
    %c0_47 = arith.constant 0 : index
    %162 = vector.load %arg14[%161, %c0_47] : memref<64x128xf32, #tpu.memory_space<vmem>>, vector<1x128xf32>
    tpu.vector_store %arg14[%161, %c0_47], %158 {strides = array<i32>} : memref<64x128xf32, #tpu.memory_space<vmem>>, vector<1x128xf32>,
    %c1_i32_48 = arith.constant 1 : i32
    %163 = arith.addi %0, %c1_i32_48 : i32
    %164 = arith.index_cast %163 : i32 to index
    %165 = arith.index_cast %c1_i32_41 : i32 to index
    %166 = memref.load %arg1[%164, %165] : memref<16x8xi32, #tpu.memory_space<smem>>
    %167 = arith.addi %0, %c1_i32_48 : i32
    %c7_i32_49 = arith.constant 7 : i32
    %168 = arith.subi %c7_i32_49, %c1_i32_41 : i32
    %169 = arith.index_cast %167 : i32 to index
    %170 = arith.index_cast %168 : i32 to index
    %171 = memref.load %arg1[%169, %170] : memref<16x8xi32, #tpu.memory_space<smem>>
    %172 = arith.index_cast %166 : i32 to index
    %c0_50 = arith.constant 0 : index
    %173 = vector.load %arg2[%172, %c0_50] : memref<16x128xf32, #tpu.memory_space<vmem>>, vector<1x128xf32>
    %174 = arith.index_cast %171 : i32 to index
    %c0_51 = arith.constant 0 : index
    %175 = vector.load %arg3[%174, %c0_51] : memref<16x128xf32, #tpu.memory_space<vmem>>, vector<1x128xf32>
    %176 = arith.addf %173, %175 : vector<1x128xf32>
    %c8_i32_52 = arith.constant 8 : i32
    %177 = arith.muli %c1_i32_41, %c8_i32_52 : i32
    %178 = arith.addi %177, %c1_i32_48 : i32
    %179 = arith.index_cast %178 : i32 to index
    %c0_53 = arith.constant 0 : index
    %180 = vector.load %arg14[%179, %c0_53] : memref<64x128xf32, #tpu.memory_space<vmem>>, vector<1x128xf32>
    tpu.vector_store %arg14[%179, %c0_53], %176 {strides = array<i32>} : memref<64x128xf32, #tpu.memory_space<vmem>>, vector<1x128xf32>,
    %c2_i32_54 = arith.constant 2 : i32
    %181 = arith.addi %0, %c2_i32_54 : i32
    %182 = arith.index_cast %181 : i32 to index
    %183 = arith.index_cast %c1_i32_41 : i32 to index
    %184 = memref.load %arg1[%182, %183] : memref<16x8xi32, #tpu.memory_space<smem>>
    %185 = arith.addi %0, %c2_i32_54 : i32
    %c7_i32_55 = arith.constant 7 : i32
    %186 = arith.subi %c7_i32_55, %c1_i32_41 : i32
    %187 = arith.index_cast %185 : i32 to index
    %188 = arith.index_cast %186 : i32 to index
    %189 = memref.load %arg1[%187, %188] : memref<16x8xi32, #tpu.memory_space<smem>>
    %190 = arith.index_cast %184 : i32 to index
    %c0_56 = arith.constant 0 : index
    %191 = vector.load %arg2[%190, %c0_56] : memref<16x128xf32, #tpu.memory_space<vmem>>, vector<1x128xf32>
    %192 = arith.index_cast %189 : i32 to index
    %c0_57 = arith.constant 0 : index
    %193 = vector.load %arg3[%192, %c0_57] : memref<16x128xf32, #tpu.memory_space<vmem>>, vector<1x128xf32>
    %194 = arith.addf %191, %193 : vector<1x128xf32>
    %c8_i32_58 = arith.constant 8 : i32
    %195 = arith.muli %c1_i32_41, %c8_i32_58 : i32
    %196 = arith.addi %195, %c2_i32_54 : i32
    %197 = arith.index_cast %196 : i32 to index
    %c0_59 = arith.constant 0 : index
    %198 = vector.load %arg14[%197, %c0_59] : memref<64x128xf32, #tpu.memory_space<vmem>>, vector<1x128xf32>
    tpu.vector_store %arg14[%197, %c0_59], %194 {strides = array<i32>} : memref<64x128xf32, #tpu.memory_space<vmem>>, vector<1x128xf32>,
    %c3_i32_60 = arith.constant 3 : i32
    %199 = arith.addi %0, %c3_i32_60 : i32
    %200 = arith.index_cast %199 : i32 to index
    %201 = arith.index_cast %c1_i32_41 : i32 to index
    %202 = memref.load %arg1[%200, %201] : memref<16x8xi32, #tpu.memory_space<smem>>
    %203 = arith.addi %0, %c3_i32_60 : i32
    %c7_i32_61 = arith.constant 7 : i32
    %204 = arith.subi %c7_i32_61, %c1_i32_41 : i32
    %205 = arith.index_cast %203 : i32 to index
    %206 = arith.index_cast %204 : i32 to index
    %207 = memref.load %arg1[%205, %206] : memref<16x8xi32, #tpu.memory_space<smem>>
    %208 = arith.index_cast %202 : i32 to index
    %c0_62 = arith.constant 0 : index
    %209 = vector.load %arg2[%208, %c0_62] : memref<16x128xf32, #tpu.memory_space<vmem>>, vector<1x128xf32>
    %210 = arith.index_cast %207 : i32 to index
    %c0_63 = arith.constant 0 : index
    %211 = vector.load %arg3[%210, %c0_63] : memref<16x128xf32, #tpu.memory_space<vmem>>, vector<1x128xf32>
    %212 = arith.addf %209, %211 : vector<1x128xf32>
    %c8_i32_64 = arith.constant 8 : i32
    %213 = arith.muli %c1_i32_41, %c8_i32_64 : i32
    %214 = arith.addi %213, %c3_i32_60 : i32
    %215 = arith.index_cast %214 : i32 to index
    %c0_65 = arith.constant 0 : index
    %216 = vector.load %arg14[%215, %c0_65] : memref<64x128xf32, #tpu.memory_space<vmem>>, vector<1x128xf32>
    tpu.vector_store %arg14[%215, %c0_65], %212 {strides = array<i32>} : memref<64x128xf32, #tpu.memory_space<vmem>>, vector<1x128xf32>,
    %c4_i32_66 = arith.constant 4 : i32
    %217 = arith.addi %0, %c4_i32_66 : i32
    %218 = arith.index_cast %217 : i32 to index
    %219 = arith.index_cast %c1_i32_41 : i32 to index
    %220 = memref.load %arg1[%218, %219] : memref<16x8xi32, #tpu.memory_space<smem>>
    %221 = arith.addi %0, %c4_i32_66 : i32
    %c7_i32_67 = arith.constant 7 : i32
    %222 = arith.subi %c7_i32_67, %c1_i32_41 : i32
    %223 = arith.index_cast %221 : i32 to index
    %224 = arith.index_cast %222 : i32 to index
    %225 = memref.load %arg1[%223, %224] : memref<16x8xi32, #tpu.memory_space<smem>>
    %226 = arith.index_cast %220 : i32 to index
    %c0_68 = arith.constant 0 : index
    %227 = vector.load %arg2[%226, %c0_68] : memref<16x128xf32, #tpu.memory_space<vmem>>, vector<1x128xf32>
    %228 = arith.index_cast %225 : i32 to index
    %c0_69 = arith.constant 0 : index
    %229 = vector.load %arg3[%228, %c0_69] : memref<16x128xf32, #tpu.memory_space<vmem>>, vector<1x128xf32>
    %230 = arith.addf %227, %229 : vector<1x128xf32>
    %c8_i32_70 = arith.constant 8 : i32
    %231 = arith.muli %c1_i32_41, %c8_i32_70 : i32
    %232 = arith.addi %231, %c4_i32_66 : i32
    %233 = arith.index_cast %232 : i32 to index
    %c0_71 = arith.constant 0 : index
    %234 = vector.load %arg14[%233, %c0_71] : memref<64x128xf32, #tpu.memory_space<vmem>>, vector<1x128xf32>
    tpu.vector_store %arg14[%233, %c0_71], %230 {strides = array<i32>} : memref<64x128xf32, #tpu.memory_space<vmem>>, vector<1x128xf32>,
    %c5_i32_72 = arith.constant 5 : i32
    %235 = arith.addi %0, %c5_i32_72 : i32
    %236 = arith.index_cast %235 : i32 to index
    %237 = arith.index_cast %c1_i32_41 : i32 to index
    %238 = memref.load %arg1[%236, %237] : memref<16x8xi32, #tpu.memory_space<smem>>
    %239 = arith.addi %0, %c5_i32_72 : i32
    %c7_i32_73 = arith.constant 7 : i32
    %240 = arith.subi %c7_i32_73, %c1_i32_41 : i32
    %241 = arith.index_cast %239 : i32 to index
    %242 = arith.index_cast %240 : i32 to index
    %243 = memref.load %arg1[%241, %242] : memref<16x8xi32, #tpu.memory_space<smem>>
    %244 = arith.index_cast %238 : i32 to index
    %c0_74 = arith.constant 0 : index
    %245 = vector.load %arg2[%244, %c0_74] : memref<16x128xf32, #tpu.memory_space<vmem>>, vector<1x128xf32>
    %246 = arith.index_cast %243 : i32 to index
    %c0_75 = arith.constant 0 : index
    %247 = vector.load %arg3[%246, %c0_75] : memref<16x128xf32, #tpu.memory_space<vmem>>, vector<1x128xf32>
    %248 = arith.addf %245, %247 : vector<1x128xf32>
    %c8_i32_76 = arith.constant 8 : i32
    %249 = arith.muli %c1_i32_41, %c8_i32_76 : i32
    %250 = arith.addi %249, %c5_i32_72 : i32
    %251 = arith.index_cast %250 : i32 to index
    %c0_77 = arith.constant 0 : index
    %252 = vector.load %arg14[%251, %c0_77] : memref<64x128xf32, #tpu.memory_space<vmem>>, vector<1x128xf32>
    tpu.vector_store %arg14[%251, %c0_77], %248 {strides = array<i32>} : memref<64x128xf32, #tpu.memory_space<vmem>>, vector<1x128xf32>,
    %c6_i32_78 = arith.constant 6 : i32
    %253 = arith.addi %0, %c6_i32_78 : i32
    %254 = arith.index_cast %253 : i32 to index
    %255 = arith.index_cast %c1_i32_41 : i32 to index
    %256 = memref.load %arg1[%254, %255] : memref<16x8xi32, #tpu.memory_space<smem>>
    %257 = arith.addi %0, %c6_i32_78 : i32
    %c7_i32_79 = arith.constant 7 : i32
    %258 = arith.subi %c7_i32_79, %c1_i32_41 : i32
    %259 = arith.index_cast %257 : i32 to index
    %260 = arith.index_cast %258 : i32 to index
    %261 = memref.load %arg1[%259, %260] : memref<16x8xi32, #tpu.memory_space<smem>>
    %262 = arith.index_cast %256 : i32 to index
    %c0_80 = arith.constant 0 : index
    %263 = vector.load %arg2[%262, %c0_80] : memref<16x128xf32, #tpu.memory_space<vmem>>, vector<1x128xf32>
    %264 = arith.index_cast %261 : i32 to index
    %c0_81 = arith.constant 0 : index
    %265 = vector.load %arg3[%264, %c0_81] : memref<16x128xf32, #tpu.memory_space<vmem>>, vector<1x128xf32>
    %266 = arith.addf %263, %265 : vector<1x128xf32>
    %c8_i32_82 = arith.constant 8 : i32
    %267 = arith.muli %c1_i32_41, %c8_i32_82 : i32
    %268 = arith.addi %267, %c6_i32_78 : i32
    %269 = arith.index_cast %268 : i32 to index
    %c0_83 = arith.constant 0 : index
    %270 = vector.load %arg14[%269, %c0_83] : memref<64x128xf32, #tpu.memory_space<vmem>>, vector<1x128xf32>
    tpu.vector_store %arg14[%269, %c0_83], %266 {strides = array<i32>} : memref<64x128xf32, #tpu.memory_space<vmem>>, vector<1x128xf32>,
    %c7_i32_84 = arith.constant 7 : i32
    %271 = arith.addi %0, %c7_i32_84 : i32
    %272 = arith.index_cast %271 : i32 to index
    %273 = arith.index_cast %c1_i32_41 : i32 to index
    %274 = memref.load %arg1[%272, %273] : memref<16x8xi32, #tpu.memory_space<smem>>
    %275 = arith.addi %0, %c7_i32_84 : i32
    %c7_i32_85 = arith.constant 7 : i32
    %276 = arith.subi %c7_i32_85, %c1_i32_41 : i32
    %277 = arith.index_cast %275 : i32 to index
    %278 = arith.index_cast %276 : i32 to index
    %279 = memref.load %arg1[%277, %278] : memref<16x8xi32, #tpu.memory_space<smem>>
    %280 = arith.index_cast %274 : i32 to index
    %c0_86 = arith.constant 0 : index
    %281 = vector.load %arg2[%280, %c0_86] : memref<16x128xf32, #tpu.memory_space<vmem>>, vector<1x128xf32>
    %282 = arith.index_cast %279 : i32 to index
    %c0_87 = arith.constant 0 : index
    %283 = vector.load %arg3[%282, %c0_87] : memref<16x128xf32, #tpu.memory_space<vmem>>, vector<1x128xf32>
    %284 = arith.addf %281, %283 : vector<1x128xf32>
    %c8_i32_88 = arith.constant 8 : i32
    %285 = arith.muli %c1_i32_41, %c8_i32_88 : i32
    %286 = arith.addi %285, %c7_i32_84 : i32
    %287 = arith.index_cast %286 : i32 to index
    %c0_89 = arith.constant 0 : index
    %288 = vector.load %arg14[%287, %c0_89] : memref<64x128xf32, #tpu.memory_space<vmem>>, vector<1x128xf32>
    tpu.vector_store %arg14[%287, %c0_89], %284 {strides = array<i32>} : memref<64x128xf32, #tpu.memory_space<vmem>>, vector<1x128xf32>,
    %c8_i32_90 = arith.constant 8 : i32
    %c2_i32_91 = arith.constant 2 : i32
    %c0_i32_92 = arith.constant 0 : i32
    %289 = arith.addi %0, %c0_i32_92 : i32
    %290 = arith.index_cast %289 : i32 to index
    %291 = arith.index_cast %c2_i32_91 : i32 to index
    %292 = memref.load %arg1[%290, %291] : memref<16x8xi32, #tpu.memory_space<smem>>
    %293 = arith.addi %0, %c0_i32_92 : i32
    %c7_i32_93 = arith.constant 7 : i32
    %294 = arith.subi %c7_i32_93, %c2_i32_91 : i32
    %295 = arith.index_cast %293 : i32 to index
    %296 = arith.index_cast %294 : i32 to index
    %297 = memref.load %arg1[%295, %296] : memref<16x8xi32, #tpu.memory_space<smem>>
    %298 = arith.index_cast %292 : i32 to index
    %c0_94 = arith.constant 0 : index
    %299 = vector.load %arg2[%298, %c0_94] : memref<16x128xf32, #tpu.memory_space<vmem>>, vector<1x128xf32>
    %300 = arith.index_cast %297 : i32 to index
    %c0_95 = arith.constant 0 : index
    %301 = vector.load %arg3[%300, %c0_95] : memref<16x128xf32, #tpu.memory_space<vmem>>, vector<1x128xf32>
    %302 = arith.addf %299, %301 : vector<1x128xf32>
    %c8_i32_96 = arith.constant 8 : i32
    %303 = arith.muli %c2_i32_91, %c8_i32_96 : i32
    %304 = arith.addi %303, %c0_i32_92 : i32
    %305 = arith.index_cast %304 : i32 to index
    %c0_97 = arith.constant 0 : index
    %306 = vector.load %arg14[%305, %c0_97] : memref<64x128xf32, #tpu.memory_space<vmem>>, vector<1x128xf32>
    tpu.vector_store %arg14[%305, %c0_97], %302 {strides = array<i32>} : memref<64x128xf32, #tpu.memory_space<vmem>>, vector<1x128xf32>,
    %c1_i32_98 = arith.constant 1 : i32
    %307 = arith.addi %0, %c1_i32_98 : i32
    %308 = arith.index_cast %307 : i32 to index
    %309 = arith.index_cast %c2_i32_91 : i32 to index
    %310 = memref.load %arg1[%308, %309] : memref<16x8xi32, #tpu.memory_space<smem>>
    %311 = arith.addi %0, %c1_i32_98 : i32
    %c7_i32_99 = arith.constant 7 : i32
    %312 = arith.subi %c7_i32_99, %c2_i32_91 : i32
    %313 = arith.index_cast %311 : i32 to index
    %314 = arith.index_cast %312 : i32 to index
    %315 = memref.load %arg1[%313, %314] : memref<16x8xi32, #tpu.memory_space<smem>>
    %316 = arith.index_cast %310 : i32 to index
    %c0_100 = arith.constant 0 : index
    %317 = vector.load %arg2[%316, %c0_100] : memref<16x128xf32, #tpu.memory_space<vmem>>, vector<1x128xf32>
    %318 = arith.index_cast %315 : i32 to index
    %c0_101 = arith.constant 0 : index
    %319 = vector.load %arg3[%318, %c0_101] : memref<16x128xf32, #tpu.memory_space<vmem>>, vector<1x128xf32>
    %320 = arith.addf %317, %319 : vector<1x128xf32>
    %c8_i32_102 = arith.constant 8 : i32
    %321 = arith.muli %c2_i32_91, %c8_i32_102 : i32
    %322 = arith.addi %321, %c1_i32_98 : i32
    %323 = arith.index_cast %322 : i32 to index
    %c0_103 = arith.constant 0 : index
    %324 = vector.load %arg14[%323, %c0_103] : memref<64x128xf32, #tpu.memory_space<vmem>>, vector<1x128xf32>
    tpu.vector_store %arg14[%323, %c0_103], %320 {strides = array<i32>} : memref<64x128xf32, #tpu.memory_space<vmem>>, vector<1x128xf32>,
    %c2_i32_104 = arith.constant 2 : i32
    %325 = arith.addi %0, %c2_i32_104 : i32
    %326 = arith.index_cast %325 : i32 to index
    %327 = arith.index_cast %c2_i32_91 : i32 to index
    %328 = memref.load %arg1[%326, %327] : memref<16x8xi32, #tpu.memory_space<smem>>
    %329 = arith.addi %0, %c2_i32_104 : i32
    %c7_i32_105 = arith.constant 7 : i32
    %330 = arith.subi %c7_i32_105, %c2_i32_91 : i32
    %331 = arith.index_cast %329 : i32 to index
    %332 = arith.index_cast %330 : i32 to index
    %333 = memref.load %arg1[%331, %332] : memref<16x8xi32, #tpu.memory_space<smem>>
    %334 = arith.index_cast %328 : i32 to index
    %c0_106 = arith.constant 0 : index
    %335 = vector.load %arg2[%334, %c0_106] : memref<16x128xf32, #tpu.memory_space<vmem>>, vector<1x128xf32>
    %336 = arith.index_cast %333 : i32 to index
    %c0_107 = arith.constant 0 : index
    %337 = vector.load %arg3[%336, %c0_107] : memref<16x128xf32, #tpu.memory_space<vmem>>, vector<1x128xf32>
    %338 = arith.addf %335, %337 : vector<1x128xf32>
    %c8_i32_108 = arith.constant 8 : i32
    %339 = arith.muli %c2_i32_91, %c8_i32_108 : i32
    %340 = arith.addi %339, %c2_i32_104 : i32
    %341 = arith.index_cast %340 : i32 to index
    %c0_109 = arith.constant 0 : index
    %342 = vector.load %arg14[%341, %c0_109] : memref<64x128xf32, #tpu.memory_space<vmem>>, vector<1x128xf32>
    tpu.vector_store %arg14[%341, %c0_109], %338 {strides = array<i32>} : memref<64x128xf32, #tpu.memory_space<vmem>>, vector<1x128xf32>,
    %c3_i32_110 = arith.constant 3 : i32
    %343 = arith.addi %0, %c3_i32_110 : i32
    %344 = arith.index_cast %343 : i32 to index
    %345 = arith.index_cast %c2_i32_91 : i32 to index
    %346 = memref.load %arg1[%344, %345] : memref<16x8xi32, #tpu.memory_space<smem>>
    %347 = arith.addi %0, %c3_i32_110 : i32
    %c7_i32_111 = arith.constant 7 : i32
    %348 = arith.subi %c7_i32_111, %c2_i32_91 : i32
    %349 = arith.index_cast %347 : i32 to index
    %350 = arith.index_cast %348 : i32 to index
    %351 = memref.load %arg1[%349, %350] : memref<16x8xi32, #tpu.memory_space<smem>>
    %352 = arith.index_cast %346 : i32 to index
    %c0_112 = arith.constant 0 : index
    %353 = vector.load %arg2[%352, %c0_112] : memref<16x128xf32, #tpu.memory_space<vmem>>, vector<1x128xf32>
    %354 = arith.index_cast %351 : i32 to index
    %c0_113 = arith.constant 0 : index
    %355 = vector.load %arg3[%354, %c0_113] : memref<16x128xf32, #tpu.memory_space<vmem>>, vector<1x128xf32>
    %356 = arith.addf %353, %355 : vector<1x128xf32>
    %c8_i32_114 = arith.constant 8 : i32
    %357 = arith.muli %c2_i32_91, %c8_i32_114 : i32
    %358 = arith.addi %357, %c3_i32_110 : i32
    %359 = arith.index_cast %358 : i32 to index
    %c0_115 = arith.constant 0 : index
    %360 = vector.load %arg14[%359, %c0_115] : memref<64x128xf32, #tpu.memory_space<vmem>>, vector<1x128xf32>
    tpu.vector_store %arg14[%359, %c0_115], %356 {strides = array<i32>} : memref<64x128xf32, #tpu.memory_space<vmem>>, vector<1x128xf32>,
    %c4_i32_116 = arith.constant 4 : i32
    %361 = arith.addi %0, %c4_i32_116 : i32
    %362 = arith.index_cast %361 : i32 to index
    %363 = arith.index_cast %c2_i32_91 : i32 to index
    %364 = memref.load %arg1[%362, %363] : memref<16x8xi32, #tpu.memory_space<smem>>
    %365 = arith.addi %0, %c4_i32_116 : i32
    %c7_i32_117 = arith.constant 7 : i32
    %366 = arith.subi %c7_i32_117, %c2_i32_91 : i32
    %367 = arith.index_cast %365 : i32 to index
    %368 = arith.index_cast %366 : i32 to index
    %369 = memref.load %arg1[%367, %368] : memref<16x8xi32, #tpu.memory_space<smem>>
    %370 = arith.index_cast %364 : i32 to index
    %c0_118 = arith.constant 0 : index
    %371 = vector.load %arg2[%370, %c0_118] : memref<16x128xf32, #tpu.memory_space<vmem>>, vector<1x128xf32>
    %372 = arith.index_cast %369 : i32 to index
    %c0_119 = arith.constant 0 : index
    %373 = vector.load %arg3[%372, %c0_119] : memref<16x128xf32, #tpu.memory_space<vmem>>, vector<1x128xf32>
    %374 = arith.addf %371, %373 : vector<1x128xf32>
    %c8_i32_120 = arith.constant 8 : i32
    %375 = arith.muli %c2_i32_91, %c8_i32_120 : i32
    %376 = arith.addi %375, %c4_i32_116 : i32
    %377 = arith.index_cast %376 : i32 to index
    %c0_121 = arith.constant 0 : index
    %378 = vector.load %arg14[%377, %c0_121] : memref<64x128xf32, #tpu.memory_space<vmem>>, vector<1x128xf32>
    tpu.vector_store %arg14[%377, %c0_121], %374 {strides = array<i32>} : memref<64x128xf32, #tpu.memory_space<vmem>>, vector<1x128xf32>,
    %c5_i32_122 = arith.constant 5 : i32
    %379 = arith.addi %0, %c5_i32_122 : i32
    %380 = arith.index_cast %379 : i32 to index
    %381 = arith.index_cast %c2_i32_91 : i32 to index
    %382 = memref.load %arg1[%380, %381] : memref<16x8xi32, #tpu.memory_space<smem>>
    %383 = arith.addi %0, %c5_i32_122 : i32
    %c7_i32_123 = arith.constant 7 : i32
    %384 = arith.subi %c7_i32_123, %c2_i32_91 : i32
    %385 = arith.index_cast %383 : i32 to index
    %386 = arith.index_cast %384 : i32 to index
    %387 = memref.load %arg1[%385, %386] : memref<16x8xi32, #tpu.memory_space<smem>>
    %388 = arith.index_cast %382 : i32 to index
    %c0_124 = arith.constant 0 : index
    %389 = vector.load %arg2[%388, %c0_124] : memref<16x128xf32, #tpu.memory_space<vmem>>, vector<1x128xf32>
    %390 = arith.index_cast %387 : i32 to index
    %c0_125 = arith.constant 0 : index
    %391 = vector.load %arg3[%390, %c0_125] : memref<16x128xf32, #tpu.memory_space<vmem>>, vector<1x128xf32>
    %392 = arith.addf %389, %391 : vector<1x128xf32>
    %c8_i32_126 = arith.constant 8 : i32
    %393 = arith.muli %c2_i32_91, %c8_i32_126 : i32
    %394 = arith.addi %393, %c5_i32_122 : i32
    %395 = arith.index_cast %394 : i32 to index
    %c0_127 = arith.constant 0 : index
    %396 = vector.load %arg14[%395, %c0_127] : memref<64x128xf32, #tpu.memory_space<vmem>>, vector<1x128xf32>
    tpu.vector_store %arg14[%395, %c0_127], %392 {strides = array<i32>} : memref<64x128xf32, #tpu.memory_space<vmem>>, vector<1x128xf32>,
    %c6_i32_128 = arith.constant 6 : i32
    %397 = arith.addi %0, %c6_i32_128 : i32
    %398 = arith.index_cast %397 : i32 to index
    %399 = arith.index_cast %c2_i32_91 : i32 to index
    %400 = memref.load %arg1[%398, %399] : memref<16x8xi32, #tpu.memory_space<smem>>
    %401 = arith.addi %0, %c6_i32_128 : i32
    %c7_i32_129 = arith.constant 7 : i32
    %402 = arith.subi %c7_i32_129, %c2_i32_91 : i32
    %403 = arith.index_cast %401 : i32 to index
    %404 = arith.index_cast %402 : i32 to index
    %405 = memref.load %arg1[%403, %404] : memref<16x8xi32, #tpu.memory_space<smem>>
    %406 = arith.index_cast %400 : i32 to index
    %c0_130 = arith.constant 0 : index
    %407 = vector.load %arg2[%406, %c0_130] : memref<16x128xf32, #tpu.memory_space<vmem>>, vector<1x128xf32>
    %408 = arith.index_cast %405 : i32 to index
    %c0_131 = arith.constant 0 : index
    %409 = vector.load %arg3[%408, %c0_131] : memref<16x128xf32, #tpu.memory_space<vmem>>, vector<1x128xf32>
    %410 = arith.addf %407, %409 : vector<1x128xf32>
    %c8_i32_132 = arith.constant 8 : i32
    %411 = arith.muli %c2_i32_91, %c8_i32_132 : i32
    %412 = arith.addi %411, %c6_i32_128 : i32
    %413 = arith.index_cast %412 : i32 to index
    %c0_133 = arith.constant 0 : index
    %414 = vector.load %arg14[%413, %c0_133] : memref<64x128xf32, #tpu.memory_space<vmem>>, vector<1x128xf32>
    tpu.vector_store %arg14[%413, %c0_133], %410 {strides = array<i32>} : memref<64x128xf32, #tpu.memory_space<vmem>>, vector<1x128xf32>,
    %c7_i32_134 = arith.constant 7 : i32
    %415 = arith.addi %0, %c7_i32_134 : i32
    %416 = arith.index_cast %415 : i32 to index
    %417 = arith.index_cast %c2_i32_91 : i32 to index
    %418 = memref.load %arg1[%416, %417] : memref<16x8xi32, #tpu.memory_space<smem>>
    %419 = arith.addi %0, %c7_i32_134 : i32
    %c7_i32_135 = arith.constant 7 : i32
    %420 = arith.subi %c7_i32_135, %c2_i32_91 : i32
    %421 = arith.index_cast %419 : i32 to index
    %422 = arith.index_cast %420 : i32 to index
    %423 = memref.load %arg1[%421, %422] : memref<16x8xi32, #tpu.memory_space<smem>>
    %424 = arith.index_cast %418 : i32 to index
    %c0_136 = arith.constant 0 : index
    %425 = vector.load %arg2[%424, %c0_136] : memref<16x128xf32, #tpu.memory_space<vmem>>, vector<1x128xf32>
    %426 = arith.index_cast %423 : i32 to index
    %c0_137 = arith.constant 0 : index
    %427 = vector.load %arg3[%426, %c0_137] : memref<16x128xf32, #tpu.memory_space<vmem>>, vector<1x128xf32>
    %428 = arith.addf %425, %427 : vector<1x128xf32>
    %c8_i32_138 = arith.constant 8 : i32
    %429 = arith.muli %c2_i32_91, %c8_i32_138 : i32
    %430 = arith.addi %429, %c7_i32_134 : i32
    %431 = arith.index_cast %430 : i32 to index
    %c0_139 = arith.constant 0 : index
    %432 = vector.load %arg14[%431, %c0_139] : memref<64x128xf32, #tpu.memory_space<vmem>>, vector<1x128xf32>
    tpu.vector_store %arg14[%431, %c0_139], %428 {strides = array<i32>} : memref<64x128xf32, #tpu.memory_space<vmem>>, vector<1x128xf32>,
    %c8_i32_140 = arith.constant 8 : i32
    %c3_i32_141 = arith.constant 3 : i32
    %c0_i32_142 = arith.constant 0 : i32
    %433 = arith.addi %0, %c0_i32_142 : i32
    %434 = arith.index_cast %433 : i32 to index
    %435 = arith.index_cast %c3_i32_141 : i32 to index
    %436 = memref.load %arg1[%434, %435] : memref<16x8xi32, #tpu.memory_space<smem>>
    %437 = arith.addi %0, %c0_i32_142 : i32
    %c7_i32_143 = arith.constant 7 : i32
    %438 = arith.subi %c7_i32_143, %c3_i32_141 : i32
    %439 = arith.index_cast %437 : i32 to index
    %440 = arith.index_cast %438 : i32 to index
    %441 = memref.load %arg1[%439, %440] : memref<16x8xi32, #tpu.memory_space<smem>>
    %442 = arith.index_cast %436 : i32 to index
    %c0_144 = arith.constant 0 : index
    %443 = vector.load %arg2[%442, %c0_144] : memref<16x128xf32, #tpu.memory_space<vmem>>, vector<1x128xf32>
    %444 = arith.index_cast %441 : i32 to index
    %c0_145 = arith.constant 0 : index
    %445 = vector.load %arg3[%444, %c0_145] : memref<16x128xf32, #tpu.memory_space<vmem>>, vector<1x128xf32>
    %446 = arith.addf %443, %445 : vector<1x128xf32>
    %c8_i32_146 = arith.constant 8 : i32
    %447 = arith.muli %c3_i32_141, %c8_i32_146 : i32
    %448 = arith.addi %447, %c0_i32_142 : i32
    %449 = arith.index_cast %448 : i32 to index
    %c0_147 = arith.constant 0 : index
    %450 = vector.load %arg14[%449, %c0_147] : memref<64x128xf32, #tpu.memory_space<vmem>>, vector<1x128xf32>
    tpu.vector_store %arg14[%449, %c0_147], %446 {strides = array<i32>} : memref<64x128xf32, #tpu.memory_space<vmem>>, vector<1x128xf32>,
    %c1_i32_148 = arith.constant 1 : i32
    %451 = arith.addi %0, %c1_i32_148 : i32
    %452 = arith.index_cast %451 : i32 to index
    %453 = arith.index_cast %c3_i32_141 : i32 to index
    %454 = memref.load %arg1[%452, %453] : memref<16x8xi32, #tpu.memory_space<smem>>
    %455 = arith.addi %0, %c1_i32_148 : i32
    %c7_i32_149 = arith.constant 7 : i32
    %456 = arith.subi %c7_i32_149, %c3_i32_141 : i32
    %457 = arith.index_cast %455 : i32 to index
    %458 = arith.index_cast %456 : i32 to index
    %459 = memref.load %arg1[%457, %458] : memref<16x8xi32, #tpu.memory_space<smem>>
    %460 = arith.index_cast %454 : i32 to index
    %c0_150 = arith.constant 0 : index
    %461 = vector.load %arg2[%460, %c0_150] : memref<16x128xf32, #tpu.memory_space<vmem>>, vector<1x128xf32>
    %462 = arith.index_cast %459 : i32 to index
    %c0_151 = arith.constant 0 : index
    %463 = vector.load %arg3[%462, %c0_151] : memref<16x128xf32, #tpu.memory_space<vmem>>, vector<1x128xf32>
    %464 = arith.addf %461, %463 : vector<1x128xf32>
    %c8_i32_152 = arith.constant 8 : i32
    %465 = arith.muli %c3_i32_141, %c8_i32_152 : i32
    %466 = arith.addi %465, %c1_i32_148 : i32
    %467 = arith.index_cast %466 : i32 to index
    %c0_153 = arith.constant 0 : index
    %468 = vector.load %arg14[%467, %c0_153] : memref<64x128xf32, #tpu.memory_space<vmem>>, vector<1x128xf32>
    tpu.vector_store %arg14[%467, %c0_153], %464 {strides = array<i32>} : memref<64x128xf32, #tpu.memory_space<vmem>>, vector<1x128xf32>,
    %c2_i32_154 = arith.constant 2 : i32
    %469 = arith.addi %0, %c2_i32_154 : i32
    %470 = arith.index_cast %469 : i32 to index
    %471 = arith.index_cast %c3_i32_141 : i32 to index
    %472 = memref.load %arg1[%470, %471] : memref<16x8xi32, #tpu.memory_space<smem>>
    %473 = arith.addi %0, %c2_i32_154 : i32
    %c7_i32_155 = arith.constant 7 : i32
    %474 = arith.subi %c7_i32_155, %c3_i32_141 : i32
    %475 = arith.index_cast %473 : i32 to index
    %476 = arith.index_cast %474 : i32 to index
    %477 = memref.load %arg1[%475, %476] : memref<16x8xi32, #tpu.memory_space<smem>>
    %478 = arith.index_cast %472 : i32 to index
    %c0_156 = arith.constant 0 : index
    %479 = vector.load %arg2[%478, %c0_156] : memref<16x128xf32, #tpu.memory_space<vmem>>, vector<1x128xf32>
    %480 = arith.index_cast %477 : i32 to index
    %c0_157 = arith.constant 0 : index
    %481 = vector.load %arg3[%480, %c0_157] : memref<16x128xf32, #tpu.memory_space<vmem>>, vector<1x128xf32>
    %482 = arith.addf %479, %481 : vector<1x128xf32>
    %c8_i32_158 = arith.constant 8 : i32
    %483 = arith.muli %c3_i32_141, %c8_i32_158 : i32
    %484 = arith.addi %483, %c2_i32_154 : i32
    %485 = arith.index_cast %484 : i32 to index
    %c0_159 = arith.constant 0 : index
    %486 = vector.load %arg14[%485, %c0_159] : memref<64x128xf32, #tpu.memory_space<vmem>>, vector<1x128xf32>
    tpu.vector_store %arg14[%485, %c0_159], %482 {strides = array<i32>} : memref<64x128xf32, #tpu.memory_space<vmem>>, vector<1x128xf32>,
    %c3_i32_160 = arith.constant 3 : i32
    %487 = arith.addi %0, %c3_i32_160 : i32
    %488 = arith.index_cast %487 : i32 to index
    %489 = arith.index_cast %c3_i32_141 : i32 to index
    %490 = memref.load %arg1[%488, %489] : memref<16x8xi32, #tpu.memory_space<smem>>
    %491 = arith.addi %0, %c3_i32_160 : i32
    %c7_i32_161 = arith.constant 7 : i32
    %492 = arith.subi %c7_i32_161, %c3_i32_141 : i32
    %493 = arith.index_cast %491 : i32 to index
    %494 = arith.index_cast %492 : i32 to index
    %495 = memref.load %arg1[%493, %494] : memref<16x8xi32, #tpu.memory_space<smem>>
    %496 = arith.index_cast %490 : i32 to index
    %c0_162 = arith.constant 0 : index
    %497 = vector.load %arg2[%496, %c0_162] : memref<16x128xf32, #tpu.memory_space<vmem>>, vector<1x128xf32>
    %498 = arith.index_cast %495 : i32 to index
    %c0_163 = arith.constant 0 : index
    %499 = vector.load %arg3[%498, %c0_163] : memref<16x128xf32, #tpu.memory_space<vmem>>, vector<1x128xf32>
    %500 = arith.addf %497, %499 : vector<1x128xf32>
    %c8_i32_164 = arith.constant 8 : i32
    %501 = arith.muli %c3_i32_141, %c8_i32_164 : i32
    %502 = arith.addi %501, %c3_i32_160 : i32
    %503 = arith.index_cast %502 : i32 to index
    %c0_165 = arith.constant 0 : index
    %504 = vector.load %arg14[%503, %c0_165] : memref<64x128xf32, #tpu.memory_space<vmem>>, vector<1x128xf32>
    tpu.vector_store %arg14[%503, %c0_165], %500 {strides = array<i32>} : memref<64x128xf32, #tpu.memory_space<vmem>>, vector<1x128xf32>,
    %c4_i32_166 = arith.constant 4 : i32
    %505 = arith.addi %0, %c4_i32_166 : i32
    %506 = arith.index_cast %505 : i32 to index
    %507 = arith.index_cast %c3_i32_141 : i32 to index
    %508 = memref.load %arg1[%506, %507] : memref<16x8xi32, #tpu.memory_space<smem>>
    %509 = arith.addi %0, %c4_i32_166 : i32
    %c7_i32_167 = arith.constant 7 : i32
    %510 = arith.subi %c7_i32_167, %c3_i32_141 : i32
    %511 = arith.index_cast %509 : i32 to index
    %512 = arith.index_cast %510 : i32 to index
    %513 = memref.load %arg1[%511, %512] : memref<16x8xi32, #tpu.memory_space<smem>>
    %514 = arith.index_cast %508 : i32 to index
    %c0_168 = arith.constant 0 : index
    %515 = vector.load %arg2[%514, %c0_168] : memref<16x128xf32, #tpu.memory_space<vmem>>, vector<1x128xf32>
    %516 = arith.index_cast %513 : i32 to index
    %c0_169 = arith.constant 0 : index
    %517 = vector.load %arg3[%516, %c0_169] : memref<16x128xf32, #tpu.memory_space<vmem>>, vector<1x128xf32>
    %518 = arith.addf %515, %517 : vector<1x128xf32>
    %c8_i32_170 = arith.constant 8 : i32
    %519 = arith.muli %c3_i32_141, %c8_i32_170 : i32
    %520 = arith.addi %519, %c4_i32_166 : i32
    %521 = arith.index_cast %520 : i32 to index
    %c0_171 = arith.constant 0 : index
    %522 = vector.load %arg14[%521, %c0_171] : memref<64x128xf32, #tpu.memory_space<vmem>>, vector<1x128xf32>
    tpu.vector_store %arg14[%521, %c0_171], %518 {strides = array<i32>} : memref<64x128xf32, #tpu.memory_space<vmem>>, vector<1x128xf32>,
    %c5_i32_172 = arith.constant 5 : i32
    %523 = arith.addi %0, %c5_i32_172 : i32
    %524 = arith.index_cast %523 : i32 to index
    %525 = arith.index_cast %c3_i32_141 : i32 to index
    %526 = memref.load %arg1[%524, %525] : memref<16x8xi32, #tpu.memory_space<smem>>
    %527 = arith.addi %0, %c5_i32_172 : i32
    %c7_i32_173 = arith.constant 7 : i32
    %528 = arith.subi %c7_i32_173, %c3_i32_141 : i32
    %529 = arith.index_cast %527 : i32 to index
    %530 = arith.index_cast %528 : i32 to index
    %531 = memref.load %arg1[%529, %530] : memref<16x8xi32, #tpu.memory_space<smem>>
    %532 = arith.index_cast %526 : i32 to index
    %c0_174 = arith.constant 0 : index
    %533 = vector.load %arg2[%532, %c0_174] : memref<16x128xf32, #tpu.memory_space<vmem>>, vector<1x128xf32>
    %534 = arith.index_cast %531 : i32 to index
    %c0_175 = arith.constant 0 : index
    %535 = vector.load %arg3[%534, %c0_175] : memref<16x128xf32, #tpu.memory_space<vmem>>, vector<1x128xf32>
    %536 = arith.addf %533, %535 : vector<1x128xf32>
    %c8_i32_176 = arith.constant 8 : i32
    %537 = arith.muli %c3_i32_141, %c8_i32_176 : i32
    %538 = arith.addi %537, %c5_i32_172 : i32
    %539 = arith.index_cast %538 : i32 to index
    %c0_177 = arith.constant 0 : index
    %540 = vector.load %arg14[%539, %c0_177] : memref<64x128xf32, #tpu.memory_space<vmem>>, vector<1x128xf32>
    tpu.vector_store %arg14[%539, %c0_177], %536 {strides = array<i32>} : memref<64x128xf32, #tpu.memory_space<vmem>>, vector<1x128xf32>,
    %c6_i32_178 = arith.constant 6 : i32
    %541 = arith.addi %0, %c6_i32_178 : i32
    %542 = arith.index_cast %541 : i32 to index
    %543 = arith.index_cast %c3_i32_141 : i32 to index
    %544 = memref.load %arg1[%542, %543] : memref<16x8xi32, #tpu.memory_space<smem>>
    %545 = arith.addi %0, %c6_i32_178 : i32
    %c7_i32_179 = arith.constant 7 : i32
    %546 = arith.subi %c7_i32_179, %c3_i32_141 : i32
    %547 = arith.index_cast %545 : i32 to index
    %548 = arith.index_cast %546 : i32 to index
    %549 = memref.load %arg1[%547, %548] : memref<16x8xi32, #tpu.memory_space<smem>>
    %550 = arith.index_cast %544 : i32 to index
    %c0_180 = arith.constant 0 : index
    %551 = vector.load %arg2[%550, %c0_180] : memref<16x128xf32, #tpu.memory_space<vmem>>, vector<1x128xf32>
    %552 = arith.index_cast %549 : i32 to index
    %c0_181 = arith.constant 0 : index
    %553 = vector.load %arg3[%552, %c0_181] : memref<16x128xf32, #tpu.memory_space<vmem>>, vector<1x128xf32>
    %554 = arith.addf %551, %553 : vector<1x128xf32>
    %c8_i32_182 = arith.constant 8 : i32
    %555 = arith.muli %c3_i32_141, %c8_i32_182 : i32
    %556 = arith.addi %555, %c6_i32_178 : i32
    %557 = arith.index_cast %556 : i32 to index
    %c0_183 = arith.constant 0 : index
    %558 = vector.load %arg14[%557, %c0_183] : memref<64x128xf32, #tpu.memory_space<vmem>>, vector<1x128xf32>
    tpu.vector_store %arg14[%557, %c0_183], %554 {strides = array<i32>} : memref<64x128xf32, #tpu.memory_space<vmem>>, vector<1x128xf32>,
    %c7_i32_184 = arith.constant 7 : i32
    %559 = arith.addi %0, %c7_i32_184 : i32
    %560 = arith.index_cast %559 : i32 to index
    %561 = arith.index_cast %c3_i32_141 : i32 to index
    %562 = memref.load %arg1[%560, %561] : memref<16x8xi32, #tpu.memory_space<smem>>
    %563 = arith.addi %0, %c7_i32_184 : i32
    %c7_i32_185 = arith.constant 7 : i32
    %564 = arith.subi %c7_i32_185, %c3_i32_141 : i32
    %565 = arith.index_cast %563 : i32 to index
    %566 = arith.index_cast %564 : i32 to index
    %567 = memref.load %arg1[%565, %566] : memref<16x8xi32, #tpu.memory_space<smem>>
    %568 = arith.index_cast %562 : i32 to index
    %c0_186 = arith.constant 0 : index
    %569 = vector.load %arg2[%568, %c0_186] : memref<16x128xf32, #tpu.memory_space<vmem>>, vector<1x128xf32>
    %570 = arith.index_cast %567 : i32 to index
    %c0_187 = arith.constant 0 : index
    %571 = vector.load %arg3[%570, %c0_187] : memref<16x128xf32, #tpu.memory_space<vmem>>, vector<1x128xf32>
    %572 = arith.addf %569, %571 : vector<1x128xf32>
    %c8_i32_188 = arith.constant 8 : i32
    %573 = arith.muli %c3_i32_141, %c8_i32_188 : i32
    %574 = arith.addi %573, %c7_i32_184 : i32
    %575 = arith.index_cast %574 : i32 to index
    %c0_189 = arith.constant 0 : index
    %576 = vector.load %arg14[%575, %c0_189] : memref<64x128xf32, #tpu.memory_space<vmem>>, vector<1x128xf32>
    tpu.vector_store %arg14[%575, %c0_189], %572 {strides = array<i32>} : memref<64x128xf32, #tpu.memory_space<vmem>>, vector<1x128xf32>,
    %c8_i32_190 = arith.constant 8 : i32
    %c4_i32_191 = arith.constant 4 : i32
    %c0_i32_192 = arith.constant 0 : i32
    %577 = arith.addi %0, %c0_i32_192 : i32
    %578 = arith.index_cast %577 : i32 to index
    %579 = arith.index_cast %c4_i32_191 : i32 to index
    %580 = memref.load %arg1[%578, %579] : memref<16x8xi32, #tpu.memory_space<smem>>
    %581 = arith.addi %0, %c0_i32_192 : i32
    %c7_i32_193 = arith.constant 7 : i32
    %582 = arith.subi %c7_i32_193, %c4_i32_191 : i32
    %583 = arith.index_cast %581 : i32 to index
    %584 = arith.index_cast %582 : i32 to index
    %585 = memref.load %arg1[%583, %584] : memref<16x8xi32, #tpu.memory_space<smem>>
    %586 = arith.index_cast %580 : i32 to index
    %c0_194 = arith.constant 0 : index
    %587 = vector.load %arg2[%586, %c0_194] : memref<16x128xf32, #tpu.memory_space<vmem>>, vector<1x128xf32>
    %588 = arith.index_cast %585 : i32 to index
    %c0_195 = arith.constant 0 : index
    %589 = vector.load %arg3[%588, %c0_195] : memref<16x128xf32, #tpu.memory_space<vmem>>, vector<1x128xf32>
    %590 = arith.addf %587, %589 : vector<1x128xf32>
    %c8_i32_196 = arith.constant 8 : i32
    %591 = arith.muli %c4_i32_191, %c8_i32_196 : i32
    %592 = arith.addi %591, %c0_i32_192 : i32
    %593 = arith.index_cast %592 : i32 to index
    %c0_197 = arith.constant 0 : index
    %594 = vector.load %arg14[%593, %c0_197] : memref<64x128xf32, #tpu.memory_space<vmem>>, vector<1x128xf32>
    tpu.vector_store %arg14[%593, %c0_197], %590 {strides = array<i32>} : memref<64x128xf32, #tpu.memory_space<vmem>>, vector<1x128xf32>,
    %c1_i32_198 = arith.constant 1 : i32
    %595 = arith.addi %0, %c1_i32_198 : i32
    %596 = arith.index_cast %595 : i32 to index
    %597 = arith.index_cast %c4_i32_191 : i32 to index
    %598 = memref.load %arg1[%596, %597] : memref<16x8xi32, #tpu.memory_space<smem>>
    %599 = arith.addi %0, %c1_i32_198 : i32
    %c7_i32_199 = arith.constant 7 : i32
    %600 = arith.subi %c7_i32_199, %c4_i32_191 : i32
    %601 = arith.index_cast %599 : i32 to index
    %602 = arith.index_cast %600 : i32 to index
    %603 = memref.load %arg1[%601, %602] : memref<16x8xi32, #tpu.memory_space<smem>>
    %604 = arith.index_cast %598 : i32 to index
    %c0_200 = arith.constant 0 : index
    %605 = vector.load %arg2[%604, %c0_200] : memref<16x128xf32, #tpu.memory_space<vmem>>, vector<1x128xf32>
    %606 = arith.index_cast %603 : i32 to index
    %c0_201 = arith.constant 0 : index
    %607 = vector.load %arg3[%606, %c0_201] : memref<16x128xf32, #tpu.memory_space<vmem>>, vector<1x128xf32>
    %608 = arith.addf %605, %607 : vector<1x128xf32>
    %c8_i32_202 = arith.constant 8 : i32
    %609 = arith.muli %c4_i32_191, %c8_i32_202 : i32
    %610 = arith.addi %609, %c1_i32_198 : i32
    %611 = arith.index_cast %610 : i32 to index
    %c0_203 = arith.constant 0 : index
    %612 = vector.load %arg14[%611, %c0_203] : memref<64x128xf32, #tpu.memory_space<vmem>>, vector<1x128xf32>
    tpu.vector_store %arg14[%611, %c0_203], %608 {strides = array<i32>} : memref<64x128xf32, #tpu.memory_space<vmem>>, vector<1x128xf32>,
    %c2_i32_204 = arith.constant 2 : i32
    %613 = arith.addi %0, %c2_i32_204 : i32
    %614 = arith.index_cast %613 : i32 to index
    %615 = arith.index_cast %c4_i32_191 : i32 to index
    %616 = memref.load %arg1[%614, %615] : memref<16x8xi32, #tpu.memory_space<smem>>
    %617 = arith.addi %0, %c2_i32_204 : i32
    %c7_i32_205 = arith.constant 7 : i32
    %618 = arith.subi %c7_i32_205, %c4_i32_191 : i32
    %619 = arith.index_cast %617 : i32 to index
    %620 = arith.index_cast %618 : i32 to index
    %621 = memref.load %arg1[%619, %620] : memref<16x8xi32, #tpu.memory_space<smem>>
    %622 = arith.index_cast %616 : i32 to index
    %c0_206 = arith.constant 0 : index
    %623 = vector.load %arg2[%622, %c0_206] : memref<16x128xf32, #tpu.memory_space<vmem>>, vector<1x128xf32>
    %624 = arith.index_cast %621 : i32 to index
    %c0_207 = arith.constant 0 : index
    %625 = vector.load %arg3[%624, %c0_207] : memref<16x128xf32, #tpu.memory_space<vmem>>, vector<1x128xf32>
    %626 = arith.addf %623, %625 : vector<1x128xf32>
    %c8_i32_208 = arith.constant 8 : i32
    %627 = arith.muli %c4_i32_191, %c8_i32_208 : i32
    %628 = arith.addi %627, %c2_i32_204 : i32
    %629 = arith.index_cast %628 : i32 to index
    %c0_209 = arith.constant 0 : index
    %630 = vector.load %arg14[%629, %c0_209] : memref<64x128xf32, #tpu.memory_space<vmem>>, vector<1x128xf32>
    tpu.vector_store %arg14[%629, %c0_209], %626 {strides = array<i32>} : memref<64x128xf32, #tpu.memory_space<vmem>>, vector<1x128xf32>,
    %c3_i32_210 = arith.constant 3 : i32
    %631 = arith.addi %0, %c3_i32_210 : i32
    %632 = arith.index_cast %631 : i32 to index
    %633 = arith.index_cast %c4_i32_191 : i32 to index
    %634 = memref.load %arg1[%632, %633] : memref<16x8xi32, #tpu.memory_space<smem>>
    %635 = arith.addi %0, %c3_i32_210 : i32
    %c7_i32_211 = arith.constant 7 : i32
    %636 = arith.subi %c7_i32_211, %c4_i32_191 : i32
    %637 = arith.index_cast %635 : i32 to index
    %638 = arith.index_cast %636 : i32 to index
    %639 = memref.load %arg1[%637, %638] : memref<16x8xi32, #tpu.memory_space<smem>>
    %640 = arith.index_cast %634 : i32 to index
    %c0_212 = arith.constant 0 : index
    %641 = vector.load %arg2[%640, %c0_212] : memref<16x128xf32, #tpu.memory_space<vmem>>, vector<1x128xf32>
    %642 = arith.index_cast %639 : i32 to index
    %c0_213 = arith.constant 0 : index
    %643 = vector.load %arg3[%642, %c0_213] : memref<16x128xf32, #tpu.memory_space<vmem>>, vector<1x128xf32>
    %644 = arith.addf %641, %643 : vector<1x128xf32>
    %c8_i32_214 = arith.constant 8 : i32
    %645 = arith.muli %c4_i32_191, %c8_i32_214 : i32
    %646 = arith.addi %645, %c3_i32_210 : i32
    %647 = arith.index_cast %646 : i32 to index
    %c0_215 = arith.constant 0 : index
    %648 = vector.load %arg14[%647, %c0_215] : memref<64x128xf32, #tpu.memory_space<vmem>>, vector<1x128xf32>
    tpu.vector_store %arg14[%647, %c0_215], %644 {strides = array<i32>} : memref<64x128xf32, #tpu.memory_space<vmem>>, vector<1x128xf32>,
    %c4_i32_216 = arith.constant 4 : i32
    %649 = arith.addi %0, %c4_i32_216 : i32
    %650 = arith.index_cast %649 : i32 to index
    %651 = arith.index_cast %c4_i32_191 : i32 to index
    %652 = memref.load %arg1[%650, %651] : memref<16x8xi32, #tpu.memory_space<smem>>
    %653 = arith.addi %0, %c4_i32_216 : i32
    %c7_i32_217 = arith.constant 7 : i32
    %654 = arith.subi %c7_i32_217, %c4_i32_191 : i32
    %655 = arith.index_cast %653 : i32 to index
    %656 = arith.index_cast %654 : i32 to index
    %657 = memref.load %arg1[%655, %656] : memref<16x8xi32, #tpu.memory_space<smem>>
    %658 = arith.index_cast %652 : i32 to index
    %c0_218 = arith.constant 0 : index
    %659 = vector.load %arg2[%658, %c0_218] : memref<16x128xf32, #tpu.memory_space<vmem>>, vector<1x128xf32>
    %660 = arith.index_cast %657 : i32 to index
    %c0_219 = arith.constant 0 : index
    %661 = vector.load %arg3[%660, %c0_219] : memref<16x128xf32, #tpu.memory_space<vmem>>, vector<1x128xf32>
    %662 = arith.addf %659, %661 : vector<1x128xf32>
    %c8_i32_220 = arith.constant 8 : i32
    %663 = arith.muli %c4_i32_191, %c8_i32_220 : i32
    %664 = arith.addi %663, %c4_i32_216 : i32
    %665 = arith.index_cast %664 : i32 to index
    %c0_221 = arith.constant 0 : index
    %666 = vector.load %arg14[%665, %c0_221] : memref<64x128xf32, #tpu.memory_space<vmem>>, vector<1x128xf32>
    tpu.vector_store %arg14[%665, %c0_221], %662 {strides = array<i32>} : memref<64x128xf32, #tpu.memory_space<vmem>>, vector<1x128xf32>,
    %c5_i32_222 = arith.constant 5 : i32
    %667 = arith.addi %0, %c5_i32_222 : i32
    %668 = arith.index_cast %667 : i32 to index
    %669 = arith.index_cast %c4_i32_191 : i32 to index
    %670 = memref.load %arg1[%668, %669] : memref<16x8xi32, #tpu.memory_space<smem>>
    %671 = arith.addi %0, %c5_i32_222 : i32
    %c7_i32_223 = arith.constant 7 : i32
    %672 = arith.subi %c7_i32_223, %c4_i32_191 : i32
    %673 = arith.index_cast %671 : i32 to index
    %674 = arith.index_cast %672 : i32 to index
    %675 = memref.load %arg1[%673, %674] : memref<16x8xi32, #tpu.memory_space<smem>>
    %676 = arith.index_cast %670 : i32 to index
    %c0_224 = arith.constant 0 : index
    %677 = vector.load %arg2[%676, %c0_224] : memref<16x128xf32, #tpu.memory_space<vmem>>, vector<1x128xf32>
    %678 = arith.index_cast %675 : i32 to index
    %c0_225 = arith.constant 0 : index
    %679 = vector.load %arg3[%678, %c0_225] : memref<16x128xf32, #tpu.memory_space<vmem>>, vector<1x128xf32>
    %680 = arith.addf %677, %679 : vector<1x128xf32>
    %c8_i32_226 = arith.constant 8 : i32
    %681 = arith.muli %c4_i32_191, %c8_i32_226 : i32
    %682 = arith.addi %681, %c5_i32_222 : i32
    %683 = arith.index_cast %682 : i32 to index
    %c0_227 = arith.constant 0 : index
    %684 = vector.load %arg14[%683, %c0_227] : memref<64x128xf32, #tpu.memory_space<vmem>>, vector<1x128xf32>
    tpu.vector_store %arg14[%683, %c0_227], %680 {strides = array<i32>} : memref<64x128xf32, #tpu.memory_space<vmem>>, vector<1x128xf32>,
    %c6_i32_228 = arith.constant 6 : i32
    %685 = arith.addi %0, %c6_i32_228 : i32
    %686 = arith.index_cast %685 : i32 to index
    %687 = arith.index_cast %c4_i32_191 : i32 to index
    %688 = memref.load %arg1[%686, %687] : memref<16x8xi32, #tpu.memory_space<smem>>
    %689 = arith.addi %0, %c6_i32_228 : i32
    %c7_i32_229 = arith.constant 7 : i32
    %690 = arith.subi %c7_i32_229, %c4_i32_191 : i32
    %691 = arith.index_cast %689 : i32 to index
    %692 = arith.index_cast %690 : i32 to index
    %693 = memref.load %arg1[%691, %692] : memref<16x8xi32, #tpu.memory_space<smem>>
    %694 = arith.index_cast %688 : i32 to index
    %c0_230 = arith.constant 0 : index
    %695 = vector.load %arg2[%694, %c0_230] : memref<16x128xf32, #tpu.memory_space<vmem>>, vector<1x128xf32>
    %696 = arith.index_cast %693 : i32 to index
    %c0_231 = arith.constant 0 : index
    %697 = vector.load %arg3[%696, %c0_231] : memref<16x128xf32, #tpu.memory_space<vmem>>, vector<1x128xf32>
    %698 = arith.addf %695, %697 : vector<1x128xf32>
    %c8_i32_232 = arith.constant 8 : i32
    %699 = arith.muli %c4_i32_191, %c8_i32_232 : i32
    %700 = arith.addi %699, %c6_i32_228 : i32
    %701 = arith.index_cast %700 : i32 to index
    %c0_233 = arith.constant 0 : index
    %702 = vector.load %arg14[%701, %c0_233] : memref<64x128xf32, #tpu.memory_space<vmem>>, vector<1x128xf32>
    tpu.vector_store %arg14[%701, %c0_233], %698 {strides = array<i32>} : memref<64x128xf32, #tpu.memory_space<vmem>>, vector<1x128xf32>,
    %c7_i32_234 = arith.constant 7 : i32
    %703 = arith.addi %0, %c7_i32_234 : i32
    %704 = arith.index_cast %703 : i32 to index
    %705 = arith.index_cast %c4_i32_191 : i32 to index
    %706 = memref.load %arg1[%704, %705] : memref<16x8xi32, #tpu.memory_space<smem>>
    %707 = arith.addi %0, %c7_i32_234 : i32
    %c7_i32_235 = arith.constant 7 : i32
    %708 = arith.subi %c7_i32_235, %c4_i32_191 : i32
    %709 = arith.index_cast %707 : i32 to index
    %710 = arith.index_cast %708 : i32 to index
    %711 = memref.load %arg1[%709, %710] : memref<16x8xi32, #tpu.memory_space<smem>>
    %712 = arith.index_cast %706 : i32 to index
    %c0_236 = arith.constant 0 : index
    %713 = vector.load %arg2[%712, %c0_236] : memref<16x128xf32, #tpu.memory_space<vmem>>, vector<1x128xf32>
    %714 = arith.index_cast %711 : i32 to index
    %c0_237 = arith.constant 0 : index
    %715 = vector.load %arg3[%714, %c0_237] : memref<16x128xf32, #tpu.memory_space<vmem>>, vector<1x128xf32>
    %716 = arith.addf %713, %715 : vector<1x128xf32>
    %c8_i32_238 = arith.constant 8 : i32
    %717 = arith.muli %c4_i32_191, %c8_i32_238 : i32
    %718 = arith.addi %717, %c7_i32_234 : i32
    %719 = arith.index_cast %718 : i32 to index
    %c0_239 = arith.constant 0 : index
    %720 = vector.load %arg14[%719, %c0_239] : memref<64x128xf32, #tpu.memory_space<vmem>>, vector<1x128xf32>
    tpu.vector_store %arg14[%719, %c0_239], %716 {strides = array<i32>} : memref<64x128xf32, #tpu.memory_space<vmem>>, vector<1x128xf32>,
    %c8_i32_240 = arith.constant 8 : i32
    %c5_i32_241 = arith.constant 5 : i32
    %c0_i32_242 = arith.constant 0 : i32
    %721 = arith.addi %0, %c0_i32_242 : i32
    %722 = arith.index_cast %721 : i32 to index
    %723 = arith.index_cast %c5_i32_241 : i32 to index
    %724 = memref.load %arg1[%722, %723] : memref<16x8xi32, #tpu.memory_space<smem>>
    %725 = arith.addi %0, %c0_i32_242 : i32
    %c7_i32_243 = arith.constant 7 : i32
    %726 = arith.subi %c7_i32_243, %c5_i32_241 : i32
    %727 = arith.index_cast %725 : i32 to index
    %728 = arith.index_cast %726 : i32 to index
    %729 = memref.load %arg1[%727, %728] : memref<16x8xi32, #tpu.memory_space<smem>>
    %730 = arith.index_cast %724 : i32 to index
    %c0_244 = arith.constant 0 : index
    %731 = vector.load %arg2[%730, %c0_244] : memref<16x128xf32, #tpu.memory_space<vmem>>, vector<1x128xf32>
    %732 = arith.index_cast %729 : i32 to index
    %c0_245 = arith.constant 0 : index
    %733 = vector.load %arg3[%732, %c0_245] : memref<16x128xf32, #tpu.memory_space<vmem>>, vector<1x128xf32>
    %734 = arith.addf %731, %733 : vector<1x128xf32>
    %c8_i32_246 = arith.constant 8 : i32
    %735 = arith.muli %c5_i32_241, %c8_i32_246 : i32
    %736 = arith.addi %735, %c0_i32_242 : i32
    %737 = arith.index_cast %736 : i32 to index
    %c0_247 = arith.constant 0 : index
    %738 = vector.load %arg14[%737, %c0_247] : memref<64x128xf32, #tpu.memory_space<vmem>>, vector<1x128xf32>
    tpu.vector_store %arg14[%737, %c0_247], %734 {strides = array<i32>} : memref<64x128xf32, #tpu.memory_space<vmem>>, vector<1x128xf32>,
    %c1_i32_248 = arith.constant 1 : i32
    %739 = arith.addi %0, %c1_i32_248 : i32
    %740 = arith.index_cast %739 : i32 to index
    %741 = arith.index_cast %c5_i32_241 : i32 to index
    %742 = memref.load %arg1[%740, %741] : memref<16x8xi32, #tpu.memory_space<smem>>
    %743 = arith.addi %0, %c1_i32_248 : i32
    %c7_i32_249 = arith.constant 7 : i32
    %744 = arith.subi %c7_i32_249, %c5_i32_241 : i32
    %745 = arith.index_cast %743 : i32 to index
    %746 = arith.index_cast %744 : i32 to index
    %747 = memref.load %arg1[%745, %746] : memref<16x8xi32, #tpu.memory_space<smem>>
    %748 = arith.index_cast %742 : i32 to index
    %c0_250 = arith.constant 0 : index
    %749 = vector.load %arg2[%748, %c0_250] : memref<16x128xf32, #tpu.memory_space<vmem>>, vector<1x128xf32>
    %750 = arith.index_cast %747 : i32 to index
    %c0_251 = arith.constant 0 : index
    %751 = vector.load %arg3[%750, %c0_251] : memref<16x128xf32, #tpu.memory_space<vmem>>, vector<1x128xf32>
    %752 = arith.addf %749, %751 : vector<1x128xf32>
    %c8_i32_252 = arith.constant 8 : i32
    %753 = arith.muli %c5_i32_241, %c8_i32_252 : i32
    %754 = arith.addi %753, %c1_i32_248 : i32
    %755 = arith.index_cast %754 : i32 to index
    %c0_253 = arith.constant 0 : index
    %756 = vector.load %arg14[%755, %c0_253] : memref<64x128xf32, #tpu.memory_space<vmem>>, vector<1x128xf32>
    tpu.vector_store %arg14[%755, %c0_253], %752 {strides = array<i32>} : memref<64x128xf32, #tpu.memory_space<vmem>>, vector<1x128xf32>,
    %c2_i32_254 = arith.constant 2 : i32
    %757 = arith.addi %0, %c2_i32_254 : i32
    %758 = arith.index_cast %757 : i32 to index
    %759 = arith.index_cast %c5_i32_241 : i32 to index
    %760 = memref.load %arg1[%758, %759] : memref<16x8xi32, #tpu.memory_space<smem>>
    %761 = arith.addi %0, %c2_i32_254 : i32
    %c7_i32_255 = arith.constant 7 : i32
    %762 = arith.subi %c7_i32_255, %c5_i32_241 : i32
    %763 = arith.index_cast %761 : i32 to index
    %764 = arith.index_cast %762 : i32 to index
    %765 = memref.load %arg1[%763, %764] : memref<16x8xi32, #tpu.memory_space<smem>>
    %766 = arith.index_cast %760 : i32 to index
    %c0_256 = arith.constant 0 : index
    %767 = vector.load %arg2[%766, %c0_256] : memref<16x128xf32, #tpu.memory_space<vmem>>, vector<1x128xf32>
    %768 = arith.index_cast %765 : i32 to index
    %c0_257 = arith.constant 0 : index
    %769 = vector.load %arg3[%768, %c0_257] : memref<16x128xf32, #tpu.memory_space<vmem>>, vector<1x128xf32>
    %770 = arith.addf %767, %769 : vector<1x128xf32>
    %c8_i32_258 = arith.constant 8 : i32
    %771 = arith.muli %c5_i32_241, %c8_i32_258 : i32
    %772 = arith.addi %771, %c2_i32_254 : i32
    %773 = arith.index_cast %772 : i32 to index
    %c0_259 = arith.constant 0 : index
    %774 = vector.load %arg14[%773, %c0_259] : memref<64x128xf32, #tpu.memory_space<vmem>>, vector<1x128xf32>
    tpu.vector_store %arg14[%773, %c0_259], %770 {strides = array<i32>} : memref<64x128xf32, #tpu.memory_space<vmem>>, vector<1x128xf32>,
    %c3_i32_260 = arith.constant 3 : i32
    %775 = arith.addi %0, %c3_i32_260 : i32
    %776 = arith.index_cast %775 : i32 to index
    %777 = arith.index_cast %c5_i32_241 : i32 to index
    %778 = memref.load %arg1[%776, %777] : memref<16x8xi32, #tpu.memory_space<smem>>
    %779 = arith.addi %0, %c3_i32_260 : i32
    %c7_i32_261 = arith.constant 7 : i32
    %780 = arith.subi %c7_i32_261, %c5_i32_241 : i32
    %781 = arith.index_cast %779 : i32 to index
    %782 = arith.index_cast %780 : i32 to index
    %783 = memref.load %arg1[%781, %782] : memref<16x8xi32, #tpu.memory_space<smem>>
    %784 = arith.index_cast %778 : i32 to index
    %c0_262 = arith.constant 0 : index
    %785 = vector.load %arg2[%784, %c0_262] : memref<16x128xf32, #tpu.memory_space<vmem>>, vector<1x128xf32>
    %786 = arith.index_cast %783 : i32 to index
    %c0_263 = arith.constant 0 : index
    %787 = vector.load %arg3[%786, %c0_263] : memref<16x128xf32, #tpu.memory_space<vmem>>, vector<1x128xf32>
    %788 = arith.addf %785, %787 : vector<1x128xf32>
    %c8_i32_264 = arith.constant 8 : i32
    %789 = arith.muli %c5_i32_241, %c8_i32_264 : i32
    %790 = arith.addi %789, %c3_i32_260 : i32
    %791 = arith.index_cast %790 : i32 to index
    %c0_265 = arith.constant 0 : index
    %792 = vector.load %arg14[%791, %c0_265] : memref<64x128xf32, #tpu.memory_space<vmem>>, vector<1x128xf32>
    tpu.vector_store %arg14[%791, %c0_265], %788 {strides = array<i32>} : memref<64x128xf32, #tpu.memory_space<vmem>>, vector<1x128xf32>,
    %c4_i32_266 = arith.constant 4 : i32
    %793 = arith.addi %0, %c4_i32_266 : i32
    %794 = arith.index_cast %793 : i32 to index
    %795 = arith.index_cast %c5_i32_241 : i32 to index
    %796 = memref.load %arg1[%794, %795] : memref<16x8xi32, #tpu.memory_space<smem>>
    %797 = arith.addi %0, %c4_i32_266 : i32
    %c7_i32_267 = arith.constant 7 : i32
    %798 = arith.subi %c7_i32_267, %c5_i32_241 : i32
    %799 = arith.index_cast %797 : i32 to index
    %800 = arith.index_cast %798 : i32 to index
    %801 = memref.load %arg1[%799, %800] : memref<16x8xi32, #tpu.memory_space<smem>>
    %802 = arith.index_cast %796 : i32 to index
    %c0_268 = arith.constant 0 : index
    %803 = vector.load %arg2[%802, %c0_268] : memref<16x128xf32, #tpu.memory_space<vmem>>, vector<1x128xf32>
    %804 = arith.index_cast %801 : i32 to index
    %c0_269 = arith.constant 0 : index
    %805 = vector.load %arg3[%804, %c0_269] : memref<16x128xf32, #tpu.memory_space<vmem>>, vector<1x128xf32>
    %806 = arith.addf %803, %805 : vector<1x128xf32>
    %c8_i32_270 = arith.constant 8 : i32
    %807 = arith.muli %c5_i32_241, %c8_i32_270 : i32
    %808 = arith.addi %807, %c4_i32_266 : i32
    %809 = arith.index_cast %808 : i32 to index
    %c0_271 = arith.constant 0 : index
    %810 = vector.load %arg14[%809, %c0_271] : memref<64x128xf32, #tpu.memory_space<vmem>>, vector<1x128xf32>
    tpu.vector_store %arg14[%809, %c0_271], %806 {strides = array<i32>} : memref<64x128xf32, #tpu.memory_space<vmem>>, vector<1x128xf32>,
    %c5_i32_272 = arith.constant 5 : i32
    %811 = arith.addi %0, %c5_i32_272 : i32
    %812 = arith.index_cast %811 : i32 to index
    %813 = arith.index_cast %c5_i32_241 : i32 to index
    %814 = memref.load %arg1[%812, %813] : memref<16x8xi32, #tpu.memory_space<smem>>
    %815 = arith.addi %0, %c5_i32_272 : i32
    %c7_i32_273 = arith.constant 7 : i32
    %816 = arith.subi %c7_i32_273, %c5_i32_241 : i32
    %817 = arith.index_cast %815 : i32 to index
    %818 = arith.index_cast %816 : i32 to index
    %819 = memref.load %arg1[%817, %818] : memref<16x8xi32, #tpu.memory_space<smem>>
    %820 = arith.index_cast %814 : i32 to index
    %c0_274 = arith.constant 0 : index
    %821 = vector.load %arg2[%820, %c0_274] : memref<16x128xf32, #tpu.memory_space<vmem>>, vector<1x128xf32>
    %822 = arith.index_cast %819 : i32 to index
    %c0_275 = arith.constant 0 : index
    %823 = vector.load %arg3[%822, %c0_275] : memref<16x128xf32, #tpu.memory_space<vmem>>, vector<1x128xf32>
    %824 = arith.addf %821, %823 : vector<1x128xf32>
    %c8_i32_276 = arith.constant 8 : i32
    %825 = arith.muli %c5_i32_241, %c8_i32_276 : i32
    %826 = arith.addi %825, %c5_i32_272 : i32
    %827 = arith.index_cast %826 : i32 to index
    %c0_277 = arith.constant 0 : index
    %828 = vector.load %arg14[%827, %c0_277] : memref<64x128xf32, #tpu.memory_space<vmem>>, vector<1x128xf32>
    tpu.vector_store %arg14[%827, %c0_277], %824 {strides = array<i32>} : memref<64x128xf32, #tpu.memory_space<vmem>>, vector<1x128xf32>,
    %c6_i32_278 = arith.constant 6 : i32
    %829 = arith.addi %0, %c6_i32_278 : i32
    %830 = arith.index_cast %829 : i32 to index
    %831 = arith.index_cast %c5_i32_241 : i32 to index
    %832 = memref.load %arg1[%830, %831] : memref<16x8xi32, #tpu.memory_space<smem>>
    %833 = arith.addi %0, %c6_i32_278 : i32
    %c7_i32_279 = arith.constant 7 : i32
    %834 = arith.subi %c7_i32_279, %c5_i32_241 : i32
    %835 = arith.index_cast %833 : i32 to index
    %836 = arith.index_cast %834 : i32 to index
    %837 = memref.load %arg1[%835, %836] : memref<16x8xi32, #tpu.memory_space<smem>>
    %838 = arith.index_cast %832 : i32 to index
    %c0_280 = arith.constant 0 : index
    %839 = vector.load %arg2[%838, %c0_280] : memref<16x128xf32, #tpu.memory_space<vmem>>, vector<1x128xf32>
    %840 = arith.index_cast %837 : i32 to index
    %c0_281 = arith.constant 0 : index
    %841 = vector.load %arg3[%840, %c0_281] : memref<16x128xf32, #tpu.memory_space<vmem>>, vector<1x128xf32>
    %842 = arith.addf %839, %841 : vector<1x128xf32>
    %c8_i32_282 = arith.constant 8 : i32
    %843 = arith.muli %c5_i32_241, %c8_i32_282 : i32
    %844 = arith.addi %843, %c6_i32_278 : i32
    %845 = arith.index_cast %844 : i32 to index
    %c0_283 = arith.constant 0 : index
    %846 = vector.load %arg14[%845, %c0_283] : memref<64x128xf32, #tpu.memory_space<vmem>>, vector<1x128xf32>
    tpu.vector_store %arg14[%845, %c0_283], %842 {strides = array<i32>} : memref<64x128xf32, #tpu.memory_space<vmem>>, vector<1x128xf32>,
    %c7_i32_284 = arith.constant 7 : i32
    %847 = arith.addi %0, %c7_i32_284 : i32
    %848 = arith.index_cast %847 : i32 to index
    %849 = arith.index_cast %c5_i32_241 : i32 to index
    %850 = memref.load %arg1[%848, %849] : memref<16x8xi32, #tpu.memory_space<smem>>
    %851 = arith.addi %0, %c7_i32_284 : i32
    %c7_i32_285 = arith.constant 7 : i32
    %852 = arith.subi %c7_i32_285, %c5_i32_241 : i32
    %853 = arith.index_cast %851 : i32 to index
    %854 = arith.index_cast %852 : i32 to index
    %855 = memref.load %arg1[%853, %854] : memref<16x8xi32, #tpu.memory_space<smem>>
    %856 = arith.index_cast %850 : i32 to index
    %c0_286 = arith.constant 0 : index
    %857 = vector.load %arg2[%856, %c0_286] : memref<16x128xf32, #tpu.memory_space<vmem>>, vector<1x128xf32>
    %858 = arith.index_cast %855 : i32 to index
    %c0_287 = arith.constant 0 : index
    %859 = vector.load %arg3[%858, %c0_287] : memref<16x128xf32, #tpu.memory_space<vmem>>, vector<1x128xf32>
    %860 = arith.addf %857, %859 : vector<1x128xf32>
    %c8_i32_288 = arith.constant 8 : i32
    %861 = arith.muli %c5_i32_241, %c8_i32_288 : i32
    %862 = arith.addi %861, %c7_i32_284 : i32
    %863 = arith.index_cast %862 : i32 to index
    %c0_289 = arith.constant 0 : index
    %864 = vector.load %arg14[%863, %c0_289] : memref<64x128xf32, #tpu.memory_space<vmem>>, vector<1x128xf32>
    tpu.vector_store %arg14[%863, %c0_289], %860 {strides = array<i32>} : memref<64x128xf32, #tpu.memory_space<vmem>>, vector<1x128xf32>,
    %c8_i32_290 = arith.constant 8 : i32
    %c6_i32_291 = arith.constant 6 : i32
    %c0_i32_292 = arith.constant 0 : i32
    %865 = arith.addi %0, %c0_i32_292 : i32
    %866 = arith.index_cast %865 : i32 to index
    %867 = arith.index_cast %c6_i32_291 : i32 to index
    %868 = memref.load %arg1[%866, %867] : memref<16x8xi32, #tpu.memory_space<smem>>
    %869 = arith.addi %0, %c0_i32_292 : i32
    %c7_i32_293 = arith.constant 7 : i32
    %870 = arith.subi %c7_i32_293, %c6_i32_291 : i32
    %871 = arith.index_cast %869 : i32 to index
    %872 = arith.index_cast %870 : i32 to index
    %873 = memref.load %arg1[%871, %872] : memref<16x8xi32, #tpu.memory_space<smem>>
    %874 = arith.index_cast %868 : i32 to index
    %c0_294 = arith.constant 0 : index
    %875 = vector.load %arg2[%874, %c0_294] : memref<16x128xf32, #tpu.memory_space<vmem>>, vector<1x128xf32>
    %876 = arith.index_cast %873 : i32 to index
    %c0_295 = arith.constant 0 : index
    %877 = vector.load %arg3[%876, %c0_295] : memref<16x128xf32, #tpu.memory_space<vmem>>, vector<1x128xf32>
    %878 = arith.addf %875, %877 : vector<1x128xf32>
    %c8_i32_296 = arith.constant 8 : i32
    %879 = arith.muli %c6_i32_291, %c8_i32_296 : i32
    %880 = arith.addi %879, %c0_i32_292 : i32
    %881 = arith.index_cast %880 : i32 to index
    %c0_297 = arith.constant 0 : index
    %882 = vector.load %arg14[%881, %c0_297] : memref<64x128xf32, #tpu.memory_space<vmem>>, vector<1x128xf32>
    tpu.vector_store %arg14[%881, %c0_297], %878 {strides = array<i32>} : memref<64x128xf32, #tpu.memory_space<vmem>>, vector<1x128xf32>,
    %c1_i32_298 = arith.constant 1 : i32
    %883 = arith.addi %0, %c1_i32_298 : i32
    %884 = arith.index_cast %883 : i32 to index
    %885 = arith.index_cast %c6_i32_291 : i32 to index
    %886 = memref.load %arg1[%884, %885] : memref<16x8xi32, #tpu.memory_space<smem>>
    %887 = arith.addi %0, %c1_i32_298 : i32
    %c7_i32_299 = arith.constant 7 : i32
    %888 = arith.subi %c7_i32_299, %c6_i32_291 : i32
    %889 = arith.index_cast %887 : i32 to index
    %890 = arith.index_cast %888 : i32 to index
    %891 = memref.load %arg1[%889, %890] : memref<16x8xi32, #tpu.memory_space<smem>>
    %892 = arith.index_cast %886 : i32 to index
    %c0_300 = arith.constant 0 : index
    %893 = vector.load %arg2[%892, %c0_300] : memref<16x128xf32, #tpu.memory_space<vmem>>, vector<1x128xf32>
    %894 = arith.index_cast %891 : i32 to index
    %c0_301 = arith.constant 0 : index
    %895 = vector.load %arg3[%894, %c0_301] : memref<16x128xf32, #tpu.memory_space<vmem>>, vector<1x128xf32>
    %896 = arith.addf %893, %895 : vector<1x128xf32>
    %c8_i32_302 = arith.constant 8 : i32
    %897 = arith.muli %c6_i32_291, %c8_i32_302 : i32
    %898 = arith.addi %897, %c1_i32_298 : i32
    %899 = arith.index_cast %898 : i32 to index
    %c0_303 = arith.constant 0 : index
    %900 = vector.load %arg14[%899, %c0_303] : memref<64x128xf32, #tpu.memory_space<vmem>>, vector<1x128xf32>
    tpu.vector_store %arg14[%899, %c0_303], %896 {strides = array<i32>} : memref<64x128xf32, #tpu.memory_space<vmem>>, vector<1x128xf32>,
    %c2_i32_304 = arith.constant 2 : i32
    %901 = arith.addi %0, %c2_i32_304 : i32
    %902 = arith.index_cast %901 : i32 to index
    %903 = arith.index_cast %c6_i32_291 : i32 to index
    %904 = memref.load %arg1[%902, %903] : memref<16x8xi32, #tpu.memory_space<smem>>
    %905 = arith.addi %0, %c2_i32_304 : i32
    %c7_i32_305 = arith.constant 7 : i32
    %906 = arith.subi %c7_i32_305, %c6_i32_291 : i32
    %907 = arith.index_cast %905 : i32 to index
    %908 = arith.index_cast %906 : i32 to index
    %909 = memref.load %arg1[%907, %908] : memref<16x8xi32, #tpu.memory_space<smem>>
    %910 = arith.index_cast %904 : i32 to index
    %c0_306 = arith.constant 0 : index
    %911 = vector.load %arg2[%910, %c0_306] : memref<16x128xf32, #tpu.memory_space<vmem>>, vector<1x128xf32>
    %912 = arith.index_cast %909 : i32 to index
    %c0_307 = arith.constant 0 : index
    %913 = vector.load %arg3[%912, %c0_307] : memref<16x128xf32, #tpu.memory_space<vmem>>, vector<1x128xf32>
    %914 = arith.addf %911, %913 : vector<1x128xf32>
    %c8_i32_308 = arith.constant 8 : i32
    %915 = arith.muli %c6_i32_291, %c8_i32_308 : i32
    %916 = arith.addi %915, %c2_i32_304 : i32
    %917 = arith.index_cast %916 : i32 to index
    %c0_309 = arith.constant 0 : index
    %918 = vector.load %arg14[%917, %c0_309] : memref<64x128xf32, #tpu.memory_space<vmem>>, vector<1x128xf32>
    tpu.vector_store %arg14[%917, %c0_309], %914 {strides = array<i32>} : memref<64x128xf32, #tpu.memory_space<vmem>>, vector<1x128xf32>,
    %c3_i32_310 = arith.constant 3 : i32
    %919 = arith.addi %0, %c3_i32_310 : i32
    %920 = arith.index_cast %919 : i32 to index
    %921 = arith.index_cast %c6_i32_291 : i32 to index
    %922 = memref.load %arg1[%920, %921] : memref<16x8xi32, #tpu.memory_space<smem>>
    %923 = arith.addi %0, %c3_i32_310 : i32
    %c7_i32_311 = arith.constant 7 : i32
    %924 = arith.subi %c7_i32_311, %c6_i32_291 : i32
    %925 = arith.index_cast %923 : i32 to index
    %926 = arith.index_cast %924 : i32 to index
    %927 = memref.load %arg1[%925, %926] : memref<16x8xi32, #tpu.memory_space<smem>>
    %928 = arith.index_cast %922 : i32 to index
    %c0_312 = arith.constant 0 : index
    %929 = vector.load %arg2[%928, %c0_312] : memref<16x128xf32, #tpu.memory_space<vmem>>, vector<1x128xf32>
    %930 = arith.index_cast %927 : i32 to index
    %c0_313 = arith.constant 0 : index
    %931 = vector.load %arg3[%930, %c0_313] : memref<16x128xf32, #tpu.memory_space<vmem>>, vector<1x128xf32>
    %932 = arith.addf %929, %931 : vector<1x128xf32>
    %c8_i32_314 = arith.constant 8 : i32
    %933 = arith.muli %c6_i32_291, %c8_i32_314 : i32
    %934 = arith.addi %933, %c3_i32_310 : i32
    %935 = arith.index_cast %934 : i32 to index
    %c0_315 = arith.constant 0 : index
    %936 = vector.load %arg14[%935, %c0_315] : memref<64x128xf32, #tpu.memory_space<vmem>>, vector<1x128xf32>
    tpu.vector_store %arg14[%935, %c0_315], %932 {strides = array<i32>} : memref<64x128xf32, #tpu.memory_space<vmem>>, vector<1x128xf32>,
    %c4_i32_316 = arith.constant 4 : i32
    %937 = arith.addi %0, %c4_i32_316 : i32
    %938 = arith.index_cast %937 : i32 to index
    %939 = arith.index_cast %c6_i32_291 : i32 to index
    %940 = memref.load %arg1[%938, %939] : memref<16x8xi32, #tpu.memory_space<smem>>
    %941 = arith.addi %0, %c4_i32_316 : i32
    %c7_i32_317 = arith.constant 7 : i32
    %942 = arith.subi %c7_i32_317, %c6_i32_291 : i32
    %943 = arith.index_cast %941 : i32 to index
    %944 = arith.index_cast %942 : i32 to index
    %945 = memref.load %arg1[%943, %944] : memref<16x8xi32, #tpu.memory_space<smem>>
    %946 = arith.index_cast %940 : i32 to index
    %c0_318 = arith.constant 0 : index
    %947 = vector.load %arg2[%946, %c0_318] : memref<16x128xf32, #tpu.memory_space<vmem>>, vector<1x128xf32>
    %948 = arith.index_cast %945 : i32 to index
    %c0_319 = arith.constant 0 : index
    %949 = vector.load %arg3[%948, %c0_319] : memref<16x128xf32, #tpu.memory_space<vmem>>, vector<1x128xf32>
    %950 = arith.addf %947, %949 : vector<1x128xf32>
    %c8_i32_320 = arith.constant 8 : i32
    %951 = arith.muli %c6_i32_291, %c8_i32_320 : i32
    %952 = arith.addi %951, %c4_i32_316 : i32
    %953 = arith.index_cast %952 : i32 to index
    %c0_321 = arith.constant 0 : index
    %954 = vector.load %arg14[%953, %c0_321] : memref<64x128xf32, #tpu.memory_space<vmem>>, vector<1x128xf32>
    tpu.vector_store %arg14[%953, %c0_321], %950 {strides = array<i32>} : memref<64x128xf32, #tpu.memory_space<vmem>>, vector<1x128xf32>,
    %c5_i32_322 = arith.constant 5 : i32
    %955 = arith.addi %0, %c5_i32_322 : i32
    %956 = arith.index_cast %955 : i32 to index
    %957 = arith.index_cast %c6_i32_291 : i32 to index
    %958 = memref.load %arg1[%956, %957] : memref<16x8xi32, #tpu.memory_space<smem>>
    %959 = arith.addi %0, %c5_i32_322 : i32
    %c7_i32_323 = arith.constant 7 : i32
    %960 = arith.subi %c7_i32_323, %c6_i32_291 : i32
    %961 = arith.index_cast %959 : i32 to index
    %962 = arith.index_cast %960 : i32 to index
    %963 = memref.load %arg1[%961, %962] : memref<16x8xi32, #tpu.memory_space<smem>>
    %964 = arith.index_cast %958 : i32 to index
    %c0_324 = arith.constant 0 : index
    %965 = vector.load %arg2[%964, %c0_324] : memref<16x128xf32, #tpu.memory_space<vmem>>, vector<1x128xf32>
    %966 = arith.index_cast %963 : i32 to index
    %c0_325 = arith.constant 0 : index
    %967 = vector.load %arg3[%966, %c0_325] : memref<16x128xf32, #tpu.memory_space<vmem>>, vector<1x128xf32>
    %968 = arith.addf %965, %967 : vector<1x128xf32>
    %c8_i32_326 = arith.constant 8 : i32
    %969 = arith.muli %c6_i32_291, %c8_i32_326 : i32
    %970 = arith.addi %969, %c5_i32_322 : i32
    %971 = arith.index_cast %970 : i32 to index
    %c0_327 = arith.constant 0 : index
    %972 = vector.load %arg14[%971, %c0_327] : memref<64x128xf32, #tpu.memory_space<vmem>>, vector<1x128xf32>
    tpu.vector_store %arg14[%971, %c0_327], %968 {strides = array<i32>} : memref<64x128xf32, #tpu.memory_space<vmem>>, vector<1x128xf32>,
    %c6_i32_328 = arith.constant 6 : i32
    %973 = arith.addi %0, %c6_i32_328 : i32
    %974 = arith.index_cast %973 : i32 to index
    %975 = arith.index_cast %c6_i32_291 : i32 to index
    %976 = memref.load %arg1[%974, %975] : memref<16x8xi32, #tpu.memory_space<smem>>
    %977 = arith.addi %0, %c6_i32_328 : i32
    %c7_i32_329 = arith.constant 7 : i32
    %978 = arith.subi %c7_i32_329, %c6_i32_291 : i32
    %979 = arith.index_cast %977 : i32 to index
    %980 = arith.index_cast %978 : i32 to index
    %981 = memref.load %arg1[%979, %980] : memref<16x8xi32, #tpu.memory_space<smem>>
    %982 = arith.index_cast %976 : i32 to index
    %c0_330 = arith.constant 0 : index
    %983 = vector.load %arg2[%982, %c0_330] : memref<16x128xf32, #tpu.memory_space<vmem>>, vector<1x128xf32>
    %984 = arith.index_cast %981 : i32 to index
    %c0_331 = arith.constant 0 : index
    %985 = vector.load %arg3[%984, %c0_331] : memref<16x128xf32, #tpu.memory_space<vmem>>, vector<1x128xf32>
    %986 = arith.addf %983, %985 : vector<1x128xf32>
    %c8_i32_332 = arith.constant 8 : i32
    %987 = arith.muli %c6_i32_291, %c8_i32_332 : i32
    %988 = arith.addi %987, %c6_i32_328 : i32
    %989 = arith.index_cast %988 : i32 to index
    %c0_333 = arith.constant 0 : index
    %990 = vector.load %arg14[%989, %c0_333] : memref<64x128xf32, #tpu.memory_space<vmem>>, vector<1x128xf32>
    tpu.vector_store %arg14[%989, %c0_333], %986 {strides = array<i32>} : memref<64x128xf32, #tpu.memory_space<vmem>>, vector<1x128xf32>,
    %c7_i32_334 = arith.constant 7 : i32
    %991 = arith.addi %0, %c7_i32_334 : i32
    %992 = arith.index_cast %991 : i32 to index
    %993 = arith.index_cast %c6_i32_291 : i32 to index
    %994 = memref.load %arg1[%992, %993] : memref<16x8xi32, #tpu.memory_space<smem>>
    %995 = arith.addi %0, %c7_i32_334 : i32
    %c7_i32_335 = arith.constant 7 : i32
    %996 = arith.subi %c7_i32_335, %c6_i32_291 : i32
    %997 = arith.index_cast %995 : i32 to index
    %998 = arith.index_cast %996 : i32 to index
    %999 = memref.load %arg1[%997, %998] : memref<16x8xi32, #tpu.memory_space<smem>>
    %1000 = arith.index_cast %994 : i32 to index
    %c0_336 = arith.constant 0 : index
    %1001 = vector.load %arg2[%1000, %c0_336] : memref<16x128xf32, #tpu.memory_space<vmem>>, vector<1x128xf32>
    %1002 = arith.index_cast %999 : i32 to index
    %c0_337 = arith.constant 0 : index
    %1003 = vector.load %arg3[%1002, %c0_337] : memref<16x128xf32, #tpu.memory_space<vmem>>, vector<1x128xf32>
    %1004 = arith.addf %1001, %1003 : vector<1x128xf32>
    %c8_i32_338 = arith.constant 8 : i32
    %1005 = arith.muli %c6_i32_291, %c8_i32_338 : i32
    %1006 = arith.addi %1005, %c7_i32_334 : i32
    %1007 = arith.index_cast %1006 : i32 to index
    %c0_339 = arith.constant 0 : index
    %1008 = vector.load %arg14[%1007, %c0_339] : memref<64x128xf32, #tpu.memory_space<vmem>>, vector<1x128xf32>
    tpu.vector_store %arg14[%1007, %c0_339], %1004 {strides = array<i32>} : memref<64x128xf32, #tpu.memory_space<vmem>>, vector<1x128xf32>,
    %c8_i32_340 = arith.constant 8 : i32
    %c7_i32_341 = arith.constant 7 : i32
    %c0_i32_342 = arith.constant 0 : i32
    %1009 = arith.addi %0, %c0_i32_342 : i32
    %1010 = arith.index_cast %1009 : i32 to index
    %1011 = arith.index_cast %c7_i32_341 : i32 to index
    %1012 = memref.load %arg1[%1010, %1011] : memref<16x8xi32, #tpu.memory_space<smem>>
    %1013 = arith.addi %0, %c0_i32_342 : i32
    %c7_i32_343 = arith.constant 7 : i32
    %1014 = arith.subi %c7_i32_343, %c7_i32_341 : i32
    %1015 = arith.index_cast %1013 : i32 to index
    %1016 = arith.index_cast %1014 : i32 to index
    %1017 = memref.load %arg1[%1015, %1016] : memref<16x8xi32, #tpu.memory_space<smem>>
    %1018 = arith.index_cast %1012 : i32 to index
    %c0_344 = arith.constant 0 : index
    %1019 = vector.load %arg2[%1018, %c0_344] : memref<16x128xf32, #tpu.memory_space<vmem>>, vector<1x128xf32>
    %1020 = arith.index_cast %1017 : i32 to index
    %c0_345 = arith.constant 0 : index
    %1021 = vector.load %arg3[%1020, %c0_345] : memref<16x128xf32, #tpu.memory_space<vmem>>, vector<1x128xf32>
    %1022 = arith.addf %1019, %1021 : vector<1x128xf32>
    %c8_i32_346 = arith.constant 8 : i32
    %1023 = arith.muli %c7_i32_341, %c8_i32_346 : i32
    %1024 = arith.addi %1023, %c0_i32_342 : i32
    %1025 = arith.index_cast %1024 : i32 to index
    %c0_347 = arith.constant 0 : index
    %1026 = vector.load %arg14[%1025, %c0_347] : memref<64x128xf32, #tpu.memory_space<vmem>>, vector<1x128xf32>
    tpu.vector_store %arg14[%1025, %c0_347], %1022 {strides = array<i32>} : memref<64x128xf32, #tpu.memory_space<vmem>>, vector<1x128xf32>,
    %c1_i32_348 = arith.constant 1 : i32
    %1027 = arith.addi %0, %c1_i32_348 : i32
    %1028 = arith.index_cast %1027 : i32 to index
    %1029 = arith.index_cast %c7_i32_341 : i32 to index
    %1030 = memref.load %arg1[%1028, %1029] : memref<16x8xi32, #tpu.memory_space<smem>>
    %1031 = arith.addi %0, %c1_i32_348 : i32
    %c7_i32_349 = arith.constant 7 : i32
    %1032 = arith.subi %c7_i32_349, %c7_i32_341 : i32
    %1033 = arith.index_cast %1031 : i32 to index
    %1034 = arith.index_cast %1032 : i32 to index
    %1035 = memref.load %arg1[%1033, %1034] : memref<16x8xi32, #tpu.memory_space<smem>>
    %1036 = arith.index_cast %1030 : i32 to index
    %c0_350 = arith.constant 0 : index
    %1037 = vector.load %arg2[%1036, %c0_350] : memref<16x128xf32, #tpu.memory_space<vmem>>, vector<1x128xf32>
    %1038 = arith.index_cast %1035 : i32 to index
    %c0_351 = arith.constant 0 : index
    %1039 = vector.load %arg3[%1038, %c0_351] : memref<16x128xf32, #tpu.memory_space<vmem>>, vector<1x128xf32>
    %1040 = arith.addf %1037, %1039 : vector<1x128xf32>
    %c8_i32_352 = arith.constant 8 : i32
    %1041 = arith.muli %c7_i32_341, %c8_i32_352 : i32
    %1042 = arith.addi %1041, %c1_i32_348 : i32
    %1043 = arith.index_cast %1042 : i32 to index
    %c0_353 = arith.constant 0 : index
    %1044 = vector.load %arg14[%1043, %c0_353] : memref<64x128xf32, #tpu.memory_space<vmem>>, vector<1x128xf32>
    tpu.vector_store %arg14[%1043, %c0_353], %1040 {strides = array<i32>} : memref<64x128xf32, #tpu.memory_space<vmem>>, vector<1x128xf32>,
    %c2_i32_354 = arith.constant 2 : i32
    %1045 = arith.addi %0, %c2_i32_354 : i32
    %1046 = arith.index_cast %1045 : i32 to index
    %1047 = arith.index_cast %c7_i32_341 : i32 to index
    %1048 = memref.load %arg1[%1046, %1047] : memref<16x8xi32, #tpu.memory_space<smem>>
    %1049 = arith.addi %0, %c2_i32_354 : i32
    %c7_i32_355 = arith.constant 7 : i32
    %1050 = arith.subi %c7_i32_355, %c7_i32_341 : i32
    %1051 = arith.index_cast %1049 : i32 to index
    %1052 = arith.index_cast %1050 : i32 to index
    %1053 = memref.load %arg1[%1051, %1052] : memref<16x8xi32, #tpu.memory_space<smem>>
    %1054 = arith.index_cast %1048 : i32 to index
    %c0_356 = arith.constant 0 : index
    %1055 = vector.load %arg2[%1054, %c0_356] : memref<16x128xf32, #tpu.memory_space<vmem>>, vector<1x128xf32>
    %1056 = arith.index_cast %1053 : i32 to index
    %c0_357 = arith.constant 0 : index
    %1057 = vector.load %arg3[%1056, %c0_357] : memref<16x128xf32, #tpu.memory_space<vmem>>, vector<1x128xf32>
    %1058 = arith.addf %1055, %1057 : vector<1x128xf32>
    %c8_i32_358 = arith.constant 8 : i32
    %1059 = arith.muli %c7_i32_341, %c8_i32_358 : i32
    %1060 = arith.addi %1059, %c2_i32_354 : i32
    %1061 = arith.index_cast %1060 : i32 to index
    %c0_359 = arith.constant 0 : index
    %1062 = vector.load %arg14[%1061, %c0_359] : memref<64x128xf32, #tpu.memory_space<vmem>>, vector<1x128xf32>
    tpu.vector_store %arg14[%1061, %c0_359], %1058 {strides = array<i32>} : memref<64x128xf32, #tpu.memory_space<vmem>>, vector<1x128xf32>,
    %c3_i32_360 = arith.constant 3 : i32
    %1063 = arith.addi %0, %c3_i32_360 : i32
    %1064 = arith.index_cast %1063 : i32 to index
    %1065 = arith.index_cast %c7_i32_341 : i32 to index
    %1066 = memref.load %arg1[%1064, %1065] : memref<16x8xi32, #tpu.memory_space<smem>>
    %1067 = arith.addi %0, %c3_i32_360 : i32
    %c7_i32_361 = arith.constant 7 : i32
    %1068 = arith.subi %c7_i32_361, %c7_i32_341 : i32
    %1069 = arith.index_cast %1067 : i32 to index
    %1070 = arith.index_cast %1068 : i32 to index
    %1071 = memref.load %arg1[%1069, %1070] : memref<16x8xi32, #tpu.memory_space<smem>>
    %1072 = arith.index_cast %1066 : i32 to index
    %c0_362 = arith.constant 0 : index
    %1073 = vector.load %arg2[%1072, %c0_362] : memref<16x128xf32, #tpu.memory_space<vmem>>, vector<1x128xf32>
    %1074 = arith.index_cast %1071 : i32 to index
    %c0_363 = arith.constant 0 : index
    %1075 = vector.load %arg3[%1074, %c0_363] : memref<16x128xf32, #tpu.memory_space<vmem>>, vector<1x128xf32>
    %1076 = arith.addf %1073, %1075 : vector<1x128xf32>
    %c8_i32_364 = arith.constant 8 : i32
    %1077 = arith.muli %c7_i32_341, %c8_i32_364 : i32
    %1078 = arith.addi %1077, %c3_i32_360 : i32
    %1079 = arith.index_cast %1078 : i32 to index
    %c0_365 = arith.constant 0 : index
    %1080 = vector.load %arg14[%1079, %c0_365] : memref<64x128xf32, #tpu.memory_space<vmem>>, vector<1x128xf32>
    tpu.vector_store %arg14[%1079, %c0_365], %1076 {strides = array<i32>} : memref<64x128xf32, #tpu.memory_space<vmem>>, vector<1x128xf32>,
    %c4_i32_366 = arith.constant 4 : i32
    %1081 = arith.addi %0, %c4_i32_366 : i32
    %1082 = arith.index_cast %1081 : i32 to index
    %1083 = arith.index_cast %c7_i32_341 : i32 to index
    %1084 = memref.load %arg1[%1082, %1083] : memref<16x8xi32, #tpu.memory_space<smem>>
    %1085 = arith.addi %0, %c4_i32_366 : i32
    %c7_i32_367 = arith.constant 7 : i32
    %1086 = arith.subi %c7_i32_367, %c7_i32_341 : i32
    %1087 = arith.index_cast %1085 : i32 to index
    %1088 = arith.index_cast %1086 : i32 to index
    %1089 = memref.load %arg1[%1087, %1088] : memref<16x8xi32, #tpu.memory_space<smem>>
    %1090 = arith.index_cast %1084 : i32 to index
    %c0_368 = arith.constant 0 : index
    %1091 = vector.load %arg2[%1090, %c0_368] : memref<16x128xf32, #tpu.memory_space<vmem>>, vector<1x128xf32>
    %1092 = arith.index_cast %1089 : i32 to index
    %c0_369 = arith.constant 0 : index
    %1093 = vector.load %arg3[%1092, %c0_369] : memref<16x128xf32, #tpu.memory_space<vmem>>, vector<1x128xf32>
    %1094 = arith.addf %1091, %1093 : vector<1x128xf32>
    %c8_i32_370 = arith.constant 8 : i32
    %1095 = arith.muli %c7_i32_341, %c8_i32_370 : i32
    %1096 = arith.addi %1095, %c4_i32_366 : i32
    %1097 = arith.index_cast %1096 : i32 to index
    %c0_371 = arith.constant 0 : index
    %1098 = vector.load %arg14[%1097, %c0_371] : memref<64x128xf32, #tpu.memory_space<vmem>>, vector<1x128xf32>
    tpu.vector_store %arg14[%1097, %c0_371], %1094 {strides = array<i32>} : memref<64x128xf32, #tpu.memory_space<vmem>>, vector<1x128xf32>,
    %c5_i32_372 = arith.constant 5 : i32
    %1099 = arith.addi %0, %c5_i32_372 : i32
    %1100 = arith.index_cast %1099 : i32 to index
    %1101 = arith.index_cast %c7_i32_341 : i32 to index
    %1102 = memref.load %arg1[%1100, %1101] : memref<16x8xi32, #tpu.memory_space<smem>>
    %1103 = arith.addi %0, %c5_i32_372 : i32
    %c7_i32_373 = arith.constant 7 : i32
    %1104 = arith.subi %c7_i32_373, %c7_i32_341 : i32
    %1105 = arith.index_cast %1103 : i32 to index
    %1106 = arith.index_cast %1104 : i32 to index
    %1107 = memref.load %arg1[%1105, %1106] : memref<16x8xi32, #tpu.memory_space<smem>>
    %1108 = arith.index_cast %1102 : i32 to index
    %c0_374 = arith.constant 0 : index
    %1109 = vector.load %arg2[%1108, %c0_374] : memref<16x128xf32, #tpu.memory_space<vmem>>, vector<1x128xf32>
    %1110 = arith.index_cast %1107 : i32 to index
    %c0_375 = arith.constant 0 : index
    %1111 = vector.load %arg3[%1110, %c0_375] : memref<16x128xf32, #tpu.memory_space<vmem>>, vector<1x128xf32>
    %1112 = arith.addf %1109, %1111 : vector<1x128xf32>
    %c8_i32_376 = arith.constant 8 : i32
    %1113 = arith.muli %c7_i32_341, %c8_i32_376 : i32
    %1114 = arith.addi %1113, %c5_i32_372 : i32
    %1115 = arith.index_cast %1114 : i32 to index
    %c0_377 = arith.constant 0 : index
    %1116 = vector.load %arg14[%1115, %c0_377] : memref<64x128xf32, #tpu.memory_space<vmem>>, vector<1x128xf32>
    tpu.vector_store %arg14[%1115, %c0_377], %1112 {strides = array<i32>} : memref<64x128xf32, #tpu.memory_space<vmem>>, vector<1x128xf32>,
    %c6_i32_378 = arith.constant 6 : i32
    %1117 = arith.addi %0, %c6_i32_378 : i32
    %1118 = arith.index_cast %1117 : i32 to index
    %1119 = arith.index_cast %c7_i32_341 : i32 to index
    %1120 = memref.load %arg1[%1118, %1119] : memref<16x8xi32, #tpu.memory_space<smem>>
    %1121 = arith.addi %0, %c6_i32_378 : i32
    %c7_i32_379 = arith.constant 7 : i32
    %1122 = arith.subi %c7_i32_379, %c7_i32_341 : i32
    %1123 = arith.index_cast %1121 : i32 to index
    %1124 = arith.index_cast %1122 : i32 to index
    %1125 = memref.load %arg1[%1123, %1124] : memref<16x8xi32, #tpu.memory_space<smem>>
    %1126 = arith.index_cast %1120 : i32 to index
    %c0_380 = arith.constant 0 : index
    %1127 = vector.load %arg2[%1126, %c0_380] : memref<16x128xf32, #tpu.memory_space<vmem>>, vector<1x128xf32>
    %1128 = arith.index_cast %1125 : i32 to index
    %c0_381 = arith.constant 0 : index
    %1129 = vector.load %arg3[%1128, %c0_381] : memref<16x128xf32, #tpu.memory_space<vmem>>, vector<1x128xf32>
    %1130 = arith.addf %1127, %1129 : vector<1x128xf32>
    %c8_i32_382 = arith.constant 8 : i32
    %1131 = arith.muli %c7_i32_341, %c8_i32_382 : i32
    %1132 = arith.addi %1131, %c6_i32_378 : i32
    %1133 = arith.index_cast %1132 : i32 to index
    %c0_383 = arith.constant 0 : index
    %1134 = vector.load %arg14[%1133, %c0_383] : memref<64x128xf32, #tpu.memory_space<vmem>>, vector<1x128xf32>
    tpu.vector_store %arg14[%1133, %c0_383], %1130 {strides = array<i32>} : memref<64x128xf32, #tpu.memory_space<vmem>>, vector<1x128xf32>,
    %c7_i32_384 = arith.constant 7 : i32
    %1135 = arith.addi %0, %c7_i32_384 : i32
    %1136 = arith.index_cast %1135 : i32 to index
    %1137 = arith.index_cast %c7_i32_341 : i32 to index
    %1138 = memref.load %arg1[%1136, %1137] : memref<16x8xi32, #tpu.memory_space<smem>>
    %1139 = arith.addi %0, %c7_i32_384 : i32
    %c7_i32_385 = arith.constant 7 : i32
    %1140 = arith.subi %c7_i32_385, %c7_i32_341 : i32
    %1141 = arith.index_cast %1139 : i32 to index
    %1142 = arith.index_cast %1140 : i32 to index
    %1143 = memref.load %arg1[%1141, %1142] : memref<16x8xi32, #tpu.memory_space<smem>>
    %1144 = arith.index_cast %1138 : i32 to index
    %c0_386 = arith.constant 0 : index
    %1145 = vector.load %arg2[%1144, %c0_386] : memref<16x128xf32, #tpu.memory_space<vmem>>, vector<1x128xf32>
    %1146 = arith.index_cast %1143 : i32 to index
    %c0_387 = arith.constant 0 : index
    %1147 = vector.load %arg3[%1146, %c0_387] : memref<16x128xf32, #tpu.memory_space<vmem>>, vector<1x128xf32>
    %1148 = arith.addf %1145, %1147 : vector<1x128xf32>
    %c8_i32_388 = arith.constant 8 : i32
    %1149 = arith.muli %c7_i32_341, %c8_i32_388 : i32
    %1150 = arith.addi %1149, %c7_i32_384 : i32
    %1151 = arith.index_cast %1150 : i32 to index
    %c0_389 = arith.constant 0 : index
    %1152 = vector.load %arg14[%1151, %c0_389] : memref<64x128xf32, #tpu.memory_space<vmem>>, vector<1x128xf32>
    tpu.vector_store %arg14[%1151, %c0_389], %1148 {strides = array<i32>} : memref<64x128xf32, #tpu.memory_space<vmem>>, vector<1x128xf32>,
    %c8_i32_390 = arith.constant 8 : i32
    %c8_i32_391 = arith.constant 8 : i32
    %c0_392 = arith.constant 0 : index
    %c0_393 = arith.constant 0 : index
    %1153 = vector.load %arg4[%c0_392, %c0_393] : memref<32x128xf32, #tpu.memory_space<vmem>>, vector<32x128xf32>
    %c0_394 = arith.constant 0 : index
    %c0_395 = arith.constant 0 : index
    %1154 = vector.load %arg5[%c0_394, %c0_395] : memref<8x32xf32, #tpu.memory_space<vmem>>, vector<8x32xf32>
    %c0_396 = arith.constant 0 : index
    %c0_397 = arith.constant 0 : index
    %1155 = vector.load %arg6[%c0_396, %c0_397] : memref<8x32xf32, #tpu.memory_space<vmem>>, vector<8x32xf32>
    %c0_i32_398 = arith.constant 0 : i32
    %c8_i32_399 = arith.constant 8 : i32
    %1156 = arith.muli %c0_i32_398, %c8_i32_399 : i32
    %1157 = tpu.assume_multiple %1156, 8 : i32
    %1158 = arith.index_cast %1157 : i32 to index
    %c0_400 = arith.constant 0 : index
    %1159 = vector.load %arg14[%1158, %c0_400] : memref<64x128xf32, #tpu.memory_space<vmem>>, vector<8x128xf32>
    %cst = arith.constant dense<0.000000e+00> : vector<8x128xf32>
    %1160 = tpu.matmul %1154, %1153, %cst {dimension_numbers = #tpu.dot_dimension_numbers<[1], [0], [0], [1], [0, 0, 1, 1], [], []>, precision = #tpu.contract_precision<fp32>} : vector<8x32xf32>, vector<32x128xf32>, vector<8x128xf32> -> vector<8x128xf32>
    %1161 = arith.addf %1159, %1160 : vector<8x128xf32>
    %1162 = vector.extract_strided_slice %1161 {offsets = [0, 0], sizes = [8, 96], strides = [1, 1]} : vector<8x128xf32> to vector<8x96xf32>
    %1163 = arith.negf %1162 : vector<8x96xf32>
    %1164 = math.exp %1163 : vector<8x96xf32>
    %cst_401 = arith.constant 1.000000e+00 : f32
    %1165 = vector.broadcast %cst_401 : f32 to vector<8x96xf32>
    %1166 = arith.addf %1165, %1164 : vector<8x96xf32>
    %1167 = arith.divf %1165, %1166 : vector<8x96xf32>
    %1168 = vector.extract_strided_slice %1167 {offsets = [0, 0], sizes = [8, 32], strides = [1, 1]} : vector<8x96xf32> to vector<8x32xf32>
    %1169 = vector.extract_strided_slice %1167 {offsets = [0, 32], sizes = [8, 32], strides = [1, 1]} : vector<8x96xf32> to vector<8x32xf32>
    %1170 = vector.extract_strided_slice %1167 {offsets = [0, 64], sizes = [8, 32], strides = [1, 1]} : vector<8x96xf32> to vector<8x32xf32>
    %1171 = vector.extract_strided_slice %1161 {offsets = [0, 96], sizes = [8, 32], strides = [1, 1]} : vector<8x128xf32> to vector<8x32xf32>
    %1172 = math.tanh %1171 : vector<8x32xf32>
    %1173 = arith.mulf %1169, %1155 : vector<8x32xf32>
    %1174 = arith.mulf %1168, %1172 : vector<8x32xf32>
    %1175 = arith.addf %1173, %1174 : vector<8x32xf32>
    %1176 = math.tanh %1175 : vector<8x32xf32>
    %1177 = arith.mulf %1170, %1176 : vector<8x32xf32>
    %1178 = arith.index_cast %1157 : i32 to index
    %c0_402 = arith.constant 0 : index
    %1179 = vector.load %arg15[%1178, %c0_402] : memref<64x32xf32, #tpu.memory_space<vmem>>, vector<8x32xf32>
    tpu.vector_store %arg15[%1178, %c0_402], %1177 {strides = array<i32>} : memref<64x32xf32, #tpu.memory_space<vmem>>, vector<8x32xf32>,
    %c7_i32_403 = arith.constant 7 : i32
    %1180 = arith.subi %c7_i32_403, %c0_i32_398 : i32
    %c8_i32_404 = arith.constant 8 : i32
    %1181 = arith.muli %1180, %c8_i32_404 : i32
    %1182 = tpu.assume_multiple %1181, 8 : i32
    %1183 = arith.index_cast %1182 : i32 to index
    %c0_405 = arith.constant 0 : index
    %1184 = vector.load %arg16[%1183, %c0_405] : memref<64x32xf32, #tpu.memory_space<vmem>>, vector<8x32xf32>
    tpu.vector_store %arg16[%1183, %c0_405], %1177 {strides = array<i32>} : memref<64x32xf32, #tpu.memory_space<vmem>>, vector<8x32xf32>,
    %c1_i32_406 = arith.constant 1 : i32
    %c8_i32_407 = arith.constant 8 : i32
    %1185 = arith.muli %c1_i32_406, %c8_i32_407 : i32
    %1186 = tpu.assume_multiple %1185, 8 : i32
    %1187 = arith.index_cast %1186 : i32 to index
    %c0_408 = arith.constant 0 : index
    %1188 = vector.load %arg14[%1187, %c0_408] : memref<64x128xf32, #tpu.memory_space<vmem>>, vector<8x128xf32>
    %cst_409 = arith.constant dense<0.000000e+00> : vector<8x128xf32>
    %1189 = tpu.matmul %1177, %1153, %cst_409 {dimension_numbers = #tpu.dot_dimension_numbers<[1], [0], [0], [1], [0, 0, 1, 1], [], []>, precision = #tpu.contract_precision<fp32>} : vector<8x32xf32>, vector<32x128xf32>, vector<8x128xf32> -> vector<8x128xf32>
    %1190 = arith.addf %1188, %1189 : vector<8x128xf32>
    %1191 = vector.extract_strided_slice %1190 {offsets = [0, 0], sizes = [8, 96], strides = [1, 1]} : vector<8x128xf32> to vector<8x96xf32>
    %1192 = arith.negf %1191 : vector<8x96xf32>
    %1193 = math.exp %1192 : vector<8x96xf32>
    %cst_410 = arith.constant 1.000000e+00 : f32
    %1194 = vector.broadcast %cst_410 : f32 to vector<8x96xf32>
    %1195 = arith.addf %1194, %1193 : vector<8x96xf32>
    %1196 = arith.divf %1194, %1195 : vector<8x96xf32>
    %1197 = vector.extract_strided_slice %1196 {offsets = [0, 0], sizes = [8, 32], strides = [1, 1]} : vector<8x96xf32> to vector<8x32xf32>
    %1198 = vector.extract_strided_slice %1196 {offsets = [0, 32], sizes = [8, 32], strides = [1, 1]} : vector<8x96xf32> to vector<8x32xf32>
    %1199 = vector.extract_strided_slice %1196 {offsets = [0, 64], sizes = [8, 32], strides = [1, 1]} : vector<8x96xf32> to vector<8x32xf32>
    %1200 = vector.extract_strided_slice %1190 {offsets = [0, 96], sizes = [8, 32], strides = [1, 1]} : vector<8x128xf32> to vector<8x32xf32>
    %1201 = math.tanh %1200 : vector<8x32xf32>
    %1202 = arith.mulf %1198, %1175 : vector<8x32xf32>
    %1203 = arith.mulf %1197, %1201 : vector<8x32xf32>
    %1204 = arith.addf %1202, %1203 : vector<8x32xf32>
    %1205 = math.tanh %1204 : vector<8x32xf32>
    %1206 = arith.mulf %1199, %1205 : vector<8x32xf32>
    %1207 = arith.index_cast %1186 : i32 to index
    %c0_411 = arith.constant 0 : index
    %1208 = vector.load %arg15[%1207, %c0_411] : memref<64x32xf32, #tpu.memory_space<vmem>>, vector<8x32xf32>
    tpu.vector_store %arg15[%1207, %c0_411], %1206 {strides = array<i32>} : memref<64x32xf32, #tpu.memory_space<vmem>>, vector<8x32xf32>,
    %c7_i32_412 = arith.constant 7 : i32
    %1209 = arith.subi %c7_i32_412, %c1_i32_406 : i32
    %c8_i32_413 = arith.constant 8 : i32
    %1210 = arith.muli %1209, %c8_i32_413 : i32
    %1211 = tpu.assume_multiple %1210, 8 : i32
    %1212 = arith.index_cast %1211 : i32 to index
    %c0_414 = arith.constant 0 : index
    %1213 = vector.load %arg16[%1212, %c0_414] : memref<64x32xf32, #tpu.memory_space<vmem>>, vector<8x32xf32>
    tpu.vector_store %arg16[%1212, %c0_414], %1206 {strides = array<i32>} : memref<64x32xf32, #tpu.memory_space<vmem>>, vector<8x32xf32>,
    %c2_i32_415 = arith.constant 2 : i32
    %c8_i32_416 = arith.constant 8 : i32
    %1214 = arith.muli %c2_i32_415, %c8_i32_416 : i32
    %1215 = tpu.assume_multiple %1214, 8 : i32
    %1216 = arith.index_cast %1215 : i32 to index
    %c0_417 = arith.constant 0 : index
    %1217 = vector.load %arg14[%1216, %c0_417] : memref<64x128xf32, #tpu.memory_space<vmem>>, vector<8x128xf32>
    %cst_418 = arith.constant dense<0.000000e+00> : vector<8x128xf32>
    %1218 = tpu.matmul %1206, %1153, %cst_418 {dimension_numbers = #tpu.dot_dimension_numbers<[1], [0], [0], [1], [0, 0, 1, 1], [], []>, precision = #tpu.contract_precision<fp32>} : vector<8x32xf32>, vector<32x128xf32>, vector<8x128xf32> -> vector<8x128xf32>
    %1219 = arith.addf %1217, %1218 : vector<8x128xf32>
    %1220 = vector.extract_strided_slice %1219 {offsets = [0, 0], sizes = [8, 96], strides = [1, 1]} : vector<8x128xf32> to vector<8x96xf32>
    %1221 = arith.negf %1220 : vector<8x96xf32>
    %1222 = math.exp %1221 : vector<8x96xf32>
    %cst_419 = arith.constant 1.000000e+00 : f32
    %1223 = vector.broadcast %cst_419 : f32 to vector<8x96xf32>
    %1224 = arith.addf %1223, %1222 : vector<8x96xf32>
    %1225 = arith.divf %1223, %1224 : vector<8x96xf32>
    %1226 = vector.extract_strided_slice %1225 {offsets = [0, 0], sizes = [8, 32], strides = [1, 1]} : vector<8x96xf32> to vector<8x32xf32>
    %1227 = vector.extract_strided_slice %1225 {offsets = [0, 32], sizes = [8, 32], strides = [1, 1]} : vector<8x96xf32> to vector<8x32xf32>
    %1228 = vector.extract_strided_slice %1225 {offsets = [0, 64], sizes = [8, 32], strides = [1, 1]} : vector<8x96xf32> to vector<8x32xf32>
    %1229 = vector.extract_strided_slice %1219 {offsets = [0, 96], sizes = [8, 32], strides = [1, 1]} : vector<8x128xf32> to vector<8x32xf32>
    %1230 = math.tanh %1229 : vector<8x32xf32>
    %1231 = arith.mulf %1227, %1204 : vector<8x32xf32>
    %1232 = arith.mulf %1226, %1230 : vector<8x32xf32>
    %1233 = arith.addf %1231, %1232 : vector<8x32xf32>
    %1234 = math.tanh %1233 : vector<8x32xf32>
    %1235 = arith.mulf %1228, %1234 : vector<8x32xf32>
    %1236 = arith.index_cast %1215 : i32 to index
    %c0_420 = arith.constant 0 : index
    %1237 = vector.load %arg15[%1236, %c0_420] : memref<64x32xf32, #tpu.memory_space<vmem>>, vector<8x32xf32>
    tpu.vector_store %arg15[%1236, %c0_420], %1235 {strides = array<i32>} : memref<64x32xf32, #tpu.memory_space<vmem>>, vector<8x32xf32>,
    %c7_i32_421 = arith.constant 7 : i32
    %1238 = arith.subi %c7_i32_421, %c2_i32_415 : i32
    %c8_i32_422 = arith.constant 8 : i32
    %1239 = arith.muli %1238, %c8_i32_422 : i32
    %1240 = tpu.assume_multiple %1239, 8 : i32
    %1241 = arith.index_cast %1240 : i32 to index
    %c0_423 = arith.constant 0 : index
    %1242 = vector.load %arg16[%1241, %c0_423] : memref<64x32xf32, #tpu.memory_space<vmem>>, vector<8x32xf32>
    tpu.vector_store %arg16[%1241, %c0_423], %1235 {strides = array<i32>} : memref<64x32xf32, #tpu.memory_space<vmem>>, vector<8x32xf32>,
    %c3_i32_424 = arith.constant 3 : i32
    %c8_i32_425 = arith.constant 8 : i32
    %1243 = arith.muli %c3_i32_424, %c8_i32_425 : i32
    %1244 = tpu.assume_multiple %1243, 8 : i32
    %1245 = arith.index_cast %1244 : i32 to index
    %c0_426 = arith.constant 0 : index
    %1246 = vector.load %arg14[%1245, %c0_426] : memref<64x128xf32, #tpu.memory_space<vmem>>, vector<8x128xf32>
    %cst_427 = arith.constant dense<0.000000e+00> : vector<8x128xf32>
    %1247 = tpu.matmul %1235, %1153, %cst_427 {dimension_numbers = #tpu.dot_dimension_numbers<[1], [0], [0], [1], [0, 0, 1, 1], [], []>, precision = #tpu.contract_precision<fp32>} : vector<8x32xf32>, vector<32x128xf32>, vector<8x128xf32> -> vector<8x128xf32>
    %1248 = arith.addf %1246, %1247 : vector<8x128xf32>
    %1249 = vector.extract_strided_slice %1248 {offsets = [0, 0], sizes = [8, 96], strides = [1, 1]} : vector<8x128xf32> to vector<8x96xf32>
    %1250 = arith.negf %1249 : vector<8x96xf32>
    %1251 = math.exp %1250 : vector<8x96xf32>
    %cst_428 = arith.constant 1.000000e+00 : f32
    %1252 = vector.broadcast %cst_428 : f32 to vector<8x96xf32>
    %1253 = arith.addf %1252, %1251 : vector<8x96xf32>
    %1254 = arith.divf %1252, %1253 : vector<8x96xf32>
    %1255 = vector.extract_strided_slice %1254 {offsets = [0, 0], sizes = [8, 32], strides = [1, 1]} : vector<8x96xf32> to vector<8x32xf32>
    %1256 = vector.extract_strided_slice %1254 {offsets = [0, 32], sizes = [8, 32], strides = [1, 1]} : vector<8x96xf32> to vector<8x32xf32>
    %1257 = vector.extract_strided_slice %1254 {offsets = [0, 64], sizes = [8, 32], strides = [1, 1]} : vector<8x96xf32> to vector<8x32xf32>
    %1258 = vector.extract_strided_slice %1248 {offsets = [0, 96], sizes = [8, 32], strides = [1, 1]} : vector<8x128xf32> to vector<8x32xf32>
    %1259 = math.tanh %1258 : vector<8x32xf32>
    %1260 = arith.mulf %1256, %1233 : vector<8x32xf32>
    %1261 = arith.mulf %1255, %1259 : vector<8x32xf32>
    %1262 = arith.addf %1260, %1261 : vector<8x32xf32>
    %1263 = math.tanh %1262 : vector<8x32xf32>
    %1264 = arith.mulf %1257, %1263 : vector<8x32xf32>
    %1265 = arith.index_cast %1244 : i32 to index
    %c0_429 = arith.constant 0 : index
    %1266 = vector.load %arg15[%1265, %c0_429] : memref<64x32xf32, #tpu.memory_space<vmem>>, vector<8x32xf32>
    tpu.vector_store %arg15[%1265, %c0_429], %1264 {strides = array<i32>} : memref<64x32xf32, #tpu.memory_space<vmem>>, vector<8x32xf32>,
    %c7_i32_430 = arith.constant 7 : i32
    %1267 = arith.subi %c7_i32_430, %c3_i32_424 : i32
    %c8_i32_431 = arith.constant 8 : i32
    %1268 = arith.muli %1267, %c8_i32_431 : i32
    %1269 = tpu.assume_multiple %1268, 8 : i32
    %1270 = arith.index_cast %1269 : i32 to index
    %c0_432 = arith.constant 0 : index
    %1271 = vector.load %arg16[%1270, %c0_432] : memref<64x32xf32, #tpu.memory_space<vmem>>, vector<8x32xf32>
    tpu.vector_store %arg16[%1270, %c0_432], %1264 {strides = array<i32>} : memref<64x32xf32, #tpu.memory_space<vmem>>, vector<8x32xf32>,
    %c4_i32_433 = arith.constant 4 : i32
    %c8_i32_434 = arith.constant 8 : i32
    %1272 = arith.muli %c4_i32_433, %c8_i32_434 : i32
    %1273 = tpu.assume_multiple %1272, 8 : i32
    %1274 = arith.index_cast %1273 : i32 to index
    %c0_435 = arith.constant 0 : index
    %1275 = vector.load %arg14[%1274, %c0_435] : memref<64x128xf32, #tpu.memory_space<vmem>>, vector<8x128xf32>
    %cst_436 = arith.constant dense<0.000000e+00> : vector<8x128xf32>
    %1276 = tpu.matmul %1264, %1153, %cst_436 {dimension_numbers = #tpu.dot_dimension_numbers<[1], [0], [0], [1], [0, 0, 1, 1], [], []>, precision = #tpu.contract_precision<fp32>} : vector<8x32xf32>, vector<32x128xf32>, vector<8x128xf32> -> vector<8x128xf32>
    %1277 = arith.addf %1275, %1276 : vector<8x128xf32>
    %1278 = vector.extract_strided_slice %1277 {offsets = [0, 0], sizes = [8, 96], strides = [1, 1]} : vector<8x128xf32> to vector<8x96xf32>
    %1279 = arith.negf %1278 : vector<8x96xf32>
    %1280 = math.exp %1279 : vector<8x96xf32>
    %cst_437 = arith.constant 1.000000e+00 : f32
    %1281 = vector.broadcast %cst_437 : f32 to vector<8x96xf32>
    %1282 = arith.addf %1281, %1280 : vector<8x96xf32>
    %1283 = arith.divf %1281, %1282 : vector<8x96xf32>
    %1284 = vector.extract_strided_slice %1283 {offsets = [0, 0], sizes = [8, 32], strides = [1, 1]} : vector<8x96xf32> to vector<8x32xf32>
    %1285 = vector.extract_strided_slice %1283 {offsets = [0, 32], sizes = [8, 32], strides = [1, 1]} : vector<8x96xf32> to vector<8x32xf32>
    %1286 = vector.extract_strided_slice %1283 {offsets = [0, 64], sizes = [8, 32], strides = [1, 1]} : vector<8x96xf32> to vector<8x32xf32>
    %1287 = vector.extract_strided_slice %1277 {offsets = [0, 96], sizes = [8, 32], strides = [1, 1]} : vector<8x128xf32> to vector<8x32xf32>
    %1288 = math.tanh %1287 : vector<8x32xf32>
    %1289 = arith.mulf %1285, %1262 : vector<8x32xf32>
    %1290 = arith.mulf %1284, %1288 : vector<8x32xf32>
    %1291 = arith.addf %1289, %1290 : vector<8x32xf32>
    %1292 = math.tanh %1291 : vector<8x32xf32>
    %1293 = arith.mulf %1286, %1292 : vector<8x32xf32>
    %1294 = arith.index_cast %1273 : i32 to index
    %c0_438 = arith.constant 0 : index
    %1295 = vector.load %arg15[%1294, %c0_438] : memref<64x32xf32, #tpu.memory_space<vmem>>, vector<8x32xf32>
    tpu.vector_store %arg15[%1294, %c0_438], %1293 {strides = array<i32>} : memref<64x32xf32, #tpu.memory_space<vmem>>, vector<8x32xf32>,
    %c7_i32_439 = arith.constant 7 : i32
    %1296 = arith.subi %c7_i32_439, %c4_i32_433 : i32
    %c8_i32_440 = arith.constant 8 : i32
    %1297 = arith.muli %1296, %c8_i32_440 : i32
    %1298 = tpu.assume_multiple %1297, 8 : i32
    %1299 = arith.index_cast %1298 : i32 to index
    %c0_441 = arith.constant 0 : index
    %1300 = vector.load %arg16[%1299, %c0_441] : memref<64x32xf32, #tpu.memory_space<vmem>>, vector<8x32xf32>
    tpu.vector_store %arg16[%1299, %c0_441], %1293 {strides = array<i32>} : memref<64x32xf32, #tpu.memory_space<vmem>>, vector<8x32xf32>,
    %c5_i32_442 = arith.constant 5 : i32
    %c8_i32_443 = arith.constant 8 : i32
    %1301 = arith.muli %c5_i32_442, %c8_i32_443 : i32
    %1302 = tpu.assume_multiple %1301, 8 : i32
    %1303 = arith.index_cast %1302 : i32 to index
    %c0_444 = arith.constant 0 : index
    %1304 = vector.load %arg14[%1303, %c0_444] : memref<64x128xf32, #tpu.memory_space<vmem>>, vector<8x128xf32>
    %cst_445 = arith.constant dense<0.000000e+00> : vector<8x128xf32>
    %1305 = tpu.matmul %1293, %1153, %cst_445 {dimension_numbers = #tpu.dot_dimension_numbers<[1], [0], [0], [1], [0, 0, 1, 1], [], []>, precision = #tpu.contract_precision<fp32>} : vector<8x32xf32>, vector<32x128xf32>, vector<8x128xf32> -> vector<8x128xf32>
    %1306 = arith.addf %1304, %1305 : vector<8x128xf32>
    %1307 = vector.extract_strided_slice %1306 {offsets = [0, 0], sizes = [8, 96], strides = [1, 1]} : vector<8x128xf32> to vector<8x96xf32>
    %1308 = arith.negf %1307 : vector<8x96xf32>
    %1309 = math.exp %1308 : vector<8x96xf32>
    %cst_446 = arith.constant 1.000000e+00 : f32
    %1310 = vector.broadcast %cst_446 : f32 to vector<8x96xf32>
    %1311 = arith.addf %1310, %1309 : vector<8x96xf32>
    %1312 = arith.divf %1310, %1311 : vector<8x96xf32>
    %1313 = vector.extract_strided_slice %1312 {offsets = [0, 0], sizes = [8, 32], strides = [1, 1]} : vector<8x96xf32> to vector<8x32xf32>
    %1314 = vector.extract_strided_slice %1312 {offsets = [0, 32], sizes = [8, 32], strides = [1, 1]} : vector<8x96xf32> to vector<8x32xf32>
    %1315 = vector.extract_strided_slice %1312 {offsets = [0, 64], sizes = [8, 32], strides = [1, 1]} : vector<8x96xf32> to vector<8x32xf32>
    %1316 = vector.extract_strided_slice %1306 {offsets = [0, 96], sizes = [8, 32], strides = [1, 1]} : vector<8x128xf32> to vector<8x32xf32>
    %1317 = math.tanh %1316 : vector<8x32xf32>
    %1318 = arith.mulf %1314, %1291 : vector<8x32xf32>
    %1319 = arith.mulf %1313, %1317 : vector<8x32xf32>
    %1320 = arith.addf %1318, %1319 : vector<8x32xf32>
    %1321 = math.tanh %1320 : vector<8x32xf32>
    %1322 = arith.mulf %1315, %1321 : vector<8x32xf32>
    %1323 = arith.index_cast %1302 : i32 to index
    %c0_447 = arith.constant 0 : index
    %1324 = vector.load %arg15[%1323, %c0_447] : memref<64x32xf32, #tpu.memory_space<vmem>>, vector<8x32xf32>
    tpu.vector_store %arg15[%1323, %c0_447], %1322 {strides = array<i32>} : memref<64x32xf32, #tpu.memory_space<vmem>>, vector<8x32xf32>,
    %c7_i32_448 = arith.constant 7 : i32
    %1325 = arith.subi %c7_i32_448, %c5_i32_442 : i32
    %c8_i32_449 = arith.constant 8 : i32
    %1326 = arith.muli %1325, %c8_i32_449 : i32
    %1327 = tpu.assume_multiple %1326, 8 : i32
    %1328 = arith.index_cast %1327 : i32 to index
    %c0_450 = arith.constant 0 : index
    %1329 = vector.load %arg16[%1328, %c0_450] : memref<64x32xf32, #tpu.memory_space<vmem>>, vector<8x32xf32>
    tpu.vector_store %arg16[%1328, %c0_450], %1322 {strides = array<i32>} : memref<64x32xf32, #tpu.memory_space<vmem>>, vector<8x32xf32>,
    %c6_i32_451 = arith.constant 6 : i32
    %c8_i32_452 = arith.constant 8 : i32
    %1330 = arith.muli %c6_i32_451, %c8_i32_452 : i32
    %1331 = tpu.assume_multiple %1330, 8 : i32
    %1332 = arith.index_cast %1331 : i32 to index
    %c0_453 = arith.constant 0 : index
    %1333 = vector.load %arg14[%1332, %c0_453] : memref<64x128xf32, #tpu.memory_space<vmem>>, vector<8x128xf32>
    %cst_454 = arith.constant dense<0.000000e+00> : vector<8x128xf32>
    %1334 = tpu.matmul %1322, %1153, %cst_454 {dimension_numbers = #tpu.dot_dimension_numbers<[1], [0], [0], [1], [0, 0, 1, 1], [], []>, precision = #tpu.contract_precision<fp32>} : vector<8x32xf32>, vector<32x128xf32>, vector<8x128xf32> -> vector<8x128xf32>
    %1335 = arith.addf %1333, %1334 : vector<8x128xf32>
    %1336 = vector.extract_strided_slice %1335 {offsets = [0, 0], sizes = [8, 96], strides = [1, 1]} : vector<8x128xf32> to vector<8x96xf32>
    %1337 = arith.negf %1336 : vector<8x96xf32>
    %1338 = math.exp %1337 : vector<8x96xf32>
    %cst_455 = arith.constant 1.000000e+00 : f32
    %1339 = vector.broadcast %cst_455 : f32 to vector<8x96xf32>
    %1340 = arith.addf %1339, %1338 : vector<8x96xf32>
    %1341 = arith.divf %1339, %1340 : vector<8x96xf32>
    %1342 = vector.extract_strided_slice %1341 {offsets = [0, 0], sizes = [8, 32], strides = [1, 1]} : vector<8x96xf32> to vector<8x32xf32>
    %1343 = vector.extract_strided_slice %1341 {offsets = [0, 32], sizes = [8, 32], strides = [1, 1]} : vector<8x96xf32> to vector<8x32xf32>
    %1344 = vector.extract_strided_slice %1341 {offsets = [0, 64], sizes = [8, 32], strides = [1, 1]} : vector<8x96xf32> to vector<8x32xf32>
    %1345 = vector.extract_strided_slice %1335 {offsets = [0, 96], sizes = [8, 32], strides = [1, 1]} : vector<8x128xf32> to vector<8x32xf32>
    %1346 = math.tanh %1345 : vector<8x32xf32>
    %1347 = arith.mulf %1343, %1320 : vector<8x32xf32>
    %1348 = arith.mulf %1342, %1346 : vector<8x32xf32>
    %1349 = arith.addf %1347, %1348 : vector<8x32xf32>
    %1350 = math.tanh %1349 : vector<8x32xf32>
    %1351 = arith.mulf %1344, %1350 : vector<8x32xf32>
    %1352 = arith.index_cast %1331 : i32 to index
    %c0_456 = arith.constant 0 : index
    %1353 = vector.load %arg15[%1352, %c0_456] : memref<64x32xf32, #tpu.memory_space<vmem>>, vector<8x32xf32>
    tpu.vector_store %arg15[%1352, %c0_456], %1351 {strides = array<i32>} : memref<64x32xf32, #tpu.memory_space<vmem>>, vector<8x32xf32>,
    %c7_i32_457 = arith.constant 7 : i32
    %1354 = arith.subi %c7_i32_457, %c6_i32_451 : i32
    %c8_i32_458 = arith.constant 8 : i32
    %1355 = arith.muli %1354, %c8_i32_458 : i32
    %1356 = tpu.assume_multiple %1355, 8 : i32
    %1357 = arith.index_cast %1356 : i32 to index
    %c0_459 = arith.constant 0 : index
    %1358 = vector.load %arg16[%1357, %c0_459] : memref<64x32xf32, #tpu.memory_space<vmem>>, vector<8x32xf32>
    tpu.vector_store %arg16[%1357, %c0_459], %1351 {strides = array<i32>} : memref<64x32xf32, #tpu.memory_space<vmem>>, vector<8x32xf32>,
    %c7_i32_460 = arith.constant 7 : i32
    %c8_i32_461 = arith.constant 8 : i32
    %1359 = arith.muli %c7_i32_460, %c8_i32_461 : i32
    %1360 = tpu.assume_multiple %1359, 8 : i32
    %1361 = arith.index_cast %1360 : i32 to index
    %c0_462 = arith.constant 0 : index
    %1362 = vector.load %arg14[%1361, %c0_462] : memref<64x128xf32, #tpu.memory_space<vmem>>, vector<8x128xf32>
    %cst_463 = arith.constant dense<0.000000e+00> : vector<8x128xf32>
    %1363 = tpu.matmul %1351, %1153, %cst_463 {dimension_numbers = #tpu.dot_dimension_numbers<[1], [0], [0], [1], [0, 0, 1, 1], [], []>, precision = #tpu.contract_precision<fp32>} : vector<8x32xf32>, vector<32x128xf32>, vector<8x128xf32> -> vector<8x128xf32>
    %1364 = arith.addf %1362, %1363 : vector<8x128xf32>
    %1365 = vector.extract_strided_slice %1364 {offsets = [0, 0], sizes = [8, 96], strides = [1, 1]} : vector<8x128xf32> to vector<8x96xf32>
    %1366 = arith.negf %1365 : vector<8x96xf32>
    %1367 = math.exp %1366 : vector<8x96xf32>
    %cst_464 = arith.constant 1.000000e+00 : f32
    %1368 = vector.broadcast %cst_464 : f32 to vector<8x96xf32>
    %1369 = arith.addf %1368, %1367 : vector<8x96xf32>
    %1370 = arith.divf %1368, %1369 : vector<8x96xf32>
    %1371 = vector.extract_strided_slice %1370 {offsets = [0, 0], sizes = [8, 32], strides = [1, 1]} : vector<8x96xf32> to vector<8x32xf32>
    %1372 = vector.extract_strided_slice %1370 {offsets = [0, 32], sizes = [8, 32], strides = [1, 1]} : vector<8x96xf32> to vector<8x32xf32>
    %1373 = vector.extract_strided_slice %1370 {offsets = [0, 64], sizes = [8, 32], strides = [1, 1]} : vector<8x96xf32> to vector<8x32xf32>
    %1374 = vector.extract_strided_slice %1364 {offsets = [0, 96], sizes = [8, 32], strides = [1, 1]} : vector<8x128xf32> to vector<8x32xf32>
    %1375 = math.tanh %1374 : vector<8x32xf32>
    %1376 = arith.mulf %1372, %1349 : vector<8x32xf32>
    %1377 = arith.mulf %1371, %1375 : vector<8x32xf32>
    %1378 = arith.addf %1376, %1377 : vector<8x32xf32>
    %1379 = math.tanh %1378 : vector<8x32xf32>
    %1380 = arith.mulf %1373, %1379 : vector<8x32xf32>
    %1381 = arith.index_cast %1360 : i32 to index
    %c0_465 = arith.constant 0 : index
    %1382 = vector.load %arg15[%1381, %c0_465] : memref<64x32xf32, #tpu.memory_space<vmem>>, vector<8x32xf32>
    tpu.vector_store %arg15[%1381, %c0_465], %1380 {strides = array<i32>} : memref<64x32xf32, #tpu.memory_space<vmem>>, vector<8x32xf32>,
    %c7_i32_466 = arith.constant 7 : i32
    %1383 = arith.subi %c7_i32_466, %c7_i32_460 : i32
    %c8_i32_467 = arith.constant 8 : i32
    %1384 = arith.muli %1383, %c8_i32_467 : i32
    %1385 = tpu.assume_multiple %1384, 8 : i32
    %1386 = arith.index_cast %1385 : i32 to index
    %c0_468 = arith.constant 0 : index
    %1387 = vector.load %arg16[%1386, %c0_468] : memref<64x32xf32, #tpu.memory_space<vmem>>, vector<8x32xf32>
    tpu.vector_store %arg16[%1386, %c0_468], %1380 {strides = array<i32>} : memref<64x32xf32, #tpu.memory_space<vmem>>, vector<8x32xf32>,
    %c8_i32_469 = arith.constant 8 : i32
    %c0_470 = arith.constant 0 : index
    %c0_471 = arith.constant 0 : index
    %1388 = vector.load %arg15[%c0_470, %c0_471] : memref<64x32xf32, #tpu.memory_space<vmem>>, vector<64x32xf32>
    %c0_472 = arith.constant 0 : index
    %c0_473 = arith.constant 0 : index
    %1389 = vector.load %arg7[%c0_472, %c0_473] : memref<32x5xf32, #tpu.memory_space<vmem>>, vector<32x5xf32>
    %cst_474 = arith.constant dense<0.000000e+00> : vector<64x5xf32>
    %1390 = tpu.matmul %1388, %1389, %cst_474 {dimension_numbers = #tpu.dot_dimension_numbers<[1], [0], [0], [1], [0, 0, 1, 1], [], []>, precision = #tpu.contract_precision<fp32>} : vector<64x32xf32>, vector<32x5xf32>, vector<64x5xf32> -> vector<64x5xf32>
    %c0_475 = arith.constant 0 : index
    %c0_476 = arith.constant 0 : index
    %1391 = vector.load %arg16[%c0_475, %c0_476] : memref<64x32xf32, #tpu.memory_space<vmem>>, vector<64x32xf32>
    %c0_477 = arith.constant 0 : index
    %c0_478 = arith.constant 0 : index
    %1392 = vector.load %arg8[%c0_477, %c0_478] : memref<32x5xf32, #tpu.memory_space<vmem>>, vector<32x5xf32>
    %cst_479 = arith.constant dense<0.000000e+00> : vector<64x5xf32>
    %1393 = tpu.matmul %1391, %1392, %cst_479 {dimension_numbers = #tpu.dot_dimension_numbers<[1], [0], [0], [1], [0, 0, 1, 1], [], []>, precision = #tpu.contract_precision<fp32>} : vector<64x32xf32>, vector<32x5xf32>, vector<64x5xf32> -> vector<64x5xf32>
    %1394 = arith.addf %1390, %1393 : vector<64x5xf32>
    %c0_480 = arith.constant 0 : index
    %c0_481 = arith.constant 0 : index
    %1395 = vector.load %arg9[%c0_480, %c0_481] : memref<1x5xf32, #tpu.memory_space<vmem>>, vector<1x5xf32>
    %1396 = vector.broadcast %1395 : vector<1x5xf32> to vector<64x5xf32>
    %1397 = arith.addf %1394, %1396 : vector<64x5xf32>
    %c0_482 = arith.constant 0 : index
    %c0_483 = arith.constant 0 : index
    %1398 = vector.load %arg11[%c0_482, %c0_483] : memref<64x5xf32, #tpu.memory_space<vmem>>, vector<64x5xf32>
    tpu.vector_store %arg11[%c0_482, %c0_483], %1397 {strides = array<i32>} : memref<64x5xf32, #tpu.memory_space<vmem>>, vector<64x5xf32>,
    %c0_484 = arith.constant 0 : index
    %c0_485 = arith.constant 0 : index
    %1399 = vector.load %arg10[%c0_484, %c0_485] : memref<5x5xf32, #tpu.memory_space<vmem>>, vector<5x5xf32>
    %1400 = tpu.iota {dimensions = array<i32: 1>} : vector<8x5xi32>
    %c3_i32_486 = arith.constant 3 : i32
    %1401 = vector.broadcast %c3_i32_486 : i32 to vector<8x5xi32>
    %1402 = arith.cmpi eq, %1400, %1401 : vector<8x5xi32>
    %cst_487 = arith.constant 0.000000e+00 : f32
    %1403 = vector.broadcast %cst_487 : f32 to vector<8x5xf32>
    %cst_488 = arith.constant -1.000000e+04 : f32
    %1404 = vector.broadcast %cst_488 : f32 to vector<8x5xf32>
    %1405 = arith.select %1402, %1403, %1404 : vector<8x5xi1>, vector<8x5xf32>
    %c0_i32_489 = arith.constant 0 : i32
    %c8_i32_490 = arith.constant 8 : i32
    %1406 = arith.muli %c0_i32_489, %c8_i32_490 : i32
    %1407 = tpu.assume_multiple %1406, 8 : i32
    %cst_491 = arith.constant 0.000000e+00 : f32
    %1408 = vector.broadcast %cst_491 : f32 to vector<8x5xf32>
    %c0_i32_492 = arith.constant 0 : i32
    %1409 = vector.broadcast %c0_i32_492 : i32 to vector<8x5xi32>
    %1410 = vector.extract_strided_slice %1399 {offsets = [0, 0], sizes = [1, 5], strides = [1, 1]} : vector<5x5xf32> to vector<1x5xf32>
    %1411 = vector.broadcast %1410 : vector<1x5xf32> to vector<8x5xf32>
    %1412 = arith.addf %1405, %1411 : vector<8x5xf32>
    %cst_493 = arith.constant dense<0xFF800000> : vector<8xf32>
    %1413 = vector.multi_reduction <maximumf>, %1412, %cst_493 [1] : vector<8x5xf32> to vector<8xf32>
    %1414 = vector.shape_cast %1413 : vector<8xf32> to vector<8x1xf32>
    %1415 = vector.broadcast %1414 : vector<8x1xf32> to vector<8x5xf32>
    %1416 = arith.cmpf oeq, %1412, %1415 : vector<8x5xf32>
    %c5_i32_494 = arith.constant 5 : i32
    %1417 = vector.broadcast %c5_i32_494 : i32 to vector<8x5xi32>
    %1418 = arith.select %1416, %1400, %1417 : vector<8x5xi1>, vector<8x5xi32>
    %cst_495 = arith.constant dense<2147483647> : vector<8xi32>
    %1419 = vector.multi_reduction <minsi>, %1418, %cst_495 [1] : vector<8x5xi32> to vector<8xi32>
    %1420 = vector.shape_cast %1419 : vector<8xi32> to vector<8x1xi32>
    %c0_i32_496 = arith.constant 0 : i32
    %1421 = vector.broadcast %c0_i32_496 : i32 to vector<8x5xi32>
    %1422 = arith.cmpi eq, %1400, %1421 : vector<8x5xi32>
    %1423 = vector.shape_cast %1414 : vector<8x1xf32> to vector<8x1xf32>
    %1424 = vector.broadcast %1423 : vector<8x1xf32> to vector<8x5xf32>
    %1425 = arith.select %1422, %1424, %1408 : vector<8x5xi1>, vector<8x5xf32>
    %1426 = vector.shape_cast %1420 : vector<8x1xi32> to vector<8x1xi32>
    %1427 = vector.broadcast %1426 : vector<8x1xi32> to vector<8x5xi32>
    %1428 = arith.select %1422, %1427, %1409 : vector<8x5xi1>, vector<8x5xi32>
    %1429 = vector.extract_strided_slice %1399 {offsets = [1, 0], sizes = [1, 5], strides = [1, 1]} : vector<5x5xf32> to vector<1x5xf32>
    %1430 = vector.broadcast %1429 : vector<1x5xf32> to vector<8x5xf32>
    %1431 = arith.addf %1405, %1430 : vector<8x5xf32>
    %cst_497 = arith.constant dense<0xFF800000> : vector<8xf32>
    %1432 = vector.multi_reduction <maximumf>, %1431, %cst_497 [1] : vector<8x5xf32> to vector<8xf32>
    %1433 = vector.shape_cast %1432 : vector<8xf32> to vector<8x1xf32>
    %1434 = vector.broadcast %1433 : vector<8x1xf32> to vector<8x5xf32>
    %1435 = arith.cmpf oeq, %1431, %1434 : vector<8x5xf32>
    %c5_i32_498 = arith.constant 5 : i32
    %1436 = vector.broadcast %c5_i32_498 : i32 to vector<8x5xi32>
    %1437 = arith.select %1435, %1400, %1436 : vector<8x5xi1>, vector<8x5xi32>
    %cst_499 = arith.constant dense<2147483647> : vector<8xi32>
    %1438 = vector.multi_reduction <minsi>, %1437, %cst_499 [1] : vector<8x5xi32> to vector<8xi32>
    %1439 = vector.shape_cast %1438 : vector<8xi32> to vector<8x1xi32>
    %c1_i32_500 = arith.constant 1 : i32
    %1440 = vector.broadcast %c1_i32_500 : i32 to vector<8x5xi32>
    %1441 = arith.cmpi eq, %1400, %1440 : vector<8x5xi32>
    %1442 = vector.shape_cast %1433 : vector<8x1xf32> to vector<8x1xf32>
    %1443 = vector.broadcast %1442 : vector<8x1xf32> to vector<8x5xf32>
    %1444 = arith.select %1441, %1443, %1425 : vector<8x5xi1>, vector<8x5xf32>
    %1445 = vector.shape_cast %1439 : vector<8x1xi32> to vector<8x1xi32>
    %1446 = vector.broadcast %1445 : vector<8x1xi32> to vector<8x5xi32>
    %1447 = arith.select %1441, %1446, %1428 : vector<8x5xi1>, vector<8x5xi32>
    %1448 = vector.extract_strided_slice %1399 {offsets = [2, 0], sizes = [1, 5], strides = [1, 1]} : vector<5x5xf32> to vector<1x5xf32>
    %1449 = vector.broadcast %1448 : vector<1x5xf32> to vector<8x5xf32>
    %1450 = arith.addf %1405, %1449 : vector<8x5xf32>
    %cst_501 = arith.constant dense<0xFF800000> : vector<8xf32>
    %1451 = vector.multi_reduction <maximumf>, %1450, %cst_501 [1] : vector<8x5xf32> to vector<8xf32>
    %1452 = vector.shape_cast %1451 : vector<8xf32> to vector<8x1xf32>
    %1453 = vector.broadcast %1452 : vector<8x1xf32> to vector<8x5xf32>
    %1454 = arith.cmpf oeq, %1450, %1453 : vector<8x5xf32>
    %c5_i32_502 = arith.constant 5 : i32
    %1455 = vector.broadcast %c5_i32_502 : i32 to vector<8x5xi32>
    %1456 = arith.select %1454, %1400, %1455 : vector<8x5xi1>, vector<8x5xi32>
    %cst_503 = arith.constant dense<2147483647> : vector<8xi32>
    %1457 = vector.multi_reduction <minsi>, %1456, %cst_503 [1] : vector<8x5xi32> to vector<8xi32>
    %1458 = vector.shape_cast %1457 : vector<8xi32> to vector<8x1xi32>
    %c2_i32_504 = arith.constant 2 : i32
    %1459 = vector.broadcast %c2_i32_504 : i32 to vector<8x5xi32>
    %1460 = arith.cmpi eq, %1400, %1459 : vector<8x5xi32>
    %1461 = vector.shape_cast %1452 : vector<8x1xf32> to vector<8x1xf32>
    %1462 = vector.broadcast %1461 : vector<8x1xf32> to vector<8x5xf32>
    %1463 = arith.select %1460, %1462, %1444 : vector<8x5xi1>, vector<8x5xf32>
    %1464 = vector.shape_cast %1458 : vector<8x1xi32> to vector<8x1xi32>
    %1465 = vector.broadcast %1464 : vector<8x1xi32> to vector<8x5xi32>
    %1466 = arith.select %1460, %1465, %1447 : vector<8x5xi1>, vector<8x5xi32>
    %1467 = vector.extract_strided_slice %1399 {offsets = [3, 0], sizes = [1, 5], strides = [1, 1]} : vector<5x5xf32> to vector<1x5xf32>
    %1468 = vector.broadcast %1467 : vector<1x5xf32> to vector<8x5xf32>
    %1469 = arith.addf %1405, %1468 : vector<8x5xf32>
    %cst_505 = arith.constant dense<0xFF800000> : vector<8xf32>
    %1470 = vector.multi_reduction <maximumf>, %1469, %cst_505 [1] : vector<8x5xf32> to vector<8xf32>
    %1471 = vector.shape_cast %1470 : vector<8xf32> to vector<8x1xf32>
    %1472 = vector.broadcast %1471 : vector<8x1xf32> to vector<8x5xf32>
    %1473 = arith.cmpf oeq, %1469, %1472 : vector<8x5xf32>
    %c5_i32_506 = arith.constant 5 : i32
    %1474 = vector.broadcast %c5_i32_506 : i32 to vector<8x5xi32>
    %1475 = arith.select %1473, %1400, %1474 : vector<8x5xi1>, vector<8x5xi32>
    %cst_507 = arith.constant dense<2147483647> : vector<8xi32>
    %1476 = vector.multi_reduction <minsi>, %1475, %cst_507 [1] : vector<8x5xi32> to vector<8xi32>
    %1477 = vector.shape_cast %1476 : vector<8xi32> to vector<8x1xi32>
    %c3_i32_508 = arith.constant 3 : i32
    %1478 = vector.broadcast %c3_i32_508 : i32 to vector<8x5xi32>
    %1479 = arith.cmpi eq, %1400, %1478 : vector<8x5xi32>
    %1480 = vector.shape_cast %1471 : vector<8x1xf32> to vector<8x1xf32>
    %1481 = vector.broadcast %1480 : vector<8x1xf32> to vector<8x5xf32>
    %1482 = arith.select %1479, %1481, %1463 : vector<8x5xi1>, vector<8x5xf32>
    %1483 = vector.shape_cast %1477 : vector<8x1xi32> to vector<8x1xi32>
    %1484 = vector.broadcast %1483 : vector<8x1xi32> to vector<8x5xi32>
    %1485 = arith.select %1479, %1484, %1466 : vector<8x5xi1>, vector<8x5xi32>
    %1486 = vector.extract_strided_slice %1399 {offsets = [4, 0], sizes = [1, 5], strides = [1, 1]} : vector<5x5xf32> to vector<1x5xf32>
    %1487 = vector.broadcast %1486 : vector<1x5xf32> to vector<8x5xf32>
    %1488 = arith.addf %1405, %1487 : vector<8x5xf32>
    %cst_509 = arith.constant dense<0xFF800000> : vector<8xf32>
    %1489 = vector.multi_reduction <maximumf>, %1488, %cst_509 [1] : vector<8x5xf32> to vector<8xf32>
    %1490 = vector.shape_cast %1489 : vector<8xf32> to vector<8x1xf32>
    %1491 = vector.broadcast %1490 : vector<8x1xf32> to vector<8x5xf32>
    %1492 = arith.cmpf oeq, %1488, %1491 : vector<8x5xf32>
    %c5_i32_510 = arith.constant 5 : i32
    %1493 = vector.broadcast %c5_i32_510 : i32 to vector<8x5xi32>
    %1494 = arith.select %1492, %1400, %1493 : vector<8x5xi1>, vector<8x5xi32>
    %cst_511 = arith.constant dense<2147483647> : vector<8xi32>
    %1495 = vector.multi_reduction <minsi>, %1494, %cst_511 [1] : vector<8x5xi32> to vector<8xi32>
    %1496 = vector.shape_cast %1495 : vector<8xi32> to vector<8x1xi32>
    %c4_i32_512 = arith.constant 4 : i32
    %1497 = vector.broadcast %c4_i32_512 : i32 to vector<8x5xi32>
    %1498 = arith.cmpi eq, %1400, %1497 : vector<8x5xi32>
    %1499 = vector.shape_cast %1490 : vector<8x1xf32> to vector<8x1xf32>
    %1500 = vector.broadcast %1499 : vector<8x1xf32> to vector<8x5xf32>
    %1501 = arith.select %1498, %1500, %1482 : vector<8x5xi1>, vector<8x5xf32>
    %1502 = vector.shape_cast %1496 : vector<8x1xi32> to vector<8x1xi32>
    %1503 = vector.broadcast %1502 : vector<8x1xi32> to vector<8x5xi32>
    %1504 = arith.select %1498, %1503, %1485 : vector<8x5xi1>, vector<8x5xi32>
    %1505 = arith.index_cast %1407 : i32 to index
    %c0_513 = arith.constant 0 : index
    %1506 = vector.load %arg17[%1505, %c0_513] : memref<64x5xi32, #tpu.memory_space<vmem>>, vector<8x5xi32>
    tpu.vector_store %arg17[%1505, %c0_513], %1504 {strides = array<i32>} : memref<64x5xi32, #tpu.memory_space<vmem>>, vector<8x5xi32>,
    %1507 = arith.index_cast %1407 : i32 to index
    %c0_514 = arith.constant 0 : index
    %1508 = vector.load %arg11[%1507, %c0_514] : memref<64x5xf32, #tpu.memory_space<vmem>>, vector<8x5xf32>
    %1509 = arith.addf %1501, %1508 : vector<8x5xf32>
    %c1_i32_515 = arith.constant 1 : i32
    %c8_i32_516 = arith.constant 8 : i32
    %1510 = arith.muli %c1_i32_515, %c8_i32_516 : i32
    %1511 = tpu.assume_multiple %1510, 8 : i32
    %cst_517 = arith.constant 0.000000e+00 : f32
    %1512 = vector.broadcast %cst_517 : f32 to vector<8x5xf32>
    %c0_i32_518 = arith.constant 0 : i32
    %1513 = vector.broadcast %c0_i32_518 : i32 to vector<8x5xi32>
    %1514 = vector.extract_strided_slice %1399 {offsets = [0, 0], sizes = [1, 5], strides = [1, 1]} : vector<5x5xf32> to vector<1x5xf32>
    %1515 = vector.broadcast %1514 : vector<1x5xf32> to vector<8x5xf32>
    %1516 = arith.addf %1509, %1515 : vector<8x5xf32>
    %cst_519 = arith.constant dense<0xFF800000> : vector<8xf32>
    %1517 = vector.multi_reduction <maximumf>, %1516, %cst_519 [1] : vector<8x5xf32> to vector<8xf32>
    %1518 = vector.shape_cast %1517 : vector<8xf32> to vector<8x1xf32>
    %1519 = vector.broadcast %1518 : vector<8x1xf32> to vector<8x5xf32>
    %1520 = arith.cmpf oeq, %1516, %1519 : vector<8x5xf32>
    %c5_i32_520 = arith.constant 5 : i32
    %1521 = vector.broadcast %c5_i32_520 : i32 to vector<8x5xi32>
    %1522 = arith.select %1520, %1400, %1521 : vector<8x5xi1>, vector<8x5xi32>
    %cst_521 = arith.constant dense<2147483647> : vector<8xi32>
    %1523 = vector.multi_reduction <minsi>, %1522, %cst_521 [1] : vector<8x5xi32> to vector<8xi32>
    %1524 = vector.shape_cast %1523 : vector<8xi32> to vector<8x1xi32>
    %c0_i32_522 = arith.constant 0 : i32
    %1525 = vector.broadcast %c0_i32_522 : i32 to vector<8x5xi32>
    %1526 = arith.cmpi eq, %1400, %1525 : vector<8x5xi32>
    %1527 = vector.shape_cast %1518 : vector<8x1xf32> to vector<8x1xf32>
    %1528 = vector.broadcast %1527 : vector<8x1xf32> to vector<8x5xf32>
    %1529 = arith.select %1526, %1528, %1512 : vector<8x5xi1>, vector<8x5xf32>
    %1530 = vector.shape_cast %1524 : vector<8x1xi32> to vector<8x1xi32>
    %1531 = vector.broadcast %1530 : vector<8x1xi32> to vector<8x5xi32>
    %1532 = arith.select %1526, %1531, %1513 : vector<8x5xi1>, vector<8x5xi32>
    %1533 = vector.extract_strided_slice %1399 {offsets = [1, 0], sizes = [1, 5], strides = [1, 1]} : vector<5x5xf32> to vector<1x5xf32>
    %1534 = vector.broadcast %1533 : vector<1x5xf32> to vector<8x5xf32>
    %1535 = arith.addf %1509, %1534 : vector<8x5xf32>
    %cst_523 = arith.constant dense<0xFF800000> : vector<8xf32>
    %1536 = vector.multi_reduction <maximumf>, %1535, %cst_523 [1] : vector<8x5xf32> to vector<8xf32>
    %1537 = vector.shape_cast %1536 : vector<8xf32> to vector<8x1xf32>
    %1538 = vector.broadcast %1537 : vector<8x1xf32> to vector<8x5xf32>
    %1539 = arith.cmpf oeq, %1535, %1538 : vector<8x5xf32>
    %c5_i32_524 = arith.constant 5 : i32
    %1540 = vector.broadcast %c5_i32_524 : i32 to vector<8x5xi32>
    %1541 = arith.select %1539, %1400, %1540 : vector<8x5xi1>, vector<8x5xi32>
    %cst_525 = arith.constant dense<2147483647> : vector<8xi32>
    %1542 = vector.multi_reduction <minsi>, %1541, %cst_525 [1] : vector<8x5xi32> to vector<8xi32>
    %1543 = vector.shape_cast %1542 : vector<8xi32> to vector<8x1xi32>
    %c1_i32_526 = arith.constant 1 : i32
    %1544 = vector.broadcast %c1_i32_526 : i32 to vector<8x5xi32>
    %1545 = arith.cmpi eq, %1400, %1544 : vector<8x5xi32>
    %1546 = vector.shape_cast %1537 : vector<8x1xf32> to vector<8x1xf32>
    %1547 = vector.broadcast %1546 : vector<8x1xf32> to vector<8x5xf32>
    %1548 = arith.select %1545, %1547, %1529 : vector<8x5xi1>, vector<8x5xf32>
    %1549 = vector.shape_cast %1543 : vector<8x1xi32> to vector<8x1xi32>
    %1550 = vector.broadcast %1549 : vector<8x1xi32> to vector<8x5xi32>
    %1551 = arith.select %1545, %1550, %1532 : vector<8x5xi1>, vector<8x5xi32>
    %1552 = vector.extract_strided_slice %1399 {offsets = [2, 0], sizes = [1, 5], strides = [1, 1]} : vector<5x5xf32> to vector<1x5xf32>
    %1553 = vector.broadcast %1552 : vector<1x5xf32> to vector<8x5xf32>
    %1554 = arith.addf %1509, %1553 : vector<8x5xf32>
    %cst_527 = arith.constant dense<0xFF800000> : vector<8xf32>
    %1555 = vector.multi_reduction <maximumf>, %1554, %cst_527 [1] : vector<8x5xf32> to vector<8xf32>
    %1556 = vector.shape_cast %1555 : vector<8xf32> to vector<8x1xf32>
    %1557 = vector.broadcast %1556 : vector<8x1xf32> to vector<8x5xf32>
    %1558 = arith.cmpf oeq, %1554, %1557 : vector<8x5xf32>
    %c5_i32_528 = arith.constant 5 : i32
    %1559 = vector.broadcast %c5_i32_528 : i32 to vector<8x5xi32>
    %1560 = arith.select %1558, %1400, %1559 : vector<8x5xi1>, vector<8x5xi32>
    %cst_529 = arith.constant dense<2147483647> : vector<8xi32>
    %1561 = vector.multi_reduction <minsi>, %1560, %cst_529 [1] : vector<8x5xi32> to vector<8xi32>
    %1562 = vector.shape_cast %1561 : vector<8xi32> to vector<8x1xi32>
    %c2_i32_530 = arith.constant 2 : i32
    %1563 = vector.broadcast %c2_i32_530 : i32 to vector<8x5xi32>
    %1564 = arith.cmpi eq, %1400, %1563 : vector<8x5xi32>
    %1565 = vector.shape_cast %1556 : vector<8x1xf32> to vector<8x1xf32>
    %1566 = vector.broadcast %1565 : vector<8x1xf32> to vector<8x5xf32>
    %1567 = arith.select %1564, %1566, %1548 : vector<8x5xi1>, vector<8x5xf32>
    %1568 = vector.shape_cast %1562 : vector<8x1xi32> to vector<8x1xi32>
    %1569 = vector.broadcast %1568 : vector<8x1xi32> to vector<8x5xi32>
    %1570 = arith.select %1564, %1569, %1551 : vector<8x5xi1>, vector<8x5xi32>
    %1571 = vector.extract_strided_slice %1399 {offsets = [3, 0], sizes = [1, 5], strides = [1, 1]} : vector<5x5xf32> to vector<1x5xf32>
    %1572 = vector.broadcast %1571 : vector<1x5xf32> to vector<8x5xf32>
    %1573 = arith.addf %1509, %1572 : vector<8x5xf32>
    %cst_531 = arith.constant dense<0xFF800000> : vector<8xf32>
    %1574 = vector.multi_reduction <maximumf>, %1573, %cst_531 [1] : vector<8x5xf32> to vector<8xf32>
    %1575 = vector.shape_cast %1574 : vector<8xf32> to vector<8x1xf32>
    %1576 = vector.broadcast %1575 : vector<8x1xf32> to vector<8x5xf32>
    %1577 = arith.cmpf oeq, %1573, %1576 : vector<8x5xf32>
    %c5_i32_532 = arith.constant 5 : i32
    %1578 = vector.broadcast %c5_i32_532 : i32 to vector<8x5xi32>
    %1579 = arith.select %1577, %1400, %1578 : vector<8x5xi1>, vector<8x5xi32>
    %cst_533 = arith.constant dense<2147483647> : vector<8xi32>
    %1580 = vector.multi_reduction <minsi>, %1579, %cst_533 [1] : vector<8x5xi32> to vector<8xi32>
    %1581 = vector.shape_cast %1580 : vector<8xi32> to vector<8x1xi32>
    %c3_i32_534 = arith.constant 3 : i32
    %1582 = vector.broadcast %c3_i32_534 : i32 to vector<8x5xi32>
    %1583 = arith.cmpi eq, %1400, %1582 : vector<8x5xi32>
    %1584 = vector.shape_cast %1575 : vector<8x1xf32> to vector<8x1xf32>
    %1585 = vector.broadcast %1584 : vector<8x1xf32> to vector<8x5xf32>
    %1586 = arith.select %1583, %1585, %1567 : vector<8x5xi1>, vector<8x5xf32>
    %1587 = vector.shape_cast %1581 : vector<8x1xi32> to vector<8x1xi32>
    %1588 = vector.broadcast %1587 : vector<8x1xi32> to vector<8x5xi32>
    %1589 = arith.select %1583, %1588, %1570 : vector<8x5xi1>, vector<8x5xi32>
    %1590 = vector.extract_strided_slice %1399 {offsets = [4, 0], sizes = [1, 5], strides = [1, 1]} : vector<5x5xf32> to vector<1x5xf32>
    %1591 = vector.broadcast %1590 : vector<1x5xf32> to vector<8x5xf32>
    %1592 = arith.addf %1509, %1591 : vector<8x5xf32>
    %cst_535 = arith.constant dense<0xFF800000> : vector<8xf32>
    %1593 = vector.multi_reduction <maximumf>, %1592, %cst_535 [1] : vector<8x5xf32> to vector<8xf32>
    %1594 = vector.shape_cast %1593 : vector<8xf32> to vector<8x1xf32>
    %1595 = vector.broadcast %1594 : vector<8x1xf32> to vector<8x5xf32>
    %1596 = arith.cmpf oeq, %1592, %1595 : vector<8x5xf32>
    %c5_i32_536 = arith.constant 5 : i32
    %1597 = vector.broadcast %c5_i32_536 : i32 to vector<8x5xi32>
    %1598 = arith.select %1596, %1400, %1597 : vector<8x5xi1>, vector<8x5xi32>
    %cst_537 = arith.constant dense<2147483647> : vector<8xi32>
    %1599 = vector.multi_reduction <minsi>, %1598, %cst_537 [1] : vector<8x5xi32> to vector<8xi32>
    %1600 = vector.shape_cast %1599 : vector<8xi32> to vector<8x1xi32>
    %c4_i32_538 = arith.constant 4 : i32
    %1601 = vector.broadcast %c4_i32_538 : i32 to vector<8x5xi32>
    %1602 = arith.cmpi eq, %1400, %1601 : vector<8x5xi32>
    %1603 = vector.shape_cast %1594 : vector<8x1xf32> to vector<8x1xf32>
    %1604 = vector.broadcast %1603 : vector<8x1xf32> to vector<8x5xf32>
    %1605 = arith.select %1602, %1604, %1586 : vector<8x5xi1>, vector<8x5xf32>
    %1606 = vector.shape_cast %1600 : vector<8x1xi32> to vector<8x1xi32>
    %1607 = vector.broadcast %1606 : vector<8x1xi32> to vector<8x5xi32>
    %1608 = arith.select %1602, %1607, %1589 : vector<8x5xi1>, vector<8x5xi32>
    %1609 = arith.index_cast %1511 : i32 to index
    %c0_539 = arith.constant 0 : index
    %1610 = vector.load %arg17[%1609, %c0_539] : memref<64x5xi32, #tpu.memory_space<vmem>>, vector<8x5xi32>
    tpu.vector_store %arg17[%1609, %c0_539], %1608 {strides = array<i32>} : memref<64x5xi32, #tpu.memory_space<vmem>>, vector<8x5xi32>,
    %1611 = arith.index_cast %1511 : i32 to index
    %c0_540 = arith.constant 0 : index
    %1612 = vector.load %arg11[%1611, %c0_540] : memref<64x5xf32, #tpu.memory_space<vmem>>, vector<8x5xf32>
    %1613 = arith.addf %1605, %1612 : vector<8x5xf32>
    %c2_i32_541 = arith.constant 2 : i32
    %c8_i32_542 = arith.constant 8 : i32
    %1614 = arith.muli %c2_i32_541, %c8_i32_542 : i32
    %1615 = tpu.assume_multiple %1614, 8 : i32
    %cst_543 = arith.constant 0.000000e+00 : f32
    %1616 = vector.broadcast %cst_543 : f32 to vector<8x5xf32>
    %c0_i32_544 = arith.constant 0 : i32
    %1617 = vector.broadcast %c0_i32_544 : i32 to vector<8x5xi32>
    %1618 = vector.extract_strided_slice %1399 {offsets = [0, 0], sizes = [1, 5], strides = [1, 1]} : vector<5x5xf32> to vector<1x5xf32>
    %1619 = vector.broadcast %1618 : vector<1x5xf32> to vector<8x5xf32>
    %1620 = arith.addf %1613, %1619 : vector<8x5xf32>
    %cst_545 = arith.constant dense<0xFF800000> : vector<8xf32>
    %1621 = vector.multi_reduction <maximumf>, %1620, %cst_545 [1] : vector<8x5xf32> to vector<8xf32>
    %1622 = vector.shape_cast %1621 : vector<8xf32> to vector<8x1xf32>
    %1623 = vector.broadcast %1622 : vector<8x1xf32> to vector<8x5xf32>
    %1624 = arith.cmpf oeq, %1620, %1623 : vector<8x5xf32>
    %c5_i32_546 = arith.constant 5 : i32
    %1625 = vector.broadcast %c5_i32_546 : i32 to vector<8x5xi32>
    %1626 = arith.select %1624, %1400, %1625 : vector<8x5xi1>, vector<8x5xi32>
    %cst_547 = arith.constant dense<2147483647> : vector<8xi32>
    %1627 = vector.multi_reduction <minsi>, %1626, %cst_547 [1] : vector<8x5xi32> to vector<8xi32>
    %1628 = vector.shape_cast %1627 : vector<8xi32> to vector<8x1xi32>
    %c0_i32_548 = arith.constant 0 : i32
    %1629 = vector.broadcast %c0_i32_548 : i32 to vector<8x5xi32>
    %1630 = arith.cmpi eq, %1400, %1629 : vector<8x5xi32>
    %1631 = vector.shape_cast %1622 : vector<8x1xf32> to vector<8x1xf32>
    %1632 = vector.broadcast %1631 : vector<8x1xf32> to vector<8x5xf32>
    %1633 = arith.select %1630, %1632, %1616 : vector<8x5xi1>, vector<8x5xf32>
    %1634 = vector.shape_cast %1628 : vector<8x1xi32> to vector<8x1xi32>
    %1635 = vector.broadcast %1634 : vector<8x1xi32> to vector<8x5xi32>
    %1636 = arith.select %1630, %1635, %1617 : vector<8x5xi1>, vector<8x5xi32>
    %1637 = vector.extract_strided_slice %1399 {offsets = [1, 0], sizes = [1, 5], strides = [1, 1]} : vector<5x5xf32> to vector<1x5xf32>
    %1638 = vector.broadcast %1637 : vector<1x5xf32> to vector<8x5xf32>
    %1639 = arith.addf %1613, %1638 : vector<8x5xf32>
    %cst_549 = arith.constant dense<0xFF800000> : vector<8xf32>
    %1640 = vector.multi_reduction <maximumf>, %1639, %cst_549 [1] : vector<8x5xf32> to vector<8xf32>
    %1641 = vector.shape_cast %1640 : vector<8xf32> to vector<8x1xf32>
    %1642 = vector.broadcast %1641 : vector<8x1xf32> to vector<8x5xf32>
    %1643 = arith.cmpf oeq, %1639, %1642 : vector<8x5xf32>
    %c5_i32_550 = arith.constant 5 : i32
    %1644 = vector.broadcast %c5_i32_550 : i32 to vector<8x5xi32>
    %1645 = arith.select %1643, %1400, %1644 : vector<8x5xi1>, vector<8x5xi32>
    %cst_551 = arith.constant dense<2147483647> : vector<8xi32>
    %1646 = vector.multi_reduction <minsi>, %1645, %cst_551 [1] : vector<8x5xi32> to vector<8xi32>
    %1647 = vector.shape_cast %1646 : vector<8xi32> to vector<8x1xi32>
    %c1_i32_552 = arith.constant 1 : i32
    %1648 = vector.broadcast %c1_i32_552 : i32 to vector<8x5xi32>
    %1649 = arith.cmpi eq, %1400, %1648 : vector<8x5xi32>
    %1650 = vector.shape_cast %1641 : vector<8x1xf32> to vector<8x1xf32>
    %1651 = vector.broadcast %1650 : vector<8x1xf32> to vector<8x5xf32>
    %1652 = arith.select %1649, %1651, %1633 : vector<8x5xi1>, vector<8x5xf32>
    %1653 = vector.shape_cast %1647 : vector<8x1xi32> to vector<8x1xi32>
    %1654 = vector.broadcast %1653 : vector<8x1xi32> to vector<8x5xi32>
    %1655 = arith.select %1649, %1654, %1636 : vector<8x5xi1>, vector<8x5xi32>
    %1656 = vector.extract_strided_slice %1399 {offsets = [2, 0], sizes = [1, 5], strides = [1, 1]} : vector<5x5xf32> to vector<1x5xf32>
    %1657 = vector.broadcast %1656 : vector<1x5xf32> to vector<8x5xf32>
    %1658 = arith.addf %1613, %1657 : vector<8x5xf32>
    %cst_553 = arith.constant dense<0xFF800000> : vector<8xf32>
    %1659 = vector.multi_reduction <maximumf>, %1658, %cst_553 [1] : vector<8x5xf32> to vector<8xf32>
    %1660 = vector.shape_cast %1659 : vector<8xf32> to vector<8x1xf32>
    %1661 = vector.broadcast %1660 : vector<8x1xf32> to vector<8x5xf32>
    %1662 = arith.cmpf oeq, %1658, %1661 : vector<8x5xf32>
    %c5_i32_554 = arith.constant 5 : i32
    %1663 = vector.broadcast %c5_i32_554 : i32 to vector<8x5xi32>
    %1664 = arith.select %1662, %1400, %1663 : vector<8x5xi1>, vector<8x5xi32>
    %cst_555 = arith.constant dense<2147483647> : vector<8xi32>
    %1665 = vector.multi_reduction <minsi>, %1664, %cst_555 [1] : vector<8x5xi32> to vector<8xi32>
    %1666 = vector.shape_cast %1665 : vector<8xi32> to vector<8x1xi32>
    %c2_i32_556 = arith.constant 2 : i32
    %1667 = vector.broadcast %c2_i32_556 : i32 to vector<8x5xi32>
    %1668 = arith.cmpi eq, %1400, %1667 : vector<8x5xi32>
    %1669 = vector.shape_cast %1660 : vector<8x1xf32> to vector<8x1xf32>
    %1670 = vector.broadcast %1669 : vector<8x1xf32> to vector<8x5xf32>
    %1671 = arith.select %1668, %1670, %1652 : vector<8x5xi1>, vector<8x5xf32>
    %1672 = vector.shape_cast %1666 : vector<8x1xi32> to vector<8x1xi32>
    %1673 = vector.broadcast %1672 : vector<8x1xi32> to vector<8x5xi32>
    %1674 = arith.select %1668, %1673, %1655 : vector<8x5xi1>, vector<8x5xi32>
    %1675 = vector.extract_strided_slice %1399 {offsets = [3, 0], sizes = [1, 5], strides = [1, 1]} : vector<5x5xf32> to vector<1x5xf32>
    %1676 = vector.broadcast %1675 : vector<1x5xf32> to vector<8x5xf32>
    %1677 = arith.addf %1613, %1676 : vector<8x5xf32>
    %cst_557 = arith.constant dense<0xFF800000> : vector<8xf32>
    %1678 = vector.multi_reduction <maximumf>, %1677, %cst_557 [1] : vector<8x5xf32> to vector<8xf32>
    %1679 = vector.shape_cast %1678 : vector<8xf32> to vector<8x1xf32>
    %1680 = vector.broadcast %1679 : vector<8x1xf32> to vector<8x5xf32>
    %1681 = arith.cmpf oeq, %1677, %1680 : vector<8x5xf32>
    %c5_i32_558 = arith.constant 5 : i32
    %1682 = vector.broadcast %c5_i32_558 : i32 to vector<8x5xi32>
    %1683 = arith.select %1681, %1400, %1682 : vector<8x5xi1>, vector<8x5xi32>
    %cst_559 = arith.constant dense<2147483647> : vector<8xi32>
    %1684 = vector.multi_reduction <minsi>, %1683, %cst_559 [1] : vector<8x5xi32> to vector<8xi32>
    %1685 = vector.shape_cast %1684 : vector<8xi32> to vector<8x1xi32>
    %c3_i32_560 = arith.constant 3 : i32
    %1686 = vector.broadcast %c3_i32_560 : i32 to vector<8x5xi32>
    %1687 = arith.cmpi eq, %1400, %1686 : vector<8x5xi32>
    %1688 = vector.shape_cast %1679 : vector<8x1xf32> to vector<8x1xf32>
    %1689 = vector.broadcast %1688 : vector<8x1xf32> to vector<8x5xf32>
    %1690 = arith.select %1687, %1689, %1671 : vector<8x5xi1>, vector<8x5xf32>
    %1691 = vector.shape_cast %1685 : vector<8x1xi32> to vector<8x1xi32>
    %1692 = vector.broadcast %1691 : vector<8x1xi32> to vector<8x5xi32>
    %1693 = arith.select %1687, %1692, %1674 : vector<8x5xi1>, vector<8x5xi32>
    %1694 = vector.extract_strided_slice %1399 {offsets = [4, 0], sizes = [1, 5], strides = [1, 1]} : vector<5x5xf32> to vector<1x5xf32>
    %1695 = vector.broadcast %1694 : vector<1x5xf32> to vector<8x5xf32>
    %1696 = arith.addf %1613, %1695 : vector<8x5xf32>
    %cst_561 = arith.constant dense<0xFF800000> : vector<8xf32>
    %1697 = vector.multi_reduction <maximumf>, %1696, %cst_561 [1] : vector<8x5xf32> to vector<8xf32>
    %1698 = vector.shape_cast %1697 : vector<8xf32> to vector<8x1xf32>
    %1699 = vector.broadcast %1698 : vector<8x1xf32> to vector<8x5xf32>
    %1700 = arith.cmpf oeq, %1696, %1699 : vector<8x5xf32>
    %c5_i32_562 = arith.constant 5 : i32
    %1701 = vector.broadcast %c5_i32_562 : i32 to vector<8x5xi32>
    %1702 = arith.select %1700, %1400, %1701 : vector<8x5xi1>, vector<8x5xi32>
    %cst_563 = arith.constant dense<2147483647> : vector<8xi32>
    %1703 = vector.multi_reduction <minsi>, %1702, %cst_563 [1] : vector<8x5xi32> to vector<8xi32>
    %1704 = vector.shape_cast %1703 : vector<8xi32> to vector<8x1xi32>
    %c4_i32_564 = arith.constant 4 : i32
    %1705 = vector.broadcast %c4_i32_564 : i32 to vector<8x5xi32>
    %1706 = arith.cmpi eq, %1400, %1705 : vector<8x5xi32>
    %1707 = vector.shape_cast %1698 : vector<8x1xf32> to vector<8x1xf32>
    %1708 = vector.broadcast %1707 : vector<8x1xf32> to vector<8x5xf32>
    %1709 = arith.select %1706, %1708, %1690 : vector<8x5xi1>, vector<8x5xf32>
    %1710 = vector.shape_cast %1704 : vector<8x1xi32> to vector<8x1xi32>
    %1711 = vector.broadcast %1710 : vector<8x1xi32> to vector<8x5xi32>
    %1712 = arith.select %1706, %1711, %1693 : vector<8x5xi1>, vector<8x5xi32>
    %1713 = arith.index_cast %1615 : i32 to index
    %c0_565 = arith.constant 0 : index
    %1714 = vector.load %arg17[%1713, %c0_565] : memref<64x5xi32, #tpu.memory_space<vmem>>, vector<8x5xi32>
    tpu.vector_store %arg17[%1713, %c0_565], %1712 {strides = array<i32>} : memref<64x5xi32, #tpu.memory_space<vmem>>, vector<8x5xi32>,
    %1715 = arith.index_cast %1615 : i32 to index
    %c0_566 = arith.constant 0 : index
    %1716 = vector.load %arg11[%1715, %c0_566] : memref<64x5xf32, #tpu.memory_space<vmem>>, vector<8x5xf32>
    %1717 = arith.addf %1709, %1716 : vector<8x5xf32>
    %c3_i32_567 = arith.constant 3 : i32
    %c8_i32_568 = arith.constant 8 : i32
    %1718 = arith.muli %c3_i32_567, %c8_i32_568 : i32
    %1719 = tpu.assume_multiple %1718, 8 : i32
    %cst_569 = arith.constant 0.000000e+00 : f32
    %1720 = vector.broadcast %cst_569 : f32 to vector<8x5xf32>
    %c0_i32_570 = arith.constant 0 : i32
    %1721 = vector.broadcast %c0_i32_570 : i32 to vector<8x5xi32>
    %1722 = vector.extract_strided_slice %1399 {offsets = [0, 0], sizes = [1, 5], strides = [1, 1]} : vector<5x5xf32> to vector<1x5xf32>
    %1723 = vector.broadcast %1722 : vector<1x5xf32> to vector<8x5xf32>
    %1724 = arith.addf %1717, %1723 : vector<8x5xf32>
    %cst_571 = arith.constant dense<0xFF800000> : vector<8xf32>
    %1725 = vector.multi_reduction <maximumf>, %1724, %cst_571 [1] : vector<8x5xf32> to vector<8xf32>
    %1726 = vector.shape_cast %1725 : vector<8xf32> to vector<8x1xf32>
    %1727 = vector.broadcast %1726 : vector<8x1xf32> to vector<8x5xf32>
    %1728 = arith.cmpf oeq, %1724, %1727 : vector<8x5xf32>
    %c5_i32_572 = arith.constant 5 : i32
    %1729 = vector.broadcast %c5_i32_572 : i32 to vector<8x5xi32>
    %1730 = arith.select %1728, %1400, %1729 : vector<8x5xi1>, vector<8x5xi32>
    %cst_573 = arith.constant dense<2147483647> : vector<8xi32>
    %1731 = vector.multi_reduction <minsi>, %1730, %cst_573 [1] : vector<8x5xi32> to vector<8xi32>
    %1732 = vector.shape_cast %1731 : vector<8xi32> to vector<8x1xi32>
    %c0_i32_574 = arith.constant 0 : i32
    %1733 = vector.broadcast %c0_i32_574 : i32 to vector<8x5xi32>
    %1734 = arith.cmpi eq, %1400, %1733 : vector<8x5xi32>
    %1735 = vector.shape_cast %1726 : vector<8x1xf32> to vector<8x1xf32>
    %1736 = vector.broadcast %1735 : vector<8x1xf32> to vector<8x5xf32>
    %1737 = arith.select %1734, %1736, %1720 : vector<8x5xi1>, vector<8x5xf32>
    %1738 = vector.shape_cast %1732 : vector<8x1xi32> to vector<8x1xi32>
    %1739 = vector.broadcast %1738 : vector<8x1xi32> to vector<8x5xi32>
    %1740 = arith.select %1734, %1739, %1721 : vector<8x5xi1>, vector<8x5xi32>
    %1741 = vector.extract_strided_slice %1399 {offsets = [1, 0], sizes = [1, 5], strides = [1, 1]} : vector<5x5xf32> to vector<1x5xf32>
    %1742 = vector.broadcast %1741 : vector<1x5xf32> to vector<8x5xf32>
    %1743 = arith.addf %1717, %1742 : vector<8x5xf32>
    %cst_575 = arith.constant dense<0xFF800000> : vector<8xf32>
    %1744 = vector.multi_reduction <maximumf>, %1743, %cst_575 [1] : vector<8x5xf32> to vector<8xf32>
    %1745 = vector.shape_cast %1744 : vector<8xf32> to vector<8x1xf32>
    %1746 = vector.broadcast %1745 : vector<8x1xf32> to vector<8x5xf32>
    %1747 = arith.cmpf oeq, %1743, %1746 : vector<8x5xf32>
    %c5_i32_576 = arith.constant 5 : i32
    %1748 = vector.broadcast %c5_i32_576 : i32 to vector<8x5xi32>
    %1749 = arith.select %1747, %1400, %1748 : vector<8x5xi1>, vector<8x5xi32>
    %cst_577 = arith.constant dense<2147483647> : vector<8xi32>
    %1750 = vector.multi_reduction <minsi>, %1749, %cst_577 [1] : vector<8x5xi32> to vector<8xi32>
    %1751 = vector.shape_cast %1750 : vector<8xi32> to vector<8x1xi32>
    %c1_i32_578 = arith.constant 1 : i32
    %1752 = vector.broadcast %c1_i32_578 : i32 to vector<8x5xi32>
    %1753 = arith.cmpi eq, %1400, %1752 : vector<8x5xi32>
    %1754 = vector.shape_cast %1745 : vector<8x1xf32> to vector<8x1xf32>
    %1755 = vector.broadcast %1754 : vector<8x1xf32> to vector<8x5xf32>
    %1756 = arith.select %1753, %1755, %1737 : vector<8x5xi1>, vector<8x5xf32>
    %1757 = vector.shape_cast %1751 : vector<8x1xi32> to vector<8x1xi32>
    %1758 = vector.broadcast %1757 : vector<8x1xi32> to vector<8x5xi32>
    %1759 = arith.select %1753, %1758, %1740 : vector<8x5xi1>, vector<8x5xi32>
    %1760 = vector.extract_strided_slice %1399 {offsets = [2, 0], sizes = [1, 5], strides = [1, 1]} : vector<5x5xf32> to vector<1x5xf32>
    %1761 = vector.broadcast %1760 : vector<1x5xf32> to vector<8x5xf32>
    %1762 = arith.addf %1717, %1761 : vector<8x5xf32>
    %cst_579 = arith.constant dense<0xFF800000> : vector<8xf32>
    %1763 = vector.multi_reduction <maximumf>, %1762, %cst_579 [1] : vector<8x5xf32> to vector<8xf32>
    %1764 = vector.shape_cast %1763 : vector<8xf32> to vector<8x1xf32>
    %1765 = vector.broadcast %1764 : vector<8x1xf32> to vector<8x5xf32>
    %1766 = arith.cmpf oeq, %1762, %1765 : vector<8x5xf32>
    %c5_i32_580 = arith.constant 5 : i32
    %1767 = vector.broadcast %c5_i32_580 : i32 to vector<8x5xi32>
    %1768 = arith.select %1766, %1400, %1767 : vector<8x5xi1>, vector<8x5xi32>
    %cst_581 = arith.constant dense<2147483647> : vector<8xi32>
    %1769 = vector.multi_reduction <minsi>, %1768, %cst_581 [1] : vector<8x5xi32> to vector<8xi32>
    %1770 = vector.shape_cast %1769 : vector<8xi32> to vector<8x1xi32>
    %c2_i32_582 = arith.constant 2 : i32
    %1771 = vector.broadcast %c2_i32_582 : i32 to vector<8x5xi32>
    %1772 = arith.cmpi eq, %1400, %1771 : vector<8x5xi32>
    %1773 = vector.shape_cast %1764 : vector<8x1xf32> to vector<8x1xf32>
    %1774 = vector.broadcast %1773 : vector<8x1xf32> to vector<8x5xf32>
    %1775 = arith.select %1772, %1774, %1756 : vector<8x5xi1>, vector<8x5xf32>
    %1776 = vector.shape_cast %1770 : vector<8x1xi32> to vector<8x1xi32>
    %1777 = vector.broadcast %1776 : vector<8x1xi32> to vector<8x5xi32>
    %1778 = arith.select %1772, %1777, %1759 : vector<8x5xi1>, vector<8x5xi32>
    %1779 = vector.extract_strided_slice %1399 {offsets = [3, 0], sizes = [1, 5], strides = [1, 1]} : vector<5x5xf32> to vector<1x5xf32>
    %1780 = vector.broadcast %1779 : vector<1x5xf32> to vector<8x5xf32>
    %1781 = arith.addf %1717, %1780 : vector<8x5xf32>
    %cst_583 = arith.constant dense<0xFF800000> : vector<8xf32>
    %1782 = vector.multi_reduction <maximumf>, %1781, %cst_583 [1] : vector<8x5xf32> to vector<8xf32>
    %1783 = vector.shape_cast %1782 : vector<8xf32> to vector<8x1xf32>
    %1784 = vector.broadcast %1783 : vector<8x1xf32> to vector<8x5xf32>
    %1785 = arith.cmpf oeq, %1781, %1784 : vector<8x5xf32>
    %c5_i32_584 = arith.constant 5 : i32
    %1786 = vector.broadcast %c5_i32_584 : i32 to vector<8x5xi32>
    %1787 = arith.select %1785, %1400, %1786 : vector<8x5xi1>, vector<8x5xi32>
    %cst_585 = arith.constant dense<2147483647> : vector<8xi32>
    %1788 = vector.multi_reduction <minsi>, %1787, %cst_585 [1] : vector<8x5xi32> to vector<8xi32>
    %1789 = vector.shape_cast %1788 : vector<8xi32> to vector<8x1xi32>
    %c3_i32_586 = arith.constant 3 : i32
    %1790 = vector.broadcast %c3_i32_586 : i32 to vector<8x5xi32>
    %1791 = arith.cmpi eq, %1400, %1790 : vector<8x5xi32>
    %1792 = vector.shape_cast %1783 : vector<8x1xf32> to vector<8x1xf32>
    %1793 = vector.broadcast %1792 : vector<8x1xf32> to vector<8x5xf32>
    %1794 = arith.select %1791, %1793, %1775 : vector<8x5xi1>, vector<8x5xf32>
    %1795 = vector.shape_cast %1789 : vector<8x1xi32> to vector<8x1xi32>
    %1796 = vector.broadcast %1795 : vector<8x1xi32> to vector<8x5xi32>
    %1797 = arith.select %1791, %1796, %1778 : vector<8x5xi1>, vector<8x5xi32>
    %1798 = vector.extract_strided_slice %1399 {offsets = [4, 0], sizes = [1, 5], strides = [1, 1]} : vector<5x5xf32> to vector<1x5xf32>
    %1799 = vector.broadcast %1798 : vector<1x5xf32> to vector<8x5xf32>
    %1800 = arith.addf %1717, %1799 : vector<8x5xf32>
    %cst_587 = arith.constant dense<0xFF800000> : vector<8xf32>
    %1801 = vector.multi_reduction <maximumf>, %1800, %cst_587 [1] : vector<8x5xf32> to vector<8xf32>
    %1802 = vector.shape_cast %1801 : vector<8xf32> to vector<8x1xf32>
    %1803 = vector.broadcast %1802 : vector<8x1xf32> to vector<8x5xf32>
    %1804 = arith.cmpf oeq, %1800, %1803 : vector<8x5xf32>
    %c5_i32_588 = arith.constant 5 : i32
    %1805 = vector.broadcast %c5_i32_588 : i32 to vector<8x5xi32>
    %1806 = arith.select %1804, %1400, %1805 : vector<8x5xi1>, vector<8x5xi32>
    %cst_589 = arith.constant dense<2147483647> : vector<8xi32>
    %1807 = vector.multi_reduction <minsi>, %1806, %cst_589 [1] : vector<8x5xi32> to vector<8xi32>
    %1808 = vector.shape_cast %1807 : vector<8xi32> to vector<8x1xi32>
    %c4_i32_590 = arith.constant 4 : i32
    %1809 = vector.broadcast %c4_i32_590 : i32 to vector<8x5xi32>
    %1810 = arith.cmpi eq, %1400, %1809 : vector<8x5xi32>
    %1811 = vector.shape_cast %1802 : vector<8x1xf32> to vector<8x1xf32>
    %1812 = vector.broadcast %1811 : vector<8x1xf32> to vector<8x5xf32>
    %1813 = arith.select %1810, %1812, %1794 : vector<8x5xi1>, vector<8x5xf32>
    %1814 = vector.shape_cast %1808 : vector<8x1xi32> to vector<8x1xi32>
    %1815 = vector.broadcast %1814 : vector<8x1xi32> to vector<8x5xi32>
    %1816 = arith.select %1810, %1815, %1797 : vector<8x5xi1>, vector<8x5xi32>
    %1817 = arith.index_cast %1719 : i32 to index
    %c0_591 = arith.constant 0 : index
    %1818 = vector.load %arg17[%1817, %c0_591] : memref<64x5xi32, #tpu.memory_space<vmem>>, vector<8x5xi32>
    tpu.vector_store %arg17[%1817, %c0_591], %1816 {strides = array<i32>} : memref<64x5xi32, #tpu.memory_space<vmem>>, vector<8x5xi32>,
    %1819 = arith.index_cast %1719 : i32 to index
    %c0_592 = arith.constant 0 : index
    %1820 = vector.load %arg11[%1819, %c0_592] : memref<64x5xf32, #tpu.memory_space<vmem>>, vector<8x5xf32>
    %1821 = arith.addf %1813, %1820 : vector<8x5xf32>
    %c4_i32_593 = arith.constant 4 : i32
    %c8_i32_594 = arith.constant 8 : i32
    %1822 = arith.muli %c4_i32_593, %c8_i32_594 : i32
    %1823 = tpu.assume_multiple %1822, 8 : i32
    %cst_595 = arith.constant 0.000000e+00 : f32
    %1824 = vector.broadcast %cst_595 : f32 to vector<8x5xf32>
    %c0_i32_596 = arith.constant 0 : i32
    %1825 = vector.broadcast %c0_i32_596 : i32 to vector<8x5xi32>
    %1826 = vector.extract_strided_slice %1399 {offsets = [0, 0], sizes = [1, 5], strides = [1, 1]} : vector<5x5xf32> to vector<1x5xf32>
    %1827 = vector.broadcast %1826 : vector<1x5xf32> to vector<8x5xf32>
    %1828 = arith.addf %1821, %1827 : vector<8x5xf32>
    %cst_597 = arith.constant dense<0xFF800000> : vector<8xf32>
    %1829 = vector.multi_reduction <maximumf>, %1828, %cst_597 [1] : vector<8x5xf32> to vector<8xf32>
    %1830 = vector.shape_cast %1829 : vector<8xf32> to vector<8x1xf32>
    %1831 = vector.broadcast %1830 : vector<8x1xf32> to vector<8x5xf32>
    %1832 = arith.cmpf oeq, %1828, %1831 : vector<8x5xf32>
    %c5_i32_598 = arith.constant 5 : i32
    %1833 = vector.broadcast %c5_i32_598 : i32 to vector<8x5xi32>
    %1834 = arith.select %1832, %1400, %1833 : vector<8x5xi1>, vector<8x5xi32>
    %cst_599 = arith.constant dense<2147483647> : vector<8xi32>
    %1835 = vector.multi_reduction <minsi>, %1834, %cst_599 [1] : vector<8x5xi32> to vector<8xi32>
    %1836 = vector.shape_cast %1835 : vector<8xi32> to vector<8x1xi32>
    %c0_i32_600 = arith.constant 0 : i32
    %1837 = vector.broadcast %c0_i32_600 : i32 to vector<8x5xi32>
    %1838 = arith.cmpi eq, %1400, %1837 : vector<8x5xi32>
    %1839 = vector.shape_cast %1830 : vector<8x1xf32> to vector<8x1xf32>
    %1840 = vector.broadcast %1839 : vector<8x1xf32> to vector<8x5xf32>
    %1841 = arith.select %1838, %1840, %1824 : vector<8x5xi1>, vector<8x5xf32>
    %1842 = vector.shape_cast %1836 : vector<8x1xi32> to vector<8x1xi32>
    %1843 = vector.broadcast %1842 : vector<8x1xi32> to vector<8x5xi32>
    %1844 = arith.select %1838, %1843, %1825 : vector<8x5xi1>, vector<8x5xi32>
    %1845 = vector.extract_strided_slice %1399 {offsets = [1, 0], sizes = [1, 5], strides = [1, 1]} : vector<5x5xf32> to vector<1x5xf32>
    %1846 = vector.broadcast %1845 : vector<1x5xf32> to vector<8x5xf32>
    %1847 = arith.addf %1821, %1846 : vector<8x5xf32>
    %cst_601 = arith.constant dense<0xFF800000> : vector<8xf32>
    %1848 = vector.multi_reduction <maximumf>, %1847, %cst_601 [1] : vector<8x5xf32> to vector<8xf32>
    %1849 = vector.shape_cast %1848 : vector<8xf32> to vector<8x1xf32>
    %1850 = vector.broadcast %1849 : vector<8x1xf32> to vector<8x5xf32>
    %1851 = arith.cmpf oeq, %1847, %1850 : vector<8x5xf32>
    %c5_i32_602 = arith.constant 5 : i32
    %1852 = vector.broadcast %c5_i32_602 : i32 to vector<8x5xi32>
    %1853 = arith.select %1851, %1400, %1852 : vector<8x5xi1>, vector<8x5xi32>
    %cst_603 = arith.constant dense<2147483647> : vector<8xi32>
    %1854 = vector.multi_reduction <minsi>, %1853, %cst_603 [1] : vector<8x5xi32> to vector<8xi32>
    %1855 = vector.shape_cast %1854 : vector<8xi32> to vector<8x1xi32>
    %c1_i32_604 = arith.constant 1 : i32
    %1856 = vector.broadcast %c1_i32_604 : i32 to vector<8x5xi32>
    %1857 = arith.cmpi eq, %1400, %1856 : vector<8x5xi32>
    %1858 = vector.shape_cast %1849 : vector<8x1xf32> to vector<8x1xf32>
    %1859 = vector.broadcast %1858 : vector<8x1xf32> to vector<8x5xf32>
    %1860 = arith.select %1857, %1859, %1841 : vector<8x5xi1>, vector<8x5xf32>
    %1861 = vector.shape_cast %1855 : vector<8x1xi32> to vector<8x1xi32>
    %1862 = vector.broadcast %1861 : vector<8x1xi32> to vector<8x5xi32>
    %1863 = arith.select %1857, %1862, %1844 : vector<8x5xi1>, vector<8x5xi32>
    %1864 = vector.extract_strided_slice %1399 {offsets = [2, 0], sizes = [1, 5], strides = [1, 1]} : vector<5x5xf32> to vector<1x5xf32>
    %1865 = vector.broadcast %1864 : vector<1x5xf32> to vector<8x5xf32>
    %1866 = arith.addf %1821, %1865 : vector<8x5xf32>
    %cst_605 = arith.constant dense<0xFF800000> : vector<8xf32>
    %1867 = vector.multi_reduction <maximumf>, %1866, %cst_605 [1] : vector<8x5xf32> to vector<8xf32>
    %1868 = vector.shape_cast %1867 : vector<8xf32> to vector<8x1xf32>
    %1869 = vector.broadcast %1868 : vector<8x1xf32> to vector<8x5xf32>
    %1870 = arith.cmpf oeq, %1866, %1869 : vector<8x5xf32>
    %c5_i32_606 = arith.constant 5 : i32
    %1871 = vector.broadcast %c5_i32_606 : i32 to vector<8x5xi32>
    %1872 = arith.select %1870, %1400, %1871 : vector<8x5xi1>, vector<8x5xi32>
    %cst_607 = arith.constant dense<2147483647> : vector<8xi32>
    %1873 = vector.multi_reduction <minsi>, %1872, %cst_607 [1] : vector<8x5xi32> to vector<8xi32>
    %1874 = vector.shape_cast %1873 : vector<8xi32> to vector<8x1xi32>
    %c2_i32_608 = arith.constant 2 : i32
    %1875 = vector.broadcast %c2_i32_608 : i32 to vector<8x5xi32>
    %1876 = arith.cmpi eq, %1400, %1875 : vector<8x5xi32>
    %1877 = vector.shape_cast %1868 : vector<8x1xf32> to vector<8x1xf32>
    %1878 = vector.broadcast %1877 : vector<8x1xf32> to vector<8x5xf32>
    %1879 = arith.select %1876, %1878, %1860 : vector<8x5xi1>, vector<8x5xf32>
    %1880 = vector.shape_cast %1874 : vector<8x1xi32> to vector<8x1xi32>
    %1881 = vector.broadcast %1880 : vector<8x1xi32> to vector<8x5xi32>
    %1882 = arith.select %1876, %1881, %1863 : vector<8x5xi1>, vector<8x5xi32>
    %1883 = vector.extract_strided_slice %1399 {offsets = [3, 0], sizes = [1, 5], strides = [1, 1]} : vector<5x5xf32> to vector<1x5xf32>
    %1884 = vector.broadcast %1883 : vector<1x5xf32> to vector<8x5xf32>
    %1885 = arith.addf %1821, %1884 : vector<8x5xf32>
    %cst_609 = arith.constant dense<0xFF800000> : vector<8xf32>
    %1886 = vector.multi_reduction <maximumf>, %1885, %cst_609 [1] : vector<8x5xf32> to vector<8xf32>
    %1887 = vector.shape_cast %1886 : vector<8xf32> to vector<8x1xf32>
    %1888 = vector.broadcast %1887 : vector<8x1xf32> to vector<8x5xf32>
    %1889 = arith.cmpf oeq, %1885, %1888 : vector<8x5xf32>
    %c5_i32_610 = arith.constant 5 : i32
    %1890 = vector.broadcast %c5_i32_610 : i32 to vector<8x5xi32>
    %1891 = arith.select %1889, %1400, %1890 : vector<8x5xi1>, vector<8x5xi32>
    %cst_611 = arith.constant dense<2147483647> : vector<8xi32>
    %1892 = vector.multi_reduction <minsi>, %1891, %cst_611 [1] : vector<8x5xi32> to vector<8xi32>
    %1893 = vector.shape_cast %1892 : vector<8xi32> to vector<8x1xi32>
    %c3_i32_612 = arith.constant 3 : i32
    %1894 = vector.broadcast %c3_i32_612 : i32 to vector<8x5xi32>
    %1895 = arith.cmpi eq, %1400, %1894 : vector<8x5xi32>
    %1896 = vector.shape_cast %1887 : vector<8x1xf32> to vector<8x1xf32>
    %1897 = vector.broadcast %1896 : vector<8x1xf32> to vector<8x5xf32>
    %1898 = arith.select %1895, %1897, %1879 : vector<8x5xi1>, vector<8x5xf32>
    %1899 = vector.shape_cast %1893 : vector<8x1xi32> to vector<8x1xi32>
    %1900 = vector.broadcast %1899 : vector<8x1xi32> to vector<8x5xi32>
    %1901 = arith.select %1895, %1900, %1882 : vector<8x5xi1>, vector<8x5xi32>
    %1902 = vector.extract_strided_slice %1399 {offsets = [4, 0], sizes = [1, 5], strides = [1, 1]} : vector<5x5xf32> to vector<1x5xf32>
    %1903 = vector.broadcast %1902 : vector<1x5xf32> to vector<8x5xf32>
    %1904 = arith.addf %1821, %1903 : vector<8x5xf32>
    %cst_613 = arith.constant dense<0xFF800000> : vector<8xf32>
    %1905 = vector.multi_reduction <maximumf>, %1904, %cst_613 [1] : vector<8x5xf32> to vector<8xf32>
    %1906 = vector.shape_cast %1905 : vector<8xf32> to vector<8x1xf32>
    %1907 = vector.broadcast %1906 : vector<8x1xf32> to vector<8x5xf32>
    %1908 = arith.cmpf oeq, %1904, %1907 : vector<8x5xf32>
    %c5_i32_614 = arith.constant 5 : i32
    %1909 = vector.broadcast %c5_i32_614 : i32 to vector<8x5xi32>
    %1910 = arith.select %1908, %1400, %1909 : vector<8x5xi1>, vector<8x5xi32>
    %cst_615 = arith.constant dense<2147483647> : vector<8xi32>
    %1911 = vector.multi_reduction <minsi>, %1910, %cst_615 [1] : vector<8x5xi32> to vector<8xi32>
    %1912 = vector.shape_cast %1911 : vector<8xi32> to vector<8x1xi32>
    %c4_i32_616 = arith.constant 4 : i32
    %1913 = vector.broadcast %c4_i32_616 : i32 to vector<8x5xi32>
    %1914 = arith.cmpi eq, %1400, %1913 : vector<8x5xi32>
    %1915 = vector.shape_cast %1906 : vector<8x1xf32> to vector<8x1xf32>
    %1916 = vector.broadcast %1915 : vector<8x1xf32> to vector<8x5xf32>
    %1917 = arith.select %1914, %1916, %1898 : vector<8x5xi1>, vector<8x5xf32>
    %1918 = vector.shape_cast %1912 : vector<8x1xi32> to vector<8x1xi32>
    %1919 = vector.broadcast %1918 : vector<8x1xi32> to vector<8x5xi32>
    %1920 = arith.select %1914, %1919, %1901 : vector<8x5xi1>, vector<8x5xi32>
    %1921 = arith.index_cast %1823 : i32 to index
    %c0_617 = arith.constant 0 : index
    %1922 = vector.load %arg17[%1921, %c0_617] : memref<64x5xi32, #tpu.memory_space<vmem>>, vector<8x5xi32>
    tpu.vector_store %arg17[%1921, %c0_617], %1920 {strides = array<i32>} : memref<64x5xi32, #tpu.memory_space<vmem>>, vector<8x5xi32>,
    %1923 = arith.index_cast %1823 : i32 to index
    %c0_618 = arith.constant 0 : index
    %1924 = vector.load %arg11[%1923, %c0_618] : memref<64x5xf32, #tpu.memory_space<vmem>>, vector<8x5xf32>
    %1925 = arith.addf %1917, %1924 : vector<8x5xf32>
    %c5_i32_619 = arith.constant 5 : i32
    %c8_i32_620 = arith.constant 8 : i32
    %1926 = arith.muli %c5_i32_619, %c8_i32_620 : i32
    %1927 = tpu.assume_multiple %1926, 8 : i32
    %cst_621 = arith.constant 0.000000e+00 : f32
    %1928 = vector.broadcast %cst_621 : f32 to vector<8x5xf32>
    %c0_i32_622 = arith.constant 0 : i32
    %1929 = vector.broadcast %c0_i32_622 : i32 to vector<8x5xi32>
    %1930 = vector.extract_strided_slice %1399 {offsets = [0, 0], sizes = [1, 5], strides = [1, 1]} : vector<5x5xf32> to vector<1x5xf32>
    %1931 = vector.broadcast %1930 : vector<1x5xf32> to vector<8x5xf32>
    %1932 = arith.addf %1925, %1931 : vector<8x5xf32>
    %cst_623 = arith.constant dense<0xFF800000> : vector<8xf32>
    %1933 = vector.multi_reduction <maximumf>, %1932, %cst_623 [1] : vector<8x5xf32> to vector<8xf32>
    %1934 = vector.shape_cast %1933 : vector<8xf32> to vector<8x1xf32>
    %1935 = vector.broadcast %1934 : vector<8x1xf32> to vector<8x5xf32>
    %1936 = arith.cmpf oeq, %1932, %1935 : vector<8x5xf32>
    %c5_i32_624 = arith.constant 5 : i32
    %1937 = vector.broadcast %c5_i32_624 : i32 to vector<8x5xi32>
    %1938 = arith.select %1936, %1400, %1937 : vector<8x5xi1>, vector<8x5xi32>
    %cst_625 = arith.constant dense<2147483647> : vector<8xi32>
    %1939 = vector.multi_reduction <minsi>, %1938, %cst_625 [1] : vector<8x5xi32> to vector<8xi32>
    %1940 = vector.shape_cast %1939 : vector<8xi32> to vector<8x1xi32>
    %c0_i32_626 = arith.constant 0 : i32
    %1941 = vector.broadcast %c0_i32_626 : i32 to vector<8x5xi32>
    %1942 = arith.cmpi eq, %1400, %1941 : vector<8x5xi32>
    %1943 = vector.shape_cast %1934 : vector<8x1xf32> to vector<8x1xf32>
    %1944 = vector.broadcast %1943 : vector<8x1xf32> to vector<8x5xf32>
    %1945 = arith.select %1942, %1944, %1928 : vector<8x5xi1>, vector<8x5xf32>
    %1946 = vector.shape_cast %1940 : vector<8x1xi32> to vector<8x1xi32>
    %1947 = vector.broadcast %1946 : vector<8x1xi32> to vector<8x5xi32>
    %1948 = arith.select %1942, %1947, %1929 : vector<8x5xi1>, vector<8x5xi32>
    %1949 = vector.extract_strided_slice %1399 {offsets = [1, 0], sizes = [1, 5], strides = [1, 1]} : vector<5x5xf32> to vector<1x5xf32>
    %1950 = vector.broadcast %1949 : vector<1x5xf32> to vector<8x5xf32>
    %1951 = arith.addf %1925, %1950 : vector<8x5xf32>
    %cst_627 = arith.constant dense<0xFF800000> : vector<8xf32>
    %1952 = vector.multi_reduction <maximumf>, %1951, %cst_627 [1] : vector<8x5xf32> to vector<8xf32>
    %1953 = vector.shape_cast %1952 : vector<8xf32> to vector<8x1xf32>
    %1954 = vector.broadcast %1953 : vector<8x1xf32> to vector<8x5xf32>
    %1955 = arith.cmpf oeq, %1951, %1954 : vector<8x5xf32>
    %c5_i32_628 = arith.constant 5 : i32
    %1956 = vector.broadcast %c5_i32_628 : i32 to vector<8x5xi32>
    %1957 = arith.select %1955, %1400, %1956 : vector<8x5xi1>, vector<8x5xi32>
    %cst_629 = arith.constant dense<2147483647> : vector<8xi32>
    %1958 = vector.multi_reduction <minsi>, %1957, %cst_629 [1] : vector<8x5xi32> to vector<8xi32>
    %1959 = vector.shape_cast %1958 : vector<8xi32> to vector<8x1xi32>
    %c1_i32_630 = arith.constant 1 : i32
    %1960 = vector.broadcast %c1_i32_630 : i32 to vector<8x5xi32>
    %1961 = arith.cmpi eq, %1400, %1960 : vector<8x5xi32>
    %1962 = vector.shape_cast %1953 : vector<8x1xf32> to vector<8x1xf32>
    %1963 = vector.broadcast %1962 : vector<8x1xf32> to vector<8x5xf32>
    %1964 = arith.select %1961, %1963, %1945 : vector<8x5xi1>, vector<8x5xf32>
    %1965 = vector.shape_cast %1959 : vector<8x1xi32> to vector<8x1xi32>
    %1966 = vector.broadcast %1965 : vector<8x1xi32> to vector<8x5xi32>
    %1967 = arith.select %1961, %1966, %1948 : vector<8x5xi1>, vector<8x5xi32>
    %1968 = vector.extract_strided_slice %1399 {offsets = [2, 0], sizes = [1, 5], strides = [1, 1]} : vector<5x5xf32> to vector<1x5xf32>
    %1969 = vector.broadcast %1968 : vector<1x5xf32> to vector<8x5xf32>
    %1970 = arith.addf %1925, %1969 : vector<8x5xf32>
    %cst_631 = arith.constant dense<0xFF800000> : vector<8xf32>
    %1971 = vector.multi_reduction <maximumf>, %1970, %cst_631 [1] : vector<8x5xf32> to vector<8xf32>
    %1972 = vector.shape_cast %1971 : vector<8xf32> to vector<8x1xf32>
    %1973 = vector.broadcast %1972 : vector<8x1xf32> to vector<8x5xf32>
    %1974 = arith.cmpf oeq, %1970, %1973 : vector<8x5xf32>
    %c5_i32_632 = arith.constant 5 : i32
    %1975 = vector.broadcast %c5_i32_632 : i32 to vector<8x5xi32>
    %1976 = arith.select %1974, %1400, %1975 : vector<8x5xi1>, vector<8x5xi32>
    %cst_633 = arith.constant dense<2147483647> : vector<8xi32>
    %1977 = vector.multi_reduction <minsi>, %1976, %cst_633 [1] : vector<8x5xi32> to vector<8xi32>
    %1978 = vector.shape_cast %1977 : vector<8xi32> to vector<8x1xi32>
    %c2_i32_634 = arith.constant 2 : i32
    %1979 = vector.broadcast %c2_i32_634 : i32 to vector<8x5xi32>
    %1980 = arith.cmpi eq, %1400, %1979 : vector<8x5xi32>
    %1981 = vector.shape_cast %1972 : vector<8x1xf32> to vector<8x1xf32>
    %1982 = vector.broadcast %1981 : vector<8x1xf32> to vector<8x5xf32>
    %1983 = arith.select %1980, %1982, %1964 : vector<8x5xi1>, vector<8x5xf32>
    %1984 = vector.shape_cast %1978 : vector<8x1xi32> to vector<8x1xi32>
    %1985 = vector.broadcast %1984 : vector<8x1xi32> to vector<8x5xi32>
    %1986 = arith.select %1980, %1985, %1967 : vector<8x5xi1>, vector<8x5xi32>
    %1987 = vector.extract_strided_slice %1399 {offsets = [3, 0], sizes = [1, 5], strides = [1, 1]} : vector<5x5xf32> to vector<1x5xf32>
    %1988 = vector.broadcast %1987 : vector<1x5xf32> to vector<8x5xf32>
    %1989 = arith.addf %1925, %1988 : vector<8x5xf32>
    %cst_635 = arith.constant dense<0xFF800000> : vector<8xf32>
    %1990 = vector.multi_reduction <maximumf>, %1989, %cst_635 [1] : vector<8x5xf32> to vector<8xf32>
    %1991 = vector.shape_cast %1990 : vector<8xf32> to vector<8x1xf32>
    %1992 = vector.broadcast %1991 : vector<8x1xf32> to vector<8x5xf32>
    %1993 = arith.cmpf oeq, %1989, %1992 : vector<8x5xf32>
    %c5_i32_636 = arith.constant 5 : i32
    %1994 = vector.broadcast %c5_i32_636 : i32 to vector<8x5xi32>
    %1995 = arith.select %1993, %1400, %1994 : vector<8x5xi1>, vector<8x5xi32>
    %cst_637 = arith.constant dense<2147483647> : vector<8xi32>
    %1996 = vector.multi_reduction <minsi>, %1995, %cst_637 [1] : vector<8x5xi32> to vector<8xi32>
    %1997 = vector.shape_cast %1996 : vector<8xi32> to vector<8x1xi32>
    %c3_i32_638 = arith.constant 3 : i32
    %1998 = vector.broadcast %c3_i32_638 : i32 to vector<8x5xi32>
    %1999 = arith.cmpi eq, %1400, %1998 : vector<8x5xi32>
    %2000 = vector.shape_cast %1991 : vector<8x1xf32> to vector<8x1xf32>
    %2001 = vector.broadcast %2000 : vector<8x1xf32> to vector<8x5xf32>
    %2002 = arith.select %1999, %2001, %1983 : vector<8x5xi1>, vector<8x5xf32>
    %2003 = vector.shape_cast %1997 : vector<8x1xi32> to vector<8x1xi32>
    %2004 = vector.broadcast %2003 : vector<8x1xi32> to vector<8x5xi32>
    %2005 = arith.select %1999, %2004, %1986 : vector<8x5xi1>, vector<8x5xi32>
    %2006 = vector.extract_strided_slice %1399 {offsets = [4, 0], sizes = [1, 5], strides = [1, 1]} : vector<5x5xf32> to vector<1x5xf32>
    %2007 = vector.broadcast %2006 : vector<1x5xf32> to vector<8x5xf32>
    %2008 = arith.addf %1925, %2007 : vector<8x5xf32>
    %cst_639 = arith.constant dense<0xFF800000> : vector<8xf32>
    %2009 = vector.multi_reduction <maximumf>, %2008, %cst_639 [1] : vector<8x5xf32> to vector<8xf32>
    %2010 = vector.shape_cast %2009 : vector<8xf32> to vector<8x1xf32>
    %2011 = vector.broadcast %2010 : vector<8x1xf32> to vector<8x5xf32>
    %2012 = arith.cmpf oeq, %2008, %2011 : vector<8x5xf32>
    %c5_i32_640 = arith.constant 5 : i32
    %2013 = vector.broadcast %c5_i32_640 : i32 to vector<8x5xi32>
    %2014 = arith.select %2012, %1400, %2013 : vector<8x5xi1>, vector<8x5xi32>
    %cst_641 = arith.constant dense<2147483647> : vector<8xi32>
    %2015 = vector.multi_reduction <minsi>, %2014, %cst_641 [1] : vector<8x5xi32> to vector<8xi32>
    %2016 = vector.shape_cast %2015 : vector<8xi32> to vector<8x1xi32>
    %c4_i32_642 = arith.constant 4 : i32
    %2017 = vector.broadcast %c4_i32_642 : i32 to vector<8x5xi32>
    %2018 = arith.cmpi eq, %1400, %2017 : vector<8x5xi32>
    %2019 = vector.shape_cast %2010 : vector<8x1xf32> to vector<8x1xf32>
    %2020 = vector.broadcast %2019 : vector<8x1xf32> to vector<8x5xf32>
    %2021 = arith.select %2018, %2020, %2002 : vector<8x5xi1>, vector<8x5xf32>
    %2022 = vector.shape_cast %2016 : vector<8x1xi32> to vector<8x1xi32>
    %2023 = vector.broadcast %2022 : vector<8x1xi32> to vector<8x5xi32>
    %2024 = arith.select %2018, %2023, %2005 : vector<8x5xi1>, vector<8x5xi32>
    %2025 = arith.index_cast %1927 : i32 to index
    %c0_643 = arith.constant 0 : index
    %2026 = vector.load %arg17[%2025, %c0_643] : memref<64x5xi32, #tpu.memory_space<vmem>>, vector<8x5xi32>
    tpu.vector_store %arg17[%2025, %c0_643], %2024 {strides = array<i32>} : memref<64x5xi32, #tpu.memory_space<vmem>>, vector<8x5xi32>,
    %2027 = arith.index_cast %1927 : i32 to index
    %c0_644 = arith.constant 0 : index
    %2028 = vector.load %arg11[%2027, %c0_644] : memref<64x5xf32, #tpu.memory_space<vmem>>, vector<8x5xf32>
    %2029 = arith.addf %2021, %2028 : vector<8x5xf32>
    %c6_i32_645 = arith.constant 6 : i32
    %c8_i32_646 = arith.constant 8 : i32
    %2030 = arith.muli %c6_i32_645, %c8_i32_646 : i32
    %2031 = tpu.assume_multiple %2030, 8 : i32
    %cst_647 = arith.constant 0.000000e+00 : f32
    %2032 = vector.broadcast %cst_647 : f32 to vector<8x5xf32>
    %c0_i32_648 = arith.constant 0 : i32
    %2033 = vector.broadcast %c0_i32_648 : i32 to vector<8x5xi32>
    %2034 = vector.extract_strided_slice %1399 {offsets = [0, 0], sizes = [1, 5], strides = [1, 1]} : vector<5x5xf32> to vector<1x5xf32>
    %2035 = vector.broadcast %2034 : vector<1x5xf32> to vector<8x5xf32>
    %2036 = arith.addf %2029, %2035 : vector<8x5xf32>
    %cst_649 = arith.constant dense<0xFF800000> : vector<8xf32>
    %2037 = vector.multi_reduction <maximumf>, %2036, %cst_649 [1] : vector<8x5xf32> to vector<8xf32>
    %2038 = vector.shape_cast %2037 : vector<8xf32> to vector<8x1xf32>
    %2039 = vector.broadcast %2038 : vector<8x1xf32> to vector<8x5xf32>
    %2040 = arith.cmpf oeq, %2036, %2039 : vector<8x5xf32>
    %c5_i32_650 = arith.constant 5 : i32
    %2041 = vector.broadcast %c5_i32_650 : i32 to vector<8x5xi32>
    %2042 = arith.select %2040, %1400, %2041 : vector<8x5xi1>, vector<8x5xi32>
    %cst_651 = arith.constant dense<2147483647> : vector<8xi32>
    %2043 = vector.multi_reduction <minsi>, %2042, %cst_651 [1] : vector<8x5xi32> to vector<8xi32>
    %2044 = vector.shape_cast %2043 : vector<8xi32> to vector<8x1xi32>
    %c0_i32_652 = arith.constant 0 : i32
    %2045 = vector.broadcast %c0_i32_652 : i32 to vector<8x5xi32>
    %2046 = arith.cmpi eq, %1400, %2045 : vector<8x5xi32>
    %2047 = vector.shape_cast %2038 : vector<8x1xf32> to vector<8x1xf32>
    %2048 = vector.broadcast %2047 : vector<8x1xf32> to vector<8x5xf32>
    %2049 = arith.select %2046, %2048, %2032 : vector<8x5xi1>, vector<8x5xf32>
    %2050 = vector.shape_cast %2044 : vector<8x1xi32> to vector<8x1xi32>
    %2051 = vector.broadcast %2050 : vector<8x1xi32> to vector<8x5xi32>
    %2052 = arith.select %2046, %2051, %2033 : vector<8x5xi1>, vector<8x5xi32>
    %2053 = vector.extract_strided_slice %1399 {offsets = [1, 0], sizes = [1, 5], strides = [1, 1]} : vector<5x5xf32> to vector<1x5xf32>
    %2054 = vector.broadcast %2053 : vector<1x5xf32> to vector<8x5xf32>
    %2055 = arith.addf %2029, %2054 : vector<8x5xf32>
    %cst_653 = arith.constant dense<0xFF800000> : vector<8xf32>
    %2056 = vector.multi_reduction <maximumf>, %2055, %cst_653 [1] : vector<8x5xf32> to vector<8xf32>
    %2057 = vector.shape_cast %2056 : vector<8xf32> to vector<8x1xf32>
    %2058 = vector.broadcast %2057 : vector<8x1xf32> to vector<8x5xf32>
    %2059 = arith.cmpf oeq, %2055, %2058 : vector<8x5xf32>
    %c5_i32_654 = arith.constant 5 : i32
    %2060 = vector.broadcast %c5_i32_654 : i32 to vector<8x5xi32>
    %2061 = arith.select %2059, %1400, %2060 : vector<8x5xi1>, vector<8x5xi32>
    %cst_655 = arith.constant dense<2147483647> : vector<8xi32>
    %2062 = vector.multi_reduction <minsi>, %2061, %cst_655 [1] : vector<8x5xi32> to vector<8xi32>
    %2063 = vector.shape_cast %2062 : vector<8xi32> to vector<8x1xi32>
    %c1_i32_656 = arith.constant 1 : i32
    %2064 = vector.broadcast %c1_i32_656 : i32 to vector<8x5xi32>
    %2065 = arith.cmpi eq, %1400, %2064 : vector<8x5xi32>
    %2066 = vector.shape_cast %2057 : vector<8x1xf32> to vector<8x1xf32>
    %2067 = vector.broadcast %2066 : vector<8x1xf32> to vector<8x5xf32>
    %2068 = arith.select %2065, %2067, %2049 : vector<8x5xi1>, vector<8x5xf32>
    %2069 = vector.shape_cast %2063 : vector<8x1xi32> to vector<8x1xi32>
    %2070 = vector.broadcast %2069 : vector<8x1xi32> to vector<8x5xi32>
    %2071 = arith.select %2065, %2070, %2052 : vector<8x5xi1>, vector<8x5xi32>
    %2072 = vector.extract_strided_slice %1399 {offsets = [2, 0], sizes = [1, 5], strides = [1, 1]} : vector<5x5xf32> to vector<1x5xf32>
    %2073 = vector.broadcast %2072 : vector<1x5xf32> to vector<8x5xf32>
    %2074 = arith.addf %2029, %2073 : vector<8x5xf32>
    %cst_657 = arith.constant dense<0xFF800000> : vector<8xf32>
    %2075 = vector.multi_reduction <maximumf>, %2074, %cst_657 [1] : vector<8x5xf32> to vector<8xf32>
    %2076 = vector.shape_cast %2075 : vector<8xf32> to vector<8x1xf32>
    %2077 = vector.broadcast %2076 : vector<8x1xf32> to vector<8x5xf32>
    %2078 = arith.cmpf oeq, %2074, %2077 : vector<8x5xf32>
    %c5_i32_658 = arith.constant 5 : i32
    %2079 = vector.broadcast %c5_i32_658 : i32 to vector<8x5xi32>
    %2080 = arith.select %2078, %1400, %2079 : vector<8x5xi1>, vector<8x5xi32>
    %cst_659 = arith.constant dense<2147483647> : vector<8xi32>
    %2081 = vector.multi_reduction <minsi>, %2080, %cst_659 [1] : vector<8x5xi32> to vector<8xi32>
    %2082 = vector.shape_cast %2081 : vector<8xi32> to vector<8x1xi32>
    %c2_i32_660 = arith.constant 2 : i32
    %2083 = vector.broadcast %c2_i32_660 : i32 to vector<8x5xi32>
    %2084 = arith.cmpi eq, %1400, %2083 : vector<8x5xi32>
    %2085 = vector.shape_cast %2076 : vector<8x1xf32> to vector<8x1xf32>
    %2086 = vector.broadcast %2085 : vector<8x1xf32> to vector<8x5xf32>
    %2087 = arith.select %2084, %2086, %2068 : vector<8x5xi1>, vector<8x5xf32>
    %2088 = vector.shape_cast %2082 : vector<8x1xi32> to vector<8x1xi32>
    %2089 = vector.broadcast %2088 : vector<8x1xi32> to vector<8x5xi32>
    %2090 = arith.select %2084, %2089, %2071 : vector<8x5xi1>, vector<8x5xi32>
    %2091 = vector.extract_strided_slice %1399 {offsets = [3, 0], sizes = [1, 5], strides = [1, 1]} : vector<5x5xf32> to vector<1x5xf32>
    %2092 = vector.broadcast %2091 : vector<1x5xf32> to vector<8x5xf32>
    %2093 = arith.addf %2029, %2092 : vector<8x5xf32>
    %cst_661 = arith.constant dense<0xFF800000> : vector<8xf32>
    %2094 = vector.multi_reduction <maximumf>, %2093, %cst_661 [1] : vector<8x5xf32> to vector<8xf32>
    %2095 = vector.shape_cast %2094 : vector<8xf32> to vector<8x1xf32>
    %2096 = vector.broadcast %2095 : vector<8x1xf32> to vector<8x5xf32>
    %2097 = arith.cmpf oeq, %2093, %2096 : vector<8x5xf32>
    %c5_i32_662 = arith.constant 5 : i32
    %2098 = vector.broadcast %c5_i32_662 : i32 to vector<8x5xi32>
    %2099 = arith.select %2097, %1400, %2098 : vector<8x5xi1>, vector<8x5xi32>
    %cst_663 = arith.constant dense<2147483647> : vector<8xi32>
    %2100 = vector.multi_reduction <minsi>, %2099, %cst_663 [1] : vector<8x5xi32> to vector<8xi32>
    %2101 = vector.shape_cast %2100 : vector<8xi32> to vector<8x1xi32>
    %c3_i32_664 = arith.constant 3 : i32
    %2102 = vector.broadcast %c3_i32_664 : i32 to vector<8x5xi32>
    %2103 = arith.cmpi eq, %1400, %2102 : vector<8x5xi32>
    %2104 = vector.shape_cast %2095 : vector<8x1xf32> to vector<8x1xf32>
    %2105 = vector.broadcast %2104 : vector<8x1xf32> to vector<8x5xf32>
    %2106 = arith.select %2103, %2105, %2087 : vector<8x5xi1>, vector<8x5xf32>
    %2107 = vector.shape_cast %2101 : vector<8x1xi32> to vector<8x1xi32>
    %2108 = vector.broadcast %2107 : vector<8x1xi32> to vector<8x5xi32>
    %2109 = arith.select %2103, %2108, %2090 : vector<8x5xi1>, vector<8x5xi32>
    %2110 = vector.extract_strided_slice %1399 {offsets = [4, 0], sizes = [1, 5], strides = [1, 1]} : vector<5x5xf32> to vector<1x5xf32>
    %2111 = vector.broadcast %2110 : vector<1x5xf32> to vector<8x5xf32>
    %2112 = arith.addf %2029, %2111 : vector<8x5xf32>
    %cst_665 = arith.constant dense<0xFF800000> : vector<8xf32>
    %2113 = vector.multi_reduction <maximumf>, %2112, %cst_665 [1] : vector<8x5xf32> to vector<8xf32>
    %2114 = vector.shape_cast %2113 : vector<8xf32> to vector<8x1xf32>
    %2115 = vector.broadcast %2114 : vector<8x1xf32> to vector<8x5xf32>
    %2116 = arith.cmpf oeq, %2112, %2115 : vector<8x5xf32>
    %c5_i32_666 = arith.constant 5 : i32
    %2117 = vector.broadcast %c5_i32_666 : i32 to vector<8x5xi32>
    %2118 = arith.select %2116, %1400, %2117 : vector<8x5xi1>, vector<8x5xi32>
    %cst_667 = arith.constant dense<2147483647> : vector<8xi32>
    %2119 = vector.multi_reduction <minsi>, %2118, %cst_667 [1] : vector<8x5xi32> to vector<8xi32>
    %2120 = vector.shape_cast %2119 : vector<8xi32> to vector<8x1xi32>
    %c4_i32_668 = arith.constant 4 : i32
    %2121 = vector.broadcast %c4_i32_668 : i32 to vector<8x5xi32>
    %2122 = arith.cmpi eq, %1400, %2121 : vector<8x5xi32>
    %2123 = vector.shape_cast %2114 : vector<8x1xf32> to vector<8x1xf32>
    %2124 = vector.broadcast %2123 : vector<8x1xf32> to vector<8x5xf32>
    %2125 = arith.select %2122, %2124, %2106 : vector<8x5xi1>, vector<8x5xf32>
    %2126 = vector.shape_cast %2120 : vector<8x1xi32> to vector<8x1xi32>
    %2127 = vector.broadcast %2126 : vector<8x1xi32> to vector<8x5xi32>
    %2128 = arith.select %2122, %2127, %2109 : vector<8x5xi1>, vector<8x5xi32>
    %2129 = arith.index_cast %2031 : i32 to index
    %c0_669 = arith.constant 0 : index
    %2130 = vector.load %arg17[%2129, %c0_669] : memref<64x5xi32, #tpu.memory_space<vmem>>, vector<8x5xi32>
    tpu.vector_store %arg17[%2129, %c0_669], %2128 {strides = array<i32>} : memref<64x5xi32, #tpu.memory_space<vmem>>, vector<8x5xi32>,
    %2131 = arith.index_cast %2031 : i32 to index
    %c0_670 = arith.constant 0 : index
    %2132 = vector.load %arg11[%2131, %c0_670] : memref<64x5xf32, #tpu.memory_space<vmem>>, vector<8x5xf32>
    %2133 = arith.addf %2125, %2132 : vector<8x5xf32>
    %c7_i32_671 = arith.constant 7 : i32
    %c8_i32_672 = arith.constant 8 : i32
    %2134 = arith.muli %c7_i32_671, %c8_i32_672 : i32
    %2135 = tpu.assume_multiple %2134, 8 : i32
    %cst_673 = arith.constant 0.000000e+00 : f32
    %2136 = vector.broadcast %cst_673 : f32 to vector<8x5xf32>
    %c0_i32_674 = arith.constant 0 : i32
    %2137 = vector.broadcast %c0_i32_674 : i32 to vector<8x5xi32>
    %2138 = vector.extract_strided_slice %1399 {offsets = [0, 0], sizes = [1, 5], strides = [1, 1]} : vector<5x5xf32> to vector<1x5xf32>
    %2139 = vector.broadcast %2138 : vector<1x5xf32> to vector<8x5xf32>
    %2140 = arith.addf %2133, %2139 : vector<8x5xf32>
    %cst_675 = arith.constant dense<0xFF800000> : vector<8xf32>
    %2141 = vector.multi_reduction <maximumf>, %2140, %cst_675 [1] : vector<8x5xf32> to vector<8xf32>
    %2142 = vector.shape_cast %2141 : vector<8xf32> to vector<8x1xf32>
    %2143 = vector.broadcast %2142 : vector<8x1xf32> to vector<8x5xf32>
    %2144 = arith.cmpf oeq, %2140, %2143 : vector<8x5xf32>
    %c5_i32_676 = arith.constant 5 : i32
    %2145 = vector.broadcast %c5_i32_676 : i32 to vector<8x5xi32>
    %2146 = arith.select %2144, %1400, %2145 : vector<8x5xi1>, vector<8x5xi32>
    %cst_677 = arith.constant dense<2147483647> : vector<8xi32>
    %2147 = vector.multi_reduction <minsi>, %2146, %cst_677 [1] : vector<8x5xi32> to vector<8xi32>
    %2148 = vector.shape_cast %2147 : vector<8xi32> to vector<8x1xi32>
    %c0_i32_678 = arith.constant 0 : i32
    %2149 = vector.broadcast %c0_i32_678 : i32 to vector<8x5xi32>
    %2150 = arith.cmpi eq, %1400, %2149 : vector<8x5xi32>
    %2151 = vector.shape_cast %2142 : vector<8x1xf32> to vector<8x1xf32>
    %2152 = vector.broadcast %2151 : vector<8x1xf32> to vector<8x5xf32>
    %2153 = arith.select %2150, %2152, %2136 : vector<8x5xi1>, vector<8x5xf32>
    %2154 = vector.shape_cast %2148 : vector<8x1xi32> to vector<8x1xi32>
    %2155 = vector.broadcast %2154 : vector<8x1xi32> to vector<8x5xi32>
    %2156 = arith.select %2150, %2155, %2137 : vector<8x5xi1>, vector<8x5xi32>
    %2157 = vector.extract_strided_slice %1399 {offsets = [1, 0], sizes = [1, 5], strides = [1, 1]} : vector<5x5xf32> to vector<1x5xf32>
    %2158 = vector.broadcast %2157 : vector<1x5xf32> to vector<8x5xf32>
    %2159 = arith.addf %2133, %2158 : vector<8x5xf32>
    %cst_679 = arith.constant dense<0xFF800000> : vector<8xf32>
    %2160 = vector.multi_reduction <maximumf>, %2159, %cst_679 [1] : vector<8x5xf32> to vector<8xf32>
    %2161 = vector.shape_cast %2160 : vector<8xf32> to vector<8x1xf32>
    %2162 = vector.broadcast %2161 : vector<8x1xf32> to vector<8x5xf32>
    %2163 = arith.cmpf oeq, %2159, %2162 : vector<8x5xf32>
    %c5_i32_680 = arith.constant 5 : i32
    %2164 = vector.broadcast %c5_i32_680 : i32 to vector<8x5xi32>
    %2165 = arith.select %2163, %1400, %2164 : vector<8x5xi1>, vector<8x5xi32>
    %cst_681 = arith.constant dense<2147483647> : vector<8xi32>
    %2166 = vector.multi_reduction <minsi>, %2165, %cst_681 [1] : vector<8x5xi32> to vector<8xi32>
    %2167 = vector.shape_cast %2166 : vector<8xi32> to vector<8x1xi32>
    %c1_i32_682 = arith.constant 1 : i32
    %2168 = vector.broadcast %c1_i32_682 : i32 to vector<8x5xi32>
    %2169 = arith.cmpi eq, %1400, %2168 : vector<8x5xi32>
    %2170 = vector.shape_cast %2161 : vector<8x1xf32> to vector<8x1xf32>
    %2171 = vector.broadcast %2170 : vector<8x1xf32> to vector<8x5xf32>
    %2172 = arith.select %2169, %2171, %2153 : vector<8x5xi1>, vector<8x5xf32>
    %2173 = vector.shape_cast %2167 : vector<8x1xi32> to vector<8x1xi32>
    %2174 = vector.broadcast %2173 : vector<8x1xi32> to vector<8x5xi32>
    %2175 = arith.select %2169, %2174, %2156 : vector<8x5xi1>, vector<8x5xi32>
    %2176 = vector.extract_strided_slice %1399 {offsets = [2, 0], sizes = [1, 5], strides = [1, 1]} : vector<5x5xf32> to vector<1x5xf32>
    %2177 = vector.broadcast %2176 : vector<1x5xf32> to vector<8x5xf32>
    %2178 = arith.addf %2133, %2177 : vector<8x5xf32>
    %cst_683 = arith.constant dense<0xFF800000> : vector<8xf32>
    %2179 = vector.multi_reduction <maximumf>, %2178, %cst_683 [1] : vector<8x5xf32> to vector<8xf32>
    %2180 = vector.shape_cast %2179 : vector<8xf32> to vector<8x1xf32>
    %2181 = vector.broadcast %2180 : vector<8x1xf32> to vector<8x5xf32>
    %2182 = arith.cmpf oeq, %2178, %2181 : vector<8x5xf32>
    %c5_i32_684 = arith.constant 5 : i32
    %2183 = vector.broadcast %c5_i32_684 : i32 to vector<8x5xi32>
    %2184 = arith.select %2182, %1400, %2183 : vector<8x5xi1>, vector<8x5xi32>
    %cst_685 = arith.constant dense<2147483647> : vector<8xi32>
    %2185 = vector.multi_reduction <minsi>, %2184, %cst_685 [1] : vector<8x5xi32> to vector<8xi32>
    %2186 = vector.shape_cast %2185 : vector<8xi32> to vector<8x1xi32>
    %c2_i32_686 = arith.constant 2 : i32
    %2187 = vector.broadcast %c2_i32_686 : i32 to vector<8x5xi32>
    %2188 = arith.cmpi eq, %1400, %2187 : vector<8x5xi32>
    %2189 = vector.shape_cast %2180 : vector<8x1xf32> to vector<8x1xf32>
    %2190 = vector.broadcast %2189 : vector<8x1xf32> to vector<8x5xf32>
    %2191 = arith.select %2188, %2190, %2172 : vector<8x5xi1>, vector<8x5xf32>
    %2192 = vector.shape_cast %2186 : vector<8x1xi32> to vector<8x1xi32>
    %2193 = vector.broadcast %2192 : vector<8x1xi32> to vector<8x5xi32>
    %2194 = arith.select %2188, %2193, %2175 : vector<8x5xi1>, vector<8x5xi32>
    %2195 = vector.extract_strided_slice %1399 {offsets = [3, 0], sizes = [1, 5], strides = [1, 1]} : vector<5x5xf32> to vector<1x5xf32>
    %2196 = vector.broadcast %2195 : vector<1x5xf32> to vector<8x5xf32>
    %2197 = arith.addf %2133, %2196 : vector<8x5xf32>
    %cst_687 = arith.constant dense<0xFF800000> : vector<8xf32>
    %2198 = vector.multi_reduction <maximumf>, %2197, %cst_687 [1] : vector<8x5xf32> to vector<8xf32>
    %2199 = vector.shape_cast %2198 : vector<8xf32> to vector<8x1xf32>
    %2200 = vector.broadcast %2199 : vector<8x1xf32> to vector<8x5xf32>
    %2201 = arith.cmpf oeq, %2197, %2200 : vector<8x5xf32>
    %c5_i32_688 = arith.constant 5 : i32
    %2202 = vector.broadcast %c5_i32_688 : i32 to vector<8x5xi32>
    %2203 = arith.select %2201, %1400, %2202 : vector<8x5xi1>, vector<8x5xi32>
    %cst_689 = arith.constant dense<2147483647> : vector<8xi32>
    %2204 = vector.multi_reduction <minsi>, %2203, %cst_689 [1] : vector<8x5xi32> to vector<8xi32>
    %2205 = vector.shape_cast %2204 : vector<8xi32> to vector<8x1xi32>
    %c3_i32_690 = arith.constant 3 : i32
    %2206 = vector.broadcast %c3_i32_690 : i32 to vector<8x5xi32>
    %2207 = arith.cmpi eq, %1400, %2206 : vector<8x5xi32>
    %2208 = vector.shape_cast %2199 : vector<8x1xf32> to vector<8x1xf32>
    %2209 = vector.broadcast %2208 : vector<8x1xf32> to vector<8x5xf32>
    %2210 = arith.select %2207, %2209, %2191 : vector<8x5xi1>, vector<8x5xf32>
    %2211 = vector.shape_cast %2205 : vector<8x1xi32> to vector<8x1xi32>
    %2212 = vector.broadcast %2211 : vector<8x1xi32> to vector<8x5xi32>
    %2213 = arith.select %2207, %2212, %2194 : vector<8x5xi1>, vector<8x5xi32>
    %2214 = vector.extract_strided_slice %1399 {offsets = [4, 0], sizes = [1, 5], strides = [1, 1]} : vector<5x5xf32> to vector<1x5xf32>
    %2215 = vector.broadcast %2214 : vector<1x5xf32> to vector<8x5xf32>
    %2216 = arith.addf %2133, %2215 : vector<8x5xf32>
    %cst_691 = arith.constant dense<0xFF800000> : vector<8xf32>
    %2217 = vector.multi_reduction <maximumf>, %2216, %cst_691 [1] : vector<8x5xf32> to vector<8xf32>
    %2218 = vector.shape_cast %2217 : vector<8xf32> to vector<8x1xf32>
    %2219 = vector.broadcast %2218 : vector<8x1xf32> to vector<8x5xf32>
    %2220 = arith.cmpf oeq, %2216, %2219 : vector<8x5xf32>
    %c5_i32_692 = arith.constant 5 : i32
    %2221 = vector.broadcast %c5_i32_692 : i32 to vector<8x5xi32>
    %2222 = arith.select %2220, %1400, %2221 : vector<8x5xi1>, vector<8x5xi32>
    %cst_693 = arith.constant dense<2147483647> : vector<8xi32>
    %2223 = vector.multi_reduction <minsi>, %2222, %cst_693 [1] : vector<8x5xi32> to vector<8xi32>
    %2224 = vector.shape_cast %2223 : vector<8xi32> to vector<8x1xi32>
    %c4_i32_694 = arith.constant 4 : i32
    %2225 = vector.broadcast %c4_i32_694 : i32 to vector<8x5xi32>
    %2226 = arith.cmpi eq, %1400, %2225 : vector<8x5xi32>
    %2227 = vector.shape_cast %2218 : vector<8x1xf32> to vector<8x1xf32>
    %2228 = vector.broadcast %2227 : vector<8x1xf32> to vector<8x5xf32>
    %2229 = arith.select %2226, %2228, %2210 : vector<8x5xi1>, vector<8x5xf32>
    %2230 = vector.shape_cast %2224 : vector<8x1xi32> to vector<8x1xi32>
    %2231 = vector.broadcast %2230 : vector<8x1xi32> to vector<8x5xi32>
    %2232 = arith.select %2226, %2231, %2213 : vector<8x5xi1>, vector<8x5xi32>
    %2233 = arith.index_cast %2135 : i32 to index
    %c0_695 = arith.constant 0 : index
    %2234 = vector.load %arg17[%2233, %c0_695] : memref<64x5xi32, #tpu.memory_space<vmem>>, vector<8x5xi32>
    tpu.vector_store %arg17[%2233, %c0_695], %2232 {strides = array<i32>} : memref<64x5xi32, #tpu.memory_space<vmem>>, vector<8x5xi32>,
    %2235 = arith.index_cast %2135 : i32 to index
    %c0_696 = arith.constant 0 : index
    %2236 = vector.load %arg11[%2235, %c0_696] : memref<64x5xf32, #tpu.memory_space<vmem>>, vector<8x5xf32>
    %2237 = arith.addf %2229, %2236 : vector<8x5xf32>
    %c8_i32_697 = arith.constant 8 : i32
    %2238 = vector.extract_strided_slice %1399 {offsets = [4, 0], sizes = [1, 5], strides = [1, 1]} : vector<5x5xf32> to vector<1x5xf32>
    %2239 = vector.broadcast %2238 : vector<1x5xf32> to vector<8x5xf32>
    %2240 = arith.addf %2237, %2239 : vector<8x5xf32>
    %cst_698 = arith.constant dense<0xFF800000> : vector<8xf32>
    %2241 = vector.multi_reduction <maximumf>, %2240, %cst_698 [1] : vector<8x5xf32> to vector<8xf32>
    %2242 = vector.shape_cast %2241 : vector<8xf32> to vector<8x1xf32>
    %2243 = vector.broadcast %2242 : vector<8x1xf32> to vector<8x5xf32>
    %2244 = arith.cmpf oeq, %2240, %2243 : vector<8x5xf32>
    %c5_i32_699 = arith.constant 5 : i32
    %2245 = vector.broadcast %c5_i32_699 : i32 to vector<8x5xi32>
    %2246 = arith.select %2244, %1400, %2245 : vector<8x5xi1>, vector<8x5xi32>
    %cst_700 = arith.constant dense<2147483647> : vector<8xi32>
    %2247 = vector.multi_reduction <minsi>, %2246, %cst_700 [1] : vector<8x5xi32> to vector<8xi32>
    %2248 = vector.shape_cast %2247 : vector<8xi32> to vector<8x1xi32>
    %c0_701 = arith.constant 0 : index
    %c0_702 = arith.constant 0 : index
    %2249 = vector.load %arg12[%c0_701, %c0_702] : memref<8x1xf32, #tpu.memory_space<vmem>>, vector<8x1xf32>
    tpu.vector_store %arg12[%c0_701, %c0_702], %2242 {strides = array<i32>} : memref<8x1xf32, #tpu.memory_space<vmem>>, vector<8x1xf32>,
    %2250 = tpu.iota {dimensions = array<i32: 1>} : vector<8x8xi32>
    %c7_i32_703 = arith.constant 7 : i32
    %2251 = vector.broadcast %c7_i32_703 : i32 to vector<8x8xi32>
    %2252 = arith.cmpi eq, %2250, %2251 : vector<8x8xi32>
    %c0_i32_704 = arith.constant 0 : i32
    %2253 = vector.shape_cast %2248 : vector<8x1xi32> to vector<8x1xi32>
    %2254 = vector.broadcast %2253 : vector<8x1xi32> to vector<8x8xi32>
    %2255 = vector.broadcast %c0_i32_704 : i32 to vector<8x8xi32>
    %2256 = arith.select %2252, %2254, %2255 : vector<8x8xi1>, vector<8x8xi32>
    %c0_i32_705 = arith.constant 0 : i32
    %c7_i32_706 = arith.constant 7 : i32
    %2257 = arith.subi %c7_i32_706, %c0_i32_705 : i32
    %c8_i32_707 = arith.constant 8 : i32
    %2258 = arith.muli %2257, %c8_i32_707 : i32
    %2259 = tpu.assume_multiple %2258, 8 : i32
    %2260 = arith.index_cast %2259 : i32 to index
    %c0_708 = arith.constant 0 : index
    %2261 = vector.load %arg17[%2260, %c0_708] : memref<64x5xi32, #tpu.memory_space<vmem>>, vector<8x5xi32>
    %2262 = vector.broadcast %2248 : vector<8x1xi32> to vector<8x5xi32>
    %2263 = arith.cmpi eq, %1400, %2262 : vector<8x5xi32>
    %c0_i32_709 = arith.constant 0 : i32
    %2264 = vector.broadcast %c0_i32_709 : i32 to vector<8x5xi32>
    %2265 = arith.select %2263, %2261, %2264 : vector<8x5xi1>, vector<8x5xi32>
    %cst_710 = arith.constant dense<0> : vector<8xi32>
    %2266 = vector.multi_reduction <add>, %2265, %cst_710 [1] : vector<8x5xi32> to vector<8xi32>
    %2267 = vector.shape_cast %2266 : vector<8xi32> to vector<8x1xi32>
    %c1_i32_711 = arith.constant 1 : i32
    %2268 = arith.subi %2257, %c1_i32_711 : i32
    %2269 = vector.broadcast %2268 : i32 to vector<8x8xi32>
    %2270 = arith.cmpi eq, %2250, %2269 : vector<8x8xi32>
    %2271 = vector.shape_cast %2267 : vector<8x1xi32> to vector<8x1xi32>
    %2272 = vector.broadcast %2271 : vector<8x1xi32> to vector<8x8xi32>
    %2273 = arith.select %2270, %2272, %2256 : vector<8x8xi1>, vector<8x8xi32>
    %c1_i32_712 = arith.constant 1 : i32
    %c7_i32_713 = arith.constant 7 : i32
    %2274 = arith.subi %c7_i32_713, %c1_i32_712 : i32
    %c8_i32_714 = arith.constant 8 : i32
    %2275 = arith.muli %2274, %c8_i32_714 : i32
    %2276 = tpu.assume_multiple %2275, 8 : i32
    %2277 = arith.index_cast %2276 : i32 to index
    %c0_715 = arith.constant 0 : index
    %2278 = vector.load %arg17[%2277, %c0_715] : memref<64x5xi32, #tpu.memory_space<vmem>>, vector<8x5xi32>
    %2279 = vector.broadcast %2267 : vector<8x1xi32> to vector<8x5xi32>
    %2280 = arith.cmpi eq, %1400, %2279 : vector<8x5xi32>
    %c0_i32_716 = arith.constant 0 : i32
    %2281 = vector.broadcast %c0_i32_716 : i32 to vector<8x5xi32>
    %2282 = arith.select %2280, %2278, %2281 : vector<8x5xi1>, vector<8x5xi32>
    %cst_717 = arith.constant dense<0> : vector<8xi32>
    %2283 = vector.multi_reduction <add>, %2282, %cst_717 [1] : vector<8x5xi32> to vector<8xi32>
    %2284 = vector.shape_cast %2283 : vector<8xi32> to vector<8x1xi32>
    %c1_i32_718 = arith.constant 1 : i32
    %2285 = arith.subi %2274, %c1_i32_718 : i32
    %2286 = vector.broadcast %2285 : i32 to vector<8x8xi32>
    %2287 = arith.cmpi eq, %2250, %2286 : vector<8x8xi32>
    %2288 = vector.shape_cast %2284 : vector<8x1xi32> to vector<8x1xi32>
    %2289 = vector.broadcast %2288 : vector<8x1xi32> to vector<8x8xi32>
    %2290 = arith.select %2287, %2289, %2273 : vector<8x8xi1>, vector<8x8xi32>
    %c2_i32_719 = arith.constant 2 : i32
    %c7_i32_720 = arith.constant 7 : i32
    %2291 = arith.subi %c7_i32_720, %c2_i32_719 : i32
    %c8_i32_721 = arith.constant 8 : i32
    %2292 = arith.muli %2291, %c8_i32_721 : i32
    %2293 = tpu.assume_multiple %2292, 8 : i32
    %2294 = arith.index_cast %2293 : i32 to index
    %c0_722 = arith.constant 0 : index
    %2295 = vector.load %arg17[%2294, %c0_722] : memref<64x5xi32, #tpu.memory_space<vmem>>, vector<8x5xi32>
    %2296 = vector.broadcast %2284 : vector<8x1xi32> to vector<8x5xi32>
    %2297 = arith.cmpi eq, %1400, %2296 : vector<8x5xi32>
    %c0_i32_723 = arith.constant 0 : i32
    %2298 = vector.broadcast %c0_i32_723 : i32 to vector<8x5xi32>
    %2299 = arith.select %2297, %2295, %2298 : vector<8x5xi1>, vector<8x5xi32>
    %cst_724 = arith.constant dense<0> : vector<8xi32>
    %2300 = vector.multi_reduction <add>, %2299, %cst_724 [1] : vector<8x5xi32> to vector<8xi32>
    %2301 = vector.shape_cast %2300 : vector<8xi32> to vector<8x1xi32>
    %c1_i32_725 = arith.constant 1 : i32
    %2302 = arith.subi %2291, %c1_i32_725 : i32
    %2303 = vector.broadcast %2302 : i32 to vector<8x8xi32>
    %2304 = arith.cmpi eq, %2250, %2303 : vector<8x8xi32>
    %2305 = vector.shape_cast %2301 : vector<8x1xi32> to vector<8x1xi32>
    %2306 = vector.broadcast %2305 : vector<8x1xi32> to vector<8x8xi32>
    %2307 = arith.select %2304, %2306, %2290 : vector<8x8xi1>, vector<8x8xi32>
    %c3_i32_726 = arith.constant 3 : i32
    %c7_i32_727 = arith.constant 7 : i32
    %2308 = arith.subi %c7_i32_727, %c3_i32_726 : i32
    %c8_i32_728 = arith.constant 8 : i32
    %2309 = arith.muli %2308, %c8_i32_728 : i32
    %2310 = tpu.assume_multiple %2309, 8 : i32
    %2311 = arith.index_cast %2310 : i32 to index
    %c0_729 = arith.constant 0 : index
    %2312 = vector.load %arg17[%2311, %c0_729] : memref<64x5xi32, #tpu.memory_space<vmem>>, vector<8x5xi32>
    %2313 = vector.broadcast %2301 : vector<8x1xi32> to vector<8x5xi32>
    %2314 = arith.cmpi eq, %1400, %2313 : vector<8x5xi32>
    %c0_i32_730 = arith.constant 0 : i32
    %2315 = vector.broadcast %c0_i32_730 : i32 to vector<8x5xi32>
    %2316 = arith.select %2314, %2312, %2315 : vector<8x5xi1>, vector<8x5xi32>
    %cst_731 = arith.constant dense<0> : vector<8xi32>
    %2317 = vector.multi_reduction <add>, %2316, %cst_731 [1] : vector<8x5xi32> to vector<8xi32>
    %2318 = vector.shape_cast %2317 : vector<8xi32> to vector<8x1xi32>
    %c1_i32_732 = arith.constant 1 : i32
    %2319 = arith.subi %2308, %c1_i32_732 : i32
    %2320 = vector.broadcast %2319 : i32 to vector<8x8xi32>
    %2321 = arith.cmpi eq, %2250, %2320 : vector<8x8xi32>
    %2322 = vector.shape_cast %2318 : vector<8x1xi32> to vector<8x1xi32>
    %2323 = vector.broadcast %2322 : vector<8x1xi32> to vector<8x8xi32>
    %2324 = arith.select %2321, %2323, %2307 : vector<8x8xi1>, vector<8x8xi32>
    %c4_i32_733 = arith.constant 4 : i32
    %c7_i32_734 = arith.constant 7 : i32
    %2325 = arith.subi %c7_i32_734, %c4_i32_733 : i32
    %c8_i32_735 = arith.constant 8 : i32
    %2326 = arith.muli %2325, %c8_i32_735 : i32
    %2327 = tpu.assume_multiple %2326, 8 : i32
    %2328 = arith.index_cast %2327 : i32 to index
    %c0_736 = arith.constant 0 : index
    %2329 = vector.load %arg17[%2328, %c0_736] : memref<64x5xi32, #tpu.memory_space<vmem>>, vector<8x5xi32>
    %2330 = vector.broadcast %2318 : vector<8x1xi32> to vector<8x5xi32>
    %2331 = arith.cmpi eq, %1400, %2330 : vector<8x5xi32>
    %c0_i32_737 = arith.constant 0 : i32
    %2332 = vector.broadcast %c0_i32_737 : i32 to vector<8x5xi32>
    %2333 = arith.select %2331, %2329, %2332 : vector<8x5xi1>, vector<8x5xi32>
    %cst_738 = arith.constant dense<0> : vector<8xi32>
    %2334 = vector.multi_reduction <add>, %2333, %cst_738 [1] : vector<8x5xi32> to vector<8xi32>
    %2335 = vector.shape_cast %2334 : vector<8xi32> to vector<8x1xi32>
    %c1_i32_739 = arith.constant 1 : i32
    %2336 = arith.subi %2325, %c1_i32_739 : i32
    %2337 = vector.broadcast %2336 : i32 to vector<8x8xi32>
    %2338 = arith.cmpi eq, %2250, %2337 : vector<8x8xi32>
    %2339 = vector.shape_cast %2335 : vector<8x1xi32> to vector<8x1xi32>
    %2340 = vector.broadcast %2339 : vector<8x1xi32> to vector<8x8xi32>
    %2341 = arith.select %2338, %2340, %2324 : vector<8x8xi1>, vector<8x8xi32>
    %c5_i32_740 = arith.constant 5 : i32
    %c7_i32_741 = arith.constant 7 : i32
    %2342 = arith.subi %c7_i32_741, %c5_i32_740 : i32
    %c8_i32_742 = arith.constant 8 : i32
    %2343 = arith.muli %2342, %c8_i32_742 : i32
    %2344 = tpu.assume_multiple %2343, 8 : i32
    %2345 = arith.index_cast %2344 : i32 to index
    %c0_743 = arith.constant 0 : index
    %2346 = vector.load %arg17[%2345, %c0_743] : memref<64x5xi32, #tpu.memory_space<vmem>>, vector<8x5xi32>
    %2347 = vector.broadcast %2335 : vector<8x1xi32> to vector<8x5xi32>
    %2348 = arith.cmpi eq, %1400, %2347 : vector<8x5xi32>
    %c0_i32_744 = arith.constant 0 : i32
    %2349 = vector.broadcast %c0_i32_744 : i32 to vector<8x5xi32>
    %2350 = arith.select %2348, %2346, %2349 : vector<8x5xi1>, vector<8x5xi32>
    %cst_745 = arith.constant dense<0> : vector<8xi32>
    %2351 = vector.multi_reduction <add>, %2350, %cst_745 [1] : vector<8x5xi32> to vector<8xi32>
    %2352 = vector.shape_cast %2351 : vector<8xi32> to vector<8x1xi32>
    %c1_i32_746 = arith.constant 1 : i32
    %2353 = arith.subi %2342, %c1_i32_746 : i32
    %2354 = vector.broadcast %2353 : i32 to vector<8x8xi32>
    %2355 = arith.cmpi eq, %2250, %2354 : vector<8x8xi32>
    %2356 = vector.shape_cast %2352 : vector<8x1xi32> to vector<8x1xi32>
    %2357 = vector.broadcast %2356 : vector<8x1xi32> to vector<8x8xi32>
    %2358 = arith.select %2355, %2357, %2341 : vector<8x8xi1>, vector<8x8xi32>
    %c6_i32_747 = arith.constant 6 : i32
    %c7_i32_748 = arith.constant 7 : i32
    %2359 = arith.subi %c7_i32_748, %c6_i32_747 : i32
    %c8_i32_749 = arith.constant 8 : i32
    %2360 = arith.muli %2359, %c8_i32_749 : i32
    %2361 = tpu.assume_multiple %2360, 8 : i32
    %2362 = arith.index_cast %2361 : i32 to index
    %c0_750 = arith.constant 0 : index
    %2363 = vector.load %arg17[%2362, %c0_750] : memref<64x5xi32, #tpu.memory_space<vmem>>, vector<8x5xi32>
    %2364 = vector.broadcast %2352 : vector<8x1xi32> to vector<8x5xi32>
    %2365 = arith.cmpi eq, %1400, %2364 : vector<8x5xi32>
    %c0_i32_751 = arith.constant 0 : i32
    %2366 = vector.broadcast %c0_i32_751 : i32 to vector<8x5xi32>
    %2367 = arith.select %2365, %2363, %2366 : vector<8x5xi1>, vector<8x5xi32>
    %cst_752 = arith.constant dense<0> : vector<8xi32>
    %2368 = vector.multi_reduction <add>, %2367, %cst_752 [1] : vector<8x5xi32> to vector<8xi32>
    %2369 = vector.shape_cast %2368 : vector<8xi32> to vector<8x1xi32>
    %c1_i32_753 = arith.constant 1 : i32
    %2370 = arith.subi %2359, %c1_i32_753 : i32
    %2371 = vector.broadcast %2370 : i32 to vector<8x8xi32>
    %2372 = arith.cmpi eq, %2250, %2371 : vector<8x8xi32>
    %2373 = vector.shape_cast %2369 : vector<8x1xi32> to vector<8x1xi32>
    %2374 = vector.broadcast %2373 : vector<8x1xi32> to vector<8x8xi32>
    %2375 = arith.select %2372, %2374, %2358 : vector<8x8xi1>, vector<8x8xi32>
    %c7_i32_754 = arith.constant 7 : i32
    %c0_755 = arith.constant 0 : index
    %c0_756 = arith.constant 0 : index
    %2376 = vector.load %arg13[%c0_755, %c0_756] : memref<8x8xi32, #tpu.memory_space<vmem>>, vector<8x8xi32>
    tpu.vector_store %arg13[%c0_755, %c0_756], %2375 {strides = array<i32>} : memref<8x8xi32, #tpu.memory_space<vmem>>, vector<8x8xi32>,
    return
  }
  func.func @transform_0(%arg0: i32, %arg1: memref<16x8xi32, #tpu.memory_space<smem>>) -> (i32, i32) {
    %c0_i32 = arith.constant 0 : i32
    %c0_i32_0 = arith.constant 0 : i32
    %c0_i32_1 = arith.constant 0 : i32
    return %c0_i32, %c0_i32_0 : i32, i32
  }
  func.func @transform_1(%arg0: i32, %arg1: memref<16x8xi32, #tpu.memory_space<smem>>) -> (i32, i32) {
    %c0_i32 = arith.constant 0 : i32
    %c0_i32_0 = arith.constant 0 : i32
    %c0_i32_1 = arith.constant 0 : i32
    return %c0_i32, %c0_i32_0 : i32, i32
  }
  func.func @transform_2(%arg0: i32, %arg1: memref<16x8xi32, #tpu.memory_space<smem>>) -> (i32, i32) {
    %c0_i32 = arith.constant 0 : i32
    %c0_i32_0 = arith.constant 0 : i32
    %c0_i32_1 = arith.constant 0 : i32
    return %c0_i32, %c0_i32_0 : i32, i32
  }
  func.func @transform_3(%arg0: i32, %arg1: memref<16x8xi32, #tpu.memory_space<smem>>) -> (i32, i32) {
    %c0_i32 = arith.constant 0 : i32
    %c0_i32_0 = arith.constant 0 : i32
    %c0_i32_1 = arith.constant 0 : i32
    return %c0_i32, %c0_i32_0 : i32, i32
  }
  func.func @transform_4(%arg0: i32, %arg1: memref<16x8xi32, #tpu.memory_space<smem>>) -> (i32, i32) {
    %c0_i32 = arith.constant 0 : i32
    %c0_i32_0 = arith.constant 0 : i32
    %c0_i32_1 = arith.constant 0 : i32
    return %c0_i32, %c0_i32_0 : i32, i32
  }
  func.func @transform_5(%arg0: i32, %arg1: memref<16x8xi32, #tpu.memory_space<smem>>) -> (i32, i32) {
    %c0_i32 = arith.constant 0 : i32
    %c0_i32_0 = arith.constant 0 : i32
    %c0_i32_1 = arith.constant 0 : i32
    return %c0_i32, %c0_i32_0 : i32, i32
  }
  func.func @transform_6(%arg0: i32, %arg1: memref<16x8xi32, #tpu.memory_space<smem>>) -> (i32, i32) {
    %c0_i32 = arith.constant 0 : i32
    %c0_i32_0 = arith.constant 0 : i32
    %c0_i32_1 = arith.constant 0 : i32
    return %c0_i32, %c0_i32_0 : i32, i32
  }
  func.func @transform_7(%arg0: i32, %arg1: memref<16x8xi32, #tpu.memory_space<smem>>) -> (i32, i32) {
    %c0_i32 = arith.constant 0 : i32
    %c0_i32_0 = arith.constant 0 : i32
    %c0_i32_1 = arith.constant 0 : i32
    return %c0_i32, %c0_i32_0 : i32, i32
  }
  func.func @transform_8(%arg0: i32, %arg1: memref<16x8xi32, #tpu.memory_space<smem>>) -> (i32, i32) {
    %c0_i32 = arith.constant 0 : i32
    %c0_i32_0 = arith.constant 0 : i32
    %c0_i32_1 = arith.constant 0 : i32
    return %c0_i32, %c0_i32_0 : i32, i32
  }
  func.func @transform_9(%arg0: i32, %arg1: memref<16x8xi32, #tpu.memory_space<smem>>) -> (i32, i32) {
    %c0_i32 = arith.constant 0 : i32
    %c0_i32_0 = arith.constant 0 : i32
    return %arg0, %c0_i32 : i32, i32
  }
  func.func @transform_10(%arg0: i32, %arg1: memref<16x8xi32, #tpu.memory_space<smem>>) -> (i32, i32) {
    %c0_i32 = arith.constant 0 : i32
    %c0_i32_0 = arith.constant 0 : i32
    return %arg0, %c0_i32 : i32, i32
  }
  func.func @transform_11(%arg0: i32, %arg1: memref<16x8xi32, #tpu.memory_space<smem>>) -> (i32, i32) {
    %c0_i32 = arith.constant 0 : i32
    %c0_i32_0 = arith.constant 0 : i32
    return %arg0, %c0_i32 : i32, i32
  }
}

</mosaic_0001>

<bundles_post_ra>
// kernel: tpu_custom_call.1
= control target key start
LH: loop header
LB: loop body
LE: loop exit
PB: predicated region body
PF: predicated region fallthrough
CT: control target
= control target key end

     0   :  { %s12581_s0 = inlined_call_operand.vmem [shape: s32[16,8], index: 0, kind: input, shape index: {}]   ;;  %s12582_s1 = inlined_call_operand.vmem [shape: f32[16,128], index: 1, kind: input, shape index: {}]   ;;  %s12583_s2 = inlined_call_operand.vmem [shape: f32[16,128], index: 2, kind: input, shape index: {}]   ;;  %s12584_s3 = inlined_call_operand.vmem [shape: f32[32,128], index: 3, kind: input, shape index: {}]   ;;  %s12585_s4 = inlined_call_operand.vmem [shape: f32[8,32], index: 4, kind: input, shape index: {}]   ;;  %s12586_s5 = inlined_call_operand.vmem [shape: f32[8,32], index: 5, kind: input, shape index: {}]   ;;  %s12587_s6 = inlined_call_operand.vmem [shape: f32[32,5], index: 6, kind: input, shape index: {}]   ;;  %s12588_s7 = inlined_call_operand.vmem [shape: f32[32,5], index: 7, kind: input, shape index: {}]   ;;  %s12589_s8 = inlined_call_operand.vmem [shape: f32[1,5], index: 8, kind: input, shape index: {}]   ;;  %s12590_s9 = inlined_call_operand.vmem [shape: f32[5,5], index: 9, kind: input, shape index: {}]   ;;  %s12591_s10 = inlined_call_operand.vmem [shape: f32[128,5], index: 10, kind: output, shape index: {0}]   ;;  %s12592_s11 = inlined_call_operand.vmem [shape: f32[16,1], index: 11, kind: output, shape index: {1}]   ;;  %s12593_s12 = inlined_call_operand.vmem [shape: s32[16,8], index: 12, kind: output, shape index: {2}]  }
   0x1   :  { %12710 = sst [smem:[#allocation44_spill]] %s12584_s3  ;;  %s18_s23 = sshll.u32 %s12581_s0, 4  ;;  %s19_s23 = int_to_ptr.vmem [resolvable:$true] %s18_s23 }
   0x2   :  { %12711 = sst [smem:[#allocation45_spill]] %s12585_s4  ;;  %s9489_s24 = scalar_lea.vmem %s19_s23, 256 }
   0x3   :  { %12712 = sst [smem:[#allocation46_spill]] %s12586_s5  ;;  %p9490_p0 = scmp.ne.s32.totalorder %s19_s23, %s9489_s24 }
   0x4   :  { %12713 = sst [smem:[#allocation47_spill]] %s12587_s6  ;;  %p9494_p1 = scmp.lt.s32.totalorder %s19_s23, %s19_s23 }
   0x5   :  { %12714 = sst [smem:[#allocation48_spill]] %s12588_s7  ;;  %p9495_p2 = scmp.lt.s32.totalorder %s9489_s24, %s9489_s24 }
   0x6   :  { %12715 = sst [smem:[#allocation49_spill]] %s12589_s8 }
   0x7   :  { %12716 = sst [smem:[#allocation50_spill]] %s12590_s9  ;;  %p9496_p3 = por %p9495_p2, %p9494_p1 }
   0x8   :  { %12717 = sst [smem:[#allocation51_spill]] %s12591_s10 }
   0x9   :  { %12718 = sst [smem:[#allocation52_spill]] %s12592_s11  ;;  %p9497_p4 = pnand %p9496_p3, %p9490_p0 }
   0xa   :  { %12719 = sst [smem:[#allocation53_spill]] %s12593_s12 }
   0xb   :  { %9500 = shalt.err (!%p9497_p4)  }
   0xc   :  { %s9511_s25 = smov [#allocation7]  }
   0xd   :  { %21 = dma.vmem_to_smem %s19_s23, 256, %s9511_s25, [#allocation6] }
   0xe   :  { %9505 = dma.done.wait [#allocation6], 256 }
   0xf   :  { %9506 = vsyncadd [#allocation6], 4294967040 }
  0x10   :  { %23 = sfence }
  0x11   :  { %s9585_s26 = smov 0  }
  0x12 LB: > { %12720 = sst [smem:[#allocation9_spill]] %s9509_s26  ;;  %s9591_s0 = sadd.s32 4294967295, %s9509_s26   ;;  %s9509_s26 = sphi %s9585_s26, %s29_s26  }
  0x13   : > { %12721 = sst [smem:[#allocation10_spill]] %s9591_s0  ;;  %p8205_p5 = scmp.ge.s32.totalorder %s9509_s26, 1 }
  0x14   : > { %p339_p6 = scmp.lt.s32.totalorder %s9509_s26, 3 }
  0x16   : > { %p340_p7 = pnand %p8205_p5, %p339_p6 }
  0x18   : > { %343 = sbr.rel (%p340_p7) target bundleno = 8700 (0x21fc), region = 56 }
  0x1d   : > { %s12722_s3 = sld [smem:[#allocation44_spill]]  ;;  %vm987_vm0 = vcmask 261120   ;;  %v9512_v3 = vmov 0.0   ;;  %vm9513_vm1 = vmmov 0   ;;  %s9748_s19 = sshll.u32 %s9591_s0, 10  ;;  %vm6824_vm3 = vcmask 39936  }
  0x1e   : > { %8643 = vmatprep.subr.mxu0 %v9512_v3  ;;  %8654 = vmatprep.subr.mxu1 %v9512_v3  ;;  %s12723_s4 = sld [smem:[#allocation45_spill]]  ;;  %s9751_s20 = sadd.s32 128, %s9748_s19 }
  0x1f   : > { %8651 = vmatprep.mubr.msk.f32.mxu0 %vm9513_vm1, %v9512_v3  ;;  %8662 = vmatprep.mubr.msk.f32.mxu1 %vm9513_vm1, %v9512_v3  ;;  %12724 = sst [smem:[#allocation11_spill]] %s9751_s20  ;;  %s9754_s21 = sadd.s32 256, %s9748_s19 }
  0x20   : > { %12725 = sst [smem:[#allocation12_spill]] %s9754_s21  ;;  %s12594_s22 = sadd.s32 7, %s9748_s19 }
  0x21   : > { %s12596_s23 = sadd.s32 7, %s9751_s20  ;;  %s398_s24 = sld [smem:[#allocation7 + %s9748_s19]] }
  0x22   : > { %s12597_s25 = sadd.s32 7, %s9754_s21  ;;  %s400_s27 = sld [smem:[#allocation7 + %s12594_s22]] }
  0x23   : > { %v983_v0 = vld [vmem:[%s12722_s3 + $0x18] sm:$0xff]  ;;  %v982_v1 = vld [vmem:[%s12722_s3 + $0x10] sm:$0xff]  ;;  %v981_v2 = vld [vmem:[%s12722_s3 + $0x8] sm:$0xff]  ;;  %s9763_s28 = sadd.s32 384, %s9748_s19  ;;  %s409_s29 = sld [smem:[#allocation7 + %s9751_s20]] }
  0x24   : > { %v9605_v4 = vand.u32 4294901760, %v983_v0  ;;  %v9607_v5 = vand.u32 4294901760, %v982_v1  ;;  %v9609_v6 = vand.u32 4294901760, %v981_v2  ;;  %v980_v7 = vld [vmem:[%s12722_s3] sm:$0xff]  ;;  %s411_s13 = sld [smem:[#allocation7 + %s12596_s23]]  ;;  %s9770_s14 = sadd.s32 512, %s9748_s19 }
  0x25   : > { %v984_v8 = vld [vmem:[%s12723_s4] sm:$0xff]  ;;  %v9618_v9 = vand.u32 4294901760, %v980_v7  ;;  %s420_s15 = sld [smem:[#allocation7 + %s9754_s21]]  ;;  %s9777_s18 = sadd.s32 640, %s9748_s19 }
  0x26   : > { %v989_v10 = vsel %vm987_vm0, %v984_v8, 0  ;;  %8644 = vmatpush3.msra.mxu0 %v9605_v4  ;;  %v9627_v11 = vsub.f32 %v983_v0, %v9605_v4  ;;  %v9632_v13 = vsub.f32 %v982_v1, %v9607_v5  ;;  %v9635_v14 = vsub.f32 %v981_v2, %v9609_v6  ;;  %s422_s17 = sld [smem:[#allocation7 + %s12597_s25]]  ;;  %s12726_s11 = sadd.s32 7, %s9763_s28 }
  0x27   : > { %v9629_v12 = vand.u32 4294901760, %v989_v10  ;;  %8645 = vmatprep.subr.mxu0 %v9512_v3  ;;  %v9639_v15 = vsub.f32 %v980_v7, %v9618_v9  ;;  %s401_s4 = scalar_lea.vmem %s12582_s1, %s398_s24  ;;  %s431_s26 = sld [smem:[#allocation7 + %s9763_s28]] }
  0x28   : > { %8646 = vmatpush3.msra.mxu0 %v9607_v5  ;;  %v9643_v16 = vand.u32 4294901760, %v9627_v11  ;;  %v9647_v18 = vand.u32 4294901760, %v9632_v13  ;;  %v9650_v19 = vand.u32 4294901760, %v9635_v14  ;;  %v402_v32 = vld [vmem:[%s401_s4] sm:$0x1]  ;;  %s403_s12 = scalar_lea.vmem %s12583_s2, %s400_s27  ;;  %s433_s10 = sld [smem:[#allocation7 + %s12726_s11]] }
  0x29   : > { %v1061_v17 = vsub.f32 %v989_v10, %v9629_v12  ;;  %8647 = vmatprep.subr.mxu0 %v9512_v3  ;;  %v9654_v20 = vand.u32 4294901760, %v9639_v15  ;;  %v404_v33 = vld [vmem:[%s403_s12] sm:$0x1]  ;;  %s412_s25 = scalar_lea.vmem %s12582_s1, %s409_s29  ;;  %s442_s0 = sld [smem:[#allocation7 + %s9770_s14]] }
  0x2a   : > { %8648 = vmatpush3.msra.mxu0 %v9609_v6  ;;  %v1098_v21 = vsub.f32 %v9627_v11, %v9643_v16  ;;  %v1105_v23 = vsub.f32 %v9632_v13, %v9647_v18  ;;  %v1112_v24 = vsub.f32 %v9635_v14, %v9650_v19  ;;  %v405_v34 = vadd.f32 %v404_v33, %v402_v32  ;;  %v413_v35 = vld [vmem:[%s412_s25] sm:$0x1]  ;;  %s414_s4 = scalar_lea.vmem %s12583_s2, %s411_s13  ;;  %s12727_s24 = sadd.s32 7, %s9770_s14 }
  0x2b   : > { %v1062_v22 = vand.u32 4294901760, %v1061_v17  ;;  %8649 = vmatprep.subr.mxu0 %v9512_v3  ;;  %v1119_v28 = vsub.f32 %v9639_v15, %v9654_v20  ;;  %s444_s6 = sld [smem:[#allocation7 + %s12727_s24]]  ;;  %v415_v36 = vld [vmem:[%s414_s4] sm:$0x1]  ;;  %s423_s11 = scalar_lea.vmem %s12582_s1, %s420_s15 }
  0x2c   : > { %8650 = vmatpush3.msra.mxu0 %v9618_v9  ;;  %v9665_v25 = vand.u32 4294901760, %v1098_v21  ;;  %v9667_v27 = vand.u32 4294901760, %v1105_v23  ;;  %v9673_v30 = vand.u32 4294901760, %v1112_v24  ;;  %s453_s12 = sld [smem:[#allocation7 + %s9777_s18]]  ;;  %406 = vst [vmem:[#allocation2] sm:$0x1] %v405_v34  ;;  %v416_v37 = vadd.f32 %v415_v36, %v413_v35  ;;  %s425_s25 = scalar_lea.vmem %s12583_s2, %s422_s17 }
  0x2d   : > { %v1063_v26 = vsub.f32 %v1061_v17, %v1062_v22  ;;  %8665 = vmatprep.subr.mxu0 %v9512_v3  ;;  %v9677_v31 = vand.u32 4294901760, %v1119_v28  ;;  %v424_v38 = vld [vmem:[%s423_s11] sm:$0x1]  ;;  %s12603_s30 = sadd.s32 7, %s9777_s18  ;;  %s434_s3 = scalar_lea.vmem %s12582_s1, %s431_s26 }
  0x2e   : > { %8655 = vmatpush3.msra.mxu1 %v9665_v25  ;;  %v426_v39 = vld [vmem:[%s425_s25] sm:$0x1]  ;;  %s455_s22 = sld [smem:[#allocation7 + %s12603_s30]]  ;;  %417 = vst [vmem:[#allocation2 + $0x1] sm:$0x1] %v416_v37  ;;  %s436_s24 = scalar_lea.vmem %s12583_s2, %s433_s10 }
  0x2f   : > { %v1064_v29 = vand.u32 4294901760, %v1063_v26  ;;  %8656 = vmatprep.subr.mxu1 %v9512_v3  ;;  %v427_v40 = vadd.f32 %v426_v39, %v424_v38  ;;  %v435_v41 = vld [vmem:[%s434_s3] sm:$0x1]  ;;  %s9814_s23 = sadd.s32 768, %s9748_s19  ;;  %s445_s26 = scalar_lea.vmem %s12582_s1, %s442_s0 }
  0x30   : > { %8657 = vmatpush3.msra.mxu1 %v9667_v27  ;;  %v437_v42 = vld [vmem:[%s436_s24] sm:$0x1]  ;;  %s464_s11 = sld [smem:[#allocation7 + %s9814_s23]]  ;;  %s12602_s10 = sadd.s32 7, %s9814_s23 }
  0x31   : > { %8652 = vmatmul.mubr.f32.vlgmr.msra.gmra.mxu0 %v1064_v29  ;;  %8658 = vmatprep.subr.mxu1 %v9512_v3  ;;  %428 = vst [vmem:[#allocation2 + $0x2] sm:$0x1] %v427_v40  ;;  %v438_v43 = vadd.f32 %v437_v42, %v435_v41  ;;  %v446_v44 = vld [vmem:[%s445_s26] sm:$0x1]  ;;  %s447_s25 = scalar_lea.vmem %s12583_s2, %s444_s6  ;;  %s466_s15 = sld [smem:[#allocation7 + %s12602_s10]] }
  0x32   : > { %8666 = vmatpush3.msra.mxu0 %v9627_v11  ;;  %8659 = vmatpush3.msra.mxu1 %v9673_v30  ;;  %v448_v45 = vld [vmem:[%s447_s25] sm:$0x1]  ;;  %s456_s3 = scalar_lea.vmem %s12582_s1, %s453_s12  ;;  %s9830_s0 = sadd.s32 896, %s9748_s19 }
  0x33   : > { %8667 = vmatprep.subr.mxu0 %v9512_v3  ;;  %8660 = vmatprep.subr.mxu1 %v9512_v3  ;;  %439 = vst [vmem:[#allocation2 + $0x3] sm:$0x1] %v438_v43  ;;  %v449_v46 = vadd.f32 %v448_v45, %v446_v44  ;;  %v457_v47 = vld [vmem:[%s456_s3] sm:$0x1]  ;;  %s475_s17 = sld [smem:[#allocation7 + %s9830_s0]]  ;;  %s12601_s27 = sadd.s32 7, %s9830_s0 }
  0x34   : > { %8668 = vmatpush3.msra.mxu0 %v9632_v13  ;;  %8661 = vmatpush3.msra.mxu1 %v9677_v31  ;;  %s458_s6 = scalar_lea.vmem %s12583_s2, %s455_s22  ;;  %s477_s29 = sld [smem:[#allocation7 + %s12601_s27]] }
  0x35   : > { %8669 = vmatprep.subr.mxu0 %v9512_v3  ;;  %8663 = vmatmul.mubr.f32.vlgmr.msra.gmra.mxu1 %v9629_v12  ;;  %450 = vst [vmem:[#allocation2 + $0x4] sm:$0x1] %v449_v46  ;;  %v459_v48 = vld [vmem:[%s458_s6] sm:$0x1]  ;;  %s12728_s5 = sld [smem:[#allocation46_spill]]  ;;  %s12607_s26 = smov 64  }
  0x36   : > { %8670 = vmatpush3.msra.mxu0 %v9635_v14  ;;  %8676 = vmatprep.subr.mxu1 %v9512_v3  ;;  %v460_v49 = vadd.f32 %v459_v48, %v457_v47  ;;  %s467_s8 = scalar_lea.vmem %s12582_s1, %s464_s11  ;;  %s12606_s16 = sadd.s32 1, %s9751_s20 }
  0x37   : > { %8671 = vmatprep.subr.mxu0 %v9512_v3  ;;  %8673 = vmatprep.mubr.msk.f32.mxu0 %vm9513_vm1, %v9512_v3  ;;  %v468_v50 = vld [vmem:[%s467_s8] sm:$0x1]  ;;  %s469_s13 = scalar_lea.vmem %s12583_s2, %s466_s15  ;;  %s12610_s15 = smov 32  }
  0x38   : > { %8672 = vmatpush3.msra.mxu0 %v9639_v15  ;;  %8677 = vmatpush3.msra.mxu1 %v9605_v4  ;;  %461 = vst [vmem:[#allocation2 + $0x5] sm:$0x1] %v460_v49  ;;  %v470_v51 = vld [vmem:[%s469_s13] sm:$0x1]  ;;  %s12604_s8 = sadd.s32 1, %s9748_s19  ;;  %s12609_s22 = sadd.s32 6, %s9751_s20 }
  0x39   : > { %8674 = vmatmul.mubr.f32.vlgmr.msra.gmra.mxu0 %v1061_v17  ;;  %8678 = vmatprep.subr.mxu1 %v9512_v3  ;;  %v471_v52 = vadd.f32 %v470_v51, %v468_v50  ;;  %s478_s4 = scalar_lea.vmem %s12582_s1, %s475_s17  ;;  %s485_s25 = sld [smem:[#allocation7 + %s12604_s8]] }
  0x3a   : > { %8687 = vmatprep.subr.mxu0 %v9512_v3  ;;  %8679 = vmatpush3.msra.mxu1 %v9607_v5  ;;  %v479_v53 = vld [vmem:[%s478_s4] sm:$0x1]  ;;  %s480_s11 = scalar_lea.vmem %s12583_s2, %s477_s29  ;;  %s12605_s29 = sadd.s32 6, %s9748_s19 }
  0x3b   : > { %8688 = vmatpush3.msra.mxu0 %v9643_v16  ;;  %8680 = vmatprep.subr.mxu1 %v9512_v3  ;;  %472 = vst [vmem:[#allocation2 + $0x6] sm:$0x1] %v471_v52  ;;  %v481_v54 = vld [vmem:[%s480_s11] sm:$0x1]  ;;  %s487_s13 = sld [smem:[#allocation7 + %s12605_s29]]  ;;  %s12612_s4 = sadd.s32 1, %s9754_s21 }
  0x3c   : > { %8689 = vmatprep.subr.mxu0 %v9512_v3  ;;  %8681 = vmatpush3.msra.mxu1 %v9609_v6  ;;  %v482_v55 = vadd.f32 %v481_v54, %v479_v53  ;;  %v985_v26 = vld [vmem:[%s12728_s5] sm:$0xff]  ;;  %s495_s3 = sld [smem:[#allocation7 + %s12606_s16]]  ;;  %s12613_s6 = sadd.s32 6, %s9754_s21 }
  0x3d   : > { %8690 = vmatpush3.msra.mxu0 %v9647_v18  ;;  %8682 = vmatprep.subr.mxu1 %v9512_v3  ;;  %s497_s24 = sld [smem:[#allocation7 + %s12609_s22]]  ;;  %s12622_s17 = sadd.s32 1, %s9763_s28 }
  0x3e   : > { %8691 = vmatprep.subr.mxu0 %v9512_v3  ;;  %8683 = vmatpush3.msra.mxu1 %v9618_v9  ;;  %483 = vst [vmem:[#allocation2 + $0x7] sm:$0x1] %v482_v55  ;;  %s505_s11 = sld [smem:[#allocation7 + %s12612_s4]]  ;;  %s12623_s27 = sadd.s32 6, %s9763_s28 }
  0x3f   : > { %8684 = vmatprep.mubr.msk.f32.mxu1 %vm9513_vm1, %v9512_v3  ;;  %8692 = vmatpush3.msra.mxu0 %v9650_v19  ;;  %s507_s12 = sld [smem:[#allocation7 + %s12613_s6]]  ;;  %s488_s8 = scalar_lea.vmem %s12582_s1, %s485_s25 }
  0x40   : > { %8685 = vmatmul.mubr.f32.vlgmr.msra.gmra.mxu1 %v1062_v22  ;;  %8693 = vmatprep.subr.mxu0 %v9512_v3  ;;  %s515_s29 = sld [smem:[#allocation7 + %s12622_s17]]  ;;  %v489_v50 = vld [vmem:[%s488_s8] sm:$0x1]  ;;  %s12615_s9 = sadd.s32 1, %s9770_s14 }
  0x41   : > { %8698 = vmatprep.subr.mxu1 %v9512_v3  ;;  %8694 = vmatpush3.msra.mxu0 %v9654_v20  ;;  %s490_s22 = scalar_lea.vmem %s12583_s2, %s487_s13  ;;  %s525_s25 = sld [smem:[#allocation7 + %s12615_s9]] }
  0x42   : > { %8695 = vmatprep.mubr.msk.f32.mxu0 %vm9513_vm1, %v9512_v3  ;;  %8699 = vmatpush3.msra.mxu1 %v9605_v4  ;;  %v491_v51 = vld [vmem:[%s490_s22] sm:$0x1]  ;;  %s498_s6 = scalar_lea.vmem %s12582_s1, %s495_s3  ;;  %s12618_s22 = sadd.s32 6, %s9770_s14 }
  0x43   : > { %8696 = vmatmul.mubr.f32.vlgmr.msra.gmra.mxu0 %v9629_v12  ;;  %8700 = vmatprep.subr.mxu1 %v9512_v3  ;;  %v492_v52 = vadd.f32 %v491_v51, %v489_v50  ;;  %v499_v53 = vld [vmem:[%s498_s6] sm:$0x1]  ;;  %s500_s8 = scalar_lea.vmem %s12583_s2, %s497_s24  ;;  %s527_s24 = sld [smem:[#allocation7 + %s12618_s22]] }
  0x44   : > { %8706 = vmatprep.mubr.msk.f32.mxu1 %vm9513_vm1, %v9512_v3  ;;  %8701 = vmatpush3.msra.mxu1 %v9607_v5  ;;  %v501_v54 = vld [vmem:[%s500_s8] sm:$0x1]  ;;  %s508_s13 = scalar_lea.vmem %s12582_s1, %s505_s11  ;;  %s12614_s11 = sadd.s32 1, %s9777_s18 }
  0x45   : > { %8709 = vmatprep.subr.mxu0 %v9512_v3  ;;  %8702 = vmatprep.subr.mxu1 %v9512_v3  ;;  %493 = vst [vmem:[#allocation2 + $0x8] sm:$0x1] %v492_v52  ;;  %v502_v55 = vadd.f32 %v501_v54, %v499_v53  ;;  %s510_s4 = scalar_lea.vmem %s12583_s2, %s507_s12  ;;  %s535_s12 = sld [smem:[#allocation7 + %s12614_s11]] }
  0x46   : > { %8710 = vmatpush3.msra.mxu0 %v9605_v4  ;;  %8703 = vmatpush3.msra.mxu1 %v9609_v6  ;;  %s518_s10 = scalar_lea.vmem %s12582_s1, %s515_s29  ;;  %s12616_s5 = sadd.s32 1, %s9814_s23 }
  0x47   : > { %8711 = vmatprep.subr.mxu0 %v9512_v3  ;;  %8704 = vmatprep.subr.mxu1 %v9512_v3  ;;  %503 = vst [vmem:[#allocation2 + $0x9] sm:$0x1] %v502_v55  ;;  %s12619_s30 = sadd.s32 6, %s9814_s23  ;;  %s12620_s11 = sadd.s32 1, %s9830_s0 }
  0x48   : > { %8712 = vmatpush3.msra.mxu0 %v9607_v5  ;;  %8705 = vmatpush3.msra.mxu1 %v9618_v9  ;;  %s12621_s9 = sadd.s32 6, %s9830_s0  ;;  %s12635_s7 = sadd.s32 2, %s9814_s23 }
  0x49   : > { %8713 = vmatprep.subr.mxu0 %v9512_v3  ;;  %8707 = vmatmul.mubr.f32.vlgmr.msra.gmra.mxu1 %v9629_v12  ;;  %v986_v12 = vld [vmem:[#allocation2] sm:$0xff] }
  0x4a   : > { %8720 = vmatprep.subr.mxu1 %v9512_v3  ;;  %8728 = vmatprep.mubr.msk.f32.mxu1 %vm9513_vm1, %v9512_v3 }
  0x4b   : > { %8721 = vmatpush3.msra.mxu1 %v9665_v25  ;;  %8714 = vmatpush3.msra.mxu0 %v9609_v6 }
  0x4c   : > { %8722 = vmatprep.subr.mxu1 %v9512_v3  ;;  %8715 = vmatprep.subr.mxu0 %v9512_v3 }
  0x4d   : > { %8723 = vmatpush3.msra.mxu1 %v9667_v27  ;;  %8716 = vmatpush3.msra.mxu0 %v9618_v9 }
  0x4e   : > { %8724 = vmatprep.subr.mxu1 %v9512_v3  ;;  %8717 = vmatprep.mubr.msk.f32.mxu0 %vm9513_vm1, %v9512_v3 }
  0x4f   : > { %8725 = vmatpush3.msra.mxu1 %v9673_v30  ;;  %8731 = vmatprep.subr.mxu0 %v9512_v3 }
  0x50   : > { %8726 = vmatprep.subr.mxu1 %v9512_v3 }
  0x51   : > { %8727 = vmatpush3.msra.mxu1 %v9677_v31 }
  0x52   : > { %8742 = vmatprep.subr.mxu1 %v9512_v3 }
  0xf1   : > { %v1066_v56 = vpop.f32.mrf.mxu0 }
  0xf3   : > { %v8653_v57 = vpop.f32.mrf.mxu0 }
  0xf4   : > { %v511_v57 = vld [vmem:[%s510_s4] sm:$0x1]  ;;  %s528_s4 = scalar_lea.vmem %s12582_s1, %s525_s25  ;;  %s538_s25 = scalar_lea.vmem %s12582_s1, %s535_s12 }
  0xf5   : > { %v1157_v58 = vpop.f32.mrf.mxu1 }
  0xf6   : > { %v1158_v62 = vadd.f32 %v1157_v58, %v1066_v56  ;;  %v509_v56 = vld [vmem:[%s508_s13] sm:$0x1]  ;;  %s12617_s13 = sadd.s32 6, %s9777_s18 }
  0xf7   : > { %v8664_v59 = vpop.f32.mrf.mxu1  ;;  %v512_v58 = vadd.f32 %v511_v57, %v509_v56  ;;  %s537_s6 = sld [smem:[#allocation7 + %s12617_s13]]  ;;  %s12642_s13 = sadd.s32 5, %s9763_s28 }
  0xf8   : > { %v519_v59 = vld [vmem:[%s518_s10] sm:$0x1]  ;;  %s12626_s10 = sadd.s32 5, %s9751_s20 }
  0xf9   : > { %v1237_v60 = vpop.f32.mrf.mxu0  ;;  %513 = vst [vmem:[#allocation2 + $0xa] sm:$0x1] %v512_v58  ;;  %s577_s29 = sld [smem:[#allocation7 + %s12626_s10]] }
  0xfa   : > { %v1238_v1 = vadd.f32 %v1237_v60, %v1158_v62  ;;  %v529_v62 = vld [vmem:[%s528_s4] sm:$0x1]  ;;  %s555_s4 = sld [smem:[#allocation7 + %s12620_s11]] }
  0xfb   : > { %v8675_v61 = vpop.f32.mrf.mxu0 }
 0x100   : > { %v1314_v63 = vpop.f32.mrf.mxu1  ;;  %s558_s11 = scalar_lea.vmem %s12582_s1, %s555_s4  ;;  %s12624_s4 = sadd.s32 2, %s9751_s20 }
 0x101   : > { %v1315_v7 = vadd.f32 %v1314_v63, %v1238_v1  ;;  %v539_v1 = vld [vmem:[%s538_s25] sm:$0x1]  ;;  %s575_s8 = sld [smem:[#allocation7 + %s12624_s4]]  ;;  %s12641_s25 = sadd.s32 2, %s9763_s28 }
 0x102   : > { %v8686_v0 = vpop.f32.mrf.mxu1 }
 0x103   : > { %v1397_v2 = vpop.f32.mrf.mxu0 }
 0x104   : > { %v1398_v10 = vadd.f32 %v1397_v2, %v1315_v7 }
 0x105   : > { %v8697_v8 = vpop.f32.mrf.mxu0 }
 0x109   : > { %v1472_v17 = vpop.f32.mrf.mxu1 }
 0x10a   : > { %v1473_v21 = vadd.f32 %v1472_v17, %v1398_v10  ;;  %v559_v17 = vld [vmem:[%s558_s11] sm:$0x1]  ;;  %s12729_s11 = smov 32  }
 0x10b   : > { %v8708_v22 = vpop.f32.mrf.mxu1 }
 0x10c   : > { %v1476_v23 = vadd.f32 %v1473_v21, %v986_v12 }
 0x10e   : > { %9425 = vtanh.f32 %v1476_v23  ;;  %v8219_v28 = vmul.f32 -1.442695, %v1476_v23 }
 0x110   : > { %9427 = vpow2.f32 %v8219_v28 }
 0x11b   : > { %v9426_v24 = vpop.eup %9425 }
 0x11c   : > { %1490 = vrot.lane.b32.xlu0 %v9426_v24, %s12610_s15 }
 0x11d   : > { %v9428_v29 = vpop.eup %9427 }
 0x11e   : > { %v1480_v32 = vadd.f32 1.0, %v9428_v29 }
 0x120   : > { %1485 = vrot.lane.b32.xlu0 %v985_v26, %s12610_s15  ;;  %9429 = vrcp.f32 %v1480_v32 }
 0x12d   : > { %v9430_v33 = vpop.eup %9429 }
 0x18e   : > { %v1491_v34 = vpop.permute.xlu0 %1490 }
 0x18f   : > { %v1493_v35 = vmul.f32 %v9430_v33, %v1491_v34 }
 0x191   : > { %1495 = vrot.lane.b32.xlu1 %v1493_v35, %s12610_s15 }
 0x192   : > { %v1486_v36 = vpop.permute.xlu0 %1485 }
 0x193   : > { %v1488_v37 = vmul.f32 %v9430_v33, %v1486_v36 }
 0x203   : > { %v1496_v38 = vpop.permute.xlu1 %1495 }
 0x204   : > { %v9857_v39 = vadd.f32 %v1496_v38, %v1488_v37 }
 0x206   : > { %9431 = vtanh.f32 %v9857_v39 }
 0x213   : > { %v9432_v40 = vpop.eup %9431 }
 0x214   : > { %1501 = vrot.lane.b32.xlu1 %v9432_v40, %s12610_s15  ;;  %s517_s15 = sld [smem:[#allocation7 + %s12623_s27]] }
 0x215   : > { %s595_s27 = sld [smem:[#allocation7 + %s12641_s25]] }
 0x21a   : > { %s520_s16 = scalar_lea.vmem %s12583_s2, %s517_s15  ;;  %s545_s15 = sld [smem:[#allocation7 + %s12616_s5]] }
 0x21b   : > { %v521_v60 = vld [vmem:[%s520_s16] sm:$0x1]  ;;  %s547_s16 = sld [smem:[#allocation7 + %s12619_s30]]  ;;  %s12627_s30 = sadd.s32 5, %s9748_s19 }
 0x21c   : > { %v522_v61 = vadd.f32 %v521_v60, %v519_v59  ;;  %s557_s5 = sld [smem:[#allocation7 + %s12621_s9]]  ;;  %s12638_s9 = sadd.s32 5, %s9814_s23 }
 0x21e   : > { %523 = vst [vmem:[#allocation2 + $0xb] sm:$0x1] %v522_v61 }
 0x221   : > { %s550_s12 = scalar_lea.vmem %s12583_s2, %s547_s16 }
 0x222   : > { %v551_v10 = vld [vmem:[%s550_s12] sm:$0x1]  ;;  %s12630_s12 = sadd.s32 5, %s9754_s21 }
 0x223   : > { %s587_s22 = sld [smem:[#allocation7 + %s12630_s12]]  ;;  %s578_s12 = scalar_lea.vmem %s12582_s1, %s575_s8 }
 0x224   : > { %s674_s8 = sadd.s32 3, %s9763_s28 }
 0x225   : > { %s675_s25 = sld [smem:[#allocation7 + %s674_s8]] }
 0x286   : > { %v1502_v41 = vpop.permute.xlu1 %1501 }
 0x287   : > { %v1504_v42 = vmul.f32 %v9430_v33, %v1502_v41 }
 0x289   : > { %1506 = vrot.lane.b32.xlu0 %v1504_v42, %s12607_s26  ;;  %s530_s26 = scalar_lea.vmem %s12583_s2, %s527_s24  ;;  %s540_s24 = scalar_lea.vmem %s12583_s2, %s537_s6 }
 0x28a   : > { %v531_v63 = vld [vmem:[%s530_s26] sm:$0x1]  ;;  %s548_s26 = scalar_lea.vmem %s12582_s1, %s545_s15  ;;  %s560_s6 = scalar_lea.vmem %s12583_s2, %s557_s5 }
 0x28b   : > { %v532_v0 = vadd.f32 %v531_v63, %v529_v62  ;;  %v541_v2 = vld [vmem:[%s540_s24] sm:$0x1]  ;;  %s12730_s5 = smov 64   ;;  %s12625_s15 = sadd.s32 2, %s9748_s19 }
 0x28c   : > { %v542_v7 = vadd.f32 %v541_v2, %v539_v1  ;;  %v549_v8 = vld [vmem:[%s548_s26] sm:$0x1]  ;;  %s565_s16 = sld [smem:[#allocation7 + %s12625_s15]]  ;;  %s12628_s26 = sadd.s32 2, %s9754_s21 }
 0x28d   : > { %533 = vst [vmem:[#allocation2 + $0xc] sm:$0x1] %v532_v0  ;;  %v552_v12 = vadd.f32 %v551_v10, %v549_v8  ;;  %v561_v21 = vld [vmem:[%s560_s6] sm:$0x1]  ;;  %s567_s24 = sld [smem:[#allocation7 + %s12627_s30]]  ;;  %s12634_s21 = sadd.s32 2, %s9770_s14 }
 0x28e   : > { %543 = vst [vmem:[#allocation2 + $0xd] sm:$0x1] %v542_v7  ;;  %v562_v22 = vadd.f32 %v561_v21, %v559_v17  ;;  %s585_s3 = sld [smem:[#allocation7 + %s12628_s26]]  ;;  %v579_v10 = vld [vmem:[%s578_s12] sm:$0x1]  ;;  %s590_s26 = scalar_lea.vmem %s12583_s2, %s587_s22 }
 0x28f   : > { %553 = vst [vmem:[#allocation2 + $0xe] sm:$0x1] %v552_v12  ;;  %s597_s30 = sld [smem:[#allocation7 + %s12642_s13]] }
 0x290   : > { %563 = vst [vmem:[#allocation2 + $0xf] sm:$0x1] %v562_v22  ;;  %s605_s6 = sld [smem:[#allocation7 + %s12634_s21]]  ;;  %v591_v22 = vld [vmem:[%s590_s26] sm:$0x1]  ;;  %s12640_s21 = sadd.s32 5, %s9830_s0 }
 0x292   : > { %s568_s17 = scalar_lea.vmem %s12582_s1, %s565_s16  ;;  %s598_s16 = scalar_lea.vmem %s12582_s1, %s595_s27 }
 0x293   : > { %v569_v2 = vld [vmem:[%s568_s17] sm:$0x1]  ;;  %s570_s10 = scalar_lea.vmem %s12583_s2, %s567_s24  ;;  %s580_s17 = scalar_lea.vmem %s12583_s2, %s577_s29 }
 0x294   : > { %v571_v7 = vld [vmem:[%s570_s10] sm:$0x1]  ;;  %s588_s24 = scalar_lea.vmem %s12582_s1, %s585_s3  ;;  %s12637_s10 = sadd.s32 5, %s9770_s14 }
 0x295   : > { %v572_v8 = vadd.f32 %v571_v7, %v569_v2  ;;  %v581_v12 = vld [vmem:[%s580_s17] sm:$0x1]  ;;  %s607_s29 = sld [smem:[#allocation7 + %s12637_s10]]  ;;  %s12633_s3 = sadd.s32 2, %s9777_s18 }
 0x296   : > { %v582_v17 = vadd.f32 %v581_v12, %v579_v10  ;;  %v589_v21 = vld [vmem:[%s588_s24] sm:$0x1]  ;;  %s600_s4 = scalar_lea.vmem %s12583_s2, %s597_s30  ;;  %s615_s22 = sld [smem:[#allocation7 + %s12633_s3]] }
 0x297   : > { %573 = vst [vmem:[#allocation2 + $0x10] sm:$0x1] %v572_v8  ;;  %s12636_s24 = sadd.s32 5, %s9777_s18  ;;  %s608_s26 = scalar_lea.vmem %s12582_s1, %s605_s6 }
 0x298   : > { %583 = vst [vmem:[#allocation2 + $0x11] sm:$0x1] %v582_v17  ;;  %s617_s12 = sld [smem:[#allocation7 + %s12636_s24]]  ;;  %s12639_s3 = sadd.s32 2, %s9830_s0 }
 0x299   : > { %s625_s30 = sld [smem:[#allocation7 + %s12635_s7]]  ;;  %s676_s10 = sadd.s32 4, %s9763_s28 }
 0x29a   : > { %s637_s7 = sld [smem:[#allocation7 + %s12640_s21]]  ;;  %s678_s24 = scalar_lea.vmem %s12582_s1, %s675_s25 }
 0x29b   : > { %s610_s15 = scalar_lea.vmem %s12583_s2, %s607_s29 }
 0x29c   : > { %s618_s6 = scalar_lea.vmem %s12582_s1, %s615_s22 }
 0x29e   : > { %s620_s29 = scalar_lea.vmem %s12583_s2, %s617_s12 }
 0x2a0   : > { %s640_s12 = scalar_lea.vmem %s12583_s2, %s637_s7  ;;  %s12645_s7 = sadd.s32 3, %s9748_s19 }
 0x2fb   : > { %v1507_v43 = vpop.permute.xlu0 %1506 }
 0x2fc   : > { %1509 = vst.msk [vmem:[#allocation3] sm:$0xff] %vm987_vm0, %v1507_v43  ;;  %1511 = vst.msk [vmem:[#allocation4 + $0x38] sm:$0xff] %vm987_vm0, %v1507_v43  ;;  %v1514_v44 = vsel %vm987_vm0, %v1507_v43, 0  ;;  %v1513_v43 = vld [vmem:[#allocation2 + $0x8] sm:$0xff] }
 0x2fd   : > { %v1585_v45 = vand.u32 4294901760, %v1514_v44 }
 0x2ff   : > { %v1586_v46 = vsub.f32 %v1514_v44, %v1585_v45  ;;  %8729 = vmatmul.mubr.f32.vlgmr.msra.gmra.mxu1 %v1585_v45 }
 0x300   : > { %8743 = vmatpush3.msra.mxu1 %v9605_v4  ;;  %8750 = vmatprep.mubr.msk.f32.mxu1 %vm9513_vm1, %v9512_v3 }
 0x301   : > { %8744 = vmatprep.subr.mxu1 %v9512_v3  ;;  %v1587_v47 = vand.u32 4294901760, %v1586_v46 }
 0x302   : > { %8745 = vmatpush3.msra.mxu1 %v9607_v5 }
 0x303   : > { %8746 = vmatprep.subr.mxu1 %v9512_v3  ;;  %v1588_v48 = vsub.f32 %v1586_v46, %v1587_v47 }
 0x304   : > { %8747 = vmatpush3.msra.mxu1 %v9609_v6 }
 0x305   : > { %8748 = vmatprep.subr.mxu1 %v9512_v3  ;;  %v1589_v49 = vand.u32 4294901760, %v1588_v48 }
 0x306   : > { %8749 = vmatpush3.msra.mxu1 %v9618_v9 }
 0x307   : > { %8751 = vmatmul.mubr.f32.vlgmr.msra.gmra.mxu1 %v1587_v47  ;;  %8764 = vmatprep.subr.mxu1 %v9512_v3 }
 0x308   : > { %8718 = vmatmul.mubr.f32.vlgmr.msra.gmra.mxu0 %v1589_v49  ;;  %8765 = vmatpush3.msra.mxu1 %v9605_v4 }
 0x309   : > { %8732 = vmatpush3.msra.mxu0 %v9627_v11  ;;  %8766 = vmatprep.subr.mxu1 %v9512_v3 }
 0x30a   : > { %8733 = vmatprep.subr.mxu0 %v9512_v3  ;;  %8767 = vmatpush3.msra.mxu1 %v9607_v5 }
 0x30b   : > { %8734 = vmatpush3.msra.mxu0 %v9632_v13  ;;  %8768 = vmatprep.subr.mxu1 %v9512_v3 }
 0x30c   : > { %8735 = vmatprep.subr.mxu0 %v9512_v3  ;;  %8769 = vmatpush3.msra.mxu1 %v9609_v6 }
 0x30d   : > { %8736 = vmatpush3.msra.mxu0 %v9635_v14  ;;  %8770 = vmatprep.subr.mxu1 %v9512_v3 }
 0x30e   : > { %8737 = vmatprep.subr.mxu0 %v9512_v3  ;;  %8739 = vmatprep.mubr.msk.f32.mxu0 %vm9513_vm1, %v9512_v3 }
 0x30f   : > { %8738 = vmatpush3.msra.mxu0 %v9639_v15  ;;  %8771 = vmatpush3.msra.mxu1 %v9618_v9 }
 0x310   : > { %8772 = vmatprep.mubr.msk.f32.mxu1 %vm9513_vm1, %v9512_v3  ;;  %8740 = vmatmul.mubr.f32.vlgmr.msra.gmra.mxu0 %v1586_v46 }
 0x311   : > { %8753 = vmatprep.subr.mxu0 %v9512_v3  ;;  %8773 = vmatmul.mubr.f32.vlgmr.msra.gmra.mxu1 %v1585_v45 }
 0x312   : > { %8754 = vmatpush3.msra.mxu0 %v9643_v16  ;;  %8761 = vmatprep.mubr.msk.f32.mxu0 %vm9513_vm1, %v9512_v3 }
 0x313   : > { %8755 = vmatprep.subr.mxu0 %v9512_v3  ;;  %8786 = vmatprep.subr.mxu1 %v9512_v3 }
 0x314   : > { %8756 = vmatpush3.msra.mxu0 %v9647_v18  ;;  %8787 = vmatpush3.msra.mxu1 %v9665_v25 }
 0x315   : > { %8757 = vmatprep.subr.mxu0 %v9512_v3  ;;  %8788 = vmatprep.subr.mxu1 %v9512_v3 }
 0x316   : > { %8758 = vmatpush3.msra.mxu0 %v9650_v19  ;;  %8789 = vmatpush3.msra.mxu1 %v9667_v27 }
 0x317   : > { %8759 = vmatprep.subr.mxu0 %v9512_v3  ;;  %8790 = vmatprep.subr.mxu1 %v9512_v3 }
 0x318   : > { %8760 = vmatpush3.msra.mxu0 %v9654_v20  ;;  %8791 = vmatpush3.msra.mxu1 %v9673_v30 }
 0x319   : > { %8762 = vmatmul.mubr.f32.vlgmr.msra.gmra.mxu0 %v1585_v45  ;;  %8792 = vmatprep.subr.mxu1 %v9512_v3 }
 0x31a   : > { %8793 = vmatpush3.msra.mxu1 %v9677_v31  ;;  %8775 = vmatprep.subr.mxu0 %v9512_v3 }
 0x31b   : > { %8794 = vmatprep.mubr.msk.f32.mxu1 %vm9513_vm1, %v9512_v3  ;;  %8808 = vmatprep.subr.mxu1 %v9512_v3 }
 0x31c   : > { %8776 = vmatpush3.msra.mxu0 %v9605_v4  ;;  %8783 = vmatprep.mubr.msk.f32.mxu0 %vm9513_vm1, %v9512_v3 }
 0x31d   : > { %8777 = vmatprep.subr.mxu0 %v9512_v3 }
 0x31e   : > { %8778 = vmatpush3.msra.mxu0 %v9607_v5 }
 0x31f   : > { %8779 = vmatprep.subr.mxu0 %v9512_v3 }
 0x320   : > { %8780 = vmatpush3.msra.mxu0 %v9609_v6 }
 0x321   : > { %8781 = vmatprep.subr.mxu0 %v9512_v3 }
 0x322   : > { %8782 = vmatpush3.msra.mxu0 %v9618_v9 }
 0x323   : > { %8797 = vmatprep.subr.mxu0 %v9512_v3 }
 0x3bf   : > { %v1682_v23 = vpop.f32.mrf.mxu1 }
 0x3c1   : > { %v8730_v24 = vpop.f32.mrf.mxu1 }
 0x3c2   : > { %v599_v24 = vld [vmem:[%s598_s16] sm:$0x1] }
 0x3c7   : > { %v1839_v26 = vpop.f32.mrf.mxu1 }
 0x3c8   : > { %v1591_v28 = vpop.f32.mrf.mxu0 }
 0x3c9   : > { %v8752_v29 = vpop.f32.mrf.mxu1  ;;  %v1683_v35 = vadd.f32 %v1682_v23, %v1591_v28  ;;  %v592_v23 = vadd.f32 %v591_v22, %v589_v21 }
 0x3ca   : > { %v8719_v32 = vpop.f32.mrf.mxu0  ;;  %v609_v29 = vld [vmem:[%s608_s26] sm:$0x1]  ;;  %s635_s26 = sld [smem:[#allocation7 + %s12639_s3]] }
 0x3cb   : > { %593 = vst [vmem:[#allocation2 + $0x12] sm:$0x1] %v592_v23  ;;  %v611_v32 = vld [vmem:[%s610_s15] sm:$0x1]  ;;  %s628_s15 = scalar_lea.vmem %s12582_s1, %s625_s30  ;;  %s12647_s30 = sadd.s32 4, %s9748_s19 }
 0x3d0   : > { %v1762_v33 = vpop.f32.mrf.mxu0  ;;  %s638_s3 = scalar_lea.vmem %s12582_s1, %s635_s26  ;;  %s647_s26 = sld [smem:[#allocation7 + %s12647_s30]] }
 0x3d1   : > { %v1997_v34 = vpop.f32.mrf.mxu1  ;;  %v1763_v38 = vadd.f32 %v1762_v33, %v1683_v35  ;;  %v612_v33 = vadd.f32 %v611_v32, %v609_v29  ;;  %v621_v35 = vld [vmem:[%s620_s29] sm:$0x1]  ;;  %s12644_s29 = sadd.s32 4, %s9751_s20  ;;  %s12652_s30 = sadd.s32 3, %s9814_s23 }
 0x3d2   : > { %v8741_v36 = vpop.f32.mrf.mxu0 }
 0x3d3   : > { %v8774_v37 = vpop.f32.mrf.mxu1  ;;  %v1840_v40 = vadd.f32 %v1839_v26, %v1763_v38  ;;  %v601_v26 = vld [vmem:[%s600_s4] sm:$0x1]  ;;  %s627_s4 = sld [smem:[#allocation7 + %s12638_s9]]  ;;  %613 = vst [vmem:[#allocation2 + $0x14] sm:$0x1] %v612_v33 }
 0x3d4   : > { %v602_v28 = vadd.f32 %v601_v26, %v599_v24  ;;  %v629_v37 = vld [vmem:[%s628_s15] sm:$0x1]  ;;  %s645_s9 = sld [smem:[#allocation7 + %s12645_s7]] }
 0x3d5   : > { %s657_s15 = sld [smem:[#allocation7 + %s12644_s29]] }
 0x3d6   : > { %603 = vst [vmem:[#allocation2 + $0x13] sm:$0x1] %v602_v28  ;;  %s650_s29 = scalar_lea.vmem %s12583_s2, %s647_s26  ;;  %s677_s7 = sld [smem:[#allocation7 + %s676_s10]] }
 0x3d9   : > { %v1922_v41 = vpop.f32.mrf.mxu0  ;;  %s630_s22 = scalar_lea.vmem %s12583_s2, %s627_s4  ;;  %s12643_s4 = sadd.s32 3, %s9751_s20 }
 0x3da   : > { %v1923_v42 = vadd.f32 %v1922_v41, %v1840_v40  ;;  %v631_v38 = vld [vmem:[%s630_s22] sm:$0x1]  ;;  %s655_s16 = sld [smem:[#allocation7 + %s12643_s4]]  ;;  %s648_s21 = scalar_lea.vmem %s12582_s1, %s645_s9 }
 0x3db   : > { %v8763_v44 = vpop.f32.mrf.mxu0  ;;  %v632_v40 = vadd.f32 %v631_v38, %v629_v37  ;;  %v639_v41 = vld [vmem:[%s638_s3] sm:$0x1]  ;;  %s12731_s3 = sld [smem:[#allocation12_spill]]  ;;  %s12655_s9 = sadd.s32 4, %s9814_s23 }
 0x3dc   : > { %v1998_v45 = vadd.f32 %v1997_v34, %v1923_v42  ;;  %v619_v34 = vld [vmem:[%s618_s6] sm:$0x1]  ;;  %s680_s4 = scalar_lea.vmem %s12583_s2, %s677_s7  ;;  %s705_s7 = sld [smem:[#allocation7 + %s12652_s30]] }
 0x3dd   : > { %v622_v36 = vadd.f32 %v621_v35, %v619_v34  ;;  %633 = vst [vmem:[#allocation2 + $0x16] sm:$0x1] %v632_v40  ;;  %v641_v42 = vld [vmem:[%s640_s12] sm:$0x1] }
 0x3de   : > { %v2001_v46 = vadd.f32 %v1998_v45, %v1513_v43  ;;  %v642_v43 = vadd.f32 %v641_v42, %v639_v41  ;;  %v649_v35 = vld [vmem:[%s648_s21] sm:$0x1]  ;;  %s660_s21 = scalar_lea.vmem %s12583_s2, %s657_s15 }
 0x3df   : > { %623 = vst [vmem:[#allocation2 + $0x15] sm:$0x1] %v622_v36  ;;  %v651_v36 = vld [vmem:[%s650_s29] sm:$0x1]  ;;  %s12654_s29 = sadd.s32 4, %s9770_s14 }
 0x3e0   : > { %9433 = vtanh.f32 %v2001_v46  ;;  %v8220_v48 = vmul.f32 -1.442695, %v2001_v46  ;;  %643 = vst [vmem:[#allocation2 + $0x17] sm:$0x1] %v642_v43  ;;  %v652_v37 = vadd.f32 %v651_v36, %v649_v35  ;;  %v661_v40 = vld [vmem:[%s660_s21] sm:$0x1] }
 0x3e1   : > { %s12646_s17 = sadd.s32 3, %s12731_s3  ;;  %s12648_s27 = sadd.s32 4, %s12731_s3 }
 0x3e2   : > { %9435 = vpow2.f32 %v8220_v48  ;;  %s665_s22 = sld [smem:[#allocation7 + %s12646_s17]]  ;;  %s12651_s3 = sadd.s32 3, %s9770_s14  ;;  %653 = vst [vmem:[#allocation2 + $0x18] sm:$0x1] %v652_v37 }
 0x3e3   : > { %s667_s6 = sld [smem:[#allocation7 + %s12648_s27]]  ;;  %s658_s27 = scalar_lea.vmem %s12582_s1, %s655_s16 }
 0x3e4   : > { %v659_v38 = vld [vmem:[%s658_s27] sm:$0x1]  ;;  %s685_s12 = sld [smem:[#allocation7 + %s12651_s3]]  ;;  %s12657_s3 = sadd.s32 4, %s9830_s0 }
 0x3e5   : > { %v662_v41 = vadd.f32 %v661_v40, %v659_v38  ;;  %s687_s15 = sld [smem:[#allocation7 + %s12654_s29]]  ;;  %s12740_s29 = sadd.s32 3, %s9770_s14 }
 0x3e6   : > { %s717_s30 = sld [smem:[#allocation7 + %s12657_s3]] }
 0x3e7   : > { %663 = vst [vmem:[#allocation2 + $0x19] sm:$0x1] %v662_v41  ;;  %s757_s3 = sld [smem:[#allocation7 + %s12740_s29]]  ;;  %s12750_s29 = sadd.s32 2, %s9748_s19 }
 0x3e8   : > { %s668_s26 = scalar_lea.vmem %s12582_s1, %s665_s22  ;;  %s12650_s22 = sadd.s32 3, %s9777_s18 }
 0x3e9   : > { %v669_v42 = vld [vmem:[%s668_s26] sm:$0x1]  ;;  %s670_s17 = scalar_lea.vmem %s12583_s2, %s667_s6  ;;  %s695_s6 = sld [smem:[#allocation7 + %s12650_s22]] }
 0x3ea   : > { %v671_v43 = vld [vmem:[%s670_s17] sm:$0x1]  ;;  %s12653_s26 = sadd.s32 4, %s9777_s18  ;;  %s688_s17 = scalar_lea.vmem %s12582_s1, %s685_s12 }
 0x3eb   : > { %s697_s27 = sld [smem:[#allocation7 + %s12653_s26]]  ;;  %s690_s13 = scalar_lea.vmem %s12583_s2, %s687_s15 }
 0x3ec   : > { %s12656_s22 = sadd.s32 3, %s9830_s0 }
 0x3ed   : > { %v9434_v47 = vpop.eup %9433 }
 0x3ee   : > { %2011 = vrot.lane.b32.xlu1 %v9434_v47, %s12729_s11 }
 0x3ef   : > { %v9436_v49 = vpop.eup %9435  ;;  %s698_s12 = scalar_lea.vmem %s12582_s1, %s695_s6 }
 0x3f0   : > { %v2005_v50 = vadd.f32 1.0, %v9436_v49 }
 0x3f1   : > { %s700_s15 = scalar_lea.vmem %s12583_s2, %s697_s27  ;;  %s720_s27 = scalar_lea.vmem %s12583_s2, %s717_s30 }
 0x3f2   : > { %9437 = vrcp.f32 %v2005_v50  ;;  %s12733_s30 = sadd.s32 4, %s9748_s19 }
 0x3ff   : > { %v9438_v51 = vpop.eup %9437 }
 0x400   : > { %v2009_v54 = vmul.f32 %v9438_v51, %v9857_v39 }
 0x460   : > { %v2012_v52 = vpop.permute.xlu1 %2011 }
 0x461   : > { %v2014_v53 = vmul.f32 %v9438_v51, %v2012_v52 }
 0x463   : > { %2016 = vrot.lane.b32.xlu0 %v2014_v53, %s12729_s11 }
 0x4d5   : > { %v2017_v55 = vpop.permute.xlu0 %2016 }
 0x4d6   : > { %v10024_v56 = vadd.f32 %v2017_v55, %v2009_v54 }
 0x4d8   : > { %9439 = vtanh.f32 %v10024_v56 }
 0x4e5   : > { %v9440_v57 = vpop.eup %9439 }
 0x4e6   : > { %2022 = vrot.lane.b32.xlu1 %v9440_v57, %s12729_s11 }
 0x558   : > { %v2023_v58 = vpop.permute.xlu1 %2022 }
 0x559   : > { %v2025_v59 = vmul.f32 %v9438_v51, %v2023_v58 }
 0x55b   : > { %2027 = vrot.lane.b32.xlu0 %v2025_v59, %s12730_s5 }
 0x5cd   : > { %v2028_v60 = vpop.permute.xlu0 %2027 }
 0x5ce   : > { %2031 = vst.msk [vmem:[#allocation3 + $0x8] sm:$0xff] %vm987_vm0, %v2028_v60  ;;  %2033 = vst.msk [vmem:[#allocation4 + $0x30] sm:$0xff] %vm987_vm0, %v2028_v60  ;;  %v2036_v61 = vsel %vm987_vm0, %v2028_v60, 0  ;;  %v2035_v60 = vld [vmem:[#allocation2 + $0x10] sm:$0xff] }
 0x5cf   : > { %v2107_v39 = vand.u32 4294901760, %v2036_v61 }
 0x5d1   : > { %v2108_v62 = vsub.f32 %v2036_v61, %v2107_v39  ;;  %8795 = vmatmul.mubr.f32.vlgmr.msra.gmra.mxu1 %v2107_v39 }
 0x5d2   : > { %8809 = vmatpush3.msra.mxu1 %v9605_v4  ;;  %8816 = vmatprep.mubr.msk.f32.mxu1 %vm9513_vm1, %v9512_v3 }
 0x5d3   : > { %8810 = vmatprep.subr.mxu1 %v9512_v3  ;;  %v2109_v63 = vand.u32 4294901760, %v2108_v62 }
 0x5d4   : > { %8811 = vmatpush3.msra.mxu1 %v9607_v5 }
 0x5d5   : > { %8812 = vmatprep.subr.mxu1 %v9512_v3  ;;  %v2110_v0 = vsub.f32 %v2108_v62, %v2109_v63 }
 0x5d6   : > { %8813 = vmatpush3.msra.mxu1 %v9609_v6 }
 0x5d7   : > { %8814 = vmatprep.subr.mxu1 %v9512_v3  ;;  %v2111_v1 = vand.u32 4294901760, %v2110_v0 }
 0x5d8   : > { %8815 = vmatpush3.msra.mxu1 %v9618_v9 }
 0x5d9   : > { %8817 = vmatmul.mubr.f32.vlgmr.msra.gmra.mxu1 %v2109_v63  ;;  %8830 = vmatprep.subr.mxu1 %v9512_v3 }
 0x5da   : > { %8784 = vmatmul.mubr.f32.vlgmr.msra.gmra.mxu0 %v2111_v1  ;;  %8831 = vmatpush3.msra.mxu1 %v9605_v4 }
 0x5db   : > { %8798 = vmatpush3.msra.mxu0 %v9627_v11  ;;  %8832 = vmatprep.subr.mxu1 %v9512_v3 }
 0x5dc   : > { %8799 = vmatprep.subr.mxu0 %v9512_v3  ;;  %8833 = vmatpush3.msra.mxu1 %v9607_v5 }
 0x5dd   : > { %8800 = vmatpush3.msra.mxu0 %v9632_v13  ;;  %8834 = vmatprep.subr.mxu1 %v9512_v3 }
 0x5de   : > { %8801 = vmatprep.subr.mxu0 %v9512_v3  ;;  %8835 = vmatpush3.msra.mxu1 %v9609_v6 }
 0x5df   : > { %8802 = vmatpush3.msra.mxu0 %v9635_v14  ;;  %8836 = vmatprep.subr.mxu1 %v9512_v3 }
 0x5e0   : > { %8803 = vmatprep.subr.mxu0 %v9512_v3  ;;  %8805 = vmatprep.mubr.msk.f32.mxu0 %vm9513_vm1, %v9512_v3 }
 0x5e1   : > { %8804 = vmatpush3.msra.mxu0 %v9639_v15  ;;  %8837 = vmatpush3.msra.mxu1 %v9618_v9 }
 0x5e2   : > { %8838 = vmatprep.mubr.msk.f32.mxu1 %vm9513_vm1, %v9512_v3  ;;  %8806 = vmatmul.mubr.f32.vlgmr.msra.gmra.mxu0 %v2108_v62 }
 0x5e3   : > { %8819 = vmatprep.subr.mxu0 %v9512_v3  ;;  %8839 = vmatmul.mubr.f32.vlgmr.msra.gmra.mxu1 %v2107_v39 }
 0x5e4   : > { %8820 = vmatpush3.msra.mxu0 %v9643_v16  ;;  %8827 = vmatprep.mubr.msk.f32.mxu0 %vm9513_vm1, %v9512_v3 }
 0x5e5   : > { %8821 = vmatprep.subr.mxu0 %v9512_v3  ;;  %8852 = vmatprep.subr.mxu1 %v9512_v3 }
 0x5e6   : > { %8822 = vmatpush3.msra.mxu0 %v9647_v18  ;;  %8853 = vmatpush3.msra.mxu1 %v9665_v25 }
 0x5e7   : > { %8823 = vmatprep.subr.mxu0 %v9512_v3  ;;  %8854 = vmatprep.subr.mxu1 %v9512_v3 }
 0x5e8   : > { %8824 = vmatpush3.msra.mxu0 %v9650_v19  ;;  %8855 = vmatpush3.msra.mxu1 %v9667_v27 }
 0x5e9   : > { %8825 = vmatprep.subr.mxu0 %v9512_v3  ;;  %8856 = vmatprep.subr.mxu1 %v9512_v3 }
 0x5ea   : > { %8826 = vmatpush3.msra.mxu0 %v9654_v20  ;;  %8857 = vmatpush3.msra.mxu1 %v9673_v30 }
 0x5eb   : > { %8828 = vmatmul.mubr.f32.vlgmr.msra.gmra.mxu0 %v2107_v39  ;;  %8858 = vmatprep.subr.mxu1 %v9512_v3 }
 0x5ec   : > { %8859 = vmatpush3.msra.mxu1 %v9677_v31  ;;  %8841 = vmatprep.subr.mxu0 %v9512_v3 }
 0x5ed   : > { %8860 = vmatprep.mubr.msk.f32.mxu1 %vm9513_vm1, %v9512_v3  ;;  %8874 = vmatprep.subr.mxu1 %v9512_v3 }
 0x5ee   : > { %8842 = vmatpush3.msra.mxu0 %v9605_v4  ;;  %8849 = vmatprep.mubr.msk.f32.mxu0 %vm9513_vm1, %v9512_v3 }
 0x5ef   : > { %8843 = vmatprep.subr.mxu0 %v9512_v3 }
 0x5f0   : > { %8844 = vmatpush3.msra.mxu0 %v9607_v5 }
 0x5f1   : > { %8845 = vmatprep.subr.mxu0 %v9512_v3 }
 0x5f2   : > { %8846 = vmatpush3.msra.mxu0 %v9609_v6 }
 0x5f3   : > { %8847 = vmatprep.subr.mxu0 %v9512_v3 }
 0x5f4   : > { %8848 = vmatpush3.msra.mxu0 %v9618_v9 }
 0x5f5   : > { %8863 = vmatprep.subr.mxu0 %v9512_v3 }
 0x691   : > { %v2204_v44 = vpop.f32.mrf.mxu1 }
 0x693   : > { %v8796_v45 = vpop.f32.mrf.mxu1 }
 0x694   : > { %v679_v45 = vld [vmem:[%s678_s24] sm:$0x1]  ;;  %s12736_s24 = sadd.s32 3, %s9751_s20 }
 0x695   : > { %s733_s21 = sld [smem:[#allocation7 + %s12736_s24]] }
 0x699   : > { %v2361_v46 = vpop.f32.mrf.mxu1 }
 0x69a   : > { %v2113_v47 = vpop.f32.mrf.mxu0 }
 0x69b   : > { %v8818_v48 = vpop.f32.mrf.mxu1  ;;  %v2205_v52 = vadd.f32 %v2204_v44, %v2113_v47  ;;  %v672_v44 = vadd.f32 %v671_v43, %v669_v42 }
 0x69c   : > { %v8785_v49 = vpop.f32.mrf.mxu0  ;;  %v689_v48 = vld [vmem:[%s688_s17] sm:$0x1]  ;;  %s715_s17 = sld [smem:[#allocation7 + %s12656_s22]] }
 0x69d   : > { %673 = vst [vmem:[#allocation2 + $0x1a] sm:$0x1] %v672_v44  ;;  %v691_v49 = vld [vmem:[%s690_s13] sm:$0x1]  ;;  %s708_s13 = scalar_lea.vmem %s12582_s1, %s705_s7  ;;  %s724_s7 = sld [smem:[#allocation7 + %s12733_s30]] }
 0x69e   : > { %s12741_s30 = sadd.s32 4, %s9777_s18 }
 0x6a2   : > { %v2284_v50 = vpop.f32.mrf.mxu0  ;;  %s718_s22 = scalar_lea.vmem %s12582_s1, %s715_s17  ;;  %s12735_s17 = sadd.s32 4, %s9751_s20 }
 0x6a3   : > { %v2519_v51 = vpop.f32.mrf.mxu1  ;;  %v2285_v55 = vadd.f32 %v2284_v50, %v2205_v52  ;;  %v692_v50 = vadd.f32 %v691_v49, %v689_v48  ;;  %v701_v52 = vld [vmem:[%s700_s15] sm:$0x1]  ;;  %s732_s15 = sld [smem:[#allocation7 + %s12735_s17]]  ;;  %s726_s26 = scalar_lea.vmem %s12582_s1, %s724_s7 }
 0x6a4   : > { %v8807_v53 = vpop.f32.mrf.mxu0  ;;  %s749_s17 = sld [smem:[#allocation7 + %s674_s8]]  ;;  %s760_s7 = scalar_lea.vmem %s12583_s2, %s757_s3 }
 0x6a5   : > { %v8840_v54 = vpop.f32.mrf.mxu1  ;;  %v2362_v57 = vadd.f32 %v2361_v46, %v2285_v55  ;;  %v681_v46 = vld [vmem:[%s680_s4] sm:$0x1]  ;;  %s707_s4 = sld [smem:[#allocation7 + %s12655_s9]]  ;;  %693 = vst [vmem:[#allocation2 + $0x1c] sm:$0x1] %v692_v50  ;;  %s12734_s9 = sadd.s32 3, %s9748_s19 }
 0x6a6   : > { %v682_v47 = vadd.f32 %v681_v46, %v679_v45  ;;  %v709_v54 = vld [vmem:[%s708_s13] sm:$0x1] }
 0x6a8   : > { %683 = vst [vmem:[#allocation2 + $0x1b] sm:$0x1] %v682_v47 }
 0x6aa   : > { %s752_s8 = scalar_lea.vmem %s12583_s2, %s749_s17 }
 0x6ab   : > { %v2444_v58 = vpop.f32.mrf.mxu0  ;;  %s710_s6 = scalar_lea.vmem %s12583_s2, %s707_s4  ;;  %s725_s4 = sld [smem:[#allocation7 + %s12734_s9]] }
 0x6ac   : > { %v2445_v59 = vadd.f32 %v2444_v58, %v2362_v57  ;;  %v711_v55 = vld [vmem:[%s710_s6] sm:$0x1] }
 0x6ad   : > { %v8829_v61 = vpop.f32.mrf.mxu0  ;;  %v712_v57 = vadd.f32 %v711_v55, %v709_v54  ;;  %v719_v58 = vld [vmem:[%s718_s22] sm:$0x1]  ;;  %s12732_s22 = sld [smem:[#allocation12_spill]] }
 0x6ae   : > { %v2520_v39 = vadd.f32 %v2519_v51, %v2445_v59  ;;  %v699_v51 = vld [vmem:[%s698_s12] sm:$0x1]  ;;  %s736_s12 = scalar_lea.vmem %s12583_s2, %s733_s21 }
 0x6af   : > { %v702_v53 = vadd.f32 %v701_v52, %v699_v51  ;;  %713 = vst [vmem:[#allocation2 + $0x1e] sm:$0x1] %v712_v57  ;;  %v721_v59 = vld [vmem:[%s720_s27] sm:$0x1]  ;;  %s748_s27 = sld [smem:[#allocation7 + %s676_s10]] }
 0x6b0   : > { %v2523_v62 = vadd.f32 %v2520_v39, %v2035_v60  ;;  %v722_v60 = vadd.f32 %v721_v59, %v719_v58  ;;  %v727_v52 = vld [vmem:[%s726_s26] sm:$0x1] }
 0x6b1   : > { %703 = vst [vmem:[#allocation2 + $0x1d] sm:$0x1] %v702_v53  ;;  %s728_s9 = scalar_lea.vmem %s12583_s2, %s725_s4  ;;  %v737_v57 = vld [vmem:[%s736_s12] sm:$0x1]  ;;  %s12743_s12 = sadd.s32 4, %s9814_s23 }
 0x6b2   : > { %9441 = vtanh.f32 %v2523_v62  ;;  %v8221_v0 = vmul.f32 -1.442695, %v2523_v62  ;;  %723 = vst [vmem:[#allocation2 + $0x1f] sm:$0x1] %v722_v60  ;;  %v729_v53 = vld [vmem:[%s728_s9] sm:$0x1] }
 0x6b3   : > { %s12737_s13 = sadd.s32 4, %s12732_s22  ;;  %s12738_s6 = sadd.s32 3, %s12732_s22  ;;  %v730_v54 = vadd.f32 %v729_v53, %v727_v52 }
 0x6b4   : > { %9443 = vpow2.f32 %v8221_v0  ;;  %s740_s25 = sld [smem:[#allocation7 + %s12737_s13]]  ;;  %s734_s22 = scalar_lea.vmem %s12582_s1, %s732_s15 }
 0x6b5   : > { %s741_s16 = sld [smem:[#allocation7 + %s12738_s6]]  ;;  %s12739_s6 = sadd.s32 4, %s9770_s14  ;;  %v735_v55 = vld [vmem:[%s734_s22] sm:$0x1]  ;;  %731 = vst [vmem:[#allocation2 + $0x20] sm:$0x1] %v730_v54 }
 0x6b6   : > { %s756_s20 = sld [smem:[#allocation7 + %s12739_s6]]  ;;  %v738_v58 = vadd.f32 %v737_v57, %v735_v55  ;;  %s12742_s13 = sadd.s32 3, %s9777_s18 }
 0x6b7   : > { %s764_s9 = sld [smem:[#allocation7 + %s12741_s30]]  ;;  %s750_s10 = scalar_lea.vmem %s12582_s1, %s748_s27 }
 0x6b8   : > { %s765_s21 = sld [smem:[#allocation7 + %s12742_s13]]  ;;  %739 = vst [vmem:[#allocation2 + $0x21] sm:$0x1] %v738_v58 }
 0x6ba   : > { %s742_s26 = scalar_lea.vmem %s12582_s1, %s740_s25  ;;  %s772_s25 = sld [smem:[#allocation7 + %s12743_s12]] }
 0x6bb   : > { %v743_v59 = vld [vmem:[%s742_s26] sm:$0x1]  ;;  %s744_s24 = scalar_lea.vmem %s12583_s2, %s741_s16  ;;  %s12744_s26 = sadd.s32 3, %s9814_s23 }
 0x6bc   : > { %v745_v60 = vld [vmem:[%s744_s24] sm:$0x1]  ;;  %s773_s30 = sld [smem:[#allocation7 + %s12744_s26]]  ;;  %s758_s22 = scalar_lea.vmem %s12582_s1, %s756_s20 }
 0x6bd   : > { %s12745_s24 = sadd.s32 4, %s9830_s0  ;;  %s766_s4 = scalar_lea.vmem %s12582_s1, %s764_s9 }
 0x6be   : > { %s780_s13 = sld [smem:[#allocation7 + %s12745_s24]]  ;;  %s768_s26 = scalar_lea.vmem %s12583_s2, %s765_s21 }
 0x6bf   : > { %v9442_v63 = vpop.eup %9441 }
 0x6c0   : > { %2533 = vrot.lane.b32.xlu1 %v9442_v63, %s12729_s11 }
 0x6c1   : > { %v9444_v1 = vpop.eup %9443 }
 0x6c2   : > { %v2527_v2 = vadd.f32 1.0, %v9444_v1  ;;  %s776_s27 = scalar_lea.vmem %s12583_s2, %s773_s30  ;;  %s12748_s30 = sld [smem:[#allocation12_spill]] }
 0x6c4   : > { %9445 = vrcp.f32 %v2527_v2 }
 0x6c8   : > { %s12753_s15 = sadd.s32 5, %s12748_s30  ;;  %s12754_s3 = sadd.s32 2, %s12748_s30 }
 0x6c9   : > { %s805_s24 = sld [smem:[#allocation7 + %s12754_s3]]  ;;  %s12757_s3 = sadd.s32 5, %s9770_s14 }
 0x6d1   : > { %v9446_v7 = vpop.eup %9445 }
 0x6d2   : > { %v2531_v12 = vmul.f32 %v9446_v7, %v10024_v56 }
 0x732   : > { %v2534_v8 = vpop.permute.xlu1 %2533 }
 0x733   : > { %v2536_v10 = vmul.f32 %v9446_v7, %v2534_v8 }
 0x735   : > { %2538 = vrot.lane.b32.xlu0 %v2536_v10, %s12729_s11 }
 0x7a7   : > { %v2539_v17 = vpop.permute.xlu0 %2538 }
 0x7a8   : > { %v10191_v21 = vadd.f32 %v2539_v17, %v2531_v12 }
 0x7aa   : > { %9447 = vtanh.f32 %v10191_v21 }
 0x7b7   : > { %v9448_v22 = vpop.eup %9447 }
 0x7b8   : > { %2544 = vrot.lane.b32.xlu1 %v9448_v22, %s12729_s11 }
 0x82a   : > { %v2545_v23 = vpop.permute.xlu1 %2544 }
 0x82b   : > { %v2547_v24 = vmul.f32 %v9446_v7, %v2545_v23 }
 0x82d   : > { %2549 = vrot.lane.b32.xlu0 %v2547_v24, %s12730_s5 }
 0x89f   : > { %v2550_v26 = vpop.permute.xlu0 %2549 }
 0x8a0   : > { %2553 = vst.msk [vmem:[#allocation3 + $0x10] sm:$0xff] %vm987_vm0, %v2550_v26  ;;  %2555 = vst.msk [vmem:[#allocation4 + $0x28] sm:$0xff] %vm987_vm0, %v2550_v26  ;;  %v2558_v28 = vsel %vm987_vm0, %v2550_v26, 0  ;;  %v2557_v26 = vld [vmem:[#allocation2 + $0x18] sm:$0xff] }
 0x8a1   : > { %v2629_v56 = vand.u32 4294901760, %v2558_v28 }
 0x8a3   : > { %v2630_v29 = vsub.f32 %v2558_v28, %v2629_v56  ;;  %8861 = vmatmul.mubr.f32.vlgmr.msra.gmra.mxu1 %v2629_v56 }
 0x8a4   : > { %8875 = vmatpush3.msra.mxu1 %v9605_v4  ;;  %8882 = vmatprep.mubr.msk.f32.mxu1 %vm9513_vm1, %v9512_v3 }
 0x8a5   : > { %8876 = vmatprep.subr.mxu1 %v9512_v3  ;;  %v2631_v32 = vand.u32 4294901760, %v2630_v29 }
 0x8a6   : > { %8877 = vmatpush3.msra.mxu1 %v9607_v5 }
 0x8a7   : > { %8878 = vmatprep.subr.mxu1 %v9512_v3  ;;  %v2632_v33 = vsub.f32 %v2630_v29, %v2631_v32 }
 0x8a8   : > { %8879 = vmatpush3.msra.mxu1 %v9609_v6 }
 0x8a9   : > { %8880 = vmatprep.subr.mxu1 %v9512_v3  ;;  %v2633_v34 = vand.u32 4294901760, %v2632_v33 }
 0x8aa   : > { %8881 = vmatpush3.msra.mxu1 %v9618_v9 }
 0x8ab   : > { %8883 = vmatmul.mubr.f32.vlgmr.msra.gmra.mxu1 %v2631_v32  ;;  %8896 = vmatprep.subr.mxu1 %v9512_v3 }
 0x8ac   : > { %8850 = vmatmul.mubr.f32.vlgmr.msra.gmra.mxu0 %v2633_v34  ;;  %8897 = vmatpush3.msra.mxu1 %v9605_v4 }
 0x8ad   : > { %8864 = vmatpush3.msra.mxu0 %v9627_v11  ;;  %8898 = vmatprep.subr.mxu1 %v9512_v3 }
 0x8ae   : > { %8865 = vmatprep.subr.mxu0 %v9512_v3  ;;  %8899 = vmatpush3.msra.mxu1 %v9607_v5 }
 0x8af   : > { %8866 = vmatpush3.msra.mxu0 %v9632_v13  ;;  %8900 = vmatprep.subr.mxu1 %v9512_v3 }
 0x8b0   : > { %8867 = vmatprep.subr.mxu0 %v9512_v3  ;;  %8901 = vmatpush3.msra.mxu1 %v9609_v6 }
 0x8b1   : > { %8868 = vmatpush3.msra.mxu0 %v9635_v14  ;;  %8902 = vmatprep.subr.mxu1 %v9512_v3 }
 0x8b2   : > { %8869 = vmatprep.subr.mxu0 %v9512_v3  ;;  %8871 = vmatprep.mubr.msk.f32.mxu0 %vm9513_vm1, %v9512_v3 }
 0x8b3   : > { %8870 = vmatpush3.msra.mxu0 %v9639_v15  ;;  %8903 = vmatpush3.msra.mxu1 %v9618_v9 }
 0x8b4   : > { %8904 = vmatprep.mubr.msk.f32.mxu1 %vm9513_vm1, %v9512_v3  ;;  %8872 = vmatmul.mubr.f32.vlgmr.msra.gmra.mxu0 %v2630_v29 }
 0x8b5   : > { %8885 = vmatprep.subr.mxu0 %v9512_v3  ;;  %8905 = vmatmul.mubr.f32.vlgmr.msra.gmra.mxu1 %v2629_v56 }
 0x8b6   : > { %8886 = vmatpush3.msra.mxu0 %v9643_v16  ;;  %8893 = vmatprep.mubr.msk.f32.mxu0 %vm9513_vm1, %v9512_v3 }
 0x8b7   : > { %8887 = vmatprep.subr.mxu0 %v9512_v3  ;;  %8918 = vmatprep.subr.mxu1 %v9512_v3 }
 0x8b8   : > { %8888 = vmatpush3.msra.mxu0 %v9647_v18  ;;  %8919 = vmatpush3.msra.mxu1 %v9665_v25 }
 0x8b9   : > { %8889 = vmatprep.subr.mxu0 %v9512_v3  ;;  %8920 = vmatprep.subr.mxu1 %v9512_v3 }
 0x8ba   : > { %8890 = vmatpush3.msra.mxu0 %v9650_v19  ;;  %8921 = vmatpush3.msra.mxu1 %v9667_v27 }
 0x8bb   : > { %8891 = vmatprep.subr.mxu0 %v9512_v3  ;;  %8922 = vmatprep.subr.mxu1 %v9512_v3 }
 0x8bc   : > { %8892 = vmatpush3.msra.mxu0 %v9654_v20  ;;  %8923 = vmatpush3.msra.mxu1 %v9673_v30 }
 0x8bd   : > { %8894 = vmatmul.mubr.f32.vlgmr.msra.gmra.mxu0 %v2629_v56  ;;  %8924 = vmatprep.subr.mxu1 %v9512_v3 }
 0x8be   : > { %8925 = vmatpush3.msra.mxu1 %v9677_v31  ;;  %8907 = vmatprep.subr.mxu0 %v9512_v3 }
 0x8bf   : > { %8926 = vmatprep.mubr.msk.f32.mxu1 %vm9513_vm1, %v9512_v3  ;;  %8940 = vmatprep.subr.mxu1 %v9512_v3 }
 0x8c0   : > { %8908 = vmatpush3.msra.mxu0 %v9605_v4  ;;  %8915 = vmatprep.mubr.msk.f32.mxu0 %vm9513_vm1, %v9512_v3 }
 0x8c1   : > { %8909 = vmatprep.subr.mxu0 %v9512_v3 }
 0x8c2   : > { %8910 = vmatpush3.msra.mxu0 %v9607_v5 }
 0x8c3   : > { %8911 = vmatprep.subr.mxu0 %v9512_v3 }
 0x8c4   : > { %8912 = vmatpush3.msra.mxu0 %v9609_v6 }
 0x8c5   : > { %8913 = vmatprep.subr.mxu0 %v9512_v3 }
 0x8c6   : > { %8914 = vmatpush3.msra.mxu0 %v9618_v9 }
 0x8c7   : > { %8929 = vmatprep.subr.mxu0 %v9512_v3 }
 0x963   : > { %v2726_v61 = vpop.f32.mrf.mxu1 }
 0x965   : > { %v8862_v39 = vpop.f32.mrf.mxu1 }
 0x966   : > { %v751_v39 = vld [vmem:[%s750_s10] sm:$0x1]  ;;  %s12746_s10 = sadd.s32 3, %s9830_s0 }
 0x967   : > { %s781_s12 = sld [smem:[#allocation7 + %s12746_s10]] }
 0x96b   : > { %v2883_v62 = vpop.f32.mrf.mxu1 }
 0x96c   : > { %v2635_v63 = vpop.f32.mrf.mxu0 }
 0x96d   : > { %v8884_v0 = vpop.f32.mrf.mxu1  ;;  %v2727_v8 = vadd.f32 %v2726_v61, %v2635_v63  ;;  %v746_v61 = vadd.f32 %v745_v60, %v743_v59  ;;  %s784_s17 = scalar_lea.vmem %s12583_s2, %s781_s12 }
 0x96e   : > { %v8851_v1 = vpop.f32.mrf.mxu0  ;;  %v759_v0 = vld [vmem:[%s758_s22] sm:$0x1]  ;;  %s774_s22 = scalar_lea.vmem %s12582_s1, %s772_s25  ;;  %s12747_s25 = sld [smem:[#allocation11_spill]] }
 0x96f   : > { %747 = vst [vmem:[#allocation2 + $0x22] sm:$0x1] %v746_v61  ;;  %v761_v1 = vld [vmem:[%s760_s7] sm:$0x1]  ;;  %s782_s7 = scalar_lea.vmem %s12582_s1, %s780_s13  ;;  %s12749_s13 = sadd.s32 5, %s9748_s19 }
 0x970   : > { %s788_s12 = sld [smem:[#allocation7 + %s12749_s13]] }
 0x974   : > { %v2806_v2 = vpop.f32.mrf.mxu0  ;;  %s12751_s20 = sadd.s32 5, %s12747_s25 }
 0x975   : > { %v3041_v7 = vpop.f32.mrf.mxu1  ;;  %v2807_v17 = vadd.f32 %v2806_v2, %v2727_v8  ;;  %v762_v2 = vadd.f32 %v761_v1, %v759_v0  ;;  %v769_v8 = vld [vmem:[%s768_s26] sm:$0x1]  ;;  %s12752_s26 = sadd.s32 2, %s12747_s25  ;;  %s820_s25 = sld [smem:[#allocation7 + %s12757_s3]] }
 0x976   : > { %v8873_v10 = vpop.f32.mrf.mxu0  ;;  %s797_s16 = sld [smem:[#allocation7 + %s12752_s26]]  ;;  %s790_s6 = scalar_lea.vmem %s12582_s1, %s788_s12 }
 0x977   : > { %v8906_v12 = vpop.f32.mrf.mxu1  ;;  %v2884_v22 = vadd.f32 %v2883_v62, %v2807_v17  ;;  %v753_v62 = vld [vmem:[%s752_s8] sm:$0x1]  ;;  %763 = vst [vmem:[#allocation2 + $0x24] sm:$0x1] %v762_v2  ;;  %s796_s8 = sld [smem:[#allocation7 + %s12751_s20]]  ;;  %s808_s26 = scalar_lea.vmem %s12583_s2, %s805_s24 }
 0x978   : > { %v754_v63 = vadd.f32 %v753_v62, %v751_v39  ;;  %v775_v12 = vld [vmem:[%s774_s22] sm:$0x1]  ;;  %s804_s22 = sld [smem:[#allocation7 + %s12753_s15]]  ;;  %s12760_s15 = sadd.s32 2, %s9777_s18 }
 0x979   : > { %v777_v17 = vld [vmem:[%s776_s27] sm:$0x1] }
 0x97a   : > { %755 = vst [vmem:[#allocation2 + $0x23] sm:$0x1] %v754_v63 }
 0x97c   : > { %s800_s9 = scalar_lea.vmem %s12583_s2, %s797_s16  ;;  %s829_s16 = sld [smem:[#allocation7 + %s12760_s15]] }
 0x97d   : > { %v2966_v23 = vpop.f32.mrf.mxu0  ;;  %s798_s30 = scalar_lea.vmem %s12582_s1, %s796_s8 }
 0x97e   : > { %v2967_v24 = vadd.f32 %v2966_v23, %v2884_v22  ;;  %v778_v22 = vadd.f32 %v777_v17, %v775_v12  ;;  %v783_v23 = vld [vmem:[%s782_s7] sm:$0x1]  ;;  %s12755_s7 = sadd.s32 5, %s9763_s28 }
 0x97f   : > { %v8895_v28 = vpop.f32.mrf.mxu0  ;;  %s812_s21 = sld [smem:[#allocation7 + %s12755_s7]]  ;;  %v799_v17 = vld [vmem:[%s798_s30] sm:$0x1]  ;;  %s822_s30 = scalar_lea.vmem %s12582_s1, %s820_s25 }
 0x980   : > { %v3042_v56 = vadd.f32 %v3041_v7, %v2967_v24  ;;  %v767_v7 = vld [vmem:[%s766_s4] sm:$0x1]  ;;  %779 = vst [vmem:[#allocation2 + $0x26] sm:$0x1] %v778_v22  ;;  %s789_s4 = sld [smem:[#allocation7 + %s12750_s29]]  ;;  %s12756_s29 = sadd.s32 2, %s9763_s28 }
 0x981   : > { %v770_v10 = vadd.f32 %v769_v8, %v767_v7  ;;  %v785_v24 = vld [vmem:[%s784_s17] sm:$0x1]  ;;  %s813_s20 = sld [smem:[#allocation7 + %s12756_s29]]  ;;  %s806_s17 = scalar_lea.vmem %s12582_s1, %s804_s22 }
 0x982   : > { %v3045_v29 = vadd.f32 %v3042_v56, %v2557_v26  ;;  %v786_v26 = vadd.f32 %v785_v24, %v783_v23  ;;  %v791_v8 = vld [vmem:[%s790_s6] sm:$0x1]  ;;  %s12758_s6 = sadd.s32 2, %s9770_s14 }
 0x983   : > { %771 = vst [vmem:[#allocation2 + $0x25] sm:$0x1] %v770_v10  ;;  %s821_s7 = sld [smem:[#allocation7 + %s12758_s6]]  ;;  %v801_v22 = vld [vmem:[%s800_s9] sm:$0x1]  ;;  %s12761_s9 = sadd.s32 5, %s9814_s23 }
 0x984   : > { %9449 = vtanh.f32 %v3045_v29  ;;  %v8222_v33 = vmul.f32 -1.442695, %v3045_v29  ;;  %787 = vst [vmem:[#allocation2 + $0x27] sm:$0x1] %v786_v26  ;;  %v802_v23 = vadd.f32 %v801_v22, %v799_v17  ;;  %v807_v24 = vld [vmem:[%s806_s17] sm:$0x1] }
 0x985   : > { %v809_v26 = vld [vmem:[%s808_s26] sm:$0x1]  ;;  %s814_s27 = scalar_lea.vmem %s12582_s1, %s812_s21  ;;  %s836_s22 = sld [smem:[#allocation7 + %s12761_s9]] }
 0x986   : > { %9451 = vpow2.f32 %v8222_v33  ;;  %s792_s13 = scalar_lea.vmem %s12583_s2, %s789_s4  ;;  %803 = vst [vmem:[#allocation2 + $0x29] sm:$0x1] %v802_v23  ;;  %s12762_s17 = sadd.s32 2, %s9814_s23 }
 0x987   : > { %v793_v10 = vld [vmem:[%s792_s13] sm:$0x1]  ;;  %s12759_s13 = sadd.s32 5, %s9777_s18  ;;  %s816_s10 = scalar_lea.vmem %s12583_s2, %s813_s20 }
 0x988   : > { %v794_v12 = vadd.f32 %v793_v10, %v791_v8  ;;  %s828_s29 = sld [smem:[#allocation7 + %s12759_s13]]  ;;  %s12763_s26 = sadd.s32 5, %s9830_s0 }
 0x989   : > { %s837_s13 = sld [smem:[#allocation7 + %s12762_s17]]  ;;  %s824_s12 = scalar_lea.vmem %s12583_s2, %s821_s7 }
 0x98a   : > { %795 = vst [vmem:[#allocation2 + $0x28] sm:$0x1] %v794_v12  ;;  %s844_s15 = sld [smem:[#allocation7 + %s12763_s26]]  ;;  %s832_s17 = scalar_lea.vmem %s12583_s2, %s829_s16 }
 0x98b   : > { %s12768_s6 = sadd.s32 1, %s9748_s19 }
 0x98e   : > { %s830_s4 = scalar_lea.vmem %s12582_s1, %s828_s29 }
 0x98f   : > { %s840_s21 = scalar_lea.vmem %s12583_s2, %s837_s13  ;;  %s12766_s13 = sld [smem:[#allocation12_spill]] }
 0x991   : > { %v9450_v32 = vpop.eup %9449 }
 0x992   : > { %3055 = vrot.lane.b32.xlu1 %v9450_v32, %s12729_s11 }
 0x993   : > { %v9452_v34 = vpop.eup %9451 }
 0x994   : > { %v3049_v35 = vadd.f32 1.0, %v9452_v34 }
 0x995   : > { %s12771_s8 = sadd.s32 6, %s12766_s13  ;;  %s12772_s7 = sadd.s32 1, %s12766_s13 }
 0x996   : > { %9453 = vrcp.f32 %v3049_v35  ;;  %s869_s26 = sld [smem:[#allocation7 + %s12772_s7]]  ;;  %s12775_s7 = sadd.s32 6, %s9770_s14 }
 0x9a3   : > { %v9454_v36 = vpop.eup %9453 }
 0x9a4   : > { %v3053_v40 = vmul.f32 %v9454_v36, %v10191_v21 }
 0xa04   : > { %v3056_v37 = vpop.permute.xlu1 %3055 }
 0xa05   : > { %v3058_v38 = vmul.f32 %v9454_v36, %v3056_v37 }
 0xa07   : > { %3060 = vrot.lane.b32.xlu0 %v3058_v38, %s12729_s11 }
 0xa79   : > { %v3061_v41 = vpop.permute.xlu0 %3060 }
 0xa7a   : > { %v10358_v42 = vadd.f32 %v3061_v41, %v3053_v40 }
 0xa7c   : > { %9455 = vtanh.f32 %v10358_v42 }
 0xa89   : > { %v9456_v43 = vpop.eup %9455 }
 0xa8a   : > { %3066 = vrot.lane.b32.xlu1 %v9456_v43, %s12729_s11 }
 0xafc   : > { %v3067_v44 = vpop.permute.xlu1 %3066 }
 0xafd   : > { %v3069_v45 = vmul.f32 %v9454_v36, %v3067_v44 }
 0xaff   : > { %3071 = vrot.lane.b32.xlu0 %v3069_v45, %s12730_s5 }
 0xb71   : > { %v3072_v46 = vpop.permute.xlu0 %3071 }
 0xb72   : > { %3075 = vst.msk [vmem:[#allocation3 + $0x18] sm:$0xff] %vm987_vm0, %v3072_v46  ;;  %3077 = vst.msk [vmem:[#allocation4 + $0x20] sm:$0xff] %vm987_vm0, %v3072_v46  ;;  %v3080_v47 = vsel %vm987_vm0, %v3072_v46, 0  ;;  %v3079_v46 = vld [vmem:[#allocation2 + $0x20] sm:$0xff] }
 0xb73   : > { %v3151_v21 = vand.u32 4294901760, %v3080_v47 }
 0xb75   : > { %v3152_v48 = vsub.f32 %v3080_v47, %v3151_v21  ;;  %8927 = vmatmul.mubr.f32.vlgmr.msra.gmra.mxu1 %v3151_v21 }
 0xb76   : > { %8941 = vmatpush3.msra.mxu1 %v9605_v4  ;;  %8948 = vmatprep.mubr.msk.f32.mxu1 %vm9513_vm1, %v9512_v3 }
 0xb77   : > { %8942 = vmatprep.subr.mxu1 %v9512_v3  ;;  %v3153_v49 = vand.u32 4294901760, %v3152_v48 }
 0xb78   : > { %8943 = vmatpush3.msra.mxu1 %v9607_v5 }
 0xb79   : > { %8944 = vmatprep.subr.mxu1 %v9512_v3  ;;  %v3154_v50 = vsub.f32 %v3152_v48, %v3153_v49 }
 0xb7a   : > { %8945 = vmatpush3.msra.mxu1 %v9609_v6 }
 0xb7b   : > { %8946 = vmatprep.subr.mxu1 %v9512_v3  ;;  %v3155_v51 = vand.u32 4294901760, %v3154_v50 }
 0xb7c   : > { %8947 = vmatpush3.msra.mxu1 %v9618_v9 }
 0xb7d   : > { %8949 = vmatmul.mubr.f32.vlgmr.msra.gmra.mxu1 %v3153_v49  ;;  %8962 = vmatprep.subr.mxu1 %v9512_v3 }
 0xb7e   : > { %8916 = vmatmul.mubr.f32.vlgmr.msra.gmra.mxu0 %v3155_v51  ;;  %8963 = vmatpush3.msra.mxu1 %v9605_v4 }
 0xb7f   : > { %8930 = vmatpush3.msra.mxu0 %v9627_v11  ;;  %8964 = vmatprep.subr.mxu1 %v9512_v3 }
 0xb80   : > { %8931 = vmatprep.subr.mxu0 %v9512_v3  ;;  %8965 = vmatpush3.msra.mxu1 %v9607_v5 }
 0xb81   : > { %8932 = vmatpush3.msra.mxu0 %v9632_v13  ;;  %8966 = vmatprep.subr.mxu1 %v9512_v3 }
 0xb82   : > { %8933 = vmatprep.subr.mxu0 %v9512_v3  ;;  %8967 = vmatpush3.msra.mxu1 %v9609_v6 }
 0xb83   : > { %8934 = vmatpush3.msra.mxu0 %v9635_v14  ;;  %8968 = vmatprep.subr.mxu1 %v9512_v3 }
 0xb84   : > { %8935 = vmatprep.subr.mxu0 %v9512_v3  ;;  %8937 = vmatprep.mubr.msk.f32.mxu0 %vm9513_vm1, %v9512_v3 }
 0xb85   : > { %8936 = vmatpush3.msra.mxu0 %v9639_v15  ;;  %8969 = vmatpush3.msra.mxu1 %v9618_v9 }
 0xb86   : > { %8970 = vmatprep.mubr.msk.f32.mxu1 %vm9513_vm1, %v9512_v3  ;;  %8938 = vmatmul.mubr.f32.vlgmr.msra.gmra.mxu0 %v3152_v48 }
 0xb87   : > { %8951 = vmatprep.subr.mxu0 %v9512_v3  ;;  %8971 = vmatmul.mubr.f32.vlgmr.msra.gmra.mxu1 %v3151_v21 }
 0xb88   : > { %8952 = vmatpush3.msra.mxu0 %v9643_v16  ;;  %8959 = vmatprep.mubr.msk.f32.mxu0 %vm9513_vm1, %v9512_v3 }
 0xb89   : > { %8953 = vmatprep.subr.mxu0 %v9512_v3  ;;  %8984 = vmatprep.subr.mxu1 %v9512_v3 }
 0xb8a   : > { %8954 = vmatpush3.msra.mxu0 %v9647_v18  ;;  %8985 = vmatpush3.msra.mxu1 %v9665_v25 }
 0xb8b   : > { %8955 = vmatprep.subr.mxu0 %v9512_v3  ;;  %8986 = vmatprep.subr.mxu1 %v9512_v3 }
 0xb8c   : > { %8956 = vmatpush3.msra.mxu0 %v9650_v19  ;;  %8987 = vmatpush3.msra.mxu1 %v9667_v27 }
 0xb8d   : > { %8957 = vmatprep.subr.mxu0 %v9512_v3  ;;  %8988 = vmatprep.subr.mxu1 %v9512_v3 }
 0xb8e   : > { %8958 = vmatpush3.msra.mxu0 %v9654_v20  ;;  %8989 = vmatpush3.msra.mxu1 %v9673_v30 }
 0xb8f   : > { %8960 = vmatmul.mubr.f32.vlgmr.msra.gmra.mxu0 %v3151_v21  ;;  %8990 = vmatprep.subr.mxu1 %v9512_v3 }
 0xb90   : > { %8991 = vmatpush3.msra.mxu1 %v9677_v31  ;;  %8973 = vmatprep.subr.mxu0 %v9512_v3 }
 0xb91   : > { %8992 = vmatprep.mubr.msk.f32.mxu1 %vm9513_vm1, %v9512_v3  ;;  %9006 = vmatprep.subr.mxu1 %v9512_v3 }
 0xb92   : > { %8974 = vmatpush3.msra.mxu0 %v9605_v4  ;;  %8981 = vmatprep.mubr.msk.f32.mxu0 %vm9513_vm1, %v9512_v3 }
 0xb93   : > { %8975 = vmatprep.subr.mxu0 %v9512_v3 }
 0xb94   : > { %8976 = vmatpush3.msra.mxu0 %v9607_v5 }
 0xb95   : > { %8977 = vmatprep.subr.mxu0 %v9512_v3 }
 0xb96   : > { %8978 = vmatpush3.msra.mxu0 %v9609_v6 }
 0xb97   : > { %8979 = vmatprep.subr.mxu0 %v9512_v3 }
 0xb98   : > { %8980 = vmatpush3.msra.mxu0 %v9618_v9 }
 0xb99   : > { %8995 = vmatprep.subr.mxu0 %v9512_v3 }
 0xc35   : > { %v3248_v28 = vpop.f32.mrf.mxu1 }
 0xc37   : > { %v8928_v56 = vpop.f32.mrf.mxu1 }
 0xc38   : > { %v815_v56 = vld [vmem:[%s814_s27] sm:$0x1]  ;;  %s12764_s27 = sadd.s32 2, %s9830_s0 }
 0xc39   : > { %s845_s9 = sld [smem:[#allocation7 + %s12764_s27]] }
 0xc3d   : > { %v3405_v29 = vpop.f32.mrf.mxu1 }
 0xc3e   : > { %v3157_v32 = vpop.f32.mrf.mxu0 }
 0xc3f   : > { %v8950_v33 = vpop.f32.mrf.mxu1  ;;  %v3249_v37 = vadd.f32 %v3248_v28, %v3157_v32  ;;  %v810_v28 = vadd.f32 %v809_v26, %v807_v24  ;;  %s848_s20 = scalar_lea.vmem %s12583_s2, %s845_s9 }
 0xc40   : > { %v8917_v34 = vpop.f32.mrf.mxu0  ;;  %v823_v33 = vld [vmem:[%s822_s30] sm:$0x1]  ;;  %s838_s30 = scalar_lea.vmem %s12582_s1, %s836_s22  ;;  %s12765_s22 = sld [smem:[#allocation11_spill]] }
 0xc41   : > { %811 = vst [vmem:[#allocation2 + $0x2a] sm:$0x1] %v810_v28  ;;  %v825_v34 = vld [vmem:[%s824_s12] sm:$0x1]  ;;  %s846_s12 = scalar_lea.vmem %s12582_s1, %s844_s15  ;;  %s12767_s15 = sadd.s32 6, %s9748_s19 }
 0xc42   : > { %s852_s9 = sld [smem:[#allocation7 + %s12767_s15]] }
 0xc46   : > { %v3328_v35 = vpop.f32.mrf.mxu0  ;;  %s12769_s25 = sadd.s32 6, %s12765_s22 }
 0xc47   : > { %v3563_v36 = vpop.f32.mrf.mxu1  ;;  %v3329_v41 = vadd.f32 %v3328_v35, %v3249_v37  ;;  %v826_v35 = vadd.f32 %v825_v34, %v823_v33  ;;  %v833_v37 = vld [vmem:[%s832_s17] sm:$0x1]  ;;  %s12770_s17 = sadd.s32 1, %s12765_s22  ;;  %s884_s22 = sld [smem:[#allocation7 + %s12775_s7]] }
 0xc48   : > { %v8939_v38 = vpop.f32.mrf.mxu0  ;;  %s861_s24 = sld [smem:[#allocation7 + %s12770_s17]]  ;;  %s854_s3 = scalar_lea.vmem %s12582_s1, %s852_s9 }
 0xc49   : > { %v8972_v40 = vpop.f32.mrf.mxu1  ;;  %v3406_v43 = vadd.f32 %v3405_v29, %v3329_v41  ;;  %v817_v29 = vld [vmem:[%s816_s10] sm:$0x1]  ;;  %827 = vst [vmem:[#allocation2 + $0x2c] sm:$0x1] %v826_v35  ;;  %s860_s10 = sld [smem:[#allocation7 + %s12769_s25]]  ;;  %s872_s17 = scalar_lea.vmem %s12583_s2, %s869_s26 }
 0xc4a   : > { %v818_v32 = vadd.f32 %v817_v29, %v815_v56  ;;  %v839_v40 = vld [vmem:[%s838_s30] sm:$0x1]  ;;  %s868_s30 = sld [smem:[#allocation7 + %s12771_s8]]  ;;  %s12778_s8 = sadd.s32 1, %s9777_s18 }
 0xc4b   : > { %v841_v41 = vld [vmem:[%s840_s21] sm:$0x1] }
 0xc4c   : > { %819 = vst [vmem:[#allocation2 + $0x2b] sm:$0x1] %v818_v32 }
 0xc4e   : > { %s864_s29 = scalar_lea.vmem %s12583_s2, %s861_s24  ;;  %s893_s24 = sld [smem:[#allocation7 + %s12778_s8]] }
 0xc4f   : > { %v3488_v44 = vpop.f32.mrf.mxu0  ;;  %s862_s13 = scalar_lea.vmem %s12582_s1, %s860_s10 }
 0xc50   : > { %v3489_v45 = vadd.f32 %v3488_v44, %v3406_v43  ;;  %v842_v43 = vadd.f32 %v841_v41, %v839_v40  ;;  %v847_v44 = vld [vmem:[%s846_s12] sm:$0x1]  ;;  %s12773_s12 = sadd.s32 6, %s9763_s28 }
 0xc51   : > { %v8961_v47 = vpop.f32.mrf.mxu0  ;;  %s876_s16 = sld [smem:[#allocation7 + %s12773_s12]]  ;;  %v873_v41 = vld [vmem:[%s872_s17] sm:$0x1]  ;;  %s12781_s17 = sadd.s32 6, %s9830_s0 }
 0xc52   : > { %v3564_v21 = vadd.f32 %v3563_v36, %v3489_v45  ;;  %v831_v36 = vld [vmem:[%s830_s4] sm:$0x1]  ;;  %843 = vst [vmem:[#allocation2 + $0x2e] sm:$0x1] %v842_v43  ;;  %s853_s4 = sld [smem:[#allocation7 + %s12768_s6]]  ;;  %s12774_s6 = sadd.s32 1, %s9763_s28 }
 0xc53   : > { %v834_v38 = vadd.f32 %v833_v37, %v831_v36  ;;  %v849_v45 = vld [vmem:[%s848_s20] sm:$0x1]  ;;  %s877_s25 = sld [smem:[#allocation7 + %s12774_s6]]  ;;  %s870_s20 = scalar_lea.vmem %s12582_s1, %s868_s30 }
 0xc54   : > { %v3567_v48 = vadd.f32 %v3564_v21, %v3079_v46  ;;  %v850_v46 = vadd.f32 %v849_v45, %v847_v44  ;;  %v865_v37 = vld [vmem:[%s864_s29] sm:$0x1]  ;;  %s12779_s29 = sadd.s32 6, %s9814_s23  ;;  %s908_s8 = sld [smem:[#allocation7 + %s12781_s17]] }
 0xc55   : > { %835 = vst [vmem:[#allocation2 + $0x2d] sm:$0x1] %v834_v38  ;;  %v871_v40 = vld [vmem:[%s870_s20] sm:$0x1]  ;;  %s900_s30 = sld [smem:[#allocation7 + %s12779_s29]]  ;;  %s12780_s20 = sadd.s32 1, %s9814_s23 }
 0xc56   : > { %9457 = vtanh.f32 %v3567_v48  ;;  %v8223_v50 = vmul.f32 -1.442695, %v3567_v48  ;;  %851 = vst [vmem:[#allocation2 + $0x2f] sm:$0x1] %v850_v46  ;;  %v874_v43 = vadd.f32 %v873_v41, %v871_v40 }
 0xc57   : > { %s878_s21 = scalar_lea.vmem %s12582_s1, %s876_s16 }
 0xc58   : > { %9459 = vpow2.f32 %v8223_v50  ;;  %s856_s15 = scalar_lea.vmem %s12583_s2, %s853_s4  ;;  %v879_v44 = vld [vmem:[%s878_s21] sm:$0x1]  ;;  %875 = vst [vmem:[#allocation2 + $0x32] sm:$0x1] %v874_v43  ;;  %s12782_s21 = sadd.s32 1, %s9830_s0 }
 0xc59   : > { %s880_s27 = scalar_lea.vmem %s12583_s2, %s877_s25  ;;  %s909_s29 = sld [smem:[#allocation7 + %s12782_s21]] }
 0xc5a   : > { %v881_v45 = vld [vmem:[%s880_s27] sm:$0x1] }
 0xc5b   : > { %v882_v46 = vadd.f32 %v881_v45, %v879_v44 }
 0xc5d   : > { %883 = vst [vmem:[#allocation2 + $0x33] sm:$0x1] %v882_v46 }
 0xc5f   : > { %s912_s25 = scalar_lea.vmem %s12583_s2, %s909_s29 }
 0xc63   : > { %v9458_v49 = vpop.eup %9457 }
 0xc64   : > { %3577 = vrot.lane.b32.xlu1 %v9458_v49, %s12729_s11 }
 0xc65   : > { %v9460_v51 = vpop.eup %9459 }
 0xc66   : > { %v3571_v52 = vadd.f32 1.0, %v9460_v51 }
 0xc68   : > { %9461 = vrcp.f32 %v3571_v52 }
 0xc75   : > { %v9462_v53 = vpop.eup %9461 }
 0xc76   : > { %v3575_v57 = vmul.f32 %v9462_v53, %v10358_v42 }
 0xcd6   : > { %v3578_v54 = vpop.permute.xlu1 %3577 }
 0xcd7   : > { %v3580_v55 = vmul.f32 %v9462_v53, %v3578_v54 }
 0xcd9   : > { %3582 = vrot.lane.b32.xlu0 %v3580_v55, %s12729_s11 }
 0xd4b   : > { %v3583_v58 = vpop.permute.xlu0 %3582 }
 0xd4c   : > { %v10509_v59 = vadd.f32 %v3583_v58, %v3575_v57 }
 0xd4e   : > { %9463 = vtanh.f32 %v10509_v59 }
 0xd5b   : > { %v9464_v60 = vpop.eup %9463 }
 0xd5c   : > { %3588 = vrot.lane.b32.xlu1 %v9464_v60, %s12729_s11 }
 0xdce   : > { %v3589_v61 = vpop.permute.xlu1 %3588 }
 0xdcf   : > { %v3591_v39 = vmul.f32 %v9462_v53, %v3589_v61 }
 0xdd1   : > { %3593 = vrot.lane.b32.xlu0 %v3591_v39, %s12730_s5 }
 0xe43   : > { %v3594_v62 = vpop.permute.xlu0 %3593 }
 0xe44   : > { %3597 = vst.msk [vmem:[#allocation3 + $0x20] sm:$0xff] %vm987_vm0, %v3594_v62  ;;  %3599 = vst.msk [vmem:[#allocation4 + $0x18] sm:$0xff] %vm987_vm0, %v3594_v62  ;;  %v3602_v63 = vsel %vm987_vm0, %v3594_v62, 0  ;;  %v3601_v62 = vld [vmem:[#allocation2 + $0x28] sm:$0xff] }
 0xe45   : > { %v3673_v42 = vand.u32 4294901760, %v3602_v63 }
 0xe47   : > { %v3674_v0 = vsub.f32 %v3602_v63, %v3673_v42  ;;  %8993 = vmatmul.mubr.f32.vlgmr.msra.gmra.mxu1 %v3673_v42 }
 0xe48   : > { %9007 = vmatpush3.msra.mxu1 %v9605_v4  ;;  %9014 = vmatprep.mubr.msk.f32.mxu1 %vm9513_vm1, %v9512_v3 }
 0xe49   : > { %9008 = vmatprep.subr.mxu1 %v9512_v3  ;;  %v3675_v1 = vand.u32 4294901760, %v3674_v0 }
 0xe4a   : > { %9009 = vmatpush3.msra.mxu1 %v9607_v5 }
 0xe4b   : > { %9010 = vmatprep.subr.mxu1 %v9512_v3  ;;  %v3676_v2 = vsub.f32 %v3674_v0, %v3675_v1 }
 0xe4c   : > { %9011 = vmatpush3.msra.mxu1 %v9609_v6 }
 0xe4d   : > { %9012 = vmatprep.subr.mxu1 %v9512_v3  ;;  %v3677_v7 = vand.u32 4294901760, %v3676_v2 }
 0xe4e   : > { %9013 = vmatpush3.msra.mxu1 %v9618_v9 }
 0xe4f   : > { %9015 = vmatmul.mubr.f32.vlgmr.msra.gmra.mxu1 %v3675_v1  ;;  %9028 = vmatprep.subr.mxu1 %v9512_v3 }
 0xe50   : > { %8982 = vmatmul.mubr.f32.vlgmr.msra.gmra.mxu0 %v3677_v7  ;;  %9029 = vmatpush3.msra.mxu1 %v9605_v4 }
 0xe51   : > { %8996 = vmatpush3.msra.mxu0 %v9627_v11  ;;  %9030 = vmatprep.subr.mxu1 %v9512_v3 }
 0xe52   : > { %8997 = vmatprep.subr.mxu0 %v9512_v3  ;;  %9031 = vmatpush3.msra.mxu1 %v9607_v5 }
 0xe53   : > { %8998 = vmatpush3.msra.mxu0 %v9632_v13  ;;  %9032 = vmatprep.subr.mxu1 %v9512_v3 }
 0xe54   : > { %8999 = vmatprep.subr.mxu0 %v9512_v3  ;;  %9033 = vmatpush3.msra.mxu1 %v9609_v6 }
 0xe55   : > { %9000 = vmatpush3.msra.mxu0 %v9635_v14  ;;  %9034 = vmatprep.subr.mxu1 %v9512_v3 }
 0xe56   : > { %9001 = vmatprep.subr.mxu0 %v9512_v3  ;;  %9003 = vmatprep.mubr.msk.f32.mxu0 %vm9513_vm1, %v9512_v3 }
 0xe57   : > { %9002 = vmatpush3.msra.mxu0 %v9639_v15  ;;  %9035 = vmatpush3.msra.mxu1 %v9618_v9 }
 0xe58   : > { %9036 = vmatprep.mubr.msk.f32.mxu1 %vm9513_vm1, %v9512_v3  ;;  %9004 = vmatmul.mubr.f32.vlgmr.msra.gmra.mxu0 %v3674_v0 }
 0xe59   : > { %9017 = vmatprep.subr.mxu0 %v9512_v3  ;;  %9037 = vmatmul.mubr.f32.vlgmr.msra.gmra.mxu1 %v3673_v42 }
 0xe5a   : > { %9018 = vmatpush3.msra.mxu0 %v9643_v16  ;;  %9025 = vmatprep.mubr.msk.f32.mxu0 %vm9513_vm1, %v9512_v3 }
 0xe5b   : > { %9019 = vmatprep.subr.mxu0 %v9512_v3  ;;  %9050 = vmatprep.subr.mxu1 %v9512_v3 }
 0xe5c   : > { %9020 = vmatpush3.msra.mxu0 %v9647_v18  ;;  %9051 = vmatpush3.msra.mxu1 %v9665_v25 }
 0xe5d   : > { %9021 = vmatprep.subr.mxu0 %v9512_v3  ;;  %9052 = vmatprep.subr.mxu1 %v9512_v3 }
 0xe5e   : > { %9022 = vmatpush3.msra.mxu0 %v9650_v19  ;;  %9053 = vmatpush3.msra.mxu1 %v9667_v27 }
 0xe5f   : > { %9023 = vmatprep.subr.mxu0 %v9512_v3  ;;  %9054 = vmatprep.subr.mxu1 %v9512_v3 }
 0xe60   : > { %9024 = vmatpush3.msra.mxu0 %v9654_v20  ;;  %9055 = vmatpush3.msra.mxu1 %v9673_v30 }
 0xe61   : > { %9026 = vmatmul.mubr.f32.vlgmr.msra.gmra.mxu0 %v3673_v42  ;;  %9056 = vmatprep.subr.mxu1 %v9512_v3 }
 0xe62   : > { %9057 = vmatpush3.msra.mxu1 %v9677_v31  ;;  %9039 = vmatprep.subr.mxu0 %v9512_v3 }
 0xe63   : > { %9058 = vmatprep.mubr.msk.f32.mxu1 %vm9513_vm1, %v9512_v3  ;;  %9072 = vmatprep.subr.mxu1 %v9512_v3 }
 0xe64   : > { %9040 = vmatpush3.msra.mxu0 %v9605_v4  ;;  %9047 = vmatprep.mubr.msk.f32.mxu0 %vm9513_vm1, %v9512_v3 }
 0xe65   : > { %9041 = vmatprep.subr.mxu0 %v9512_v3 }
 0xe66   : > { %9042 = vmatpush3.msra.mxu0 %v9607_v5 }
 0xe67   : > { %9043 = vmatprep.subr.mxu0 %v9512_v3 }
 0xe68   : > { %9044 = vmatpush3.msra.mxu0 %v9609_v6 }
 0xe69   : > { %9045 = vmatprep.subr.mxu0 %v9512_v3 }
 0xe6a   : > { %9046 = vmatpush3.msra.mxu0 %v9618_v9 }
 0xe6b   : > { %9061 = vmatprep.subr.mxu0 %v9512_v3 }
 0xf07   : > { %v3770_v47 = vpop.f32.mrf.mxu1 }
 0xf09   : > { %v8994_v21 = vpop.f32.mrf.mxu1 }
 0xf0f   : > { %v3927_v48 = vpop.f32.mrf.mxu1 }
 0xf10   : > { %v3679_v49 = vpop.f32.mrf.mxu0 }
 0xf11   : > { %v9016_v50 = vpop.f32.mrf.mxu1  ;;  %v3771_v54 = vadd.f32 %v3770_v47, %v3679_v49 }
 0xf12   : > { %v8983_v51 = vpop.f32.mrf.mxu0 }
 0xf18   : > { %v3850_v52 = vpop.f32.mrf.mxu0 }
 0xf19   : > { %v4085_v53 = vpop.f32.mrf.mxu1  ;;  %v3851_v58 = vadd.f32 %v3850_v52, %v3771_v54 }
 0xf1a   : > { %v9005_v55 = vpop.f32.mrf.mxu0 }
 0xf1b   : > { %v9038_v57 = vpop.f32.mrf.mxu1  ;;  %v3928_v60 = vadd.f32 %v3927_v48, %v3851_v58 }
 0xf1c   : > { %v913_v57 = vld [vmem:[%s912_s25] sm:$0x1]  ;;  %s12791_s25 = sadd.s32 7, %s9814_s23 }
 0xf21   : > { %v4010_v61 = vpop.f32.mrf.mxu0 }
 0xf22   : > { %v4011_v39 = vadd.f32 %v4010_v61, %v3928_v60 }
 0xf23   : > { %v9027_v63 = vpop.f32.mrf.mxu0 }
 0xf24   : > { %v4086_v42 = vadd.f32 %v4085_v53, %v4011_v39 }
 0xf26   : > { %v4089_v0 = vadd.f32 %v4086_v42, %v3601_v62 }
 0xf28   : > { %9465 = vtanh.f32 %v4089_v0  ;;  %v8224_v2 = vmul.f32 -1.442695, %v4089_v0 }
 0xf2a   : > { %9467 = vpow2.f32 %v8224_v2 }
 0xf35   : > { %v9466_v1 = vpop.eup %9465 }
 0xf36   : > { %4099 = vrot.lane.b32.xlu1 %v9466_v1, %s12729_s11 }
 0xf37   : > { %v9468_v7 = vpop.eup %9467 }
 0xf38   : > { %v4093_v8 = vadd.f32 1.0, %v9468_v7 }
 0xf3a   : > { %9469 = vrcp.f32 %v4093_v8 }
 0xf47   : > { %v9470_v10 = vpop.eup %9469 }
 0xf48   : > { %v4097_v22 = vmul.f32 %v9470_v10, %v10509_v59 }
 0xfa8   : > { %v4100_v12 = vpop.permute.xlu1 %4099 }
 0xfa9   : > { %v4102_v17 = vmul.f32 %v9470_v10, %v4100_v12 }
 0xfab   : > { %4104 = vrot.lane.b32.xlu0 %v4102_v17, %s12729_s11 }
0x101d   : > { %v4105_v23 = vpop.permute.xlu0 %4104 }
0x101e   : > { %v10660_v24 = vadd.f32 %v4105_v23, %v4097_v22 }
0x1020   : > { %9471 = vtanh.f32 %v10660_v24 }
0x102d   : > { %v9472_v26 = vpop.eup %9471 }
0x102e   : > { %4110 = vrot.lane.b32.xlu1 %v9472_v26, %s12729_s11 }
0x10a0   : > { %v4111_v28 = vpop.permute.xlu1 %4110 }
0x10a1   : > { %v4113_v56 = vmul.f32 %v9470_v10, %v4111_v28 }
0x10a3   : > { %4115 = vrot.lane.b32.xlu0 %v4113_v56, %s12730_s5 }
0x1115   : > { %v4116_v29 = vpop.permute.xlu0 %4115 }
0x1116   : > { %4119 = vst.msk [vmem:[#allocation3 + $0x28] sm:$0xff] %vm987_vm0, %v4116_v29  ;;  %4121 = vst.msk [vmem:[#allocation4 + $0x10] sm:$0xff] %vm987_vm0, %v4116_v29  ;;  %v4124_v32 = vsel %vm987_vm0, %v4116_v29, 0 }
0x1117   : > { %v4195_v59 = vand.u32 4294901760, %v4124_v32 }
0x1119   : > { %v4196_v33 = vsub.f32 %v4124_v32, %v4195_v59  ;;  %9059 = vmatmul.mubr.f32.vlgmr.msra.gmra.mxu1 %v4195_v59 }
0x111a   : > { %9073 = vmatpush3.msra.mxu1 %v9605_v4  ;;  %9080 = vmatprep.mubr.msk.f32.mxu1 %vm9513_vm1, %v9512_v3 }
0x111b   : > { %9074 = vmatprep.subr.mxu1 %v9512_v3  ;;  %v4197_v34 = vand.u32 4294901760, %v4196_v33 }
0x111c   : > { %9075 = vmatpush3.msra.mxu1 %v9607_v5 }
0x111d   : > { %9076 = vmatprep.subr.mxu1 %v9512_v3  ;;  %v4198_v35 = vsub.f32 %v4196_v33, %v4197_v34 }
0x111e   : > { %9077 = vmatpush3.msra.mxu1 %v9609_v6 }
0x111f   : > { %9078 = vmatprep.subr.mxu1 %v9512_v3  ;;  %v4199_v36 = vand.u32 4294901760, %v4198_v35 }
0x1120   : > { %9079 = vmatpush3.msra.mxu1 %v9618_v9 }
0x1121   : > { %9081 = vmatmul.mubr.f32.vlgmr.msra.gmra.mxu1 %v4197_v34  ;;  %9094 = vmatprep.subr.mxu1 %v9512_v3 }
0x1122   : > { %9048 = vmatmul.mubr.f32.vlgmr.msra.gmra.mxu0 %v4199_v36  ;;  %9095 = vmatpush3.msra.mxu1 %v9605_v4 }
0x1123   : > { %9062 = vmatpush3.msra.mxu0 %v9627_v11  ;;  %9096 = vmatprep.subr.mxu1 %v9512_v3 }
0x1124   : > { %9063 = vmatprep.subr.mxu0 %v9512_v3  ;;  %9097 = vmatpush3.msra.mxu1 %v9607_v5 }
0x1125   : > { %9064 = vmatpush3.msra.mxu0 %v9632_v13  ;;  %9098 = vmatprep.subr.mxu1 %v9512_v3 }
0x1126   : > { %9065 = vmatprep.subr.mxu0 %v9512_v3  ;;  %9099 = vmatpush3.msra.mxu1 %v9609_v6 }
0x1127   : > { %9066 = vmatpush3.msra.mxu0 %v9635_v14  ;;  %9100 = vmatprep.subr.mxu1 %v9512_v3 }
0x1128   : > { %9067 = vmatprep.subr.mxu0 %v9512_v3  ;;  %9069 = vmatprep.mubr.msk.f32.mxu0 %vm9513_vm1, %v9512_v3 }
0x1129   : > { %9068 = vmatpush3.msra.mxu0 %v9639_v15  ;;  %9101 = vmatpush3.msra.mxu1 %v9618_v9 }
0x112a   : > { %9102 = vmatprep.mubr.msk.f32.mxu1 %vm9513_vm1, %v9512_v3  ;;  %9070 = vmatmul.mubr.f32.vlgmr.msra.gmra.mxu0 %v4196_v33 }
0x112b   : > { %9083 = vmatprep.subr.mxu0 %v9512_v3  ;;  %9103 = vmatmul.mubr.f32.vlgmr.msra.gmra.mxu1 %v4195_v59 }
0x112c   : > { %9084 = vmatpush3.msra.mxu0 %v9643_v16  ;;  %9091 = vmatprep.mubr.msk.f32.mxu0 %vm9513_vm1, %v9512_v3 }
0x112d   : > { %9085 = vmatprep.subr.mxu0 %v9512_v3  ;;  %9116 = vmatprep.subr.mxu1 %v9512_v3 }
0x112e   : > { %9086 = vmatpush3.msra.mxu0 %v9647_v18  ;;  %9117 = vmatpush3.msra.mxu1 %v9665_v25  ;;  %v855_v25 = vld [vmem:[%s854_s3] sm:$0x1]  ;;  %s12776_s3 = sadd.s32 1, %s9770_s14 }
0x112f   : > { %9087 = vmatprep.subr.mxu0 %v9512_v3  ;;  %9118 = vmatprep.subr.mxu1 %v9512_v3  ;;  %s885_s12 = sld [smem:[#allocation7 + %s12776_s3]] }
0x1130   : > { %9088 = vmatpush3.msra.mxu0 %v9650_v19  ;;  %9119 = vmatpush3.msra.mxu1 %v9667_v27  ;;  %v857_v27 = vld [vmem:[%s856_s15] sm:$0x1]  ;;  %s12777_s15 = sadd.s32 6, %s9777_s18  ;;  %s917_s3 = sld [smem:[#allocation7 + %s9748_s19]] }
0x1131   : > { %9089 = vmatprep.subr.mxu0 %v9512_v3  ;;  %9120 = vmatprep.subr.mxu1 %v9512_v3  ;;  %s892_s6 = sld [smem:[#allocation7 + %s12777_s15]] }
0x1132   : > { %9090 = vmatpush3.msra.mxu0 %v9654_v20  ;;  %9121 = vmatpush3.msra.mxu1 %v9673_v30  ;;  %v858_v30 = vadd.f32 %v857_v27, %v855_v25  ;;  %s901_s15 = sld [smem:[#allocation7 + %s12780_s20]]  ;;  %s896_s20 = scalar_lea.vmem %s12583_s2, %s893_s24 }
0x1133   : > { %9092 = vmatmul.mubr.f32.vlgmr.msra.gmra.mxu0 %v4195_v59  ;;  %9122 = vmatprep.subr.mxu1 %v9512_v3  ;;  %v897_v50 = vld [vmem:[%s896_s20] sm:$0x1] }
0x1134   : > { %9123 = vmatpush3.msra.mxu1 %v9677_v31  ;;  %9105 = vmatprep.subr.mxu0 %v9512_v3  ;;  %v863_v31 = vld [vmem:[%s862_s13] sm:$0x1]  ;;  %859 = vst [vmem:[#allocation2 + $0x30] sm:$0x1] %v858_v30  ;;  %s886_s13 = scalar_lea.vmem %s12582_s1, %s884_s22 }
0x1135   : > { %9124 = vmatprep.mubr.msk.f32.mxu1 %vm9513_vm1, %v9512_v3  ;;  %9138 = vmatprep.subr.mxu1 %v9512_v3  ;;  %v866_v38 = vadd.f32 %v865_v37, %v863_v31  ;;  %v887_v47 = vld [vmem:[%s886_s13] sm:$0x1]  ;;  %s888_s9 = scalar_lea.vmem %s12583_s2, %s885_s12  ;;  %s902_s13 = scalar_lea.vmem %s12582_s1, %s900_s30 }
0x1136   : > { %9106 = vmatpush3.msra.mxu0 %v9605_v4  ;;  %9113 = vmatprep.mubr.msk.f32.mxu0 %vm9513_vm1, %v9512_v3  ;;  %v889_v21 = vld [vmem:[%s888_s9] sm:$0x1]  ;;  %s910_s9 = scalar_lea.vmem %s12582_s1, %s908_s8  ;;  %s12783_s30 = sld [smem:[#allocation11_spill]] }
0x1137   : > { %9107 = vmatprep.subr.mxu0 %v9512_v3  ;;  %867 = vst [vmem:[#allocation2 + $0x31] sm:$0x1] %v866_v38  ;;  %s894_s4 = scalar_lea.vmem %s12582_s1, %s892_s6  ;;  %v890_v48 = vadd.f32 %v889_v21, %v887_v47  ;;  %v903_v52 = vld [vmem:[%s902_s13] sm:$0x1]  ;;  %s12785_s8 = sadd.s32 7, %s9748_s19 }
0x1138   : > { %9108 = vmatpush3.msra.mxu0 %v9607_v5  ;;  %v895_v49 = vld [vmem:[%s894_s4] sm:$0x1]  ;;  %s904_s16 = scalar_lea.vmem %s12583_s2, %s901_s15  ;;  %s12784_s15 = sld [smem:[#allocation12_spill]] }
0x1139   : > { %9109 = vmatprep.subr.mxu0 %v9512_v3  ;;  %891 = vst [vmem:[#allocation2 + $0x34] sm:$0x1] %v890_v48  ;;  %v898_v51 = vadd.f32 %v897_v50, %v895_v49  ;;  %v905_v53 = vld [vmem:[%s904_s16] sm:$0x1]  ;;  %s916_s29 = sld [smem:[#allocation7 + %s12785_s8]]  ;;  %s12788_s16 = sadd.s32 7, %s9763_s28 }
0x113a   : > { %9110 = vmatpush3.msra.mxu0 %v9609_v6  ;;  %v906_v54 = vadd.f32 %v905_v53, %v903_v52  ;;  %v911_v55 = vld [vmem:[%s910_s9] sm:$0x1]  ;;  %s940_s6 = sld [smem:[#allocation7 + %s12788_s16]]  ;;  %s920_s24 = scalar_lea.vmem %s12583_s2, %s917_s3 }
0x113b   : > { %9111 = vmatprep.subr.mxu0 %v9512_v3  ;;  %899 = vst [vmem:[#allocation2 + $0x35] sm:$0x1] %v898_v51  ;;  %v914_v58 = vadd.f32 %v913_v57, %v911_v55  ;;  %s941_s19 = sld [smem:[#allocation7 + %s9763_s28]]  ;;  %s12789_s8 = sadd.s32 7, %s9770_s14 }
0x113c   : > { %9112 = vmatpush3.msra.mxu0 %v9618_v9  ;;  %907 = vst [vmem:[#allocation2 + $0x36] sm:$0x1] %v906_v54  ;;  %s12786_s4 = sadd.s32 7, %s12783_s30  ;;  %s925_s27 = sld [smem:[#allocation7 + %s12783_s30]] }
0x113d   : > { %9127 = vmatprep.subr.mxu0 %v9512_v3  ;;  %915 = vst [vmem:[#allocation2 + $0x37] sm:$0x1] %v914_v58  ;;  %s924_s22 = sld [smem:[#allocation7 + %s12786_s4]]  ;;  %s12792_s3 = sadd.s32 7, %s9830_s0 }
0x113e   : > { %s12787_s20 = sadd.s32 7, %s12784_s15  ;;  %s933_s10 = sld [smem:[#allocation7 + %s12784_s15]] }
0x113f   : > { %s932_s26 = sld [smem:[#allocation7 + %s12787_s20]]  ;;  %s918_s17 = scalar_lea.vmem %s12582_s1, %s916_s29 }
0x1140   : > { %s948_s15 = sld [smem:[#allocation7 + %s12789_s8]]  ;;  %s942_s21 = scalar_lea.vmem %s12582_s1, %s940_s6 }
0x1141   : > { %s949_s13 = sld [smem:[#allocation7 + %s9770_s14]]  ;;  %s944_s29 = scalar_lea.vmem %s12583_s2, %s941_s19 }
0x1142   : > { %s928_s20 = scalar_lea.vmem %s12583_s2, %s925_s27  ;;  %s965_s4 = sld [smem:[#allocation7 + %s9814_s23]] }
0x1143   : > { %s926_s30 = scalar_lea.vmem %s12582_s1, %s924_s22  ;;  %s972_s12 = sld [smem:[#allocation7 + %s12792_s3]] }
0x1144   : > { %v4123_v23 = vld [vmem:[#allocation2 + $0x30] sm:$0xff]  ;;  %s936_s9 = scalar_lea.vmem %s12583_s2, %s933_s10  ;;  %s973_s22 = sld [smem:[#allocation7 + %s9830_s0]] }
0x1145   : > { %s934_s28 = scalar_lea.vmem %s12582_s1, %s932_s26  ;;  %s12806_s19 = sld [smem:[#allocation47_spill]] }
0x1148   : > { %s968_s26 = scalar_lea.vmem %s12583_s2, %s965_s4  ;;  %s12830_s4 = sld [smem:[#allocation51_spill]] }
0x1149   : > { %v969_v52 = vld [vmem:[%s968_s26] sm:$0x1] }
0x114a   : > { %s976_s10 = scalar_lea.vmem %s12583_s2, %s973_s22 }
0x114b   : > { %v977_v55 = vld [vmem:[%s976_s10] sm:$0x1] }
0x11d9   : > { %v4292_v60 = vpop.f32.mrf.mxu1 }
0x11db   : > { %v9060_v61 = vpop.f32.mrf.mxu1 }
0x11e1   : > { %v4449_v39 = vpop.f32.mrf.mxu1 }
0x11e2   : > { %v4201_v62 = vpop.f32.mrf.mxu0 }
0x11e3   : > { %v9082_v63 = vpop.f32.mrf.mxu1  ;;  %v4293_v2 = vadd.f32 %v4292_v60, %v4201_v62 }
0x11e4   : > { %v9049_v42 = vpop.f32.mrf.mxu0 }
0x11ea   : > { %v4372_v0 = vpop.f32.mrf.mxu0 }
0x11eb   : > { %v4607_v1 = vpop.f32.mrf.mxu1  ;;  %v4373_v10 = vadd.f32 %v4372_v0, %v4293_v2 }
0x11ec   : > { %v9071_v7 = vpop.f32.mrf.mxu0 }
0x11ed   : > { %v9104_v8 = vpop.f32.mrf.mxu1  ;;  %v4450_v12 = vadd.f32 %v4449_v39, %v4373_v10 }
0x11f3   : > { %v4532_v17 = vpop.f32.mrf.mxu0 }
0x11f4   : > { %v4533_v22 = vadd.f32 %v4532_v17, %v4450_v12 }
0x11f5   : > { %v9093_v26 = vpop.f32.mrf.mxu0 }
0x11f6   : > { %v4608_v28 = vadd.f32 %v4607_v1, %v4533_v22 }
0x11f8   : > { %v4611_v56 = vadd.f32 %v4608_v28, %v4123_v23 }
0x11fa   : > { %9473 = vtanh.f32 %v4611_v56  ;;  %v8225_v32 = vmul.f32 -1.442695, %v4611_v56 }
0x11fc   : > { %9475 = vpow2.f32 %v8225_v32 }
0x1207   : > { %v9474_v29 = vpop.eup %9473 }
0x1208   : > { %4621 = vrot.lane.b32.xlu1 %v9474_v29, %s12729_s11 }
0x1209   : > { %v9476_v59 = vpop.eup %9475 }
0x120a   : > { %v4615_v33 = vadd.f32 1.0, %v9476_v59 }
0x120c   : > { %9477 = vrcp.f32 %v4615_v33 }
0x1219   : > { %v9478_v34 = vpop.eup %9477 }
0x121a   : > { %v4619_v25 = vmul.f32 %v9478_v34, %v10660_v24 }
0x127a   : > { %v4622_v35 = vpop.permute.xlu1 %4621 }
0x127b   : > { %v4624_v36 = vmul.f32 %v9478_v34, %v4622_v35 }
0x127d   : > { %4626 = vrot.lane.b32.xlu0 %v4624_v36, %s12729_s11 }
0x12ef   : > { %v4627_v27 = vpop.permute.xlu0 %4626 }
0x12f0   : > { %v10811_v30 = vadd.f32 %v4627_v27, %v4619_v25 }
0x12f2   : > { %9479 = vtanh.f32 %v10811_v30 }
0x12ff   : > { %v9480_v31 = vpop.eup %9479 }
0x1300   : > { %4632 = vrot.lane.b32.xlu1 %v9480_v31, %s12729_s11 }
0x1372   : > { %v4633_v37 = vpop.permute.xlu1 %4632 }
0x1373   : > { %v4635_v38 = vmul.f32 %v9478_v34, %v4633_v37 }
0x1375   : > { %4637 = vrot.lane.b32.xlu0 %v4635_v38, %s12730_s5 }
0x13e7   : > { %v4638_v40 = vpop.permute.xlu0 %4637 }
0x13e8   : > { %4641 = vst.msk [vmem:[#allocation3 + $0x30] sm:$0xff] %vm987_vm0, %v4638_v40  ;;  %4643 = vst.msk [vmem:[#allocation4 + $0x8] sm:$0xff] %vm987_vm0, %v4638_v40  ;;  %v4646_v41 = vsel %vm987_vm0, %v4638_v40, 0 }
0x13e9   : > { %v4717_v24 = vand.u32 4294901760, %v4646_v41 }
0x13eb   : > { %v4718_v43 = vsub.f32 %v4646_v41, %v4717_v24  ;;  %9125 = vmatmul.mubr.f32.vlgmr.msra.gmra.mxu1 %v4717_v24 }
0x13ec   : > { %9139 = vmatpush3.msra.mxu1 %v9605_v4  ;;  %9146 = vmatprep.mubr.msk.f32.mxu1 %vm9513_vm1, %v9512_v3 }
0x13ed   : > { %9140 = vmatprep.subr.mxu1 %v9512_v3  ;;  %v4719_v44 = vand.u32 4294901760, %v4718_v43 }
0x13ee   : > { %9141 = vmatpush3.msra.mxu1 %v9607_v5 }
0x13ef   : > { %9142 = vmatprep.subr.mxu1 %v9512_v3  ;;  %v4720_v45 = vsub.f32 %v4718_v43, %v4719_v44 }
0x13f0   : > { %9143 = vmatpush3.msra.mxu1 %v9609_v6 }
0x13f1   : > { %9144 = vmatprep.subr.mxu1 %v9512_v3  ;;  %v4721_v46 = vand.u32 4294901760, %v4720_v45 }
0x13f2   : > { %9145 = vmatpush3.msra.mxu1 %v9618_v9 }
0x13f3   : > { %9147 = vmatmul.mubr.f32.vlgmr.msra.gmra.mxu1 %v4719_v44  ;;  %9160 = vmatprep.subr.mxu1 %v9512_v3 }
0x13f4   : > { %9114 = vmatmul.mubr.f32.vlgmr.msra.gmra.mxu0 %v4721_v46  ;;  %9161 = vmatpush3.msra.mxu1 %v9605_v4  ;;  %v921_v4 = vld [vmem:[%s920_s24] sm:$0x1]  ;;  %s957_s24 = sld [smem:[#allocation7 + %s9777_s18]] }
0x13f5   : > { %9128 = vmatpush3.msra.mxu0 %v9627_v11  ;;  %9162 = vmatprep.subr.mxu1 %v9512_v3 }
0x13f6   : > { %9129 = vmatprep.subr.mxu0 %v9512_v3  ;;  %9163 = vmatpush3.msra.mxu1 %v9607_v5 }
0x13f7   : > { %9130 = vmatpush3.msra.mxu0 %v9632_v13  ;;  %9164 = vmatprep.subr.mxu1 %v9512_v3  ;;  %v935_v13 = vld [vmem:[%s934_s28] sm:$0x1] }
0x13f8   : > { %9131 = vmatprep.subr.mxu0 %v9512_v3  ;;  %9165 = vmatpush3.msra.mxu1 %v9609_v6  ;;  %v927_v6 = vld [vmem:[%s926_s30] sm:$0x1]  ;;  %s964_s30 = sld [smem:[#allocation7 + %s12791_s25]] }
0x13f9   : > { %9132 = vmatpush3.msra.mxu0 %v9635_v14  ;;  %9166 = vmatprep.subr.mxu1 %v9512_v3  ;;  %v937_v14 = vld [vmem:[%s936_s9] sm:$0x1]  ;;  %s12795_s9 = sld [smem:[#allocation50_spill]] }
0x13fa   : > { %9133 = vmatprep.subr.mxu0 %v9512_v3  ;;  %9135 = vmatprep.mubr.msk.f32.mxu0 %vm9513_vm1, %v9512_v3  ;;  %s960_s14 = scalar_lea.vmem %s12583_s2, %s957_s24 }
0x13fb   : > { %9134 = vmatpush3.msra.mxu0 %v9639_v15  ;;  %9167 = vmatpush3.msra.mxu1 %v9618_v9  ;;  %v929_v9 = vld [vmem:[%s928_s20] sm:$0x1]  ;;  %v938_v15 = vadd.f32 %v937_v14, %v935_v13  ;;  %s12828_s20 = sld [smem:[#allocation49_spill]] }
0x13fc   : > { %9168 = vmatprep.mubr.msk.f32.mxu1 %vm9513_vm1, %v9512_v3  ;;  %9136 = vmatmul.mubr.f32.vlgmr.msra.gmra.mxu0 %v4718_v43  ;;  %v930_v11 = vadd.f32 %v929_v9, %v927_v6  ;;  %v961_v49 = vld [vmem:[%s960_s14] sm:$0x1] }
0x13fd   : > { %9149 = vmatprep.subr.mxu0 %v9512_v3  ;;  %9169 = vmatmul.mubr.f32.vlgmr.msra.gmra.mxu1 %v4717_v24  ;;  %939 = vst [vmem:[#allocation2 + $0x3a] sm:$0x1] %v938_v15 }
0x13fe   : > { %9150 = vmatpush3.msra.mxu0 %v9643_v16  ;;  %9157 = vmatprep.mubr.msk.f32.mxu0 %vm9513_vm1, %v9512_v3  ;;  %931 = vst [vmem:[#allocation2 + $0x39] sm:$0x1] %v930_v11  ;;  %v943_v16 = vld [vmem:[%s942_s21] sm:$0x1]  ;;  %s966_s25 = scalar_lea.vmem %s12582_s1, %s964_s30 }
0x13ff   : > { %9151 = vmatprep.subr.mxu0 %v9512_v3  ;;  %v967_v51 = vld [vmem:[%s966_s25] sm:$0x1] }
0x1400   : > { %9152 = vmatpush3.msra.mxu0 %v9647_v18  ;;  %v945_v18 = vld [vmem:[%s944_s29] sm:$0x1]  ;;  %s974_s29 = scalar_lea.vmem %s12582_s1, %s972_s12  ;;  %v970_v53 = vadd.f32 %v969_v52, %v967_v51 }
0x1401   : > { %9153 = vmatprep.subr.mxu0 %v9512_v3  ;;  %v975_v54 = vld [vmem:[%s974_s29] sm:$0x1] }
0x1402   : > { %9154 = vmatpush3.msra.mxu0 %v9650_v19  ;;  %v946_v19 = vadd.f32 %v945_v18, %v943_v16  ;;  %971 = vst [vmem:[#allocation2 + $0x3e] sm:$0x1] %v970_v53  ;;  %v978_v57 = vadd.f32 %v977_v55, %v975_v54  ;;  %v6833_v52 = vld [vmem:[%s12795_s9] sm:$0x1f]  ;;  %s12893_s9 = sld [smem:[#allocation53_spill]] }
0x1403   : > { %9155 = vmatprep.subr.mxu0 %v9512_v3  ;;  %v919_v3 = vld [vmem:[%s918_s17] sm:$0x1]  ;;  %s12790_s17 = sadd.s32 7, %s9777_s18  ;;  %s950_s18 = scalar_lea.vmem %s12582_s1, %s948_s15 }
0x1404   : > { %9156 = vmatpush3.msra.mxu0 %v9654_v20  ;;  %v922_v5 = vadd.f32 %v921_v4, %v919_v3  ;;  %s956_s16 = sld [smem:[#allocation7 + %s12790_s17]]  ;;  %v951_v20 = vld [vmem:[%s950_s18] sm:$0x1]  ;;  %s952_s17 = scalar_lea.vmem %s12583_s2, %s949_s13  ;;  %947 = vst [vmem:[#allocation2 + $0x3b] sm:$0x1] %v946_v19 }
0x1405   : > { %9158 = vmatmul.mubr.f32.vlgmr.msra.gmra.mxu0 %v4717_v24  ;;  %v953_v47 = vld [vmem:[%s952_s17] sm:$0x1]  ;;  %979 = vst [vmem:[#allocation2 + $0x3f] sm:$0x1] %v978_v57  ;;  %s12793_s18 = sld [smem:[#allocation48_spill]]  ;;  %v9516_v57 = vmov -10000.0  }
0x1406   : > { %923 = vst [vmem:[#allocation2 + $0x38] sm:$0x1] %v922_v5  ;;  %v954_v21 = vadd.f32 %v953_v47, %v951_v20  ;;  %s12816_s13 = sld [smem:[#allocation10_spill]] }
0x1408   : > { %955 = vst [vmem:[#allocation2 + $0x3c] sm:$0x1] %v954_v21 }
0x140a   : > { %s958_s23 = scalar_lea.vmem %s12582_s1, %s956_s16 }
0x140b   : > { %v959_v48 = vld [vmem:[%s958_s23] sm:$0x1]  ;;  %v5188_v37 = vld [vmem:[%s12793_s18 + $0x18] sm:$0xff]  ;;  %v5187_v40 = vld [vmem:[%s12793_s18 + $0x10] sm:$0xff] }
0x140c   : > { %v962_v50 = vadd.f32 %v961_v49, %v959_v48  ;;  %v10936_v38 = vand.u32 4294901760, %v5188_v37  ;;  %v5186_v24 = vld [vmem:[%s12793_s18 + $0x8] sm:$0xff]  ;;  %v5185_v46 = vld [vmem:[%s12793_s18] sm:$0xff]  ;;  %v6834_v49 = vlaneseq  ;;  %s8206_s26 = sshll.u32 %s12816_s13, 3  ;;  %p388_p9 = scmp.lt.s32.totalorder %s12816_s13, 1 }
0x140d   : > { %v10957_v45 = vand.u32 4294901760, %v5186_v24  ;;  %v10972_v6 = vand.u32 4294901760, %v5185_v46  ;;  %p11485_p8 = scmp.lt.s32.totalorder %s8206_s26, 15 }
0x140e   : > { %963 = vst [vmem:[#allocation2 + $0x3d] sm:$0x1] %v962_v50  ;;  %v10942_v41 = vsub.f32 %v5188_v37, %v10936_v38  ;;  %9171 = vmatprep.subr.mxu0 %v10936_v38  ;;  %v10996_v50 = vand.u32 127, %v6834_v49  ;;  %v6839_v51 = vshrl.u32 %v6834_v49, 7  ;;  %v5183_v37 = vld [vmem:[#allocation4 + $0x30] sm:$0xff]  ;;  %s12898_s13 = smov (!%p388_p9, %s12816_s13), 1 }
0x140f   : > { %9172 = vmatpush3.msra.mxu0 %v10936_v38  ;;  %v10970_v5 = vsub.f32 %v5186_v24, %v10957_v45  ;;  %v10982_v14 = vsub.f32 %v5185_v46, %v10972_v6  ;;  %s12896_s26 = smov (!%p11485_p8, %s8206_s26), 15  ;;  %s8208_s12 = sshll.u32 %s12898_s13, 3 }
0x1410   : > { %v10952_v43 = vand.u32 4294901760, %v10942_v41  ;;  %12794 = vst [vmem:[#allocation13_spill] sm:$0xff] %v10996_v50  ;;  %vm6836_vm2 = vcmp.eq.s32.totalorder %v10996_v50, 3  ;;  %v6868_v53 = vsub.s32 1, %v6839_v51  ;;  %v6840_v54 = vsub.s32 0, %v6839_v51  ;;  %s8207_s8 = sshll.u32 %s12896_s26, 3 }
0x1411   : > { %v10979_v13 = vand.u32 4294901760, %v10970_v5  ;;  %v10989_v18 = vand.u32 4294901760, %v10982_v14  ;;  %v6896_v55 = vsub.s32 2, %v6839_v51  ;;  %s11532_s3 = scalar_lea.vmem %s12830_s4, %s8207_s8 }
0x1412   : > { %v5390_v3 = vsub.f32 %v10942_v41, %v10952_v43 }
0x1413   : > { %v5404_v16 = vsub.f32 %v10970_v5, %v10979_v13  ;;  %v5411_v20 = vsub.f32 %v10982_v14, %v10989_v18 }
0x1414   : > { %v5391_v9 = vand.u32 4294901760, %v5390_v3 }
0x1415   : > { %v4645_v22 = vld [vmem:[#allocation2 + $0x38] sm:$0xff]  ;;  %v5405_v19 = vand.u32 4294901760, %v5404_v16  ;;  %v5412_v47 = vand.u32 4294901760, %v5411_v20 }
0x1416   : > { %9191 = vmatprep.subr.mxu1 %v5391_v9 }
0x1417   : > { %9192 = vmatpush3.msra.mxu1 %v5391_v9 }
0x14ab   : > { %v4814_v58 = vpop.f32.mrf.mxu1 }
0x14ad   : > { %v9126_v60 = vpop.f32.mrf.mxu1 }
0x14ae   : > { %v6924_v60 = vsub.s32 3, %v6839_v51 }
0x14b3   : > { %v4971_v61 = vpop.f32.mrf.mxu1 }
0x14b4   : > { %v4723_v39 = vpop.f32.mrf.mxu0 }
0x14b5   : > { %v9148_v62 = vpop.f32.mrf.mxu1  ;;  %v4815_v1 = vadd.f32 %v4814_v58, %v4723_v39  ;;  %v6837_v58 = vsel %vm6836_vm2, 0.0, %v9516_v57  ;;  %v11004_v39 = vrot.slane %v6833_v52, %v6868_v53 }
0x14b6   : > { %v9115_v63 = vpop.f32.mrf.mxu0  ;;  %v11006_v62 = vrot.slane %v6833_v52, %v6840_v54 }
0x14b7   : > { %12796 = vst [vmem:[#allocation14_spill] sm:$0xff] %v11004_v39  ;;  %v11008_v63 = vrot.slane %v6833_v52, %v6896_v55 }
0x14b8   : > { %12797 = vst [vmem:[#allocation15_spill] sm:$0xff] %v11006_v62 }
0x14b9   : > { %12798 = vst [vmem:[#allocation16_spill] sm:$0xff] %v11008_v63 }
0x14bc   : > { %v4894_v42 = vpop.f32.mrf.mxu0 }
0x14bd   : > { %v5129_v0 = vpop.f32.mrf.mxu1  ;;  %v4895_v8 = vadd.f32 %v4894_v42, %v4815_v1  ;;  %v11010_v42 = vrot.slane %v6833_v52, %v6924_v60  ;;  %v11016_v1 = vadd.f32 %v11006_v62, %v6837_v58 }
0x14be   : > { %v9137_v2 = vpop.f32.mrf.mxu0 }
0x14bf   : > { %v9170_v7 = vpop.f32.mrf.mxu1  ;;  %v4972_v10 = vadd.f32 %v4971_v61, %v4895_v8  ;;  %v6951_v61 = vsub.s32 4, %v6839_v51  ;;  %12799 = vst [vmem:[#allocation17_spill] sm:$0xff] %v11010_v42  ;;  %12801 = vst [vmem:[#allocation19_spill] sm:$0xff] %v11016_v1  ;;  %v11019_v2 = vadd.f32 %v11008_v63, %v6837_v58  ;;  %v11024_v8 = vadd.f32 %v11010_v42, %v6837_v58 }
0x14c1   : > { %12802 = vst [vmem:[#allocation20_spill] sm:$0xff] %v11019_v2  ;;  %v11021_v7 = vrot.slane %v6833_v52, %v6951_v61  ;;  %12804 = vst [vmem:[#allocation22_spill] sm:$0xff] %v11024_v8 }
0x14c3   : > { %12803 = vst [vmem:[#allocation21_spill] sm:$0xff] %v11021_v7 }
0x14c5   : > { %v5054_v12 = vpop.f32.mrf.mxu0 }
0x14c6   : > { %v5055_v17 = vadd.f32 %v5054_v12, %v4972_v10  ;;  %v6843_v12 = vsel %vm6824_vm3, %v11016_v1, -inf }
0x14c7   : > { %v9159_v23 = vpop.f32.mrf.mxu0 }
0x14c8   : > { %v5130_v26 = vadd.f32 %v5129_v0, %v5055_v17  ;;  %v11013_v0 = vadd.f32 %v11004_v39, %v6837_v58  ;;  %v5178_v17 = vld [vmem:[#allocation4 + $0x8] sm:$0xff]  ;;  %v6927_v23 = vsel %vm6824_vm3, %v11024_v8, -inf }
0x14ca   : > { %v5133_v28 = vadd.f32 %v5130_v26, %v4645_v22  ;;  %12800 = vst [vmem:[#allocation18_spill] sm:$0xff] %v11013_v0  ;;  %v6871_v10 = vsel %vm6824_vm3, %v11013_v0, -inf  ;;  %v6899_v22 = vsel %vm6824_vm3, %v11019_v2, -inf  ;;  %v11035_v26 = vadd.f32 %v11021_v7, %v6837_v58 }
0x14cc   : > { %9481 = vtanh.f32 %v5133_v28  ;;  %v8226_v29 = vmul.f32 -1.442695, %v5133_v28  ;;  %12805 = vst [vmem:[#allocation23_spill] sm:$0xff] %v11035_v26  ;;  %v5179_v28 = vld [vmem:[#allocation4 + $0x10] sm:$0xff] }
0x14ce   : > { %9483 = vpow2.f32 %v8226_v29  ;;  %v5193_v29 = vsel %vm987_vm0, %v5178_v17, 0 }
0x14d9   : > { %v9482_v56 = vpop.eup %9481 }
0x14da   : > { %5143 = vrot.lane.b32.xlu1 %v9482_v56, %s12729_s11 }
0x14db   : > { %v9484_v32 = vpop.eup %9483 }
0x14dc   : > { %v5137_v59 = vadd.f32 1.0, %v9484_v32  ;;  %v5196_v32 = vsel %vm987_vm0, %v5179_v28, 0 }
0x14de   : > { %9485 = vrcp.f32 %v5137_v59  ;;  %v5180_v59 = vld [vmem:[#allocation4 + $0x18] sm:$0xff] }
0x14eb   : > { %v9486_v33 = vpop.eup %9485 }
0x14ec   : > { %v5141_v36 = vmul.f32 %v9486_v33, %v10811_v30  ;;  %v10944_v30 = vand.u32 4294901760, %v5187_v40 }
0x14ee   : > { %v10955_v44 = vsub.f32 %v5187_v40, %v10944_v30  ;;  %9173 = vmatprep.subr.mxu0 %v10944_v30 }
0x14ef   : > { %9174 = vmatpush3.msra.mxu0 %v10944_v30 }
0x14f0   : > { %v10967_v4 = vand.u32 4294901760, %v10955_v44  ;;  %9175 = vmatprep.subr.mxu0 %v10957_v45 }
0x14f1   : > { %9176 = vmatpush3.msra.mxu0 %v10957_v45 }
0x14f2   : > { %v5397_v11 = vsub.f32 %v10955_v44, %v10967_v4  ;;  %9177 = vmatprep.subr.mxu0 %v10972_v6 }
0x14f3   : > { %9178 = vmatpush3.msra.mxu0 %v10972_v6 }
0x14f4   : > { %v5398_v15 = vand.u32 4294901760, %v5397_v11  ;;  %9211 = vmatprep.subr.mxu0 %v10942_v41 }
0x14f6   : > { %9193 = vmatprep.subr.mxu1 %v5398_v15 }
0x14f7   : > { %9194 = vmatpush3.msra.mxu1 %v5398_v15  ;;  %v5184_v15 = vld [vmem:[#allocation4 + $0x38] sm:$0xff] }
0x14f8   : > { %9195 = vmatprep.subr.mxu1 %v5405_v19  ;;  %v5211_v49 = vsel %vm987_vm0, %v5184_v15, 0 }
0x14f9   : > { %9196 = vmatpush3.msra.mxu1 %v5405_v19  ;;  %v5208_v19 = vsel %vm987_vm0, %v5183_v37, 0  ;;  %v11090_v60 = vand.u32 4294901760, %v5211_v49 }
0x14fa   : > { %9197 = vmatprep.subr.mxu1 %v5412_v47  ;;  %v11076_v53 = vand.u32 4294901760, %v5208_v19 }
0x14fb   : > { %9198 = vmatpush3.msra.mxu1 %v5412_v47 }
0x14fc   : > { %9231 = vmatprep.subr.mxu1 %v10936_v38 }
0x154c   : > { %v5144_v34 = vpop.permute.xlu1 %5143 }
0x154d   : > { %v5146_v35 = vmul.f32 %v9486_v33, %v5144_v34  ;;  %v5181_v34 = vld [vmem:[#allocation4 + $0x20] sm:$0xff] }
0x154f   : > { %5148 = vrot.lane.b32.xlu0 %v5146_v35, %s12729_s11  ;;  %v11043_v35 = vand.u32 4294901760, %v5193_v29 }
0x1551   : > { %v11050_v40 = vsub.f32 %v5193_v29, %v11043_v35 }
0x1553   : > { %v5294_v47 = vand.u32 4294901760, %v11050_v40 }
0x1555   : > { %v5295_v57 = vsub.f32 %v11050_v40, %v5294_v47 }
0x1557   : > { %v5296_v28 = vand.u32 4294901760, %v5295_v57  ;;  %v5173_v57 = vld [vmem:[%s12806_s19] sm:$0xff] }
0x15c1   : > { %v5149_v25 = vpop.permute.xlu0 %5148 }
0x15c2   : > { %v5151_v27 = vadd.f32 %v5149_v25, %v5141_v36  ;;  %v11045_v36 = vand.u32 4294901760, %v5196_v32  ;;  %v5199_v25 = vsel %vm987_vm0, %v5180_v59, 0 }
0x15c3   : > { %v11052_v24 = vand.u32 4294901760, %v5199_v25 }
0x15c4   : > { %9487 = vtanh.f32 %v5151_v27  ;;  %v5202_v27 = vsel %vm987_vm0, %v5181_v34, 0  ;;  %v11058_v11 = vsub.f32 %v5196_v32, %v11045_v36  ;;  %v11110_v32 = vsub.f32 %v5211_v49, %v11090_v60 }
0x15c5   : > { %v11054_v3 = vand.u32 4294901760, %v5202_v27 }
0x15c6   : > { %v5304_v52 = vand.u32 4294901760, %v11058_v11 }
0x15c7   : > { %v11079_v54 = vsub.f32 %v5202_v27, %v11054_v3 }
0x15c9   : > { %v5324_v17 = vand.u32 4294901760, %v11079_v54 }
0x15d1   : > { %v9488_v31 = vpop.eup %9487 }
0x15d2   : > { %5154 = vrot.lane.b32.xlu1 %v9488_v31, %s12729_s11  ;;  %v5182_v31 = vld [vmem:[#allocation4 + $0x28] sm:$0xff]  ;;  %s12861_s11 = sld [smem:[#allocation52_spill]] }
0x15d3   : > { %v5205_v9 = vsel %vm987_vm0, %v5182_v31, 0  ;;  %v5354_v31 = vand.u32 4294901760, %v11110_v32 }
0x15d5   : > { %v5355_v15 = vsub.f32 %v11110_v32, %v5354_v31 }
0x15d7   : > { %v5356_v49 = vand.u32 4294901760, %v5355_v15 }
0x15d8   : > { %s391_s17 = scalar_lea.vmem %s12861_s11, %s8208_s12 }
0x15f6   : > { %6844 = vmax.xlane.f32.xlu1 %v6843_v12  ;;  %v5305_v12 = vsub.f32 %v11058_v11, %v5304_v52 }
0x15f8   : > { %v5306_v59 = vand.u32 4294901760, %v5305_v12  ;;  %v5167_v12 = vld [vmem:[#allocation3 + $0x10] sm:$0xff] }
0x15fa   : > { %6928 = vmax.xlane.f32.xlu1 %v6927_v23 }
0x1644   : > { %v5155_v21 = vpop.permute.xlu1 %5154 }
0x1645   : > { %v5157_v48 = vmul.f32 %v9486_v33, %v5155_v21  ;;  %v6954_v33 = vsel %vm6824_vm3, %v11035_v26, -inf  ;;  %v11065_v21 = vand.u32 4294901760, %v5205_v9 }
0x1647   : > { %5159 = vrot.lane.b32.xlu0 %v5157_v48, %s12730_s5  ;;  %v11068_v48 = vsub.f32 %v5199_v25, %v11052_v24  ;;  %v11093_v61 = vsub.f32 %v5205_v9, %v11065_v21  ;;  %s395_s5 = scalar_lea.vmem %s12893_s9, %s8208_s12 }
0x1649   : > { %v5314_v58 = vand.u32 4294901760, %v11068_v48  ;;  %v5334_v29 = vand.u32 4294901760, %v11093_v61 }
0x164b   : > { %v5335_v27 = vsub.f32 %v11093_v61, %v5334_v29 }
0x164d   : > { %v5336_v9 = vand.u32 4294901760, %v5335_v27 }
0x1666   : > { %6872 = vmax.xlane.f32.xlu0 %v6871_v10 }
0x166a   : > { %6900 = vmax.xlane.f32.xlu0 %v6899_v22  ;;  %v11100_v22 = vsub.f32 %v5208_v19, %v11076_v53  ;;  %v5175_v19 = vld [vmem:[%s12806_s19 + $0x10] sm:$0xff] }
0x166c   : > { %v5344_v34 = vand.u32 4294901760, %v11100_v22 }
0x166e   : > { %6955 = vmax.xlane.f32.xlu0 %v6954_v33  ;;  %v5325_v33 = vsub.f32 %v11079_v54, %v5324_v17 }
0x1670   : > { %v5326_v37 = vand.u32 4294901760, %v5325_v33 }
0x16b9   : > { %v5160_v56 = vpop.permute.xlu0 %5159 }
0x16ba   : > { %5163 = vst.msk [vmem:[#allocation3 + $0x38] sm:$0xff] %vm987_vm0, %v5160_v56  ;;  %5164 = vst.msk [vmem:[#allocation4] sm:$0xff] %vm987_vm0, %v5160_v56  ;;  %v5315_v56 = vsub.f32 %v11068_v48, %v5314_v58 }
0x16bc   : > { %v5316_v25 = vand.u32 4294901760, %v5315_v56 }
0x16c1   : > { %v5177_v46 = vld [vmem:[#allocation4] sm:$0xff]  ;;  %v5172_v15 = vld [vmem:[#allocation3 + $0x38] sm:$0xff] }
0x16c2   : > { %v5190_v16 = vsel %vm987_vm0, %v5177_v46, 0  ;;  %v5345_v46 = vsub.f32 %v11100_v22, %v5344_v34 }
0x16c3   : > { %v11062_v20 = vand.u32 4294901760, %v5190_v16 }
0x16c5   : > { %9199 = vmatprep.mubr.f32.mxu1 %v11062_v20  ;;  %v11073_v51 = vsub.f32 %v5190_v16, %v11062_v20  ;;  %v5346_v16 = vand.u32 4294901760, %v5345_v46 }
0x16c6   : > { %9200 = vmatmul.mubr.f32.vlgmr.msra.gmra.mxu1 %v11043_v35 }
0x16c7   : > { %9202 = vmatprep.mubr.f32.mxu1 %v11045_v36  ;;  %v5284_v55 = vand.u32 4294901760, %v11073_v51  ;;  %9232 = vmatpush3.msra.mxu1 %v10936_v38 }
0x16c8   : > { %9233 = vmatprep.subr.mxu1 %v10944_v30 }
0x16c9   : > { %v5285_v10 = vsub.f32 %v11073_v51, %v5284_v55  ;;  %9234 = vmatpush3.msra.mxu1 %v10944_v30 }
0x16ca   : > { %9203 = vmatmul.mubr.f32.gmra.mxu1 %v11052_v24  ;;  %9235 = vmatprep.subr.mxu1 %v10957_v45 }
0x16cb   : > { %9205 = vmatprep.mubr.f32.mxu1 %v11054_v3  ;;  %v5286_v23 = vand.u32 4294901760, %v5285_v10  ;;  %9236 = vmatpush3.msra.mxu1 %v10957_v45  ;;  %v5166_v10 = vld [vmem:[#allocation3 + $0x8] sm:$0xff] }
0x16cc   : > { %9237 = vmatprep.subr.mxu1 %v10972_v6 }
0x16cd   : > { %9179 = vmatprep.mubr.f32.mxu0 %v5286_v23  ;;  %9238 = vmatpush3.msra.mxu1 %v10972_v6  ;;  %v6006_v23 = vsel %vm987_vm0, %v5167_v12, 0 }
0x16ce   : > { %9180 = vmatmul.mubr.f32.vlgmr.msra.gmra.mxu0 %v5296_v28  ;;  %9206 = vmatmul.mubr.f32.gmra.mxu1 %v11065_v21  ;;  %v5168_v28 = vld [vmem:[#allocation3 + $0x18] sm:$0xff] }
0x16cf   : > { %9212 = vmatpush3.msra.mxu0 %v10942_v41  ;;  %9182 = vmatprep.mubr.f32.mxu0 %v5306_v59  ;;  %v5176_v41 = vld [vmem:[%s12806_s19 + $0x18] sm:$0xff]  ;;  %v11221_v59 = vand.u32 4294901760, %v6006_v23  ;;  %v6009_v33 = vsel %vm987_vm0, %v5168_v28, 0 }
0x16d0   : > { %9208 = vmatprep.mubr.f32.mxu1 %v11076_v53  ;;  %9213 = vmatprep.subr.mxu0 %v10955_v44 }
0x16d1   : > { %9214 = vmatpush3.msra.mxu0 %v10955_v44  ;;  %9271 = vmatprep.subr.mxu1 %v10936_v38  ;;  %v11130_v44 = vand.u32 4294901760, %v5176_v41 }
0x16d2   : > { %9183 = vmatmul.mubr.f32.gmra.mxu0 %v5316_v25  ;;  %9209 = vmatmul.mubr.f32.gmra.mxu1 %v11090_v60  ;;  %v5170_v25 = vld [vmem:[#allocation3 + $0x28] sm:$0xff] }
0x16d3   : > { %9185 = vmatprep.mubr.f32.mxu0 %v5326_v37  ;;  %9239 = vmatprep.mubr.f32.mxu1 %v5284_v55  ;;  %v11141_v55 = vsub.f32 %v5176_v41, %v11130_v44  ;;  %v11237_v37 = vand.u32 4294901760, %v6009_v33 }
0x16d4   : > { %9215 = vmatprep.subr.mxu0 %v10970_v5 }
0x16d5   : > { %9216 = vmatpush3.msra.mxu0 %v10970_v5  ;;  %v11143_v5 = vand.u32 4294901760, %v5175_v19 }
0x16d6   : > { %9186 = vmatmul.mubr.f32.gmra.mxu0 %v5336_v9  ;;  %9240 = vmatmul.mubr.f32.vlgmr.msra.gmra.mxu1 %v5294_v47  ;;  %v5174_v47 = vld [vmem:[%s12806_s19 + $0x8] sm:$0xff]  ;;  %v11245_v9 = vsub.f32 %v6006_v23, %v11221_v59 }
0x16d7   : > { %9188 = vmatprep.mubr.f32.mxu0 %v5346_v16  ;;  %9242 = vmatprep.mubr.f32.mxu1 %v5304_v52  ;;  %v11160_v52 = vand.u32 4294901760, %v5174_v47 }
0x16d8   : > { %9217 = vmatprep.subr.mxu0 %v10982_v14  ;;  %9272 = vmatpush3.msra.mxu1 %v10936_v38  ;;  %v11154_v38 = vand.u32 4294901760, %v11141_v55 }
0x16d9   : > { %9218 = vmatpush3.msra.mxu0 %v10982_v14  ;;  %9273 = vmatprep.subr.mxu1 %v10944_v30  ;;  %v11157_v14 = vsub.f32 %v5175_v19, %v11143_v5 }
0x16da   : > { %9189 = vmatmul.mubr.f32.gmra.mxu0 %v5356_v49  ;;  %9243 = vmatmul.mubr.f32.gmra.mxu1 %v5314_v58  ;;  %v11174_v58 = vand.u32 4294901760, %v5173_v57 }
0x16db   : > { %9219 = vmatprep.mubr.f32.mxu0 %v11073_v51  ;;  %9245 = vmatprep.mubr.f32.mxu1 %v5324_v17  ;;  %v11172_v51 = vand.u32 4294901760, %v11157_v14 }
0x16dc   : > { %9251 = vmatprep.subr.mxu0 %v10952_v43  ;;  %9274 = vmatpush3.msra.mxu1 %v10944_v30  ;;  %v6200_v30 = vsub.f32 %v11141_v55, %v11154_v38 }
0x16dd   : > { %9275 = vmatprep.subr.mxu1 %v10957_v45 }
0x16de   : > { %9220 = vmatmul.mubr.f32.vlgmr.msra.gmra.mxu0 %v11050_v40  ;;  %9246 = vmatmul.mubr.f32.gmra.mxu1 %v5334_v29  ;;  %v11179_v40 = vsub.f32 %v5174_v47, %v11160_v52  ;;  %v11256_v47 = vsub.f32 %v6009_v33, %v11237_v37 }
0x16df   : > { %9252 = vmatpush3.msra.mxu0 %v10952_v43  ;;  %9222 = vmatprep.mubr.f32.mxu0 %v11058_v11  ;;  %v5165_v43 = vld [vmem:[#allocation3] sm:$0xff]  ;;  %v6201_v11 = vand.u32 4294901760, %v6200_v30 }
0x16e0   : > { %9248 = vmatprep.mubr.f32.mxu1 %v5344_v34  ;;  %9253 = vmatprep.subr.mxu0 %v10967_v4 }
0x16e1   : > { %9254 = vmatpush3.msra.mxu0 %v10967_v4  ;;  %9276 = vmatpush3.msra.mxu1 %v10957_v45  ;;  %v6207_v4 = vsub.f32 %v11157_v14, %v11172_v51  ;;  %v11189_v45 = vsub.f32 %v5173_v57, %v11174_v58  ;;  %v6021_v57 = vsel %vm987_vm0, %v5172_v15, 0 }
0x16e2   : > { %9223 = vmatmul.mubr.f32.gmra.mxu0 %v11068_v48  ;;  %9249 = vmatmul.mubr.f32.gmra.mxu1 %v5354_v31  ;;  %v11194_v48 = vand.u32 4294901760, %v11179_v40 }
0x16e3   : > { %9225 = vmatprep.mubr.f32.mxu0 %v11079_v54  ;;  %9279 = vmatprep.mubr.f32.mxu1 %v11062_v20  ;;  %v6000_v54 = vsel %vm987_vm0, %v5165_v43, 0 }
0x16e4   : > { %9277 = vmatprep.subr.mxu1 %v10972_v6  ;;  %9255 = vmatprep.subr.mxu0 %v10979_v13  ;;  %v11208_v17 = vand.u32 4294901760, %v6000_v54 }
0x16e5   : > { %9278 = vmatpush3.msra.mxu1 %v10972_v6  ;;  %9256 = vmatpush3.msra.mxu0 %v10979_v13  ;;  %v6208_v6 = vand.u32 4294901760, %v6207_v4  ;;  %v11203_v13 = vand.u32 4294901760, %v11189_v45  ;;  %v6124_v4 = vand.u32 4294901760, %v11256_v47 }
0x16e6   : > { %9226 = vmatmul.mubr.f32.gmra.mxu0 %v11093_v61  ;;  %9280 = vmatmul.mubr.f32.vlgmr.msra.gmra.mxu1 %v11043_v35  ;;  %v6214_v61 = vsub.f32 %v11179_v40, %v11194_v48  ;;  %v11225_v34 = vsub.f32 %v6000_v54, %v11208_v17  ;;  %v11279_v54 = vand.u32 4294901760, %v6021_v57 }
0x16e7   : > { %9228 = vmatprep.mubr.f32.mxu0 %v11100_v22  ;;  %9282 = vmatprep.mubr.f32.mxu1 %v11045_v36  ;;  %v6003_v22 = vsel %vm987_vm0, %v5166_v10, 0  ;;  %v6221_v56 = vsub.f32 %v11189_v45, %v11203_v13 }
0x16e8   : > { %9257 = vmatprep.subr.mxu0 %v10989_v18  ;;  %9311 = vmatprep.subr.mxu1 %v6201_v11  ;;  %v11219_v29 = vand.u32 4294901760, %v6003_v22  ;;  %v6094_v46 = vand.u32 4294901760, %v11225_v34  ;;  %v11299_v28 = vsub.f32 %v6021_v57, %v11279_v54 }
0x16e9   : > { %9258 = vmatpush3.msra.mxu0 %v10989_v18  ;;  %9312 = vmatpush3.msra.mxu1 %v6201_v11  ;;  %v5169_v18 = vld [vmem:[#allocation3 + $0x20] sm:$0xff]  ;;  %v6222_v27 = vand.u32 4294901760, %v6221_v56 }
0x16ea   : > { %9229 = vmatmul.mubr.f32.gmra.mxu0 %v11110_v32  ;;  %9283 = vmatmul.mubr.f32.gmra.mxu1 %v11052_v24  ;;  %v6215_v32 = vand.u32 4294901760, %v6214_v61  ;;  %v11235_v31 = vsub.f32 %v6003_v22, %v11219_v29  ;;  %v6125_v22 = vsub.f32 %v11256_v47, %v6124_v4 }
0x16eb   : > { %9259 = vmatprep.mubr.f32.mxu0 %v11062_v20  ;;  %9285 = vmatprep.mubr.f32.mxu1 %v11054_v3  ;;  %v6012_v20 = vsel %vm987_vm0, %v5169_v18, 0 }
0x16ec   : > { %9291 = vmatprep.subr.mxu0 %v11130_v44  ;;  %9313 = vmatprep.subr.mxu1 %v6208_v6  ;;  %v11241_v41 = vand.u32 4294901760, %v6012_v20  ;;  %v6104_v19 = vand.u32 4294901760, %v11235_v31 }
0x16ed   : > { %9314 = vmatpush3.msra.mxu1 %v6208_v6 }
0x16ee   : > { %9260 = vmatmul.mubr.f32.vlgmr.msra.gmra.mxu0 %v11043_v35  ;;  %9286 = vmatmul.mubr.f32.gmra.mxu1 %v11065_v21  ;;  %v5171_v35 = vld [vmem:[#allocation3 + $0x30] sm:$0xff]  ;;  %v11265_v30 = vsub.f32 %v6012_v20, %v11241_v41  ;;  %v6105_v11 = vsub.f32 %v11235_v31, %v6104_v19  ;;  %v6164_v20 = vand.u32 4294901760, %v11299_v28 }
0x16ef   : > { %9292 = vmatpush3.msra.mxu0 %v11130_v44  ;;  %9262 = vmatprep.mubr.f32.mxu0 %v11045_v36  ;;  %v6015_v36 = vsel %vm987_vm0, %v5170_v25, 0  ;;  %v6018_v16 = vsel %vm987_vm0, %v5171_v35, 0  ;;  %vm7841_vm0 = vcmask 7168  }
0x16f0   : > { %9288 = vmatprep.mubr.f32.mxu1 %v11076_v53  ;;  %9293 = vmatprep.subr.mxu0 %v11143_v5  ;;  %v11253_v49 = vand.u32 4294901760, %v6015_v36  ;;  %v11269_v43 = vand.u32 4294901760, %v6018_v16  ;;  %v6134_v12 = vand.u32 4294901760, %v11265_v30  ;;  %v6106_v61 = vand.u32 4294901760, %v6105_v11 }
0x16f1   : > { %9294 = vmatpush3.msra.mxu0 %v11143_v5  ;;  %9315 = vmatprep.subr.mxu1 %v6215_v32  ;;  %v6165_v35 = vsub.f32 %v11299_v28, %v6164_v20 }
0x16f2   : > { %9263 = vmatmul.mubr.f32.gmra.mxu0 %v11052_v24  ;;  %9289 = vmatmul.mubr.f32.gmra.mxu1 %v11090_v60  ;;  %v6095_v24 = vsub.f32 %v11225_v34, %v6094_v46  ;;  %v11291_v6 = vsub.f32 %v6018_v16, %v11269_v43  ;;  %v6135_v18 = vsub.f32 %v11265_v30, %v6134_v12 }
0x16f3   : > { %9265 = vmatprep.mubr.f32.mxu0 %v11054_v3  ;;  %9316 = vmatpush3.msra.mxu1 %v6215_v32  ;;  %v6114_v3 = vand.u32 4294901760, %v11245_v9  ;;  %v6126_v32 = vand.u32 4294901760, %v6125_v22 }
0x16f4   : > { %9319 = vmatprep.mubr.f32.mxu1 %v11208_v17  ;;  %9317 = vmatprep.subr.mxu1 %v6222_v27  ;;  %v6096_v10 = vand.u32 4294901760, %v6095_v24  ;;  %v6154_v56 = vand.u32 4294901760, %v11291_v6  ;;  %v6136_v25 = vand.u32 4294901760, %v6135_v18 }
0x16f5   : > { %9295 = vmatprep.subr.mxu0 %v11160_v52  ;;  %9318 = vmatpush3.msra.mxu1 %v6222_v27 }
0x16f6   : > { %9266 = vmatmul.mubr.f32.gmra.mxu0 %v11065_v21  ;;  %9320 = vmatmul.mubr.f32.vlgmr.msra.gmra.mxu1 %v11219_v29  ;;  %v11282_v21 = vsub.f32 %v6015_v36, %v11253_v49  ;;  %v6166_v36 = vand.u32 4294901760, %v6165_v35 }
0x16f7   : > { %9296 = vmatpush3.msra.mxu0 %v11160_v52  ;;  %9268 = vmatprep.mubr.f32.mxu0 %v11076_v53  ;;  %v6115_v53 = vsub.f32 %v11245_v9, %v6114_v3 }
0x16f8   : > { %9322 = vmatprep.mubr.f32.mxu1 %v11221_v59  ;;  %9297 = vmatprep.subr.mxu0 %v11174_v58  ;;  %v6144_v23 = vand.u32 4294901760, %v11282_v21 }
0x16f9   : > { %9298 = vmatpush3.msra.mxu0 %v11174_v58  ;;  %9351 = vmatprep.subr.mxu1 %v11130_v44 }
0x16fa   : > { %9269 = vmatmul.mubr.f32.gmra.mxu0 %v11090_v60  ;;  %9323 = vmatmul.mubr.f32.gmra.mxu1 %v11237_v37  ;;  %v6116_v60 = vand.u32 4294901760, %v6115_v53  ;;  %v6145_v33 = vsub.f32 %v11282_v21, %v6144_v23 }
0x16fb   : > { %9299 = vmatprep.mubr.f32.mxu0 %v6096_v10  ;;  %9325 = vmatprep.mubr.f32.mxu1 %v11241_v41 }
0x16fc   : > { %9331 = vmatprep.subr.mxu0 %v11141_v55  ;;  %9352 = vmatpush3.msra.mxu1 %v11130_v44  ;;  %v6146_v27 = vand.u32 4294901760, %v6145_v33 }
0x16fd   : > { %9353 = vmatprep.subr.mxu1 %v11143_v5 }
0x16fe   : > { %9300 = vmatmul.mubr.f32.vlgmr.msra.gmra.mxu0 %v6106_v61  ;;  %9326 = vmatmul.mubr.f32.gmra.mxu1 %v11253_v49 }
0x16ff   : > { %9332 = vmatpush3.msra.mxu0 %v11141_v55  ;;  %9302 = vmatprep.mubr.f32.mxu0 %v6116_v60  ;;  %v6155_v55 = vsub.f32 %v11291_v6, %v6154_v56 }
0x1700   : > { %9328 = vmatprep.mubr.f32.mxu1 %v11269_v43  ;;  %9333 = vmatprep.subr.mxu0 %v11157_v14 }
0x1701   : > { %9354 = vmatpush3.msra.mxu1 %v11143_v5  ;;  %9334 = vmatpush3.msra.mxu0 %v11157_v14  ;;  %v6156_v14 = vand.u32 4294901760, %v6155_v55 }
0x1702   : > { %9303 = vmatmul.mubr.f32.gmra.mxu0 %v6126_v32  ;;  %9329 = vmatmul.mubr.f32.gmra.mxu1 %v11279_v54 }
0x1703   : > { %9355 = vmatprep.subr.mxu1 %v11160_v52  ;;  %9305 = vmatprep.mubr.f32.mxu0 %v6136_v25 }
0x1704   : > { %9356 = vmatpush3.msra.mxu1 %v11160_v52  ;;  %9359 = vmatprep.mubr.f32.mxu1 %v6094_v46 }
0x1705   : > { %9357 = vmatprep.subr.mxu1 %v11174_v58  ;;  %9335 = vmatprep.subr.mxu0 %v11179_v40 }
0x1706   : > { %9358 = vmatpush3.msra.mxu1 %v11174_v58  ;;  %9306 = vmatmul.mubr.f32.gmra.mxu0 %v6146_v27 }
0x1707   : > { %9336 = vmatpush3.msra.mxu0 %v11179_v40  ;;  %9360 = vmatmul.mubr.f32.vlgmr.msra.gmra.mxu1 %v6104_v19 }
0x1708   : > { %9308 = vmatprep.mubr.f32.mxu0 %v6156_v14  ;;  %9362 = vmatprep.mubr.f32.mxu1 %v6114_v3 }
0x1709   : > { %9337 = vmatprep.subr.mxu0 %v11189_v45  ;;  %9391 = vmatprep.subr.mxu1 %v11130_v44 }
0x170a   : > { %9309 = vmatmul.mubr.f32.gmra.mxu0 %v6166_v36  ;;  %9392 = vmatpush3.msra.mxu1 %v11130_v44 }
0x170b   : > { %9338 = vmatpush3.msra.mxu0 %v11189_v45  ;;  %9363 = vmatmul.mubr.f32.gmra.mxu1 %v6124_v4 }
0x170c   : > { %9339 = vmatprep.mubr.f32.mxu0 %v11225_v34  ;;  %9365 = vmatprep.mubr.f32.mxu1 %v6134_v12 }
0x170d   : > { %9371 = vmatprep.subr.mxu0 %v11154_v38  ;;  %9393 = vmatprep.subr.mxu1 %v11143_v5 }
0x170e   : > { %9340 = vmatmul.mubr.f32.vlgmr.msra.gmra.mxu0 %v11235_v31  ;;  %9394 = vmatpush3.msra.mxu1 %v11143_v5 }
0x170f   : > { %9366 = vmatmul.mubr.f32.gmra.mxu1 %v6144_v23  ;;  %9372 = vmatpush3.msra.mxu0 %v11154_v38 }
0x1710   : > { %9342 = vmatprep.mubr.f32.mxu0 %v11245_v9  ;;  %9368 = vmatprep.mubr.f32.mxu1 %v6154_v56 }
0x1711   : > { %9373 = vmatprep.subr.mxu0 %v11172_v51  ;;  %9395 = vmatprep.subr.mxu1 %v11160_v52 }
0x1712   : > { %9343 = vmatmul.mubr.f32.gmra.mxu0 %v11256_v47  ;;  %9396 = vmatpush3.msra.mxu1 %v11160_v52 }
0x1713   : > { %9369 = vmatmul.mubr.f32.gmra.mxu1 %v6164_v20  ;;  %9374 = vmatpush3.msra.mxu0 %v11172_v51 }
0x1714   : > { %9345 = vmatprep.mubr.f32.mxu0 %v11265_v30  ;;  %9399 = vmatprep.mubr.f32.mxu1 %v11208_v17 }
0x1715   : > { %9397 = vmatprep.subr.mxu1 %v11174_v58  ;;  %9375 = vmatprep.subr.mxu0 %v11194_v48 }
0x1716   : > { %9398 = vmatpush3.msra.mxu1 %v11174_v58  ;;  %9346 = vmatmul.mubr.f32.gmra.mxu0 %v11282_v21 }
0x1717   : > { %9376 = vmatpush3.msra.mxu0 %v11194_v48  ;;  %9400 = vmatmul.mubr.f32.vlgmr.msra.gmra.mxu1 %v11219_v29 }
0x1718   : > { %9348 = vmatprep.mubr.f32.mxu0 %v11291_v6  ;;  %9402 = vmatprep.mubr.f32.mxu1 %v11221_v59 }
0x1719   : > { %9377 = vmatprep.subr.mxu0 %v11203_v13 }
0x171a   : > { %9349 = vmatmul.mubr.f32.gmra.mxu0 %v11299_v28 }
0x171b   : > { %9378 = vmatpush3.msra.mxu0 %v11203_v13  ;;  %9403 = vmatmul.mubr.f32.gmra.mxu1 %v11237_v37 }
0x171c   : > { %9379 = vmatprep.mubr.f32.mxu0 %v11208_v17  ;;  %9405 = vmatprep.mubr.f32.mxu1 %v11241_v41 }
0x171e   : > { %9380 = vmatmul.mubr.f32.vlgmr.msra.gmra.mxu0 %v11219_v29 }
0x171f   : > { %9406 = vmatmul.mubr.f32.gmra.mxu1 %v11253_v49  ;;  %9382 = vmatprep.mubr.f32.mxu0 %v11221_v59 }
0x1720   : > { %9408 = vmatprep.mubr.f32.mxu1 %v11269_v43 }
0x1722   : > { %9383 = vmatmul.mubr.f32.gmra.mxu0 %v11237_v37 }
0x1723   : > { %9409 = vmatmul.mubr.f32.gmra.mxu1 %v11279_v54  ;;  %9385 = vmatprep.mubr.f32.mxu0 %v11241_v41 }
0x1726   : > { %9386 = vmatmul.mubr.f32.gmra.mxu0 %v11253_v49 }
0x1727   : > { %9388 = vmatprep.mubr.f32.mxu0 %v11269_v43 }
0x172a   : > { %9389 = vmatmul.mubr.f32.gmra.mxu0 %v11279_v54 }
0x1786   : > { %v9201_v44 = vpop.f32.mrf.mxu1 }
0x1788   : > { %v5449_v5 = vpop.f32.mrf.mxu1 }
0x178a   : > { %v11367_v38 = vpop.f32.mrf.mxu1 }
0x178c   : > { %v11369_v52 = vpop.f32.mrf.mxu1 }
0x178e   : > { %v9181_v51 = vpop.f32.mrf.mxu0  ;;  %v11371_v58 = vpop.f32.mrf.mxu1 }
0x178f   : > { %v5456_v42 = vadd.f32 %v9201_v44, %v9181_v51 }
0x1790   : > { %v5288_v40 = vpop.f32.mrf.mxu0  ;;  %v11373_v45 = vpop.f32.mrf.mxu1 }
0x1791   : > { %v5450_v39 = vadd.f32 %v5449_v5, %v5288_v40 }
0x1792   : > { %v9184_v48 = vpop.f32.mrf.mxu0  ;;  %v11375_v13 = vpop.f32.mrf.mxu1 }
0x1794   : > { %v5308_v17 = vpop.f32.mrf.mxu0  ;;  %v11377_v29 = vpop.f32.mrf.mxu1 }
0x1796   : > { %v9187_v59 = vpop.f32.mrf.mxu0  ;;  %v9241_v34 = vpop.f32.mrf.mxu1 }
0x1797   : > { %v5480_v5 = vadd.f32 %v11371_v58, %v9187_v59 }
0x1798   : > { %v11379_v31 = vpop.f32.mrf.mxu0  ;;  %v11381_v37 = vpop.f32.mrf.mxu1 }
0x179a   : > { %v11383_v46 = vpop.f32.mrf.mxu0  ;;  %v11385_v41 = vpop.f32.mrf.mxu1 }
0x179b   : > { %v5492_v58 = vadd.f32 %v11375_v13, %v11383_v46 }
0x179c   : > { %v11387_v9 = vpop.f32.mrf.mxu0  ;;  %v11389_v15 = vpop.f32.mrf.mxu1 }
0x179e   : > { %v9221_v16 = vpop.f32.mrf.mxu0  ;;  %v11391_v19 = vpop.f32.mrf.mxu1 }
0x17a0   : > { %v5571_v49 = vpop.f32.mrf.mxu0  ;;  %v11393_v47 = vpop.f32.mrf.mxu1 }
0x17a1   : > { %v5572_v50 = vadd.f32 %v5571_v49, %v5450_v39  ;;  %v5474_v39 = vadd.f32 %v11373_v45, %v11379_v31  ;;  %v5486_v45 = vadd.f32 %v11377_v29, %v11387_v9 }
0x17a2   : > { %v9224_v24 = vpop.f32.mrf.mxu0  ;;  %v11395_v3 = vpop.f32.mrf.mxu1 }
0x17a4   : > { %v5585_v57 = vpop.f32.mrf.mxu0  ;;  %v11397_v30 = vpop.f32.mrf.mxu1 }
0x17a6   : > { %v9227_v43 = vpop.f32.mrf.mxu0  ;;  %v9281_v11 = vpop.f32.mrf.mxu1 }
0x17a8   : > { %v5599_v4 = vpop.f32.mrf.mxu0  ;;  %v11399_v54 = vpop.f32.mrf.mxu1 }
0x17a9   : > { %v5600_v59 = vadd.f32 %v5599_v4, %v5474_v39 }
0x17aa   : > { %v9230_v21 = vpop.f32.mrf.mxu0  ;;  %v11401_v10 = vpop.f32.mrf.mxu1 }
0x17ab   : > { %v5621_v31 = vadd.f32 %v9230_v21, %v5492_v58 }
0x17ac   : > { %v11403_v53 = vpop.f32.mrf.mxu0  ;;  %v11405_v12 = vpop.f32.mrf.mxu1 }
0x17ad   : > { %v5614_v4 = vadd.f32 %v11403_v53, %v5486_v45  ;;  %v5754_v21 = vadd.f32 %v11395_v3, %v5621_v31 }
0x17ae   : > { %v9261_v6 = vpop.f32.mrf.mxu0  ;;  %v11407_v61 = vpop.f32.mrf.mxu1 }
0x17b0   : > { %v5836_v22 = vpop.f32.mrf.mxu0  ;;  %v11409_v23 = vpop.f32.mrf.mxu1 }
0x17b1   : > { %12807 = vst [vmem:[#allocation24_spill] sm:$0xff] %v11409_v23 }
0x17b2   : > { %v9264_v28 = vpop.f32.mrf.mxu0  ;;  %v11411_v60 = vpop.f32.mrf.mxu1 }
0x17b3   : > { %12808 = vst [vmem:[#allocation25_spill] sm:$0xff] %v11411_v60 }
0x17b4   : > { %v5848_v18 = vpop.f32.mrf.mxu0  ;;  %v11413_v56 = vpop.f32.mrf.mxu1 }
0x17b5   : > { %12809 = vst [vmem:[#allocation26_spill] sm:$0xff] %v11413_v56  ;;  %v5579_v56 = vadd.f32 %v9221_v16, %v5456_v42  ;;  %v5698_v16 = vadd.f32 %v11381_v37, %v5572_v50 }
0x17b6   : > { %v9267_v32 = vpop.f32.mrf.mxu0  ;;  %v11415_v33 = vpop.f32.mrf.mxu1 }
0x17b8   : > { %v11417_v20 = vpop.f32.mrf.mxu0  ;;  %v11419_v25 = vpop.f32.mrf.mxu1 }
0x17ba   : > { %v11421_v55 = vpop.f32.mrf.mxu0  ;;  %v11423_v27 = vpop.f32.mrf.mxu1 }
0x17bb   : > { %12810 = vst [vmem:[#allocation27_spill] sm:$0xff] %v11423_v27 }
0x17bc   : > { %v11425_v35 = vpop.f32.mrf.mxu0  ;;  %v11427_v14 = vpop.f32.mrf.mxu1 }
0x17bd   : > { %12811 = vst [vmem:[#allocation28_spill] sm:$0xff] %v11427_v14 }
0x17be   : > { %v9301_v36 = vpop.f32.mrf.mxu0  ;;  %v11429_v26 = vpop.f32.mrf.mxu1 }
0x17bf   : > { %12812 = vst [vmem:[#allocation29_spill] sm:$0xff] %v11429_v26  ;;  %v5468_v26 = vadd.f32 %v11367_v38, %v9184_v48  ;;  %v5607_v48 = vadd.f32 %v9227_v43, %v5480_v5 }
0x17c0   : > { %v6098_v8 = vpop.f32.mrf.mxu0  ;;  %v11431_v2 = vpop.f32.mrf.mxu1 }
0x17c1   : > { %12813 = vst [vmem:[#allocation30_spill] sm:$0xff] %v11431_v2  ;;  %v5593_v23 = vadd.f32 %v9224_v24, %v5468_v26 }
0x17c2   : > { %v9304_v0 = vpop.f32.mrf.mxu0  ;;  %v11433_v1 = vpop.f32.mrf.mxu1 }
0x17c3   : > { %12814 = vst [vmem:[#allocation31_spill] sm:$0xff] %v11433_v1  ;;  %v5462_v1 = vadd.f32 %v11369_v52, %v5308_v17  ;;  %v5837_v52 = vadd.f32 %v5836_v22, %v5698_v16  ;;  %v5722_v26 = vadd.f32 %v11385_v41, %v5593_v23  ;;  %v5738_v41 = vadd.f32 %v11391_v19, %v5607_v48 }
0x17c4   : > { %v11435_v7 = vpop.f32.mrf.mxu0  ;;  %v11437_v63 = vpop.f32.mrf.mxu1 }
0x17c5   : > { %12815 = vst [vmem:[#allocation32_spill] sm:$0xff] %v11437_v63  ;;  %v5706_v63 = vadd.f32 %v9241_v34, %v5579_v56  ;;  %v5586_v51 = vadd.f32 %v5585_v57, %v5462_v1  ;;  %v5954_v13 = vadd.f32 %v11399_v54, %v5837_v52 }
0x17c6   : > { %v11439_v62 = vpop.f32.mrf.mxu0 }
0x17c7   : > { %v11441_v60 = vpop.f32.mrf.mxu1  ;;  %v5843_v40 = vadd.f32 %v9261_v6, %v5706_v63  ;;  %v5855_v63 = vadd.f32 %v9264_v28, %v5722_v26  ;;  %v5714_v50 = vadd.f32 %v11389_v15, %v5586_v51  ;;  %v5867_v6 = vadd.f32 %v9267_v32, %v5738_v41 }
0x17c8   : > { %v11443_v14 = vpop.f32.mrf.mxu0  ;;  %v5730_v15 = vadd.f32 %v11393_v47, %v5600_v59  ;;  %v6099_v22 = vadd.f32 %v6098_v8, %v5954_v13  ;;  %v5879_v8 = vadd.f32 %v11421_v55, %v5754_v21  ;;  %v5746_v47 = vadd.f32 %v11397_v30, %v5614_v4  ;;  %v12819_v55 = vld [vmem:[#allocation27_spill] sm:$0xff]  ;;  %v12824_v59 = vld [vmem:[#allocation26_spill] sm:$0xff]  ;;  %v11525_v4 = vld [vmem:[%s12828_s20] ss:$0 sm:$0xff] }
0x17c9   : > { %v11446_v2 = vpop.f32.mrf.mxu1  ;;  %v5960_v34 = vadd.f32 %v9281_v11, %v5843_v40  ;;  %v5849_v57 = vadd.f32 %v5848_v18, %v5714_v50  ;;  %v5972_v29 = vadd.f32 %v11401_v10, %v5855_v63  ;;  %v5984_v10 = vadd.f32 %v11407_v61, %v5867_v6  ;;  %v12820_v61 = vld [vmem:[#allocation13_spill] sm:$0xff] }
0x17ca   : > { %v11448_v27 = vpop.f32.mrf.mxu0  ;;  %v5861_v19 = vadd.f32 %v11417_v20, %v5730_v15  ;;  %vm6863_vm4 = vcmp.eq.s32.totalorder %v12820_v61, 0  ;;  %v12825_v63 = vld [vmem:[#allocation29_spill] sm:$0xff]  ;;  %vm6891_vm5 = vcmp.eq.s32.totalorder %v12820_v61, 1  ;;  %vm6919_vm6 = vcmp.eq.s32.totalorder %v12820_v61, 2 }
0x17cb   : > { %v11451_v44 = vpop.f32.mrf.mxu1  ;;  %v6109_v43 = vadd.f32 %v9301_v36, %v5960_v34  ;;  %v6129_v54 = vadd.f32 %v9304_v0, %v5972_v29  ;;  %v5966_v28 = vadd.f32 %v11405_v12, %v5849_v57  ;;  %v6260_v12 = vadd.f32 %v11419_v25, %v6099_v22  ;;  %v12818_v36 = vld [vmem:[#allocation24_spill] sm:$0xff] }
0x17cc   : > { %v11454_v42 = vpop.f32.mrf.mxu0  ;;  %v6149_v20 = vadd.f32 %v11439_v62, %v5984_v10  ;;  %v5978_v5 = vadd.f32 %v12818_v36, %v5861_v19  ;;  %v12829_v19 = vld [vmem:[#allocation31_spill] sm:$0xff]  ;;  %vm6974_vm7 = vcmp.eq.s32.totalorder %v12820_v61, 4 }
0x17cd   : > { %v11457_v38 = vpop.f32.mrf.mxu1  ;;  %v6266_v53 = vadd.f32 %v11415_v33, %v6109_v43  ;;  %v6119_v3 = vadd.f32 %v11435_v7, %v5966_v28  ;;  %v5873_v33 = vadd.f32 %v11425_v35, %v5746_v47  ;;  %v6278_v16 = vadd.f32 %v12819_v55, %v6129_v54  ;;  %v11503_v7 = vpop.xlane.xlu1 %6844  ;;  %v12822_v35 = vld [vmem:[#allocation25_spill] sm:$0xff]  ;;  %v12827_v43 = vld [vmem:[#allocation30_spill] sm:$0xff] }
0x17ce   : > { %v9341_v49 = vpop.f32.mrf.mxu0  ;;  %12821 = vst [vmem:[#allocation24_spill] sm:$0xff] %v11503_v7  ;;  %v6139_v25 = vadd.f32 %v11443_v14, %v5978_v5  ;;  %v5996_v39 = vadd.f32 %v12822_v35, %v5879_v8  ;;  %v6290_v50 = vadd.f32 %v12825_v63, %v6149_v20  ;;  %v6864_v14 = vsel %vm6863_vm4, %v11503_v7, 0.0 }
0x17cf   : > { %v11462_v17 = vpop.f32.mrf.mxu1  ;;  %v6389_v0 = vadd.f32 %v9341_v49, %v6266_v53  ;;  %v12823_v49 = vld [vmem:[#allocation28_spill] sm:$0xff] }
0x17d0   : > { %v6381_v1 = vpop.f32.mrf.mxu0  ;;  %v6272_v52 = vadd.f32 %v12823_v49, %v6119_v3  ;;  %v6169_v58 = vadd.f32 %v11448_v27, %v5996_v39  ;;  %v6284_v13 = vadd.f32 %v12827_v43, %v6139_v25  ;;  %v12837_v43 = vld [vmem:[#allocation15_spill] sm:$0xff] }
0x17d1   : > { %v11467_v37 = vpop.f32.mrf.mxu1  ;;  %v6382_v40 = vadd.f32 %v6381_v1, %v6260_v12  ;;  %v6516_v26 = vadd.f32 %v11441_v60, %v6389_v0  ;;  %v5990_v1 = vadd.f32 %v12824_v59, %v5873_v33  ;;  %v11554_v55 = vpop.xlane.xlu1 %6928 }
0x17d2   : > { %v9344_v24 = vpop.f32.mrf.mxu0  ;;  %12833 = vst [vmem:[#allocation25_spill] sm:$0xff] %v11554_v55 }
0x17d3   : > { %v11473_v46 = vpop.f32.mrf.mxu1  ;;  %v6403_v48 = vadd.f32 %v9344_v24, %v6278_v16  ;;  %v11516_v24 = vpop.xlane.xlu0 %6872  ;;  %v6508_v57 = vadd.f32 %v11446_v2, %v6382_v40  ;;  %v6159_v60 = vadd.f32 %v11454_v42, %v5990_v1  ;;  %v6302_v2 = vadd.f32 %v12829_v19, %v6169_v58 }
0x17d4   : > { %v6395_v11 = vpop.f32.mrf.mxu0  ;;  %12826 = vst [vmem:[#allocation27_spill] sm:$0xff] %v11516_v24 }
0x17d5   : > { %v11479_v9 = vpop.f32.mrf.mxu1  ;;  %v6396_v31 = vadd.f32 %v6395_v11, %v6272_v52  ;;  %v6532_v22 = vadd.f32 %v11451_v44, %v6403_v48 }
0x17d6   : > { %v9347_v23 = vpop.f32.mrf.mxu0 }
0x17d7   : > { %v9401_v18 = vpop.f32.mrf.mxu1  ;;  %v6417_v27 = vadd.f32 %v9347_v23, %v6290_v50  ;;  %v6892_v23 = vsel %vm6891_vm5, %v11516_v24, %v6864_v14  ;;  %v6524_v53 = vadd.f32 %v11457_v38, %v6396_v31  ;;  %v11545_v12 = vpop.xlane.xlu0 %6900 }
0x17d8   : > { %v6409_v56 = vpop.f32.mrf.mxu0  ;;  %12832 = vst [vmem:[#allocation13_spill] sm:$0xff] %v11545_v12  ;;  %v6920_v38 = vsel %vm6919_vm6, %v11545_v12, %v6892_v23 }
0x17d9   : > { %v6763_v32 = vpop.f32.mrf.mxu1  ;;  %v6410_v29 = vadd.f32 %v6409_v56, %v6284_v13  ;;  %v6548_v10 = vadd.f32 %v11462_v17, %v6417_v27 }
0x17da   : > { %v9350_v51 = vpop.f32.mrf.mxu0 }
0x17db   : > { %v9404_v30 = vpop.f32.mrf.mxu1  ;;  %v6431_v56 = vadd.f32 %v9350_v51, %v6302_v2  ;;  %v6540_v36 = vadd.f32 %v11467_v37, %v6410_v29  ;;  %v11567_v52 = vpop.xlane.xlu0 %6955  ;;  %v12841_v29 = vld [vmem:[#allocation16_spill] sm:$0xff] }
0x17dc   : > { %v6423_v62 = vpop.f32.mrf.mxu0  ;;  %12834 = vst [vmem:[#allocation28_spill] sm:$0xff] %v11567_v52 }
0x17dd   : > { %v6775_v34 = vpop.f32.mrf.mxu1  ;;  %v6564_v37 = vadd.f32 %v11473_v46, %v6431_v56 }
0x17de   : > { %v9381_v45 = vpop.f32.mrf.mxu0 }
0x17df   : > { %v6653_v41 = vadd.f32 %v9381_v45, %v6516_v26  ;;  %v9407_v42 = vpop.f32.mrf.mxu1 }
0x17e0   : > { %v6646_v6 = vpop.f32.mrf.mxu0 }
0x17e1   : > { %v6770_v15 = vadd.f32 %v9401_v18, %v6653_v41  ;;  %v6647_v11 = vadd.f32 %v6646_v6, %v6508_v57  ;;  %v12831_v18 = vld [vmem:[#allocation32_spill] sm:$0xff] }
0x17e2   : > { %v9384_v21 = vpop.f32.mrf.mxu0  ;;  %v6296_v8 = vadd.f32 %v12831_v18, %v6159_v60  ;;  %v12835_v60 = vld [vmem:[#allocation14_spill] sm:$0xff] }
0x17e3   : > { %v6817_v54 = vadd.f32 %v11525_v4, %v6770_v15  ;;  %v6764_v44 = vadd.f32 %v6763_v32, %v6647_v11  ;;  %v6665_v28 = vadd.f32 %v9384_v21, %v6532_v22  ;;  %v6787_v32 = vpop.f32.mrf.mxu1  ;;  %v12839_v11 = vld [vmem:[#allocation17_spill] sm:$0xff] }
0x17e4   : > { %v6658_v47 = vpop.f32.mrf.mxu0  ;;  %v6424_v5 = vadd.f32 %v6423_v62, %v6296_v8  ;;  %v6947_v62 = vsel %vm6836_vm2, %v11554_v55, %v6920_v38 }
0x17e5   : > { %6826 = vst.msk [vmem:[%s11532_s3 + $0x8] sm:$0xff] %vm6824_vm3, %v6817_v54  ;;  %v6816_v3 = vadd.f32 %v11525_v4, %v6764_v44  ;;  %v6782_v0 = vadd.f32 %v9404_v30, %v6665_v28  ;;  %v6659_v33 = vadd.f32 %v6658_v47, %v6524_v53  ;;  %v9410_v39 = vpop.f32.mrf.mxu1  ;;  %v6975_v45 = vsel %vm6974_vm7, %v11567_v52, %v6947_v62 }
0x17e6   : > { %v9387_v20 = vpop.f32.mrf.mxu0  ;;  %v6556_v46 = vadd.f32 %v11479_v9, %v6424_v5 }
0x17e7   : > { %6825 = vst.msk [vmem:[%s11532_s3] sm:$0xff] %vm6824_vm3, %v6816_v3  ;;  %v6819_v17 = vadd.f32 %v11525_v4, %v6782_v0  ;;  %v6776_v51 = vadd.f32 %v6775_v34, %v6659_v33  ;;  %v6677_v40 = vadd.f32 %v9387_v20, %v6548_v10  ;;  %v6799_v34 = vpop.f32.mrf.mxu1 }
0x17e8   : > { %v6670_v16 = vpop.f32.mrf.mxu0 }
0x17e9   : > { %6828 = vst.msk [vmem:[%s11532_s3 + $0x18] sm:$0xff] %vm6824_vm3, %v6819_v17  ;;  %v6818_v30 = vadd.f32 %v11525_v4, %v6776_v51  ;;  %v6794_v25 = vadd.f32 %v9407_v42, %v6677_v40  ;;  %v6671_v35 = vadd.f32 %v6670_v16, %v6540_v36  ;;  %v12843_v42 = vld [vmem:[#allocation21_spill] sm:$0xff] }
0x17ea   : > { %v9390_v48 = vpop.f32.mrf.mxu0 }
0x17eb   : > { %6827 = vst.msk [vmem:[%s11532_s3 + $0x10] sm:$0xff] %vm6824_vm3, %v6818_v30  ;;  %v6821_v49 = vadd.f32 %v11525_v4, %v6794_v25  ;;  %v6788_v26 = vadd.f32 %v6787_v32, %v6671_v35  ;;  %v6689_v58 = vadd.f32 %v9390_v48, %v6564_v37 }
0x17ec   : > { %v6682_v59 = vpop.f32.mrf.mxu0  ;;  %v8228_v3 = vld [vmem:[%s11532_s3 + $0x8] sm:$0xff] }
0x17ed   : > { %6830 = vst.msk [vmem:[%s11532_s3 + $0x28] sm:$0xff] %vm6824_vm3, %v6821_v49  ;;  %v6820_v1 = vadd.f32 %v11525_v4, %v6788_v26  ;;  %v6806_v63 = vadd.f32 %v9410_v39, %v6689_v58  ;;  %v6683_v50 = vadd.f32 %v6682_v59, %v6556_v46 }
0x17ee   : > { %v6978_v14 = vld [vmem:[%s11532_s3] sm:$0xff] }
0x17ef   : > { %v6979_v31 = vadd.f32 %v6978_v14, %v6975_v45  ;;  %6829 = vst.msk [vmem:[%s11532_s3 + $0x20] sm:$0xff] %vm6824_vm3, %v6820_v1  ;;  %v6823_v41 = vadd.f32 %v11525_v4, %v6806_v63  ;;  %v6800_v9 = vadd.f32 %v6799_v34, %v6683_v50 }
0x17f1   : > { %6832 = vst.msk [vmem:[%s11532_s3 + $0x38] sm:$0xff] %vm6824_vm3, %v6823_v41  ;;  %v6822_v57 = vadd.f32 %v11525_v4, %v6800_v9  ;;  %v11584_v27 = vadd.f32 %v6979_v31, %v12835_v60  ;;  %v11587_v13 = vadd.f32 %v6979_v31, %v12837_v43  ;;  %v11596_v22 = vadd.f32 %v6979_v31, %v12839_v11 }
0x17f2   : > { %v11599_v19 = vadd.f32 %v6979_v31, %v12841_v29  ;;  %v11606_v21 = vadd.f32 %v6979_v31, %v12843_v42  ;;  %v8229_v46 = vld [vmem:[%s11532_s3 + $0x10] sm:$0xff] }
0x17f3   : > { %12836 = vst [vmem:[#allocation26_spill] sm:$0xff] %v11584_v27  ;;  %12838 = vst [vmem:[#allocation29_spill] sm:$0xff] %v11587_v13  ;;  %v7004_v6 = vsel %vm6824_vm3, %v11584_v27, -inf  ;;  %v6981_v15 = vsel %vm6824_vm3, %v11587_v13, -inf  ;;  %v7050_v4 = vsel %vm6824_vm3, %v11596_v22, -inf }
0x17f4   : > { %6831 = vst.msk [vmem:[%s11532_s3 + $0x30] sm:$0xff] %vm6824_vm3, %v6822_v57  ;;  %12840 = vst [vmem:[#allocation30_spill] sm:$0xff] %v11596_v22  ;;  %7005 = vmax.xlane.f32.xlu0 %v7004_v6  ;;  %6982 = vmax.xlane.f32.xlu1 %v6981_v15  ;;  %v7027_v2 = vsel %vm6824_vm3, %v11599_v19, -inf  ;;  %v7073_v23 = vsel %vm6824_vm3, %v11606_v21, -inf  ;;  %v8232_v55 = vld [vmem:[%s11532_s3 + $0x28] sm:$0xff] }
0x17f5   : > { %12842 = vst [vmem:[#allocation31_spill] sm:$0xff] %v11599_v19  ;;  %12844 = vst [vmem:[#allocation32_spill] sm:$0xff] %v11606_v21 }
0x17f8   : > { %7051 = vmax.xlane.f32.xlu0 %v7050_v4  ;;  %7028 = vmax.xlane.f32.xlu1 %v7027_v2 }
0x17fb   : > { %v8233_v13 = vld [vmem:[%s11532_s3 + $0x30] sm:$0xff] }
0x17fc   : > { %7074 = vmax.xlane.f32.xlu1 %v7073_v23 }
0x187d   : > { %v11610_v54 = vpop.xlane.xlu0 %7005  ;;  %v11612_v44 = vpop.xlane.xlu1 %6982 }
0x187e   : > { %12845 = vst [vmem:[#allocation14_spill] sm:$0xff] %v11610_v54  ;;  %12846 = vst [vmem:[#allocation15_spill] sm:$0xff] %v11612_v44  ;;  %v7001_v28 = vsel %vm6863_vm4, %v11612_v44, 0.0 }
0x187f   : > { %v7024_v53 = vsel %vm6891_vm5, %v11610_v54, %v7001_v28 }
0x1881   : > { %v11620_v18 = vpop.xlane.xlu1 %7028  ;;  %v11622_v8 = vpop.xlane.xlu0 %7051 }
0x1882   : > { %12847 = vst [vmem:[#allocation17_spill] sm:$0xff] %v11620_v18  ;;  %12848 = vst [vmem:[#allocation16_spill] sm:$0xff] %v11622_v8  ;;  %v7047_v47 = vsel %vm6919_vm6, %v11620_v18, %v7024_v53 }
0x1883   : > { %v7070_v10 = vsel %vm6836_vm2, %v11622_v8, %v7047_v47 }
0x1885   : > { %v11630_v56 = vpop.xlane.xlu1 %7074 }
0x1886   : > { %12849 = vst [vmem:[#allocation21_spill] sm:$0xff] %v11630_v56  ;;  %v7093_v0 = vsel %vm6974_vm7, %v11630_v56, %v7070_v10 }
0x1887   : > { %v7099_v33 = vadd.f32 %v8228_v3, %v7093_v0  ;;  %v8230_v0 = vld [vmem:[%s11532_s3 + $0x18] sm:$0xff] }
0x1889   : > { %v11637_v32 = vadd.f32 %v7099_v33, %v12835_v60  ;;  %v11640_v38 = vadd.f32 %v7099_v33, %v12837_v43  ;;  %v11647_v5 = vadd.f32 %v7099_v33, %v12839_v11  ;;  %v11650_v17 = vadd.f32 %v7099_v33, %v12841_v29 }
0x188a   : > { %v11657_v16 = vadd.f32 %v7099_v33, %v12843_v42 }
0x188b   : > { %12850 = vst [vmem:[#allocation33_spill] sm:$0xff] %v11637_v32  ;;  %12851 = vst [vmem:[#allocation34_spill] sm:$0xff] %v11640_v38  ;;  %v7124_v20 = vsel %vm6824_vm3, %v11637_v32, -inf  ;;  %v7101_v36 = vsel %vm6824_vm3, %v11640_v38, -inf  ;;  %v7170_v51 = vsel %vm6824_vm3, %v11647_v5, -inf  ;;  %v7147_v40 = vsel %vm6824_vm3, %v11650_v17, -inf }
0x188c   : > { %12852 = vst [vmem:[#allocation35_spill] sm:$0xff] %v11647_v5  ;;  %12853 = vst [vmem:[#allocation36_spill] sm:$0xff] %v11650_v17  ;;  %7125 = vmax.xlane.f32.xlu1 %v7124_v20  ;;  %7102 = vmax.xlane.f32.xlu0 %v7101_v36  ;;  %v7193_v30 = vsel %vm6824_vm3, %v11657_v16, -inf }
0x188d   : > { %12854 = vst [vmem:[#allocation37_spill] sm:$0xff] %v11657_v16 }
0x1890   : > { %7171 = vmax.xlane.f32.xlu1 %v7170_v51  ;;  %7148 = vmax.xlane.f32.xlu0 %v7147_v40 }
0x1894   : > { %7194 = vmax.xlane.f32.xlu0 %v7193_v30 }
0x1915   : > { %v11661_v25 = vpop.xlane.xlu1 %7125  ;;  %v11663_v35 = vpop.xlane.xlu0 %7102 }
0x1916   : > { %12855 = vst [vmem:[#allocation38_spill] sm:$0xff] %v11661_v25  ;;  %12856 = vst [vmem:[#allocation39_spill] sm:$0xff] %v11663_v35  ;;  %v7121_v37 = vsel %vm6863_vm4, %v11663_v35, 0.0 }
0x1917   : > { %v7144_v39 = vsel %vm6891_vm5, %v11661_v25, %v7121_v37 }
0x1919   : > { %v11671_v62 = vpop.xlane.xlu0 %7148  ;;  %v11673_v48 = vpop.xlane.xlu1 %7171 }
0x191a   : > { %12857 = vst [vmem:[#allocation40_spill] sm:$0xff] %v11671_v62  ;;  %12858 = vst [vmem:[#allocation41_spill] sm:$0xff] %v11673_v48  ;;  %v7167_v49 = vsel %vm6919_vm6, %v11671_v62, %v7144_v39 }
0x191b   : > { %v7190_v26 = vsel %vm6836_vm2, %v11673_v48, %v7167_v49 }
0x191d   : > { %v11681_v58 = vpop.xlane.xlu0 %7194 }
0x191e   : > { %12859 = vst [vmem:[#allocation42_spill] sm:$0xff] %v11681_v58  ;;  %v7213_v59 = vsel %vm6974_vm7, %v11681_v58, %v7190_v26 }
0x191f   : > { %v7219_v1 = vadd.f32 %v8229_v46, %v7213_v59 }
0x1921   : > { %v11688_v63 = vadd.f32 %v7219_v1, %v12835_v60  ;;  %v11691_v50 = vadd.f32 %v7219_v1, %v12837_v43  ;;  %v11698_v14 = vadd.f32 %v7219_v1, %v12839_v11  ;;  %v11701_v31 = vadd.f32 %v7219_v1, %v12841_v29 }
0x1922   : > { %v11708_v57 = vadd.f32 %v7219_v1, %v12843_v42 }
0x1923   : > { %v7244_v34 = vsel %vm6824_vm3, %v11688_v63, -inf  ;;  %v7221_v45 = vsel %vm6824_vm3, %v11691_v50, -inf  ;;  %v7290_v41 = vsel %vm6824_vm3, %v11698_v14, -inf  ;;  %v7267_v9 = vsel %vm6824_vm3, %v11701_v31, -inf }
0x1924   : > { %7245 = vmax.xlane.f32.xlu0 %v7244_v34  ;;  %7222 = vmax.xlane.f32.xlu1 %v7221_v45  ;;  %12860 = vst [vmem:[#allocation43_spill] sm:$0xff] %v11708_v57  ;;  %v7313_v6 = vsel %vm6824_vm3, %v11708_v57, -inf }
0x1928   : > { %7291 = vmax.xlane.f32.xlu0 %v7290_v41  ;;  %7268 = vmax.xlane.f32.xlu1 %v7267_v9 }
0x192c   : > { %7314 = vmax.xlane.f32.xlu1 %v7313_v6 }
0x19ad   : > { %v11712_v15 = vpop.xlane.xlu0 %7245  ;;  %v11714_v4 = vpop.xlane.xlu1 %7222 }
0x19ae   : > { %v7241_v2 = vsel %vm6863_vm4, %v11714_v4, 0.0 }
0x19af   : > { %v7264_v23 = vsel %vm6891_vm5, %v11712_v15, %v7241_v2 }
0x19b1   : > { %v11722_v28 = vpop.xlane.xlu1 %7268  ;;  %v11724_v53 = vpop.xlane.xlu0 %7291 }
0x19b2   : > { %v7287_v47 = vsel %vm6919_vm6, %v11722_v28, %v7264_v23 }
0x19b3   : > { %v7310_v10 = vsel %vm6836_vm2, %v11724_v53, %v7287_v47 }
0x19b5   : > { %v11732_v3 = vpop.xlane.xlu1 %7314 }
0x19b6   : > { %v7333_v33 = vsel %vm6974_vm7, %v11732_v3, %v7310_v10  ;;  %v8231_v10 = vld [vmem:[%s11532_s3 + $0x20] sm:$0xff] }
0x19b7   : > { %v7339_v20 = vadd.f32 %v8230_v0, %v7333_v33 }
0x19b9   : > { %v11739_v36 = vadd.f32 %v7339_v20, %v12835_v60  ;;  %v11742_v51 = vadd.f32 %v7339_v20, %v12837_v43  ;;  %v11749_v37 = vadd.f32 %v7339_v20, %v12839_v11  ;;  %v11752_v39 = vadd.f32 %v7339_v20, %v12841_v29 }
0x19ba   : > { %v11759_v46 = vadd.f32 %v7339_v20, %v12843_v42 }
0x19bb   : > { %v7364_v40 = vsel %vm6824_vm3, %v11739_v36, -inf  ;;  %v7341_v30 = vsel %vm6824_vm3, %v11742_v51, -inf  ;;  %v7410_v49 = vsel %vm6824_vm3, %v11749_v37, -inf  ;;  %v7387_v26 = vsel %vm6824_vm3, %v11752_v39, -inf }
0x19bc   : > { %7365 = vmax.xlane.f32.xlu1 %v7364_v40  ;;  %7342 = vmax.xlane.f32.xlu0 %v7341_v30  ;;  %v7433_v59 = vsel %vm6824_vm3, %v11759_v46, -inf }
0x19c0   : > { %7411 = vmax.xlane.f32.xlu1 %v7410_v49  ;;  %7388 = vmax.xlane.f32.xlu0 %v7387_v26 }
0x19c4   : > { %7434 = vmax.xlane.f32.xlu0 %v7433_v59 }
0x1a45   : > { %v11763_v1 = vpop.xlane.xlu1 %7365  ;;  %v11765_v34 = vpop.xlane.xlu0 %7342 }
0x1a46   : > { %v7361_v45 = vsel %vm6863_vm4, %v11765_v34, 0.0 }
0x1a47   : > { %v7384_v41 = vsel %vm6891_vm5, %v11763_v1, %v7361_v45 }
0x1a49   : > { %v11773_v9 = vpop.xlane.xlu0 %7388  ;;  %v11775_v6 = vpop.xlane.xlu1 %7411 }
0x1a4a   : > { %v7407_v2 = vsel %vm6919_vm6, %v11773_v9, %v7384_v41 }
0x1a4b   : > { %v7430_v23 = vsel %vm6836_vm2, %v11775_v6, %v7407_v2 }
0x1a4d   : > { %v11783_v47 = vpop.xlane.xlu0 %7434 }
0x1a4e   : > { %v7453_v0 = vsel %vm6974_vm7, %v11783_v47, %v7430_v23 }
0x1a4f   : > { %v7459_v33 = vadd.f32 %v8231_v10, %v7453_v0 }
0x1a51   : > { %v11790_v20 = vadd.f32 %v7459_v33, %v12835_v60  ;;  %v11793_v40 = vadd.f32 %v7459_v33, %v12837_v43  ;;  %v11800_v26 = vadd.f32 %v7459_v33, %v12839_v11  ;;  %v11803_v59 = vadd.f32 %v7459_v33, %v12841_v29 }
0x1a52   : > { %v11810_v2 = vadd.f32 %v7459_v33, %v12843_v42 }
0x1a53   : > { %v7484_v30 = vsel %vm6824_vm3, %v11790_v20, -inf  ;;  %v7461_v49 = vsel %vm6824_vm3, %v11793_v40, -inf  ;;  %v7530_v45 = vsel %vm6824_vm3, %v11800_v26, -inf  ;;  %v7507_v41 = vsel %vm6824_vm3, %v11803_v59, -inf }
0x1a54   : > { %7485 = vmax.xlane.f32.xlu0 %v7484_v30  ;;  %7462 = vmax.xlane.f32.xlu1 %v7461_v49  ;;  %v7553_v23 = vsel %vm6824_vm3, %v11810_v2, -inf }
0x1a58   : > { %7531 = vmax.xlane.f32.xlu0 %v7530_v45  ;;  %7508 = vmax.xlane.f32.xlu1 %v7507_v41 }
0x1a5c   : > { %7554 = vmax.xlane.f32.xlu1 %v7553_v23 }
0x1add   : > { %v11814_v10 = vpop.xlane.xlu0 %7485  ;;  %v11816_v0 = vpop.xlane.xlu1 %7462 }
0x1ade   : > { %v7481_v30 = vsel %vm6863_vm4, %v11816_v0, 0.0 }
0x1adf   : > { %v7504_v49 = vsel %vm6891_vm5, %v11814_v10, %v7481_v30 }
0x1ae1   : > { %v11824_v33 = vpop.xlane.xlu1 %7508  ;;  %v11826_v45 = vpop.xlane.xlu0 %7531 }
0x1ae2   : > { %v7527_v41 = vsel %vm6919_vm6, %v11824_v33, %v7504_v49 }
0x1ae3   : > { %v7550_v23 = vsel %vm6836_vm2, %v11826_v45, %v7527_v41 }
0x1ae5   : > { %v11834_v52 = vpop.xlane.xlu1 %7554 }
0x1ae6   : > { %v7573_v12 = vsel %vm6974_vm7, %v11834_v52, %v7550_v23 }
0x1ae7   : > { %v7579_v30 = vadd.f32 %v8232_v55, %v7573_v12 }
0x1ae9   : > { %v11841_v24 = vadd.f32 %v7579_v30, %v12835_v60  ;;  %v11844_v7 = vadd.f32 %v7579_v30, %v12837_v43  ;;  %v11851_v21 = vadd.f32 %v7579_v30, %v12839_v11  ;;  %v11854_v56 = vadd.f32 %v7579_v30, %v12841_v29 }
0x1aea   : > { %v11861_v23 = vadd.f32 %v7579_v30, %v12843_v42 }
0x1aeb   : > { %v7604_v49 = vsel %vm6824_vm3, %v11841_v24, -inf  ;;  %v7581_v41 = vsel %vm6824_vm3, %v11844_v7, -inf  ;;  %v7650_v12 = vsel %vm6824_vm3, %v11851_v21, -inf  ;;  %v7627_v55 = vsel %vm6824_vm3, %v11854_v56, -inf }
0x1aec   : > { %7605 = vmax.xlane.f32.xlu1 %v7604_v49  ;;  %7582 = vmax.xlane.f32.xlu0 %v7581_v41  ;;  %v7673_v19 = vsel %vm6824_vm3, %v11861_v23, -inf }
0x1af0   : > { %7651 = vmax.xlane.f32.xlu1 %v7650_v12  ;;  %7628 = vmax.xlane.f32.xlu0 %v7627_v55 }
0x1af4   : > { %7674 = vmax.xlane.f32.xlu0 %v7673_v19 }
0x1b75   : > { %v11865_v18 = vpop.xlane.xlu1 %7605  ;;  %v11867_v49 = vpop.xlane.xlu0 %7582 }
0x1b76   : > { %v7601_v41 = vsel %vm6863_vm4, %v11867_v49, 0.0  ;;  %vm7607_vm13 = vcmp.eq.f32.partialorder %v11841_v24, %v11865_v18 }
0x1b77   : > { %v7624_v22 = vsel %vm6891_vm5, %v11865_v18, %v7601_v41 }
0x1b79   : > { %v11875_v30 = vpop.xlane.xlu0 %7628  ;;  %v11877_v12 = vpop.xlane.xlu1 %7651 }
0x1b7a   : > { %v7647_v19 = vsel %vm6919_vm6, %v11875_v30, %v7624_v22  ;;  %vm7630_vm15 = vcmp.eq.f32.partialorder %v11854_v56, %v11875_v30 }
0x1b7b   : > { %v7670_v55 = vsel %vm6836_vm2, %v11877_v12, %v7647_v19 }
0x1b7d   : > { %v11885_v8 = vpop.xlane.xlu0 %7674 }
0x1b7e   : > { %v7693_v44 = vsel %vm6974_vm7, %v11885_v8, %v7670_v55 }
0x1b7f   : > { %v7699_v41 = vadd.f32 %v8233_v13, %v7693_v44 }
0x1b81   : > { %v7723_v27 = vadd.f32 %v7699_v41, %v12835_v60  ;;  %v7700_v54 = vadd.f32 %v7699_v41, %v12837_v43  ;;  %v7769_v58 = vadd.f32 %v7699_v41, %v12839_v11  ;;  %v7746_v19 = vadd.f32 %v7699_v41, %v12841_v29 }
0x1b82   : > { %v7792_v13 = vadd.f32 %v7699_v41, %v12843_v42 }
0x1b83   : > { %v7724_v16 = vsel %vm6824_vm3, %v7723_v27, -inf  ;;  %v7701_v22 = vsel %vm6824_vm3, %v7700_v54, -inf  ;;  %v7770_v5 = vsel %vm6824_vm3, %v7769_v58, -inf  ;;  %v7747_v48 = vsel %vm6824_vm3, %v7746_v19, -inf }
0x1b84   : > { %7725 = vmax.xlane.f32.xlu0 %v7724_v16  ;;  %7702 = vmax.xlane.f32.xlu1 %v7701_v22  ;;  %v7793_v60 = vsel %vm6824_vm3, %v7792_v13, -inf }
0x1b88   : > { %7771 = vmax.xlane.f32.xlu0 %v7770_v5  ;;  %7748 = vmax.xlane.f32.xlu1 %v7747_v48 }
0x1b8c   : > { %7794 = vmax.xlane.f32.xlu1 %v7793_v60 }
0x1c0d   : > { %v7726_v43 = vpop.xlane.xlu0 %7725  ;;  %v7703_v44 = vpop.xlane.xlu1 %7702 }
0x1c0e   : > { %vm7704_vm8 = vcmp.eq.f32.partialorder %v7700_v54, %v7703_v44  ;;  %v7721_v11 = vsel %vm6863_vm4, %v7703_v44, 0.0  ;;  %vm7727_vm9 = vcmp.eq.f32.partialorder %v7723_v27, %v7726_v43 }
0x1c0f   : > { %v7705_v29 = vsel %vm7704_vm8, %v12820_v61, 5  ;;  %v7744_v55 = vsel %vm6891_vm5, %v7726_v43, %v7721_v11  ;;  %v7728_v17 = vsel %vm7727_vm9, %v12820_v61, 5  ;;  %vm7676_vm8 = vcmp.eq.f32.partialorder %v11861_v23, %v11885_v8 }
0x1c10   : > { %v7706_v16 = vsel %vm6824_vm3, %v7705_v29, 2147483647  ;;  %v8234_v29 = vld [vmem:[%s11532_s3 + $0x38] sm:$0xff]  ;;  %v7677_v8 = vsel %vm7676_vm8, %v12820_v61, 5 }
0x1c11   : > { %v7749_v5 = vpop.xlane.xlu1 %7748  ;;  %v7708_v48 = vshra.s32 %v7706_v16, 16  ;;  %v7772_v41 = vpop.xlane.xlu0 %7771 }
0x1c12   : > { %vm7750_vm10 = vcmp.eq.f32.partialorder %v7746_v19, %v7749_v5  ;;  %v7767_v22 = vsel %vm6919_vm6, %v7749_v5, %v7744_v55  ;;  %vm7773_vm11 = vcmp.eq.f32.partialorder %v7769_v58, %v7772_v41 }
0x1c13   : > { %v7710_v54 = vcvt.s32.f32 %v7708_v48  ;;  %v7751_v60 = vsel %vm7750_vm10, %v12820_v61, 5  ;;  %v7790_v27 = vsel %vm6836_vm2, %v7772_v41, %v7767_v22  ;;  %v7774_v62 = vsel %vm7773_vm11, %v12820_v61, 5 }
0x1c14   : > { %v7752_v44 = vsel %vm6824_vm3, %v7751_v60, 2147483647  ;;  %v11919_v60 = vsel %vm6824_vm3, %v7728_v17, 2147483647  ;;  %vm7584_vm11 = vcmp.eq.f32.partialorder %v11844_v7, %v11867_v49 }
0x1c15   : > { %7711 = vmin.xlane.f32.xlu1 %v7710_v54  ;;  %v7795_v43 = vpop.xlane.xlu1 %7794  ;;  %v7754_v11 = vshra.s32 %v7752_v44, 16  ;;  %v7731_v22 = vshra.s32 %v11919_v60, 16  ;;  %v7730_v23 = vand.u32 65535, %v11919_v60 }
0x1c16   : > { %vm7796_vm12 = vcmp.eq.f32.partialorder %v7792_v13, %v7795_v43  ;;  %v7813_v19 = vsel %vm6974_vm7, %v7795_v43, %v7790_v27 }
0x1c17   : > { %v7797_v55 = vsel %vm7796_vm12, %v12820_v61, 5  ;;  %v7819_v5 = vadd.f32 %v8234_v29, %v7813_v19  ;;  %v7756_v48 = vcvt.s32.f32 %v7754_v11  ;;  %v11927_v11 = vsel %vm6824_vm3, %v7774_v62, 2147483647 }
0x1c18   : > { %v7798_v58 = vsel %vm6824_vm3, %v7797_v55, 2147483647  ;;  %v7733_v17 = vcvt.s32.f32 %v7731_v22  ;;  %v7777_v29 = vshra.s32 %v11927_v11, 16  ;;  %v7608_v22 = vsel %vm7607_vm13, %v12820_v61, 5 }
0x1c19   : > { %7757 = vmin.xlane.f32.xlu1 %v7756_v48  ;;  %v7820_v41 = vadd.f32 %v7819_v5, %v12843_v42  ;;  %v7800_v13 = vshra.s32 %v7798_v58, 16  ;;  %v7707_v42 = vand.u32 65535, %v7706_v16  ;;  %v7753_v5 = vand.u32 65535, %v7752_v44 }
0x1c1a   : > { %v11930_v19 = vcvt.s32.f32 %v7777_v29  ;;  %v7799_v29 = vand.u32 65535, %v7798_v58  ;;  %v7609_v18 = vsel %vm6824_vm3, %v7608_v22, 2147483647  ;;  %v7631_v44 = vsel %vm7630_vm15, %v12820_v61, 5 }
0x1c1b   : > { %v7821_v27 = vsel %vm6824_vm3, %v7820_v41, -inf  ;;  %v7802_v43 = vcvt.s32.f32 %v7800_v13  ;;  %v7709_v55 = vcvt.s32.f32 %v7707_v42 }
0x1c1c   : > { %7822 = vmax.xlane.f32.xlu0 %v7821_v27  ;;  %v7755_v27 = vcvt.s32.f32 %v7753_v5  ;;  %v7801_v30 = vcvt.s32.f32 %v7799_v29  ;;  %v11964_v5 = vsel %vm6824_vm3, %v7631_v44, 2147483647  ;;  %v11972_v29 = vsel %vm6824_vm3, %v7677_v8, 2147483647 }
0x1c1d   : > { %7803 = vmin.xlane.f32.xlu1 %v7802_v43  ;;  %v7732_v44 = vcvt.s32.f32 %v7730_v23  ;;  %v7680_v7 = vshra.s32 %v11972_v29, 16 }
0x1c20   : > { %7734 = vmin.xlane.f32.xlu0 %v7733_v17 }
0x1c24   : > { %7780 = vmin.xlane.f32.xlu0 %v11930_v19 }
0x1c9e   : > { %v11939_v62 = vpop.xlane.xlu1 %7711 }
0x1c9f   : > { %vm7713_vm14 = vcmp.eq.f32.partialorder %v7710_v54, %v11939_v62 }
0x1ca0   : > { %v7714_v13 = vsel %vm7713_vm14, %v7709_v55, inf  ;;  %vm7653_vm14 = vcmp.eq.f32.partialorder %v11851_v21, %v11877_v12 }
0x1ca1   : > { %7715 = vmin.xlane.f32.xlu1 %v7714_v13 }
0x1ca2   : > { %v11946_v16 = vpop.xlane.xlu1 %7757 }
0x1ca3   : > { %vm7759_vm1 = vcmp.eq.f32.partialorder %v7756_v48, %v11946_v16  ;;  %v7611_v48 = vshra.s32 %v7609_v18, 16 }
0x1ca4   : > { %v7760_v24 = vsel %vm7759_vm1, %v7755_v27, inf  ;;  %vm7464_vm1 = vcmp.eq.f32.partialorder %v11793_v40, %v11816_v0 }
0x1ca5   : > { %v7823_v54 = vpop.xlane.xlu0 %7822  ;;  %7761 = vmin.xlane.f32.xlu1 %v7760_v24  ;;  %v7613_v27 = vcvt.s32.f32 %v7611_v48  ;;  %v7585_v24 = vsel %vm7584_vm11, %v12820_v61, 5  ;;  %vm7487_vm11 = vcmp.eq.f32.partialorder %v11790_v20, %v11814_v10 }
0x1ca6   : > { %vm7824_vm9 = vcmp.eq.f32.partialorder %v7820_v41, %v7823_v54  ;;  %7842 = vst.msk [vmem:[%s391_s17] sm:$0xff] %vm7841_vm0, %v7823_v54  ;;  %v11958_v56 = vpop.xlane.xlu1 %7803  ;;  %v7586_v60 = vsel %vm6824_vm3, %v7585_v24, 2147483647 }
0x1ca7   : > { %v7825_v58 = vsel %vm7824_vm9, %v12820_v61, 5  ;;  %vm7805_vm10 = vcmp.eq.f32.partialorder %v7802_v43, %v11958_v56  ;;  %v7634_v43 = vshra.s32 %v11964_v5, 16 }
0x1ca8   : > { %v7806_v42 = vsel %vm7805_vm10, %v7801_v30, inf  ;;  %v7826_v55 = vsel %vm6824_vm3, %v7825_v58, 2147483647  ;;  %v7776_v30 = vand.u32 65535, %v11927_v11 }
0x1ca9   : > { %v7735_v13 = vpop.xlane.xlu0 %7734  ;;  %7807 = vmin.xlane.f32.xlu1 %v7806_v42  ;;  %v7828_v22 = vshra.s32 %v7826_v55, 16  ;;  %v11976_v58 = vcvt.s32.f32 %v7634_v43  ;;  %v7588_v42 = vshra.s32 %v7586_v60, 16  ;;  %v7654_v43 = vsel %vm7653_vm14, %v12820_v61, 5 }
0x1caa   : > { %vm7736_vm12 = vcmp.eq.f32.partialorder %v7733_v17, %v7735_v13  ;;  %v7778_v48 = vcvt.s32.f32 %v7776_v30  ;;  %v11982_v17 = vcvt.s32.f32 %v7680_v7  ;;  %v7718_v30 = vcvt.f32.s32 %v11939_v62 }
0x1cab   : > { %v7830_v41 = vcvt.s32.f32 %v7828_v22  ;;  %v7737_v49 = vsel %vm7736_vm12, %v7732_v44, inf  ;;  %v7590_v11 = vcvt.s32.f32 %v7588_v42  ;;  %v7827_v44 = vand.u32 65535, %v7826_v55 }
0x1cac   : > { %v11990_v7 = vsel %vm6824_vm3, %v7654_v43, 2147483647  ;;  %v7741_v35 = vcvt.f32.s32 %v7735_v13  ;;  %v7719_v12 = vshll.u32 %v7718_v30, 16  ;;  %v7764_v62 = vcvt.f32.s32 %v11946_v16 }
0x1cad   : > { %7831 = vmin.xlane.f32.xlu0 %v7830_v41  ;;  %7614 = vmin.xlane.f32.xlu1 %v7613_v27  ;;  %v7781_v54 = vpop.xlane.xlu0 %7780  ;;  %v7657_v21 = vshra.s32 %v11990_v7, 16  ;;  %vm7533_vm12 = vcmp.eq.f32.partialorder %v11800_v26, %v11826_v45 }
0x1cae   : > { %vm7782_vm13 = vcmp.eq.f32.partialorder %v11930_v19, %v7781_v54  ;;  %v7610_v19 = vand.u32 65535, %v7609_v18  ;;  %v7742_v25 = vshll.u32 %v7741_v35, 16  ;;  %v7534_v20 = vsel %vm7533_vm12, %v12820_v61, 5 }
0x1caf   : > { %v7783_v22 = vsel %vm7782_vm13, %v7778_v48, inf  ;;  %v12000_v13 = vcvt.s32.f32 %v7657_v21  ;;  %vm7510_vm13 = vcmp.eq.f32.partialorder %v11803_v59, %v11824_v33 }
0x1cb0   : > { %v7612_v38 = vcvt.s32.f32 %v7610_v19  ;;  %v7511_v45 = vsel %vm7510_vm13, %v12820_v61, 5  ;;  %vm7843_vm13 = vcmp.eq.s32.totalorder %v12820_v61, 7 }
0x1cb1   : > { %7738 = vmin.xlane.f32.xlu0 %v7737_v49  ;;  %7637 = vmin.xlane.f32.xlu1 %v11976_v58 }
0x1cb5   : > { %7784 = vmin.xlane.f32.xlu0 %v7783_v22  ;;  %7683 = vmin.xlane.f32.xlu1 %v11982_v17  ;;  %v7829_v22 = vcvt.s32.f32 %v7827_v44  ;;  %v7787_v44 = vcvt.f32.s32 %v7781_v54 }
0x1cb9   : > { %7591 = vmin.xlane.f32.xlu0 %v7590_v11 }
0x1d2a   : > { %v7716_v8 = vpop.xlane.xlu1 %7715 }
0x1d2b   : > { %v7717_v49 = vcvt.f32.s32 %v7716_v8 }
0x1d2d   : > { %v7720_v8 = vadd.s32 %v7719_v12, %v7717_v49  ;;  %v7587_v49 = vand.u32 65535, %v7586_v60  ;;  %v7633_v60 = vand.u32 65535, %v11964_v5  ;;  %v7679_v5 = vand.u32 65535, %v11972_v29 }
0x1d2e   : > { %v7762_v23 = vpop.xlane.xlu1 %7761 }
0x1d2f   : > { %v7763_v43 = vcvt.f32.s32 %v7762_v23  ;;  %v7722_v16 = vsel %vm6863_vm4, %v7720_v8, 0  ;;  %v7788_v23 = vshll.u32 %v7787_v44, 16  ;;  %v7465_v8 = vsel %vm7464_vm1, %v12820_v61, 5 }
0x1d30   : > { %v7635_v0 = vcvt.s32.f32 %v7633_v60  ;;  %v7681_v44 = vcvt.s32.f32 %v7679_v5 }
0x1d32   : > { %v7808_v24 = vpop.xlane.xlu1 %7807 }
0x1d33   : > { %v7809_v30 = vcvt.f32.s32 %v7808_v24  ;;  %v7589_v24 = vcvt.s32.f32 %v7587_v49 }
0x1d36   : > { %v11992_v48 = vpop.xlane.xlu0 %7831  ;;  %v11994_v42 = vpop.xlane.xlu1 %7614 }
0x1d37   : > { %vm7833_vm15 = vcmp.eq.f32.partialorder %v7830_v41, %v11992_v48  ;;  %vm7616_vm0 = vcmp.eq.f32.partialorder %v7613_v27, %v11994_v42  ;;  %v7765_v41 = vshll.u32 %v7764_v62, 16  ;;  %v7810_v27 = vcvt.f32.s32 %v11958_v56 }
0x1d38   : > { %v7834_v18 = vsel %vm7833_vm15, %v7829_v22, inf  ;;  %v7617_v55 = vsel %vm7616_vm0, %v7612_v38, inf  ;;  %v7838_v29 = vcvt.f32.s32 %v11992_v48  ;;  %vm7556_vm0 = vcmp.eq.f32.partialorder %v11810_v2, %v11834_v52 }
0x1d39   : > { %7835 = vmin.xlane.f32.xlu0 %v7834_v18  ;;  %7618 = vmin.xlane.f32.xlu1 %v7617_v55  ;;  %v7766_v38 = vadd.s32 %v7765_v41, %v7763_v43  ;;  %v7811_v54 = vshll.u32 %v7810_v27, 16 }
0x1d3a   : > { %v7739_v32 = vpop.xlane.xlu0 %7738  ;;  %v12008_v21 = vpop.xlane.xlu1 %7637 }
0x1d3b   : > { %v7740_v19 = vcvt.f32.s32 %v7739_v32  ;;  %v7812_v12 = vadd.s32 %v7811_v54, %v7809_v30  ;;  %vm7639_vm9 = vcmp.eq.f32.partialorder %v11976_v58, %v12008_v21  ;;  %v7488_v58 = vsel %vm7487_vm11, %v12820_v61, 5 }
0x1d3c   : > { %v7640_v43 = vsel %vm7639_vm9, %v7635_v0, inf  ;;  %v7644_v2 = vcvt.f32.s32 %v12008_v21  ;;  %vm7390_vm11 = vcmp.eq.f32.partialorder %v11752_v39, %v11773_v9 }
0x1d3d   : > { %v7743_v57 = vadd.s32 %v7742_v25, %v7740_v19  ;;  %7660 = vmin.xlane.f32.xlu0 %v12000_v13  ;;  %v7391_v9 = vsel %vm7390_vm11, %v12820_v61, 5  ;;  %vm7247_vm11 = vcmp.eq.f32.partialorder %v11688_v63, %v11712_v15 }
0x1d3e   : > { %v7785_v22 = vpop.xlane.xlu0 %7784  ;;  %v12026_v40 = vpop.xlane.xlu1 %7683 }
0x1d3f   : > { %v7745_v35 = vsel %vm6891_vm5, %v7743_v57, %v7722_v16  ;;  %v7786_v32 = vcvt.f32.s32 %v7785_v22  ;;  %vm7685_vm10 = vcmp.eq.f32.partialorder %v11982_v17, %v12026_v40  ;;  %v7839_v17 = vshll.u32 %v7838_v29, 16 }
0x1d40   : > { %v7768_v25 = vsel %vm6919_vm6, %v7766_v38, %v7745_v35  ;;  %v7686_v41 = vsel %vm7685_vm10, %v7681_v44, inf  ;;  %v7656_v38 = vand.u32 65535, %v11990_v7  ;;  %v12046_v22 = vsel %vm6824_vm3, %v7488_v58, 2147483647 }
0x1d41   : > { %v7789_v56 = vadd.s32 %v7788_v23, %v7786_v32  ;;  %v7491_v26 = vshra.s32 %v12046_v22, 16  ;;  %v12063_v35 = vsel %vm6824_vm3, %v7534_v20, 2147483647  ;;  %vm7344_vm10 = vcmp.eq.f32.partialorder %v11742_v51, %v11765_v34 }
0x1d42   : > { %v12014_v62 = vpop.xlane.xlu0 %7591  ;;  %v7658_v48 = vcvt.s32.f32 %v7656_v38 }
0x1d43   : > { %v7791_v57 = vsel %vm6836_vm2, %v7789_v56, %v7768_v25  ;;  %vm7593_vm8 = vcmp.eq.f32.partialorder %v7590_v11, %v12014_v62  ;;  %v12030_v11 = vsel %vm6824_vm3, %v7465_v8, 2147483647  ;;  %v7598_v54 = vcvt.f32.s32 %v12014_v62 }
0x1d44   : > { %v7814_v18 = vsel %vm6974_vm7, %v7812_v12, %v7791_v57  ;;  %v7594_v55 = vsel %vm7593_vm8, %v7589_v24, inf  ;;  %v7468_v19 = vshra.s32 %v12030_v11, 16  ;;  %v12069_v12 = vsel %vm6824_vm3, %v7511_v45, 2147483647 }
0x1d45   : > { %7816 = vst.msk [vmem:[#allocation5 + $0x38] sm:$0xff] %vm6824_vm3, %v7814_v18  ;;  %7595 = vmin.xlane.f32.xlu0 %v7594_v55  ;;  %v7621_v24 = vcvt.f32.s32 %v11994_v42  ;;  %v7537_v57 = vshra.s32 %v12063_v35, 16  ;;  %v7557_v18 = vsel %vm7556_vm0, %v12820_v61, 5  ;;  %v7514_v52 = vshra.s32 %v12069_v12, 16 }
0x1d46   : > { %v12035_v27 = vcvt.s32.f32 %v7468_v19  ;;  %v7599_v62 = vshll.u32 %v7598_v54, 16  ;;  %v12077_v42 = vsel %vm6824_vm3, %v7557_v18, 2147483647  ;;  %v7690_v54 = vcvt.f32.s32 %v12026_v40 }
0x1d47   : > { %v7539_v44 = vcvt.s32.f32 %v7537_v57  ;;  %v12079_v58 = vcvt.s32.f32 %v7514_v52  ;;  %vm7367_vm8 = vcmp.eq.f32.partialorder %v11739_v36, %v11763_v1  ;;  %vm7436_vm0 = vcmp.eq.f32.partialorder %v11759_v46, %v11783_v47 }
0x1d48   : > { %v7691_v57 = vshll.u32 %v7690_v54, 16  ;;  %v12151_v46 = vsel %vm6824_vm3, %v7391_v9, 2147483647  ;;  %v7437_v47 = vsel %vm7436_vm0, %v12820_v61, 5  ;;  %vm7293_vm0 = vcmp.eq.f32.partialorder %v11698_v14, %v11724_v53 }
0x1d49   : > { %7641 = vmin.xlane.f32.xlu0 %v7640_v43  ;;  %v7622_v43 = vshll.u32 %v7621_v24, 16  ;;  %v12159_v54 = vsel %vm6824_vm3, %v7437_v47, 2147483647  ;;  %v7393_v47 = vand.u32 65535, %v12151_v46 }
0x1d4c   : > { %v7845_v23 = vld [vmem:[#allocation5 + $0x38] sm:$0xff] }
0x1d4d   : > { %7687 = vmin.xlane.f32.xlu0 %v7686_v41 }
0x1d51   : > { %7471 = vmin.xlane.f32.xlu0 %v12035_v27 }
0x1dc2   : > { %v7836_v16 = vpop.xlane.xlu0 %7835  ;;  %v7619_v25 = vpop.xlane.xlu1 %7618 }
0x1dc3   : > { %v7837_v30 = vcvt.f32.s32 %v7836_v16  ;;  %v7620_v55 = vcvt.f32.s32 %v7619_v25  ;;  %v7645_v16 = vshll.u32 %v7644_v2, 16 }
0x1dc5   : > { %v12050_v49 = vadd.s32 %v7839_v17, %v7837_v30  ;;  %v7623_v41 = vadd.s32 %v7622_v43, %v7620_v55  ;;  %v7560_v17 = vshra.s32 %v12077_v42, 16  ;;  %v7368_v55 = vsel %vm7367_vm8, %v12820_v61, 5 }
0x1dc6   : > { %v12053_v10 = vpop.xlane.xlu0 %7660  ;;  %v12115_v2 = vsel %vm6824_vm3, %v7368_v55, 2147483647  ;;  %v7345_v43 = vsel %vm7344_vm10, %v12820_v61, 5  ;;  %vm7413_vm8 = vcmp.eq.f32.partialorder %v11749_v37, %v11775_v6 }
0x1dc7   : > { %vm7846_vm14 = vcmp.eq.s32.totalorder %v12820_v61, %v12050_v49  ;;  %vm7662_vm15 = vcmp.eq.f32.partialorder %v12000_v13, %v12053_v10  ;;  %v7493_v13 = vcvt.s32.f32 %v7491_v26  ;;  %v12090_v45 = vcvt.s32.f32 %v7560_v17 }
0x1dc8   : > { %v7847_v7 = vsel %vm7846_vm14, %v7845_v23, 0  ;;  %v7663_v59 = vsel %vm7662_vm15, %v7658_v48, inf  ;;  %v7467_v23 = vand.u32 65535, %v12030_v11  ;;  %v7490_v11 = vand.u32 65535, %v12046_v22 }
0x1dc9   : > { %7664 = vmin.xlane.f32.xlu1 %v7663_v59  ;;  %v7848_v33 = vsel %vm6824_vm3, %v7847_v7, 0  ;;  %v7371_v51 = vshra.s32 %v12115_v2, 16  ;;  %vm7861_vm14 = vcmp.eq.s32.totalorder %v12820_v61, 6  ;;  %v12133_v39 = vsel %vm6824_vm3, %v7345_v43, 2147483647 }
0x1dca   : > { %v7849_v32 = vand.u32 65535, %v7848_v33  ;;  %v7850_v56 = vshrl.u32 %v7848_v33, 16  ;;  %v7469_v59 = vcvt.s32.f32 %v7467_v23  ;;  %v7492_v52 = vcvt.s32.f32 %v7490_v11 }
0x1dcb   : > { %v7348_v23 = vshra.s32 %v12133_v39, 16  ;;  %v7414_v37 = vsel %vm7413_vm8, %v12820_v61, 5 }
0x1dcc   : > { %v7851_v60 = vcvt.s32.f32 %v7849_v32  ;;  %v7852_v5 = vcvt.s32.f32 %v7850_v56  ;;  %v7667_v32 = vcvt.f32.s32 %v12053_v10  ;;  %v7536_v10 = vand.u32 65535, %v12063_v35 }
0x1dcd   : > { %7494 = vmin.xlane.f32.xlu1 %v7493_v13  ;;  %v12162_v11 = vsel %vm6824_vm3, %v7414_v37, 2147483647 }
0x1dce   : > { %v7596_v8 = vpop.xlane.xlu0 %7595  ;;  %7853 = vadd.xlane.f32.xlu0 %v7851_v60  ;;  %v7668_v24 = vshll.u32 %v7667_v32, 16  ;;  %v7538_v35 = vcvt.s32.f32 %v7536_v10  ;;  %v12156_v32 = vcvt.s32.f32 %v7348_v23 }
0x1dcf   : > { %v7597_v0 = vcvt.f32.s32 %v7596_v8 }
0x1dd1   : > { %v7600_v19 = vadd.s32 %v7599_v62, %v7597_v0  ;;  %7855 = vadd.xlane.f32.xlu1 %v7852_v5  ;;  %v7513_v0 = vand.u32 65535, %v12069_v12 }
0x1dd2   : > { %v7642_v29 = vpop.xlane.xlu0 %7641  ;;  %7540 = vmin.xlane.f32.xlu0 %v7539_v44 }
0x1dd3   : > { %v7602_v38 = vsel %vm6863_vm4, %v7600_v19, 0  ;;  %v7643_v21 = vcvt.f32.s32 %v7642_v29  ;;  %v7515_v29 = vcvt.s32.f32 %v7513_v0  ;;  %v7370_v0 = vand.u32 65535, %v12115_v2 }
0x1dd4   : > { %v7625_v30 = vsel %vm6891_vm5, %v7623_v41, %v7602_v38 }
0x1dd5   : > { %v7646_v20 = vadd.s32 %v7645_v16, %v7643_v21  ;;  %7517 = vmin.xlane.f32.xlu1 %v12079_v58  ;;  %v7559_v16 = vand.u32 65535, %v12077_v42 }
0x1dd6   : > { %v7688_v48 = vpop.xlane.xlu0 %7687 }
0x1dd7   : > { %v7648_v26 = vsel %vm6919_vm6, %v7646_v20, %v7625_v30  ;;  %v7689_v25 = vcvt.f32.s32 %v7688_v48  ;;  %v12137_v30 = vcvt.s32.f32 %v7371_v51 }
0x1dd9   : > { %7563 = vmin.xlane.f32.xlu1 %v12090_v45 }
0x1dda   : > { %v12093_v7 = vpop.xlane.xlu0 %7471 }
0x1ddb   : > { %vm7473_vm1 = vcmp.eq.f32.partialorder %v12035_v27, %v12093_v7  ;;  %v7692_v27 = vadd.s32 %v7691_v57, %v7689_v25 }
0x1ddc   : > { %v7474_v33 = vsel %vm7473_vm1, %v7469_v59, inf }
0x1ddd   : > { %7475 = vmin.xlane.f32.xlu0 %v7474_v33  ;;  %v7394_v33 = vshra.s32 %v12151_v46, 16 }
0x1ddf   : > { %v12165_v25 = vcvt.s32.f32 %v7394_v33  ;;  %v7416_v33 = vand.u32 65535, %v12162_v11 }
0x1e52   : > { %v7665_v56 = vpop.xlane.xlu1 %7664 }
0x1e53   : > { %v7666_v60 = vcvt.f32.s32 %v7665_v56  ;;  %v7440_v56 = vshra.s32 %v12159_v54, 16 }
0x1e55   : > { %v7669_v18 = vadd.s32 %v7668_v24, %v7666_v60  ;;  %v7417_v60 = vshra.s32 %v12162_v11, 16  ;;  %v12170_v57 = vcvt.s32.f32 %v7440_v56 }
0x1e56   : > { %v12103_v8 = vpop.xlane.xlu1 %7494 }
0x1e57   : > { %v7671_v40 = vsel %vm6836_vm2, %v7669_v18, %v7648_v26  ;;  %vm7496_vm9 = vcmp.eq.f32.partialorder %v7493_v13, %v12103_v8  ;;  %v7854_v22 = vpop.xlane.xlu0 %7853  ;;  %v12172_v18 = vcvt.s32.f32 %v7417_v60 }
0x1e58   : > { %v7694_v36 = vsel %vm6974_vm7, %v7692_v27, %v7671_v40  ;;  %v7497_v1 = vsel %vm7496_vm9, %v7492_v52, inf  ;;  %v7857_v34 = vcvt.f32.s32 %v7854_v22  ;;  %v7478_v52 = vcvt.f32.s32 %v12093_v7 }
0x1e59   : > { %7696 = vst.msk [vmem:[#allocation5 + $0x30] sm:$0xff] %vm6824_vm3, %v7694_v36  ;;  %7498 = vmin.xlane.f32.xlu1 %v7497_v1  ;;  %v7501_v40 = vcvt.f32.s32 %v12103_v8  ;;  %v7372_v8 = vcvt.s32.f32 %v7370_v0  ;;  %v12862_v0 = vld [vmem:[#allocation43_spill] sm:$0xff] }
0x1e5a   : > { %v7856_v62 = vpop.xlane.xlu1 %7855  ;;  %v7479_v36 = vshll.u32 %v7478_v52, 16  ;;  %v7418_v52 = vcvt.s32.f32 %v7416_v33 }
0x1e5b   : > { %v7858_v13 = vcvt.f32.s32 %v7856_v62  ;;  %v12118_v5 = vpop.xlane.xlu0 %7540 }
0x1e5c   : > { %vm7542_vm12 = vcmp.eq.f32.partialorder %v7539_v44, %v12118_v5  ;;  %v7844_v44 = vsel %vm7843_vm13, %v12050_v49, 0  ;;  %v7561_v49 = vcvt.s32.f32 %v7559_v16 }
0x1e5d   : > { %v7859_v19 = vshll.u32 %v7858_v13, 16  ;;  %v7543_v41 = vsel %vm7542_vm12, %v7538_v35, inf  ;;  %v7502_v13 = vshll.u32 %v7501_v40, 16  ;;  %v7547_v35 = vcvt.f32.s32 %v12118_v5 }
0x1e5e   : > { %v12127_v12 = vpop.xlane.xlu1 %7517  ;;  %7544 = vmin.xlane.f32.xlu1 %v7543_v41  ;;  %vm7224_vm12 = vcmp.eq.f32.partialorder %v11691_v50, %v11714_v4  ;;  %v7395_v50 = vcvt.s32.f32 %v7393_v47 }
0x1e5f   : > { %v7860_v38 = vadd.s32 %v7859_v19, %v7857_v34  ;;  %vm7519_vm15 = vcmp.eq.f32.partialorder %v12079_v58, %v12127_v12  ;;  %v7524_v1 = vcvt.f32.s32 %v12127_v12  ;;  %v7225_v15 = vsel %vm7224_vm12, %v12820_v61, 5 }
0x1e60   : > { %v7863_v21 = vld [vmem:[#allocation5 + $0x30] sm:$0xff]  ;;  %v7520_v17 = vsel %vm7519_vm15, %v7515_v29, inf  ;;  %vm7879_vm15 = vcmp.eq.s32.totalorder %v12820_v61, 5 }
0x1e61   : > { %v12141_v20 = vsel %vm7861_vm14, %v7860_v38, %v7844_v44  ;;  %vm7864_vm1 = vcmp.eq.s32.totalorder %v12820_v61, %v7860_v38  ;;  %7521 = vmin.xlane.f32.xlu0 %v7520_v17  ;;  %v7525_v41 = vshll.u32 %v7524_v1, 16  ;;  %v7548_v38 = vshll.u32 %v7547_v35, 16 }
0x1e62   : > { %v7865_v42 = vsel %vm7864_vm1, %v7863_v21, 0  ;;  %7374 = vmin.xlane.f32.xlu1 %v12137_v30  ;;  %v7564_v58 = vpop.xlane.xlu1 %7563  ;;  %v7347_v17 = vand.u32 65535, %v12133_v39  ;;  %vm7270_vm1 = vcmp.eq.f32.partialorder %v11701_v31, %v11722_v28 }
0x1e63   : > { %vm7565_vm9 = vcmp.eq.f32.partialorder %v12090_v45, %v7564_v58  ;;  %v7866_v48 = vsel %vm6824_vm3, %v7865_v42, 0  ;;  %v7570_v29 = vcvt.f32.s32 %v7564_v58 }
0x1e64   : > { %v7566_v26 = vsel %vm7565_vm9, %v7561_v49, inf  ;;  %v7868_v59 = vshrl.u32 %v7866_v48, 16  ;;  %v7867_v45 = vand.u32 65535, %v7866_v48  ;;  %v7349_v39 = vcvt.s32.f32 %v7347_v17 }
0x1e65   : > { %7567 = vmin.xlane.f32.xlu0 %v7566_v26  ;;  %v7571_v42 = vshll.u32 %v7570_v29, 16 }
0x1e66   : > { %v7870_v6 = vcvt.s32.f32 %v7868_v59  ;;  %v7869_v24 = vcvt.s32.f32 %v7867_v45  ;;  %v7476_v55 = vpop.xlane.xlu0 %7475  ;;  %v7248_v59 = vsel %vm7247_vm11, %v12820_v61, 5  ;;  %v7439_v45 = vand.u32 65535, %v12159_v54 }
0x1e67   : > { %v7477_v22 = vcvt.f32.s32 %v7476_v55  ;;  %v12215_v56 = vsel %vm6824_vm3, %v7248_v59, 2147483647  ;;  %v12219_v55 = vsel %vm6824_vm3, %v7225_v15, 2147483647  ;;  %vm7316_vm11 = vcmp.eq.f32.partialorder %v12862_v0, %v11732_v3 }
0x1e68   : > { %7873 = vadd.xlane.f32.xlu1 %v7870_v6  ;;  %v7251_v54 = vshra.s32 %v12215_v56, 16  ;;  %v7441_v40 = vcvt.s32.f32 %v7439_v45  ;;  %v7317_v53 = vsel %vm7316_vm11, %v12820_v61, 5 }
0x1e69   : > { %7351 = vmin.xlane.f32.xlu0 %v12156_v32  ;;  %v7480_v43 = vadd.s32 %v7479_v36, %v7477_v22  ;;  %v7228_v36 = vshra.s32 %v12219_v55, 16  ;;  %v12260_v29 = vsel %vm6824_vm3, %v7317_v53, 2147483647 }
0x1e6b   : > { %v7482_v2 = vsel %vm6863_vm4, %v7480_v43, 0 }
0x1e6c   : > { %7397 = vmin.xlane.f32.xlu1 %v12165_v25 }
0x1e6d   : > { %7871 = vadd.xlane.f32.xlu0 %v7869_v24 }
0x1e70   : > { %7443 = vmin.xlane.f32.xlu1 %v12170_v57 }
0x1e71   : > { %7420 = vmin.xlane.f32.xlu0 %v12172_v18 }
0x1ee2   : > { %v7499_v27 = vpop.xlane.xlu1 %7498 }
0x1ee3   : > { %v7500_v10 = vcvt.f32.s32 %v7499_v27 }
0x1ee5   : > { %v7503_v51 = vadd.s32 %v7502_v13, %v7500_v10  ;;  %v7230_v13 = vcvt.s32.f32 %v7228_v36 }
0x1ee7   : > { %v7545_v62 = vpop.xlane.xlu1 %7544  ;;  %v7505_v5 = vsel %vm6891_vm5, %v7503_v51, %v7482_v2 }
0x1ee8   : > { %v7546_v34 = vcvt.f32.s32 %v7545_v62  ;;  %v7271_v62 = vsel %vm7270_vm1, %v12820_v61, 5 }
0x1ee9   : > { %v12250_v51 = vsel %vm6824_vm3, %v7271_v62, 2147483647 }
0x1eea   : > { %v7522_v19 = vpop.xlane.xlu0 %7521  ;;  %v7549_v44 = vadd.s32 %v7548_v38, %v7546_v34  ;;  %v7274_v3 = vshra.s32 %v12250_v51, 16  ;;  %v7320_v38 = vshra.s32 %v12260_v29, 16  ;;  %v7273_v0 = vand.u32 65535, %v12250_v51 }
0x1eeb   : > { %v7523_v7 = vcvt.f32.s32 %v7522_v19  ;;  %v12181_v16 = vpop.xlane.xlu1 %7374  ;;  %v7319_v51 = vand.u32 65535, %v12260_v29 }
0x1eec   : > { %vm7376_vm10 = vcmp.eq.f32.partialorder %v12137_v30, %v12181_v16  ;;  %v12269_v2 = vcvt.s32.f32 %v7320_v38 }
0x1eed   : > { %v7526_v12 = vadd.s32 %v7525_v41, %v7523_v7  ;;  %v7377_v9 = vsel %vm7376_vm10, %v7372_v8, inf  ;;  %v12262_v7 = vcvt.s32.f32 %v7274_v3  ;;  %v12868_v3 = vld [vmem:[#allocation36_spill] sm:$0xff] }
0x1eee   : > { %v7568_v21 = vpop.xlane.xlu0 %7567  ;;  %7378 = vmin.xlane.f32.xlu1 %v7377_v9 }
0x1eef   : > { %v7528_v58 = vsel %vm6919_vm6, %v7526_v12, %v7505_v5  ;;  %v7569_v49 = vcvt.f32.s32 %v7568_v21  ;;  %v7381_v5 = vcvt.f32.s32 %v12181_v16 }
0x1ef0   : > { %v7551_v30 = vsel %vm6836_vm2, %v7549_v44, %v7528_v58 }
0x1ef1   : > { %v7572_v48 = vadd.s32 %v7571_v42, %v7569_v49  ;;  %v7874_v23 = vpop.xlane.xlu1 %7873  ;;  %v7382_v49 = vshll.u32 %v7381_v5, 16 }
0x1ef2   : > { %v12199_v26 = vpop.xlane.xlu0 %7351  ;;  %v7876_v6 = vcvt.f32.s32 %v7874_v23 }
0x1ef3   : > { %v7574_v37 = vsel %vm6974_vm7, %v7572_v48, %v7551_v30  ;;  %vm7353_vm13 = vcmp.eq.f32.partialorder %v12156_v32, %v12199_v26  ;;  %v7358_v12 = vcvt.f32.s32 %v12199_v26 }
0x1ef4   : > { %7576 = vst.msk [vmem:[#allocation5 + $0x28] sm:$0xff] %vm6824_vm3, %v7574_v37  ;;  %v7354_v63 = vsel %vm7353_vm13, %v7349_v39, inf  ;;  %v7877_v32 = vshll.u32 %v7876_v6, 16 }
0x1ef5   : > { %v12208_v46 = vpop.xlane.xlu1 %7397  ;;  %7355 = vmin.xlane.f32.xlu0 %v7354_v63  ;;  %v7359_v17 = vshll.u32 %v7358_v12, 16  ;;  %v7275_v12 = vcvt.s32.f32 %v7273_v0 }
0x1ef6   : > { %vm7399_vm14 = vcmp.eq.f32.partialorder %v12165_v25, %v12208_v46  ;;  %v7872_v4 = vpop.xlane.xlu0 %7871  ;;  %v7404_v42 = vcvt.f32.s32 %v12208_v46 }
0x1ef7   : > { %v7875_v24 = vcvt.f32.s32 %v7872_v4  ;;  %v7400_v60 = vsel %vm7399_vm14, %v7395_v50, inf  ;;  %v7227_v50 = vand.u32 65535, %v12219_v55  ;;  %v7250_v4 = vand.u32 65535, %v12215_v56 }
0x1ef8   : > { %v7405_v39 = vshll.u32 %v7404_v42, 16 }
0x1ef9   : > { %v7878_v25 = vadd.s32 %v7877_v32, %v7875_v24  ;;  %7401 = vmin.xlane.f32.xlu0 %v7400_v60  ;;  %v12223_v27 = vpop.xlane.xlu1 %7443 }
0x1efa   : > { %vm7445_vm8 = vcmp.eq.f32.partialorder %v12170_v57, %v12223_v27  ;;  %v12230_v11 = vpop.xlane.xlu0 %7420  ;;  %v7294_v57 = vsel %vm7293_vm0, %v12820_v61, 5  ;;  %v7450_v48 = vcvt.f32.s32 %v12223_v27  ;;  %v12863_v27 = vld [vmem:[#allocation38_spill] sm:$0xff] }
0x1efb   : > { %v7881_v22 = vld [vmem:[#allocation5 + $0x28] sm:$0xff]  ;;  %v12233_v10 = vsel %vm7879_vm15, %v7878_v25, %v12141_v20  ;;  %vm7882_vm9 = vcmp.eq.s32.totalorder %v12820_v61, %v7878_v25  ;;  %vm7422_vm10 = vcmp.eq.f32.partialorder %v12172_v18, %v12230_v11  ;;  %v7446_v28 = vsel %vm7445_vm8, %v7441_v40, inf }
0x1efc   : > { %v7883_v1 = vsel %vm7882_vm9, %v7881_v22, 0  ;;  %v7423_v31 = vsel %vm7422_vm10, %v7418_v52, inf  ;;  %v12247_v18 = vcvt.s32.f32 %v7251_v54  ;;  %v12253_v14 = vsel %vm6824_vm3, %v7294_v57, 2147483647  ;;  %v12864_v54 = vld [vmem:[#allocation33_spill] sm:$0xff]  ;;  %v12866_v57 = vld [vmem:[#allocation34_spill] sm:$0xff] }
0x1efd   : > { %7424 = vmin.xlane.f32.xlu1 %v7423_v31  ;;  %7447 = vmin.xlane.f32.xlu0 %v7446_v28  ;;  %v7884_v20 = vsel %vm6824_vm3, %v7883_v1, 0  ;;  %v7297_v41 = vshra.s32 %v12253_v14, 16  ;;  %v7427_v59 = vcvt.f32.s32 %v12230_v11  ;;  %v7451_v63 = vshll.u32 %v7450_v48, 16  ;;  %v12865_v28 = vld [vmem:[#allocation39_spill] sm:$0xff] }
0x1efe   : > { %v7886_v35 = vshrl.u32 %v7884_v20, 16  ;;  %v7885_v43 = vand.u32 65535, %v7884_v20  ;;  %vm7127_vm12 = vcmp.eq.f32.partialorder %v12864_v54, %v12863_v27  ;;  %v7229_v40 = vcvt.s32.f32 %v7227_v50 }
0x1eff   : > { %v12264_v8 = vcvt.s32.f32 %v7297_v41  ;;  %v7428_v33 = vshll.u32 %v7427_v59, 16  ;;  %v7252_v22 = vcvt.s32.f32 %v7250_v4  ;;  %v7128_v31 = vsel %vm7127_vm12, %v12820_v61, 5 }
0x1f00   : > { %v7888_v34 = vcvt.s32.f32 %v7886_v35  ;;  %v7887_v19 = vcvt.s32.f32 %v7885_v43  ;;  %vm7104_vm15 = vcmp.eq.f32.partialorder %v12866_v57, %v12865_v28  ;;  %v12305_v35 = vsel %vm6824_vm3, %v7128_v31, 2147483647 }
0x1f01   : > { %7254 = vmin.xlane.f32.xlu1 %v12247_v18  ;;  %7231 = vmin.xlane.f32.xlu0 %v7230_v13  ;;  %v7105_v43 = vsel %vm7104_vm15, %v12820_v61, 5  ;;  %v7131_v5 = vshra.s32 %v12305_v35, 16 }
0x1f02   : > { %v12321_v42 = vsel %vm6824_vm3, %v7105_v43, 2147483647 }
0x1f05   : > { %7891 = vadd.xlane.f32.xlu1 %v7888_v34  ;;  %7889 = vadd.xlane.f32.xlu0 %v7887_v19  ;;  %v12867_v19 = vld [vmem:[#allocation40_spill] sm:$0xff] }
0x1f06   : > { %vm7150_vm0 = vcmp.eq.f32.partialorder %v12868_v3, %v12867_v19 }
0x1f09   : > { %7277 = vmin.xlane.f32.xlu1 %v12262_v7  ;;  %7300 = vmin.xlane.f32.xlu0 %v12264_v8 }
0x1f0d   : > { %7323 = vmin.xlane.f32.xlu1 %v12269_v2 }
0x1f77   : > { %v7379_v9 = vpop.xlane.xlu1 %7378 }
0x1f78   : > { %v7380_v44 = vcvt.f32.s32 %v7379_v9 }
0x1f7a   : > { %v7383_v23 = vadd.s32 %v7382_v49, %v7380_v44  ;;  %v12871_v49 = vld [vmem:[#allocation42_spill] sm:$0xff] }
0x1f7e   : > { %v7356_v21 = vpop.xlane.xlu0 %7355 }
0x1f7f   : > { %v7357_v58 = vcvt.f32.s32 %v7356_v21 }
0x1f81   : > { %v7360_v30 = vadd.s32 %v7359_v17, %v7357_v58  ;;  %v7151_v58 = vsel %vm7150_vm0, %v12820_v61, 5 }
0x1f82   : > { %v7402_v47 = vpop.xlane.xlu0 %7401 }
0x1f83   : > { %v7362_v26 = vsel %vm6863_vm4, %v7360_v30, 0  ;;  %v7403_v37 = vcvt.f32.s32 %v7402_v47  ;;  %v12872_v30 = vld [vmem:[#allocation37_spill] sm:$0xff]  ;;  %v7321_v47 = vcvt.s32.f32 %v7319_v51 }
0x1f84   : > { %v7385_v16 = vsel %vm6891_vm5, %v7383_v23, %v7362_v26  ;;  %vm7196_vm11 = vcmp.eq.f32.partialorder %v12872_v30, %v12871_v49  ;;  %v12876_v49 = vld [vmem:[#allocation29_spill] sm:$0xff] }
0x1f85   : > { %v7406_v6 = vadd.s32 %v7405_v39, %v7403_v37  ;;  %v7133_v39 = vcvt.s32.f32 %v7131_v5 }
0x1f86   : > { %v7425_v15 = vpop.xlane.xlu1 %7424  ;;  %v7448_v46 = vpop.xlane.xlu0 %7447 }
0x1f87   : > { %v7408_v45 = vsel %vm6919_vm6, %v7406_v6, %v7385_v16  ;;  %v7426_v32 = vcvt.f32.s32 %v7425_v15  ;;  %v7449_v24 = vcvt.f32.s32 %v7448_v46  ;;  %v12338_v16 = vsel %vm6824_vm3, %v7151_v58, 2147483647 }
0x1f89   : > { %v7429_v60 = vadd.s32 %v7428_v33, %v7426_v32  ;;  %v7452_v25 = vadd.s32 %v7451_v63, %v7449_v24  ;;  %v7197_v63 = vsel %vm7196_vm11, %v12820_v61, 5 }
0x1f8a   : > { %v12287_v11 = vpop.xlane.xlu1 %7254  ;;  %v12289_v52 = vpop.xlane.xlu0 %7231  ;;  %v12349_v33 = vsel %vm6824_vm3, %v7197_v63, 2147483647 }
0x1f8b   : > { %v7431_v56 = vsel %vm6836_vm2, %v7429_v60, %v7408_v45  ;;  %vm7256_vm13 = vcmp.eq.f32.partialorder %v12247_v18, %v12287_v11  ;;  %vm7233_vm14 = vcmp.eq.f32.partialorder %v7230_v13, %v12289_v52  ;;  %v7296_v18 = vand.u32 65535, %v12253_v14 }
0x1f8c   : > { %v7454_v55 = vsel %vm6974_vm7, %v7452_v25, %v7431_v56  ;;  %v7234_v36 = vsel %vm7233_vm14, %v7229_v40, inf  ;;  %v7257_v1 = vsel %vm7256_vm13, %v7252_v22, inf  ;;  %v7200_v60 = vshra.s32 %v12349_v33, 16 }
0x1f8d   : > { %7456 = vst.msk [vmem:[#allocation5 + $0x20] sm:$0xff] %vm6824_vm3, %v7454_v55  ;;  %7235 = vmin.xlane.f32.xlu0 %v7234_v36  ;;  %7258 = vmin.xlane.f32.xlu1 %v7257_v1  ;;  %v7298_v9 = vcvt.s32.f32 %v7296_v18  ;;  %v7261_v54 = vcvt.f32.s32 %v12287_v11  ;;  %v7238_v40 = vcvt.f32.s32 %v12289_v52 }
0x1f8e   : > { %v7892_v62 = vpop.xlane.xlu1 %7891  ;;  %v7890_v20 = vpop.xlane.xlu0 %7889  ;;  %v12359_v27 = vcvt.s32.f32 %v7200_v60 }
0x1f8f   : > { %v7894_v13 = vcvt.f32.s32 %v7892_v62  ;;  %v7893_v34 = vcvt.f32.s32 %v7890_v20  ;;  %v7262_v55 = vshll.u32 %v7261_v54, 16  ;;  %v7239_v36 = vshll.u32 %v7238_v40, 16  ;;  %v12877_v40 = vld [vmem:[#allocation16_spill] sm:$0xff] }
0x1f91   : > { %v7895_v53 = vshll.u32 %v7894_v13, 16  ;;  %v7130_v13 = vand.u32 65535, %v12305_v35 }
0x1f92   : > { %v12310_v41 = vpop.xlane.xlu1 %7277  ;;  %v12312_v38 = vpop.xlane.xlu0 %7300 }
0x1f93   : > { %v7896_v14 = vadd.s32 %v7895_v53, %v7893_v34  ;;  %vm7279_vm1 = vcmp.eq.f32.partialorder %v12262_v7, %v12310_v41  ;;  %vm7302_vm8 = vcmp.eq.f32.partialorder %v12264_v8, %v12312_v38  ;;  %v12869_v7 = vld [vmem:[#allocation41_spill] sm:$0xff]  ;;  %v12870_v8 = vld [vmem:[#allocation35_spill] sm:$0xff]  ;;  %v7284_v62 = vcvt.f32.s32 %v12310_v41 }
0x1f94   : > { %v7898_v44 = vld [vmem:[#allocation5 + $0x20] sm:$0xff]  ;;  %v7280_v21 = vsel %vm7279_vm1, %v7275_v12, inf  ;;  %v7303_v17 = vsel %vm7302_vm8, %v7298_v9, inf  ;;  %vm7173_vm10 = vcmp.eq.f32.partialorder %v12870_v8, %v12869_v7  ;;  %v7307_v0 = vcvt.f32.s32 %v12312_v38  ;;  %v12875_v8 = vld [vmem:[#allocation15_spill] sm:$0xff] }
0x1f95   : > { %v12327_v29 = vsel %vm6974_vm7, %v7896_v14, %v12233_v10  ;;  %vm7899_vm9 = vcmp.eq.s32.totalorder %v12820_v61, %v7896_v14  ;;  %7281 = vmin.xlane.f32.xlu0 %v7280_v21  ;;  %7304 = vmin.xlane.f32.xlu1 %v7303_v17  ;;  %v7108_v10 = vshra.s32 %v12321_v42, 16  ;;  %v7174_v6 = vsel %vm7173_vm10, %v12820_v61, 5  ;;  %v12873_v21 = vld [vmem:[#allocation14_spill] sm:$0xff] }
0x1f96   : > { %v7900_v48 = vsel %vm7899_vm9, %v7898_v44, 0  ;;  %v7324_v23 = vpop.xlane.xlu1 %7323  ;;  %v12346_v4 = vsel %vm6824_vm3, %v7174_v6, 2147483647  ;;  %v7285_v43 = vshll.u32 %v7284_v62, 16  ;;  %v7308_v3 = vshll.u32 %v7307_v0, 16  ;;  %v12874_v17 = vld [vmem:[#allocation26_spill] sm:$0xff] }
0x1f97   : > { %vm7325_vm12 = vcmp.eq.f32.partialorder %v12269_v2, %v7324_v23  ;;  %v7901_v59 = vsel %vm6824_vm3, %v7900_v48, 0  ;;  %v12342_v46 = vcvt.s32.f32 %v7108_v10  ;;  %v7154_v2 = vshra.s32 %v12338_v16, 16 }
0x1f98   : > { %v7326_v26 = vsel %vm7325_vm12, %v7321_v47, inf  ;;  %v7903_v37 = vshrl.u32 %v7901_v59, 16  ;;  %v7902_v50 = vand.u32 65535, %v7901_v59  ;;  %v7177_v24 = vshra.s32 %v12346_v4, 16 }
0x1f99   : > { %7134 = vmin.xlane.f32.xlu1 %v7133_v39  ;;  %7327 = vmin.xlane.f32.xlu0 %v7326_v26  ;;  %v12352_v45 = vcvt.s32.f32 %v7154_v2  ;;  %v7330_v53 = vcvt.f32.s32 %v7324_v23  ;;  %v7132_v14 = vcvt.s32.f32 %v7130_v13  ;;  %v7107_v38 = vand.u32 65535, %v12321_v42 }
0x1f9a   : > { %v7905_v15 = vcvt.s32.f32 %v7903_v37  ;;  %v7904_v32 = vcvt.s32.f32 %v7902_v50  ;;  %v12357_v25 = vcvt.s32.f32 %v7177_v24  ;;  %vm7007_vm14 = vcmp.eq.f32.partialorder %v12874_v17, %v12873_v21 }
0x1f9b   : > { %v7331_v5 = vshll.u32 %v7330_v53, 16  ;;  %vm6984_vm15 = vcmp.eq.f32.partialorder %v12876_v49, %v12875_v8  ;;  %v7109_v23 = vcvt.s32.f32 %v7107_v38  ;;  %v7153_v47 = vand.u32 65535, %v12338_v16 }
0x1f9c   : > { %v6985_v37 = vsel %vm6984_vm15, %v12820_v61, 5  ;;  %v7176_v16 = vand.u32 65535, %v12346_v4  ;;  %v12879_v4 = vld [vmem:[#allocation17_spill] sm:$0xff] }
0x1f9d   : > { %7908 = vadd.xlane.f32.xlu1 %v7905_v15  ;;  %7111 = vmin.xlane.f32.xlu0 %v12342_v46  ;;  %v7155_v15 = vcvt.s32.f32 %v7153_v47  ;;  %v12404_v54 = vsel %vm6824_vm3, %v6985_v37, 2147483647 }
0x1fa1   : > { %7157 = vmin.xlane.f32.xlu1 %v12352_v45  ;;  %7906 = vadd.xlane.f32.xlu0 %v7904_v32  ;;  %v7199_v32 = vand.u32 65535, %v12349_v33 }
0x1fa5   : > { %7180 = vmin.xlane.f32.xlu0 %v12357_v25  ;;  %7203 = vmin.xlane.f32.xlu1 %v12359_v27 }
0x2016   : > { %v7236_v22 = vpop.xlane.xlu0 %7235  ;;  %v7259_v56 = vpop.xlane.xlu1 %7258 }
0x2017   : > { %v7237_v1 = vcvt.f32.s32 %v7236_v22  ;;  %v7260_v31 = vcvt.f32.s32 %v7259_v56  ;;  %v12878_v22 = vld [vmem:[#allocation30_spill] sm:$0xff]  ;;  %v12880_v56 = vld [vmem:[#allocation31_spill] sm:$0xff] }
0x2018   : > { %vm7053_vm8 = vcmp.eq.f32.partialorder %v12878_v22, %v12877_v40  ;;  %vm7030_vm9 = vcmp.eq.f32.partialorder %v12880_v56, %v12879_v4  ;;  %v6987_v40 = vand.u32 65535, %v12404_v54 }
0x2019   : > { %v7240_v28 = vadd.s32 %v7239_v36, %v7237_v1  ;;  %v7263_v57 = vadd.s32 %v7262_v55, %v7260_v31  ;;  %v7031_v0 = vsel %vm7030_vm9, %v12820_v61, 5 }
0x201b   : > { %v7242_v20 = vsel %vm6863_vm4, %v7240_v28, 0  ;;  %v7201_v28 = vcvt.s32.f32 %v7199_v32 }
0x201c   : > { %v7265_v11 = vsel %vm6891_vm5, %v7263_v57, %v7242_v20  ;;  %v6988_v20 = vshra.s32 %v12404_v54, 16 }
0x201e   : > { %v7282_v18 = vpop.xlane.xlu0 %7281  ;;  %v7305_v52 = vpop.xlane.xlu1 %7304 }
0x201f   : > { %v7283_v34 = vcvt.f32.s32 %v7282_v18  ;;  %v7306_v19 = vcvt.f32.s32 %v7305_v52  ;;  %v7054_v18 = vsel %vm7053_vm8, %v12820_v61, 5  ;;  %v12882_v52 = vld [vmem:[#allocation32_spill] sm:$0xff] }
0x2021   : > { %v7286_v12 = vadd.s32 %v7285_v43, %v7283_v34  ;;  %v7309_v9 = vadd.s32 %v7308_v3, %v7306_v19  ;;  %v6990_v43 = vcvt.s32.f32 %v6988_v20  ;;  %v12435_v34 = vsel %vm6824_vm3, %v7031_v0, 2147483647 }
0x2022   : > { %v12372_v41 = vpop.xlane.xlu1 %7134  ;;  %v7328_v51 = vpop.xlane.xlu0 %7327  ;;  %v12439_v3 = vsel %vm6824_vm3, %v7054_v18, 2147483647  ;;  %v7033_v20 = vand.u32 65535, %v12435_v34  ;;  %v12883_v18 = vld [vmem:[#allocation24_spill] sm:$0xff] }
0x2023   : > { %v7288_v44 = vsel %vm6919_vm6, %v7286_v12, %v7265_v11  ;;  %vm7136_vm13 = vcmp.eq.f32.partialorder %v7133_v39, %v12372_v41  ;;  %v7329_v35 = vcvt.f32.s32 %v7328_v51  ;;  %v7008_v39 = vsel %vm7007_vm14, %v12820_v61, 5 }
0x2024   : > { %v7137_v58 = vsel %vm7136_vm13, %v7132_v14, inf  ;;  %v7311_v30 = vsel %vm6836_vm2, %v7309_v9, %v7288_v44  ;;  %v12398_v2 = vsel %vm6824_vm3, %v7008_v39, 2147483647  ;;  %v7034_v9 = vshra.s32 %v12435_v34, 16 }
0x2025   : > { %v7332_v7 = vadd.s32 %v7331_v5, %v7329_v35  ;;  %7138 = vmin.xlane.f32.xlu1 %v7137_v58  ;;  %v7011_v1 = vshra.s32 %v12398_v2, 16  ;;  %v7057_v14 = vshra.s32 %v12439_v3, 16 }
0x2026   : > { %v7909_v42 = vpop.xlane.xlu1 %7908  ;;  %v12384_v48 = vpop.xlane.xlu0 %7111  ;;  %v12446_v5 = vcvt.s32.f32 %v7034_v9 }
0x2027   : > { %v7334_v59 = vsel %vm6974_vm7, %v7332_v7, %v7311_v30  ;;  %v7911_v10 = vcvt.f32.s32 %v7909_v42  ;;  %vm7113_vm0 = vcmp.eq.f32.partialorder %v12342_v46, %v12384_v48  ;;  %v7013_v13 = vcvt.s32.f32 %v7011_v1 }
0x2028   : > { %7336 = vst.msk [vmem:[#allocation5 + $0x18] sm:$0xff] %vm6824_vm3, %v7334_v59  ;;  %v7114_v26 = vsel %vm7113_vm0, %v7109_v23, inf  ;;  %v12449_v35 = vcvt.s32.f32 %v7057_v14  ;;  %v7118_v17 = vcvt.f32.s32 %v12384_v48  ;;  %v7141_v7 = vcvt.f32.s32 %v12372_v41  ;;  %v12887_v14 = vld [vmem:[#allocation13_spill] sm:$0xff] }
0x2029   : > { %7115 = vmin.xlane.f32.xlu0 %v7114_v26  ;;  %v7912_v50 = vshll.u32 %v7911_v10, 16 }
0x202a   : > { %v12394_v6 = vpop.xlane.xlu1 %7157  ;;  %v7907_v63 = vpop.xlane.xlu0 %7906  ;;  %v7119_v30 = vshll.u32 %v7118_v17, 16  ;;  %v7142_v47 = vshll.u32 %v7141_v7, 16 }
0x202b   : > { %vm7159_vm1 = vcmp.eq.f32.partialorder %v12352_v45, %v12394_v6  ;;  %v7910_v46 = vcvt.f32.s32 %v7907_v63  ;;  %v7178_v45 = vcvt.s32.f32 %v7176_v16  ;;  %v7164_v42 = vcvt.f32.s32 %v12394_v6 }
0x202c   : > { %v7160_v24 = vsel %vm7159_vm1, %v7155_v15, inf  ;;  %v7010_v6 = vand.u32 65535, %v12398_v2 }
0x202d   : > { %v7913_v60 = vadd.s32 %v7912_v50, %v7910_v46  ;;  %7161 = vmin.xlane.f32.xlu0 %v7160_v24  ;;  %v7165_v26 = vshll.u32 %v7164_v42, 16 }
0x202e   : > { %v12410_v55 = vpop.xlane.xlu0 %7180  ;;  %v12412_v36 = vpop.xlane.xlu1 %7203 }
0x202f   : > { %v7915_v33 = vld [vmem:[#allocation5 + $0x18] sm:$0xff]  ;;  %v12418_v31 = vsel %vm6836_vm2, %v7913_v60, %v12327_v29  ;;  %vm7916_vm10 = vcmp.eq.s32.totalorder %v12820_v61, %v7913_v60  ;;  %vm7182_vm11 = vcmp.eq.f32.partialorder %v12357_v25, %v12410_v55  ;;  %vm7205_vm12 = vcmp.eq.f32.partialorder %v12359_v27, %v12412_v36  ;;  %v12881_v25 = vld [vmem:[#allocation21_spill] sm:$0xff] }
0x2030   : > { %v7917_v57 = vsel %vm7916_vm10, %v7915_v33, 0  ;;  %v7183_v62 = vsel %vm7182_vm11, %v7178_v45, inf  ;;  %v7206_v11 = vsel %vm7205_vm12, %v7201_v28, inf  ;;  %vm7076_vm13 = vcmp.eq.f32.partialorder %v12882_v52, %v12881_v25  ;;  %v12884_v25 = vld [vmem:[#allocation19_spill] sm:$0xff] }
0x2031   : > { %7184 = vmin.xlane.f32.xlu1 %v7183_v62  ;;  %v7918_v29 = vsel %vm6824_vm3, %v7917_v57, 0  ;;  %7207 = vmin.xlane.f32.xlu0 %v7206_v11  ;;  %v7077_v19 = vsel %vm7076_vm13, %v12820_v61, 5  ;;  %v7187_v37 = vcvt.f32.s32 %v12410_v55  ;;  %v7210_v15 = vcvt.f32.s32 %v12412_v36 }
0x2032   : > { %v7920_v27 = vshrl.u32 %v7918_v29, 16  ;;  %v7919_v53 = vand.u32 65535, %v7918_v29  ;;  %v12444_v38 = vsel %vm6824_vm3, %v7077_v19, 2147483647  ;;  %v7012_v45 = vcvt.s32.f32 %v7010_v6 }
0x2033   : > { %v7080_v44 = vshra.s32 %v12444_v38, 16  ;;  %v7188_v46 = vshll.u32 %v7187_v37, 16  ;;  %v7211_v22 = vshll.u32 %v7210_v15, 16  ;;  %v6989_v33 = vcvt.s32.f32 %v6987_v40 }
0x2034   : > { %v7922_v12 = vcvt.s32.f32 %v7920_v27  ;;  %v7921_v51 = vcvt.s32.f32 %v7919_v53  ;;  %v7056_v29 = vand.u32 65535, %v12439_v3  ;;  %vm6846_vm0 = vcmp.eq.f32.partialorder %v12884_v25, %v12883_v18  ;;  %v12885_v27 = vld [vmem:[#allocation27_spill] sm:$0xff] }
0x2035   : > { %7014 = vmin.xlane.f32.xlu1 %v7013_v13  ;;  %6991 = vmin.xlane.f32.xlu0 %v6990_v43  ;;  %v12453_v21 = vcvt.s32.f32 %v7080_v44  ;;  %v7035_v19 = vcvt.s32.f32 %v7033_v20  ;;  %v12888_v44 = vld [vmem:[#allocation20_spill] sm:$0xff] }
0x2036   : > { %v7058_v3 = vcvt.s32.f32 %v7056_v29  ;;  %vm6902_vm9 = vcmp.eq.f32.partialorder %v12888_v44, %v12887_v14 }
0x2039   : > { %7925 = vadd.xlane.f32.xlu1 %v7922_v12  ;;  %7923 = vadd.xlane.f32.xlu0 %v7921_v51  ;;  %v7079_v12 = vand.u32 65535, %v12444_v38  ;;  %v6847_v51 = vsel %vm6846_vm0, %v12820_v61, 5 }
0x203d   : > { %7037 = vmin.xlane.f32.xlu1 %v12446_v5  ;;  %7060 = vmin.xlane.f32.xlu0 %v12449_v35 }
0x2041   : > { %7083 = vmin.xlane.f32.xlu1 %v12453_v21 }
0x20ae   : > { %v7139_v58 = vpop.xlane.xlu1 %7138 }
0x20af   : > { %v7140_v8 = vcvt.f32.s32 %v7139_v58 }
0x20b1   : > { %v7143_v59 = vadd.s32 %v7142_v47, %v7140_v8  ;;  %v12889_v8 = vld [vmem:[#allocation25_spill] sm:$0xff] }
0x20b2   : > { %v7116_v49 = vpop.xlane.xlu0 %7115 }
0x20b3   : > { %v7117_v23 = vcvt.f32.s32 %v7116_v49  ;;  %v12890_v49 = vld [vmem:[#allocation22_spill] sm:$0xff] }
0x20b4   : > { %vm6930_vm12 = vcmp.eq.f32.partialorder %v12890_v49, %v12889_v8 }
0x20b5   : > { %v7120_v39 = vadd.s32 %v7119_v30, %v7117_v23  ;;  %v7081_v23 = vcvt.s32.f32 %v7079_v12  ;;  %v6931_v37 = vsel %vm6930_vm12, %v12820_v61, 5 }
0x20b6   : > { %v7162_v10 = vpop.xlane.xlu0 %7161 }
0x20b7   : > { %v7122_v63 = vsel %vm6863_vm4, %v7120_v39, 0  ;;  %v7163_v48 = vcvt.f32.s32 %v7162_v10 }
0x20b8   : > { %v7145_v41 = vsel %vm6891_vm5, %v7143_v59, %v7122_v63  ;;  %v12891_v63 = vld [vmem:[#allocation28_spill] sm:$0xff] }
0x20b9   : > { %v7166_v16 = vadd.s32 %v7165_v26, %v7163_v48  ;;  %v12892_v48 = vld [vmem:[#allocation23_spill] sm:$0xff] }
0x20ba   : > { %v7185_v50 = vpop.xlane.xlu1 %7184  ;;  %v7208_v60 = vpop.xlane.xlu0 %7207 }
0x20bb   : > { %v7168_v32 = vsel %vm6919_vm6, %v7166_v16, %v7145_v41  ;;  %v7186_v24 = vcvt.f32.s32 %v7185_v50  ;;  %v7209_v4 = vcvt.f32.s32 %v7208_v60 }
0x20bd   : > { %v7189_v56 = vadd.s32 %v7188_v46, %v7186_v24  ;;  %v7212_v55 = vadd.s32 %v7211_v22, %v7209_v4  ;;  %v12526_v46 = vsel %vm6824_vm3, %v6931_v37, 2147483647 }
0x20be   : > { %v12469_v36 = vpop.xlane.xlu1 %7014  ;;  %v12474_v2 = vpop.xlane.xlu0 %6991  ;;  %v6934_v40 = vshra.s32 %v12526_v46, 16 }
0x20bf   : > { %v7191_v1 = vsel %vm6836_vm2, %v7189_v56, %v7168_v32  ;;  %vm7016_vm14 = vcmp.eq.f32.partialorder %v7013_v13, %v12469_v36  ;;  %vm6993_vm15 = vcmp.eq.f32.partialorder %v6990_v43, %v12474_v2  ;;  %v12886_v43 = vld [vmem:[#allocation18_spill] sm:$0xff] }
0x20c0   : > { %v7214_v28 = vsel %vm6974_vm7, %v7212_v55, %v7191_v1  ;;  %v7017_v54 = vsel %vm7016_vm14, %v7012_v45, inf  ;;  %v6994_v57 = vsel %vm6993_vm15, %v6989_v33, inf  ;;  %vm6874_vm1 = vcmp.eq.f32.partialorder %v12886_v43, %v12885_v27 }
0x20c1   : > { %7216 = vst.msk [vmem:[#allocation5 + $0x10] sm:$0xff] %vm6824_vm3, %v7214_v28  ;;  %7018 = vmin.xlane.f32.xlu1 %v7017_v54  ;;  %6995 = vmin.xlane.f32.xlu0 %v6994_v57  ;;  %v6875_v7 = vsel %vm6874_vm1, %v12820_v61, 5  ;;  %vm6957_vm14 = vcmp.eq.f32.partialorder %v12892_v48, %v12891_v63  ;;  %v12536_v55 = vcvt.s32.f32 %v6934_v40  ;;  %v7021_v1 = vcvt.f32.s32 %v12469_v36 }
0x20c2   : > { %v7926_v62 = vpop.xlane.xlu1 %7925  ;;  %v7924_v11 = vpop.xlane.xlu0 %7923  ;;  %v12514_v26 = vsel %vm6824_vm3, %v6875_v7, 2147483647  ;;  %v6958_v6 = vsel %vm6957_vm14, %v12820_v61, 5  ;;  %v6998_v33 = vcvt.f32.s32 %v12474_v2 }
0x20c3   : > { %v7928_v0 = vcvt.f32.s32 %v7926_v62  ;;  %v7927_v13 = vcvt.f32.s32 %v7924_v11  ;;  %v6878_v16 = vshra.s32 %v12514_v26, 16  ;;  %v12531_v22 = vsel %vm6824_vm3, %v6958_v6, 2147483647 }
0x20c4   : > { %v6961_v56 = vshra.s32 %v12531_v22, 16  ;;  %v7022_v54 = vshll.u32 %v7021_v1, 16  ;;  %v6999_v20 = vshll.u32 %v6998_v33, 16 }
0x20c5   : > { %v7929_v52 = vshll.u32 %v7928_v0, 16  ;;  %v6880_v60 = vcvt.s32.f32 %v6878_v16 }
0x20c6   : > { %v12486_v53 = vpop.xlane.xlu1 %7037  ;;  %v12491_v34 = vpop.xlane.xlu0 %7060  ;;  %v12540_v45 = vcvt.s32.f32 %v6961_v56 }
0x20c7   : > { %v7930_v9 = vadd.s32 %v7929_v52, %v7927_v13  ;;  %vm7039_vm8 = vcmp.eq.f32.partialorder %v12446_v5, %v12486_v53  ;;  %vm7062_vm10 = vcmp.eq.f32.partialorder %v12449_v35, %v12491_v34  ;;  %v6903_v35 = vsel %vm6902_vm9, %v12820_v61, 5 }
0x20c8   : > { %v7932_v17 = vld [vmem:[#allocation5 + $0x10] sm:$0xff]  ;;  %v7040_v58 = vsel %vm7039_vm8, %v7035_v19, inf  ;;  %v7063_v5 = vsel %vm7062_vm10, %v7058_v3, inf  ;;  %v12522_v50 = vsel %vm6824_vm3, %v6903_v35, 2147483647  ;;  %v7044_v18 = vcvt.f32.s32 %v12486_v53 }
0x20c9   : > { %v12502_v38 = vsel %vm6919_vm6, %v7930_v9, %v12418_v31  ;;  %vm7933_vm11 = vcmp.eq.s32.totalorder %v12820_v61, %v7930_v9  ;;  %7041 = vmin.xlane.f32.xlu0 %v7040_v58  ;;  %7064 = vmin.xlane.f32.xlu1 %v7063_v5  ;;  %v12511_v31 = vsel %vm6824_vm3, %v6847_v51, 2147483647  ;;  %v6906_v24 = vshra.s32 %v12522_v50, 16 }
0x20ca   : > { %v7934_v30 = vsel %vm7933_vm11, %v7932_v17, 0  ;;  %v7084_v42 = vpop.xlane.xlu1 %7083  ;;  %v7067_v25 = vcvt.f32.s32 %v12491_v34  ;;  %v7045_v2 = vshll.u32 %v7044_v18, 16  ;;  %v6849_v7 = vand.u32 65535, %v12511_v31 }
0x20cb   : > { %vm7085_vm13 = vcmp.eq.f32.partialorder %v12453_v21, %v7084_v42  ;;  %v7935_v47 = vsel %vm6824_vm3, %v7934_v30, 0  ;;  %v6850_v21 = vshra.s32 %v12511_v31, 16  ;;  %v12533_v4 = vcvt.s32.f32 %v6906_v24 }
0x20cc   : > { %v7086_v39 = vsel %vm7085_vm13, %v7081_v23, inf  ;;  %v7937_v59 = vshrl.u32 %v7935_v47, 16  ;;  %v7936_v10 = vand.u32 65535, %v7935_v47  ;;  %v7090_v27 = vcvt.f32.s32 %v7084_v42 }
0x20cd   : > { %7087 = vmin.xlane.f32.xlu0 %v7086_v39  ;;  %v6852_v32 = vcvt.s32.f32 %v6850_v21  ;;  %v7068_v12 = vshll.u32 %v7067_v25, 16  ;;  %v6877_v30 = vand.u32 65535, %v12514_v26  ;;  %v6851_v39 = vcvt.s32.f32 %v6849_v7 }
0x20ce   : > { %v7939_v15 = vcvt.s32.f32 %v7937_v59  ;;  %v7938_v41 = vcvt.s32.f32 %v7936_v10  ;;  %v7091_v44 = vshll.u32 %v7090_v27, 16  ;;  %v6905_v59 = vand.u32 65535, %v12522_v50 }
0x20cf   : > { %v6879_v37 = vcvt.s32.f32 %v6877_v30  ;;  %v6933_v21 = vand.u32 65535, %v12526_v46  ;;  %v6960_v46 = vand.u32 65535, %v12531_v22 }
0x20d0   : > { %7942 = vadd.xlane.f32.xlu1 %v7939_v15 }
0x20d1   : > { %7940 = vadd.xlane.f32.xlu0 %v7938_v41  ;;  %v6907_v41 = vcvt.s32.f32 %v6905_v59  ;;  %v6935_v24 = vcvt.s32.f32 %v6933_v21 }
0x20d4   : > { %6853 = vmin.xlane.f32.xlu1 %v6852_v32 }
0x20d5   : > { %6881 = vmin.xlane.f32.xlu0 %v6880_v60 }
0x20d8   : > { %6909 = vmin.xlane.f32.xlu1 %v12533_v4 }
0x20d9   : > { %6937 = vmin.xlane.f32.xlu0 %v12536_v55 }
0x20dc   : > { %6964 = vmin.xlane.f32.xlu1 %v12540_v45 }
0x214a   : > { %v7019_v28 = vpop.xlane.xlu1 %7018  ;;  %v6996_v57 = vpop.xlane.xlu0 %6995 }
0x214b   : > { %v7020_v62 = vcvt.f32.s32 %v7019_v28  ;;  %v6997_v0 = vcvt.f32.s32 %v6996_v57  ;;  %v6962_v28 = vcvt.s32.f32 %v6960_v46 }
0x214d   : > { %v7023_v11 = vadd.s32 %v7022_v54, %v7020_v62  ;;  %v7000_v29 = vadd.s32 %v6999_v20, %v6997_v0 }
0x214f   : > { %v7002_v52 = vsel %vm6863_vm4, %v7000_v29, 0 }
0x2150   : > { %v7025_v36 = vsel %vm6891_vm5, %v7023_v11, %v7002_v52 }
0x2152   : > { %v7042_v13 = vpop.xlane.xlu0 %7041  ;;  %v7065_v19 = vpop.xlane.xlu1 %7064 }
0x2153   : > { %v7043_v43 = vcvt.f32.s32 %v7042_v13  ;;  %v7066_v9 = vcvt.f32.s32 %v7065_v19 }
0x2155   : > { %v7046_v3 = vadd.s32 %v7045_v2, %v7043_v43  ;;  %v7069_v51 = vadd.s32 %v7068_v12, %v7066_v9 }
0x2156   : > { %v7088_v14 = vpop.xlane.xlu0 %7087 }
0x2157   : > { %v7048_v53 = vsel %vm6919_vm6, %v7046_v3, %v7025_v36  ;;  %v7089_v34 = vcvt.f32.s32 %v7088_v14 }
0x2158   : > { %v7071_v5 = vsel %vm6836_vm2, %v7069_v51, %v7048_v53 }
0x2159   : > { %v7092_v17 = vadd.s32 %v7091_v44, %v7089_v34  ;;  %v7943_v58 = vpop.xlane.xlu1 %7942 }
0x215a   : > { %v7945_v8 = vcvt.f32.s32 %v7943_v58  ;;  %v7941_v49 = vpop.xlane.xlu0 %7940 }
0x215b   : > { %v7094_v42 = vsel %vm6974_vm7, %v7092_v17, %v7071_v5  ;;  %v7944_v23 = vcvt.f32.s32 %v7941_v49 }
0x215c   : > { %7096 = vst.msk [vmem:[#allocation5 + $0x8] sm:$0xff] %vm6824_vm3, %v7094_v42  ;;  %v7946_v35 = vshll.u32 %v7945_v8, 16 }
0x215d   : > { %v6854_v47 = vpop.xlane.xlu1 %6853 }
0x215e   : > { %v7947_v10 = vadd.s32 %v7946_v35, %v7944_v23  ;;  %vm6855_vm6 = vcmp.eq.f32.partialorder %v6852_v32, %v6854_v47  ;;  %v6882_v31 = vpop.xlane.xlu0 %6881 }
0x215f   : > { %vm6883_vm2 = vcmp.eq.f32.partialorder %v6880_v60, %v6882_v31  ;;  %v6856_v63 = vsel %vm6855_vm6, %v6851_v39, inf }
0x2160   : > { %v7948_v26 = vsel %vm6891_vm5, %v7947_v10, %v12502_v38  ;;  %6857 = vmin.xlane.f32.xlu0 %v6856_v63  ;;  %v6884_v48 = vsel %vm6883_vm2, %v6879_v37, inf  ;;  %vm7950_vm15 = vcmp.eq.s32.totalorder %v12820_v61, %v7947_v10 }
0x2161   : > { %v6910_v15 = vpop.xlane.xlu1 %6909  ;;  %6885 = vmin.xlane.f32.xlu1 %v6884_v48 }
0x2162   : > { %vm6911_vm7 = vcmp.eq.f32.partialorder %v12533_v4, %v6910_v15  ;;  %v6938_v16 = vpop.xlane.xlu0 %6937 }
0x2163   : > { %v7949_v50 = vld [vmem:[#allocation5 + $0x8] sm:$0xff]  ;;  %v6912_v6 = vsel %vm6911_vm7, %v6907_v41, inf  ;;  %vm6939_vm0 = vcmp.eq.f32.partialorder %v12536_v55, %v6938_v16 }
0x2164   : > { %v7951_v32 = vsel %vm7950_vm15, %v7949_v50, 0  ;;  %6913 = vmin.xlane.f32.xlu0 %v6912_v6  ;;  %v6940_v1 = vsel %vm6939_vm0, %v6935_v24, inf }
0x2165   : > { %v7952_v38 = vsel %vm6824_vm3, %v7951_v32, 0  ;;  %v6965_v56 = vpop.xlane.xlu1 %6964  ;;  %vm7966_vm3 = vcmask 64512  }
0x2166   : > { %v7954_v60 = vshrl.u32 %v7952_v38, 16  ;;  %v7953_v40 = vand.u32 65535, %v7952_v38  ;;  %vm6966_vm5 = vcmp.eq.f32.partialorder %v12540_v45, %v6965_v56 }
0x2167   : > { %v6967_v55 = vsel %vm6966_vm5, %v6962_v28, inf }
0x2168   : > { %6941 = vmin.xlane.f32.xlu0 %v6940_v1  ;;  %v7956_v4 = vcvt.s32.f32 %v7954_v60  ;;  %v7955_v33 = vcvt.s32.f32 %v7953_v40 }
0x216a   : > { %7959 = vadd.xlane.f32.xlu1 %v7956_v4 }
0x216c   : > { %7957 = vadd.xlane.f32.xlu0 %v7955_v33 }
0x216e   : > { %6968 = vmin.xlane.f32.xlu1 %v6967_v55 }
0x21e9   : > { %v6858_v54 = vpop.xlane.xlu0 %6857 }
0x21ea   : > { %v6886_v57 = vpop.xlane.xlu1 %6885 }
0x21ed   : > { %v6914_v62 = vpop.xlane.xlu0 %6913 }
0x21f1   : > { %v6942_v20 = vpop.xlane.xlu0 %6941 }
0x21f3   : > { %v7960_v0 = vpop.xlane.xlu1 %7959 }
0x21f4   : > { %v7962_v11 = vcvt.f32.s32 %v7960_v0 }
0x21f5   : > { %v7958_v29 = vpop.xlane.xlu0 %7957 }
0x21f6   : > { %v7963_v18 = vshll.u32 %v7962_v11, 16  ;;  %v7961_v22 = vcvt.f32.s32 %v7958_v29 }
0x21f7   : > { %v6969_v25 = vpop.xlane.xlu1 %6968 }
0x21f8   : > { %v7964_v45 = vadd.s32 %v7963_v18, %v7961_v22 }
0x21fa   : > { %v7965_v52 = vsel %vm6863_vm4, %v7964_v45, %v7948_v26 }
0x21fb   : > { %7967 = vst.msk [vmem:[%s395_s5] sm:$0xff] %vm7966_vm3, %v7965_v52 }
0x21fc PF: > { %s12894_s23 = sld [smem:[#allocation9_spill]] }
0x2202   : > { %s29_s26 = sadd.s32 1, %s12894_s23  }
0x2203   : > { %p26_p10 = scmp.ge.s32.totalorder %s29_s26, 4  }
0x2205   :  { %28 = sbr.rel (!%p26_p10) target bundleno = 18 (0x12), region = 270 }

</bundles_post_ra>
